<compile_context>
chip_gen: v5e
topology: v5e:2x2
jax: 0.10.0
libtpu: 0.0.40
codegen_flags: <defaults>
</compile_context>

<pallas_src>
import jax
import jax.numpy as jnp
from jax.experimental import pallas as pl
from jax.experimental.pallas import tpu as pltpu

C_PAD = 128                                          # lane-padded channel width
CHANNELS = [(3, 32), (32, 64), (64, 32), (32, 3)]    # (Cin, Cout) per conv layer


def _fused_generator_kernel(x_ref, w_ref, b_ref, o_ref, pad_ref):
    """All four conv3x3 + ReLU layers for one batch element.

    x_ref:   (1, H, W, 3)          input tile (VMEM)
    w_ref:   (4, 9*C_PAD, C_PAD)   packed im2col weights, channel-zero-padded
    b_ref:   (4, 1, C_PAD)         packed biases, channel-zero-padded
    o_ref:   (1, H*W, C_PAD)       lane-dense output slab
    pad_ref: (H+2, W+2, C_PAD)     VMEM scratch: zero-padded activation buffer
    """
    _, H, W, cin0 = x_ref.shape
    n_layers = w_ref.shape[0]

    # In-kernel zero padding: memset once; the border stays zero for every layer
    # (only the interior is ever written).
    pad_ref[...] = jnp.zeros_like(pad_ref)
    pad_ref[1:H + 1, 1:W + 1, :cin0] = x_ref[0]

    for l in range(n_layers):
        # im2col: nine shifted (H*W, 128) taps -> one lane-aligned (H*W, 1152) slab.
        taps = [
            pad_ref[dy:dy + H, dx:dx + W, :].reshape(H * W, C_PAD)
            for dy in range(3) for dx in range(3)
        ]
        slab = jnp.concatenate(taps, axis=-1)                      # (H*W, 9*C_PAD)
        y = jnp.dot(slab, w_ref[l], preferred_element_type=jnp.float32)
        y = jnp.maximum(y + b_ref[l], 0.0)                         # bias + ReLU (f32)
        if l < n_layers - 1:
            # Zero-padded weight columns + zero bias tail keep channels Cout..127
            # exactly 0, so writing all 128 lanes back is exact and unmasked.
            pad_ref[1:H + 1, 1:W + 1, :] = y.reshape(H, W, C_PAD)
        else:
            o_ref[...] = y.reshape(1, H * W, C_PAD)


def fused_generator(x_nhwc, w_packed, b_packed):
    """x_nhwc: (N, H, W, 3) f32 -> (N, H*W, 128) f32 (real channels in [..., :3])."""
    N, H, W, cin0 = x_nhwc.shape
    return pl.pallas_call(
        _fused_generator_kernel,
        out_shape=jax.ShapeDtypeStruct((N, H * W, C_PAD), jnp.float32),
        grid_spec=pltpu.PrefetchScalarGridSpec(
            num_scalar_prefetch=0,
            grid=(N,),
            in_specs=[
                pl.BlockSpec((1, H, W, cin0), lambda n: (n, 0, 0, 0)),
                pl.BlockSpec(w_packed.shape, lambda n: (0, 0, 0)),
                pl.BlockSpec(b_packed.shape, lambda n: (0, 0, 0)),
            ],
            out_specs=pl.BlockSpec((1, H * W, C_PAD), lambda n: (n, 0, 0)),
            scratch_shapes=[pltpu.VMEM((H + 2, W + 2, C_PAD), jnp.float32)],
        ),
        compiler_params=pltpu.CompilerParams(
            dimension_semantics=("parallel",),        # v7x: one batch elem per TC
            vmem_limit_bytes=32 * 1024 * 1024,
        ),
    )(x_nhwc, w_packed, b_packed)


def init_params(key):
    """Deterministic parameters matching MiniGenerator's conv shapes (HWIO layout)."""
    params = []
    for i, (cin, cout) in enumerate(CHANNELS):
        kw, kb = jax.random.split(jax.random.fold_in(key, i))
        bound = 1.0 / jnp.sqrt(cin * 9)
        w = jax.random.uniform(kw, (3, 3, cin, cout), jnp.float32, -bound, bound)
        b = jax.random.uniform(kb, (cout,), jnp.float32, -bound, bound)
        params.append((w, b))
    return params


def pack_params(params):
    """Offline weight prep: HWIO -> stacked, channel-padded im2col layout.

    Layer l becomes a (9*C_PAD, C_PAD) matrix whose row block t = dy*3 + dx holds
    w[dy, dx] in its top-left (cin, cout) corner; all padding entries are zero so the
    padded-channel matmul is numerically identical to the real convolution.
    """
    w_stack, b_stack = [], []
    for (cin, cout), (w, b) in zip(CHANNELS, params):
        wp = jnp.zeros((9, C_PAD, C_PAD), jnp.float32)
        wp = wp.at[:, :cin, :cout].set(w.reshape(9, cin, cout))
        w_stack.append(wp.reshape(9 * C_PAD, C_PAD))
        b_stack.append(jnp.zeros((1, C_PAD), jnp.float32).at[0, :cout].set(b))
    return jnp.stack(w_stack), jnp.stack(b_stack)     # (4, 1152, 128), (4, 1, 128)


@jax.jit
def mini_generator_forward(x_nchw, w_packed, b_packed):
    """Matches MiniGenerator.forward: NCHW float32 in, NCHW float32 out."""
    N, _, H, W = x_nchw.shape
    x = jnp.transpose(x_nchw, (0, 2, 3, 1))                  # NCHW -> NHWC
    out = fused_generator(x, w_packed, b_packed)             # (N, H*W, 128)
    out = out.reshape(N, H, W, C_PAD)[..., :CHANNELS[-1][1]]
    return jnp.transpose(out, (0, 3, 1, 2))                  # NHWC -> NCHW


def _reference_forward(x_nchw, params):
    """Pure-JAX reference using lax.conv_general_dilated (correctness check)."""
    x = jnp.transpose(x_nchw, (0, 2, 3, 1))
    for w, b in params:
        x = jax.lax.conv_general_dilated(
            x, w, window_strides=(1, 1), padding="SAME",
            dimension_numbers=("NHWC", "HWIO", "NHWC"))
        x = jnp.maximum(x + b, 0.0)
    return jnp.transpose(x, (0, 3, 1, 2))


if __name__ == "__main__":
    key = jax.random.PRNGKey(0)
    k_x, k_p = jax.random.split(key)

    # Small shapes consistent with the module: batch=2, 3 input channels, 16x16.
    x = jax.random.normal(k_x, (2, 3, 16, 16), dtype=jnp.float32)
    params = init_params(k_p)
    w_packed, b_packed = pack_params(params)

    out = mini_generator_forward(x, w_packed, b_packed)
    out = jax.block_until_ready(out)

    ref = _reference_forward(x, params)
    assert out.shape == (2, 3, 16, 16)
    assert jnp.max(jnp.abs(out - ref)) < 1e-4

    print("KERNEL_OK")
</pallas_src>

<mosaic_0001>
module attributes {stable_mosaic.version = 11 : i64} {
  func.func @_fused_generator_kernel(%arg0: i32, %arg1: memref<1x16x16x3xf32, #tpu.memory_space<vmem>>, %arg2: memref<4x1152x128xf32, #tpu.memory_space<vmem>>, %arg3: memref<4x1x128xf32, #tpu.memory_space<vmem>>, %arg4: memref<1x256x128xf32, #tpu.memory_space<vmem>>, %arg5: memref<18x18x128xf32, #tpu.memory_space<vmem>>) attributes {dimension_semantics = [#tpu.dimension_semantics<parallel>], iteration_bounds = array<i64: 2>, scalar_prefetch = 0 : i64, scratch_operands = 1 : i64, tpu.core_type = #tpu.core_type<tc>, window_params = [{transform_indices = @transform_0, window_bounds = array<i64: 1, 16, 16, 3>}, {pipeline_mode = #tpu.pipeline_mode<synchronous>, transform_indices = @transform_1, window_bounds = array<i64: 4, 1152, 128>}, {pipeline_mode = #tpu.pipeline_mode<synchronous>, transform_indices = @transform_2, window_bounds = array<i64: 4, 1, 128>}, {transform_indices = @transform_3, window_bounds = array<i64: 1, 256, 128>}]} {
    %cst = arith.constant 0.000000e+00 : f32
    %0 = vector.broadcast %cst : f32 to vector<18x18x128xf32>
    %c0 = arith.constant 0 : index
    %c0_0 = arith.constant 0 : index
    %c0_1 = arith.constant 0 : index
    %1 = vector.load %arg5[%c0, %c0_0, %c0_1] : memref<18x18x128xf32, #tpu.memory_space<vmem>>, vector<18x18x128xf32>
    tpu.vector_store %arg5[%c0, %c0_0, %c0_1], %0 {strides = array<i32>} : memref<18x18x128xf32, #tpu.memory_space<vmem>>, vector<18x18x128xf32>,
    %c0_2 = arith.constant 0 : index
    %c0_3 = arith.constant 0 : index
    %c0_4 = arith.constant 0 : index
    %c0_5 = arith.constant 0 : index
    %2 = vector.load %arg1[%c0_2, %c0_3, %c0_4, %c0_5] : memref<1x16x16x3xf32, #tpu.memory_space<vmem>>, vector<1x16x16x3xf32>
    %3 = vector.shape_cast %2 : vector<1x16x16x3xf32> to vector<16x16x3xf32>
    %c1 = arith.constant 1 : index
    %c1_6 = arith.constant 1 : index
    %c0_7 = arith.constant 0 : index
    %4 = vector.load %arg5[%c1, %c1_6, %c0_7] : memref<18x18x128xf32, #tpu.memory_space<vmem>>, vector<16x16x3xf32>
    tpu.vector_store %arg5[%c1, %c1_6, %c0_7], %3 {strides = array<i32>} : memref<18x18x128xf32, #tpu.memory_space<vmem>>, vector<16x16x3xf32>,
    %c0_8 = arith.constant 0 : index
    %c0_9 = arith.constant 0 : index
    %c0_10 = arith.constant 0 : index
    %5 = vector.load %arg5[%c0_8, %c0_9, %c0_10] : memref<18x18x128xf32, #tpu.memory_space<vmem>>, vector<16x16x128xf32>
    %6 = vector.shape_cast %5 : vector<16x16x128xf32> to vector<256x128xf32>
    %c0_11 = arith.constant 0 : index
    %c1_12 = arith.constant 1 : index
    %c0_13 = arith.constant 0 : index
    %7 = vector.load %arg5[%c0_11, %c1_12, %c0_13] : memref<18x18x128xf32, #tpu.memory_space<vmem>>, vector<16x16x128xf32>
    %8 = vector.shape_cast %7 : vector<16x16x128xf32> to vector<256x128xf32>
    %c0_14 = arith.constant 0 : index
    %c2 = arith.constant 2 : index
    %c0_15 = arith.constant 0 : index
    %9 = vector.load %arg5[%c0_14, %c2, %c0_15] : memref<18x18x128xf32, #tpu.memory_space<vmem>>, vector<16x16x128xf32>
    %10 = vector.shape_cast %9 : vector<16x16x128xf32> to vector<256x128xf32>
    %c1_16 = arith.constant 1 : index
    %c0_17 = arith.constant 0 : index
    %c0_18 = arith.constant 0 : index
    %11 = vector.load %arg5[%c1_16, %c0_17, %c0_18] : memref<18x18x128xf32, #tpu.memory_space<vmem>>, vector<16x16x128xf32>
    %12 = vector.shape_cast %11 : vector<16x16x128xf32> to vector<256x128xf32>
    %c1_19 = arith.constant 1 : index
    %c1_20 = arith.constant 1 : index
    %c0_21 = arith.constant 0 : index
    %13 = vector.load %arg5[%c1_19, %c1_20, %c0_21] : memref<18x18x128xf32, #tpu.memory_space<vmem>>, vector<16x16x128xf32>
    %14 = vector.shape_cast %13 : vector<16x16x128xf32> to vector<256x128xf32>
    %c1_22 = arith.constant 1 : index
    %c2_23 = arith.constant 2 : index
    %c0_24 = arith.constant 0 : index
    %15 = vector.load %arg5[%c1_22, %c2_23, %c0_24] : memref<18x18x128xf32, #tpu.memory_space<vmem>>, vector<16x16x128xf32>
    %16 = vector.shape_cast %15 : vector<16x16x128xf32> to vector<256x128xf32>
    %c2_25 = arith.constant 2 : index
    %c0_26 = arith.constant 0 : index
    %c0_27 = arith.constant 0 : index
    %17 = vector.load %arg5[%c2_25, %c0_26, %c0_27] : memref<18x18x128xf32, #tpu.memory_space<vmem>>, vector<16x16x128xf32>
    %18 = vector.shape_cast %17 : vector<16x16x128xf32> to vector<256x128xf32>
    %c2_28 = arith.constant 2 : index
    %c1_29 = arith.constant 1 : index
    %c0_30 = arith.constant 0 : index
    %19 = vector.load %arg5[%c2_28, %c1_29, %c0_30] : memref<18x18x128xf32, #tpu.memory_space<vmem>>, vector<16x16x128xf32>
    %20 = vector.shape_cast %19 : vector<16x16x128xf32> to vector<256x128xf32>
    %c2_31 = arith.constant 2 : index
    %c2_32 = arith.constant 2 : index
    %c0_33 = arith.constant 0 : index
    %21 = vector.load %arg5[%c2_31, %c2_32, %c0_33] : memref<18x18x128xf32, #tpu.memory_space<vmem>>, vector<16x16x128xf32>
    %22 = vector.shape_cast %21 : vector<16x16x128xf32> to vector<256x128xf32>
    %23 = tpu.concatenate %6, %8, %10, %12, %14, %16, %18, %20, %22 in 1 : vector<256x128xf32>, vector<256x128xf32>, vector<256x128xf32>, vector<256x128xf32>, vector<256x128xf32>, vector<256x128xf32>, vector<256x128xf32>, vector<256x128xf32>, vector<256x128xf32> -> vector<256x1152xf32>
    %c0_34 = arith.constant 0 : index
    %c0_35 = arith.constant 0 : index
    %c0_36 = arith.constant 0 : index
    %24 = vector.load %arg2[%c0_34, %c0_35, %c0_36] : memref<4x1152x128xf32, #tpu.memory_space<vmem>>, vector<1x1152x128xf32>
    %25 = vector.shape_cast %24 : vector<1x1152x128xf32> to vector<1152x128xf32>
    %cst_37 = arith.constant dense<0.000000e+00> : vector<256x128xf32>
    %26 = tpu.matmul %23, %25, %cst_37 {dimension_numbers = #tpu.dot_dimension_numbers<[1], [0], [0], [1], [0, 0, 1, 1], [], []>} : vector<256x1152xf32>, vector<1152x128xf32>, vector<256x128xf32> -> vector<256x128xf32>
    %c0_38 = arith.constant 0 : index
    %c0_39 = arith.constant 0 : index
    %c0_40 = arith.constant 0 : index
    %27 = vector.load %arg3[%c0_38, %c0_39, %c0_40] : memref<4x1x128xf32, #tpu.memory_space<vmem>>, vector<1x1x128xf32>
    %28 = vector.shape_cast %27 : vector<1x1x128xf32> to vector<1x128xf32>
    %29 = vector.broadcast %28 : vector<1x128xf32> to vector<256x128xf32>
    %30 = arith.addf %26, %29 : vector<256x128xf32>
    %cst_41 = arith.constant 0.000000e+00 : f32
    %31 = vector.broadcast %cst_41 : f32 to vector<256x128xf32>
    %32 = arith.maximumf %30, %31 : vector<256x128xf32>
    %33 = vector.shape_cast %32 : vector<256x128xf32> to vector<16x16x128xf32>
    %c1_42 = arith.constant 1 : index
    %c1_43 = arith.constant 1 : index
    %c0_44 = arith.constant 0 : index
    %34 = vector.load %arg5[%c1_42, %c1_43, %c0_44] : memref<18x18x128xf32, #tpu.memory_space<vmem>>, vector<16x16x128xf32>
    tpu.vector_store %arg5[%c1_42, %c1_43, %c0_44], %33 {strides = array<i32>} : memref<18x18x128xf32, #tpu.memory_space<vmem>>, vector<16x16x128xf32>,
    %c0_45 = arith.constant 0 : index
    %c0_46 = arith.constant 0 : index
    %c0_47 = arith.constant 0 : index
    %35 = vector.load %arg5[%c0_45, %c0_46, %c0_47] : memref<18x18x128xf32, #tpu.memory_space<vmem>>, vector<16x16x128xf32>
    %36 = vector.shape_cast %35 : vector<16x16x128xf32> to vector<256x128xf32>
    %c0_48 = arith.constant 0 : index
    %c1_49 = arith.constant 1 : index
    %c0_50 = arith.constant 0 : index
    %37 = vector.load %arg5[%c0_48, %c1_49, %c0_50] : memref<18x18x128xf32, #tpu.memory_space<vmem>>, vector<16x16x128xf32>
    %38 = vector.shape_cast %37 : vector<16x16x128xf32> to vector<256x128xf32>
    %c0_51 = arith.constant 0 : index
    %c2_52 = arith.constant 2 : index
    %c0_53 = arith.constant 0 : index
    %39 = vector.load %arg5[%c0_51, %c2_52, %c0_53] : memref<18x18x128xf32, #tpu.memory_space<vmem>>, vector<16x16x128xf32>
    %40 = vector.shape_cast %39 : vector<16x16x128xf32> to vector<256x128xf32>
    %c1_54 = arith.constant 1 : index
    %c0_55 = arith.constant 0 : index
    %c0_56 = arith.constant 0 : index
    %41 = vector.load %arg5[%c1_54, %c0_55, %c0_56] : memref<18x18x128xf32, #tpu.memory_space<vmem>>, vector<16x16x128xf32>
    %42 = vector.shape_cast %41 : vector<16x16x128xf32> to vector<256x128xf32>
    %c1_57 = arith.constant 1 : index
    %c1_58 = arith.constant 1 : index
    %c0_59 = arith.constant 0 : index
    %43 = vector.load %arg5[%c1_57, %c1_58, %c0_59] : memref<18x18x128xf32, #tpu.memory_space<vmem>>, vector<16x16x128xf32>
    %44 = vector.shape_cast %43 : vector<16x16x128xf32> to vector<256x128xf32>
    %c1_60 = arith.constant 1 : index
    %c2_61 = arith.constant 2 : index
    %c0_62 = arith.constant 0 : index
    %45 = vector.load %arg5[%c1_60, %c2_61, %c0_62] : memref<18x18x128xf32, #tpu.memory_space<vmem>>, vector<16x16x128xf32>
    %46 = vector.shape_cast %45 : vector<16x16x128xf32> to vector<256x128xf32>
    %c2_63 = arith.constant 2 : index
    %c0_64 = arith.constant 0 : index
    %c0_65 = arith.constant 0 : index
    %47 = vector.load %arg5[%c2_63, %c0_64, %c0_65] : memref<18x18x128xf32, #tpu.memory_space<vmem>>, vector<16x16x128xf32>
    %48 = vector.shape_cast %47 : vector<16x16x128xf32> to vector<256x128xf32>
    %c2_66 = arith.constant 2 : index
    %c1_67 = arith.constant 1 : index
    %c0_68 = arith.constant 0 : index
    %49 = vector.load %arg5[%c2_66, %c1_67, %c0_68] : memref<18x18x128xf32, #tpu.memory_space<vmem>>, vector<16x16x128xf32>
    %50 = vector.shape_cast %49 : vector<16x16x128xf32> to vector<256x128xf32>
    %c2_69 = arith.constant 2 : index
    %c2_70 = arith.constant 2 : index
    %c0_71 = arith.constant 0 : index
    %51 = vector.load %arg5[%c2_69, %c2_70, %c0_71] : memref<18x18x128xf32, #tpu.memory_space<vmem>>, vector<16x16x128xf32>
    %52 = vector.shape_cast %51 : vector<16x16x128xf32> to vector<256x128xf32>
    %53 = tpu.concatenate %36, %38, %40, %42, %44, %46, %48, %50, %52 in 1 : vector<256x128xf32>, vector<256x128xf32>, vector<256x128xf32>, vector<256x128xf32>, vector<256x128xf32>, vector<256x128xf32>, vector<256x128xf32>, vector<256x128xf32>, vector<256x128xf32> -> vector<256x1152xf32>
    %c1_72 = arith.constant 1 : index
    %c0_73 = arith.constant 0 : index
    %c0_74 = arith.constant 0 : index
    %54 = vector.load %arg2[%c1_72, %c0_73, %c0_74] : memref<4x1152x128xf32, #tpu.memory_space<vmem>>, vector<1x1152x128xf32>
    %55 = vector.shape_cast %54 : vector<1x1152x128xf32> to vector<1152x128xf32>
    %cst_75 = arith.constant dense<0.000000e+00> : vector<256x128xf32>
    %56 = tpu.matmul %53, %55, %cst_75 {dimension_numbers = #tpu.dot_dimension_numbers<[1], [0], [0], [1], [0, 0, 1, 1], [], []>} : vector<256x1152xf32>, vector<1152x128xf32>, vector<256x128xf32> -> vector<256x128xf32>
    %c1_76 = arith.constant 1 : index
    %c0_77 = arith.constant 0 : index
    %c0_78 = arith.constant 0 : index
    %57 = vector.load %arg3[%c1_76, %c0_77, %c0_78] : memref<4x1x128xf32, #tpu.memory_space<vmem>>, vector<1x1x128xf32>
    %58 = vector.shape_cast %57 : vector<1x1x128xf32> to vector<1x128xf32>
    %59 = vector.broadcast %58 : vector<1x128xf32> to vector<256x128xf32>
    %60 = arith.addf %56, %59 : vector<256x128xf32>
    %cst_79 = arith.constant 0.000000e+00 : f32
    %61 = vector.broadcast %cst_79 : f32 to vector<256x128xf32>
    %62 = arith.maximumf %60, %61 : vector<256x128xf32>
    %63 = vector.shape_cast %62 : vector<256x128xf32> to vector<16x16x128xf32>
    %c1_80 = arith.constant 1 : index
    %c1_81 = arith.constant 1 : index
    %c0_82 = arith.constant 0 : index
    %64 = vector.load %arg5[%c1_80, %c1_81, %c0_82] : memref<18x18x128xf32, #tpu.memory_space<vmem>>, vector<16x16x128xf32>
    tpu.vector_store %arg5[%c1_80, %c1_81, %c0_82], %63 {strides = array<i32>} : memref<18x18x128xf32, #tpu.memory_space<vmem>>, vector<16x16x128xf32>,
    %c0_83 = arith.constant 0 : index
    %c0_84 = arith.constant 0 : index
    %c0_85 = arith.constant 0 : index
    %65 = vector.load %arg5[%c0_83, %c0_84, %c0_85] : memref<18x18x128xf32, #tpu.memory_space<vmem>>, vector<16x16x128xf32>
    %66 = vector.shape_cast %65 : vector<16x16x128xf32> to vector<256x128xf32>
    %c0_86 = arith.constant 0 : index
    %c1_87 = arith.constant 1 : index
    %c0_88 = arith.constant 0 : index
    %67 = vector.load %arg5[%c0_86, %c1_87, %c0_88] : memref<18x18x128xf32, #tpu.memory_space<vmem>>, vector<16x16x128xf32>
    %68 = vector.shape_cast %67 : vector<16x16x128xf32> to vector<256x128xf32>
    %c0_89 = arith.constant 0 : index
    %c2_90 = arith.constant 2 : index
    %c0_91 = arith.constant 0 : index
    %69 = vector.load %arg5[%c0_89, %c2_90, %c0_91] : memref<18x18x128xf32, #tpu.memory_space<vmem>>, vector<16x16x128xf32>
    %70 = vector.shape_cast %69 : vector<16x16x128xf32> to vector<256x128xf32>
    %c1_92 = arith.constant 1 : index
    %c0_93 = arith.constant 0 : index
    %c0_94 = arith.constant 0 : index
    %71 = vector.load %arg5[%c1_92, %c0_93, %c0_94] : memref<18x18x128xf32, #tpu.memory_space<vmem>>, vector<16x16x128xf32>
    %72 = vector.shape_cast %71 : vector<16x16x128xf32> to vector<256x128xf32>
    %c1_95 = arith.constant 1 : index
    %c1_96 = arith.constant 1 : index
    %c0_97 = arith.constant 0 : index
    %73 = vector.load %arg5[%c1_95, %c1_96, %c0_97] : memref<18x18x128xf32, #tpu.memory_space<vmem>>, vector<16x16x128xf32>
    %74 = vector.shape_cast %73 : vector<16x16x128xf32> to vector<256x128xf32>
    %c1_98 = arith.constant 1 : index
    %c2_99 = arith.constant 2 : index
    %c0_100 = arith.constant 0 : index
    %75 = vector.load %arg5[%c1_98, %c2_99, %c0_100] : memref<18x18x128xf32, #tpu.memory_space<vmem>>, vector<16x16x128xf32>
    %76 = vector.shape_cast %75 : vector<16x16x128xf32> to vector<256x128xf32>
    %c2_101 = arith.constant 2 : index
    %c0_102 = arith.constant 0 : index
    %c0_103 = arith.constant 0 : index
    %77 = vector.load %arg5[%c2_101, %c0_102, %c0_103] : memref<18x18x128xf32, #tpu.memory_space<vmem>>, vector<16x16x128xf32>
    %78 = vector.shape_cast %77 : vector<16x16x128xf32> to vector<256x128xf32>
    %c2_104 = arith.constant 2 : index
    %c1_105 = arith.constant 1 : index
    %c0_106 = arith.constant 0 : index
    %79 = vector.load %arg5[%c2_104, %c1_105, %c0_106] : memref<18x18x128xf32, #tpu.memory_space<vmem>>, vector<16x16x128xf32>
    %80 = vector.shape_cast %79 : vector<16x16x128xf32> to vector<256x128xf32>
    %c2_107 = arith.constant 2 : index
    %c2_108 = arith.constant 2 : index
    %c0_109 = arith.constant 0 : index
    %81 = vector.load %arg5[%c2_107, %c2_108, %c0_109] : memref<18x18x128xf32, #tpu.memory_space<vmem>>, vector<16x16x128xf32>
    %82 = vector.shape_cast %81 : vector<16x16x128xf32> to vector<256x128xf32>
    %83 = tpu.concatenate %66, %68, %70, %72, %74, %76, %78, %80, %82 in 1 : vector<256x128xf32>, vector<256x128xf32>, vector<256x128xf32>, vector<256x128xf32>, vector<256x128xf32>, vector<256x128xf32>, vector<256x128xf32>, vector<256x128xf32>, vector<256x128xf32> -> vector<256x1152xf32>
    %c2_110 = arith.constant 2 : index
    %c0_111 = arith.constant 0 : index
    %c0_112 = arith.constant 0 : index
    %84 = vector.load %arg2[%c2_110, %c0_111, %c0_112] : memref<4x1152x128xf32, #tpu.memory_space<vmem>>, vector<1x1152x128xf32>
    %85 = vector.shape_cast %84 : vector<1x1152x128xf32> to vector<1152x128xf32>
    %cst_113 = arith.constant dense<0.000000e+00> : vector<256x128xf32>
    %86 = tpu.matmul %83, %85, %cst_113 {dimension_numbers = #tpu.dot_dimension_numbers<[1], [0], [0], [1], [0, 0, 1, 1], [], []>} : vector<256x1152xf32>, vector<1152x128xf32>, vector<256x128xf32> -> vector<256x128xf32>
    %c2_114 = arith.constant 2 : index
    %c0_115 = arith.constant 0 : index
    %c0_116 = arith.constant 0 : index
    %87 = vector.load %arg3[%c2_114, %c0_115, %c0_116] : memref<4x1x128xf32, #tpu.memory_space<vmem>>, vector<1x1x128xf32>
    %88 = vector.shape_cast %87 : vector<1x1x128xf32> to vector<1x128xf32>
    %89 = vector.broadcast %88 : vector<1x128xf32> to vector<256x128xf32>
    %90 = arith.addf %86, %89 : vector<256x128xf32>
    %cst_117 = arith.constant 0.000000e+00 : f32
    %91 = vector.broadcast %cst_117 : f32 to vector<256x128xf32>
    %92 = arith.maximumf %90, %91 : vector<256x128xf32>
    %93 = vector.shape_cast %92 : vector<256x128xf32> to vector<16x16x128xf32>
    %c1_118 = arith.constant 1 : index
    %c1_119 = arith.constant 1 : index
    %c0_120 = arith.constant 0 : index
    %94 = vector.load %arg5[%c1_118, %c1_119, %c0_120] : memref<18x18x128xf32, #tpu.memory_space<vmem>>, vector<16x16x128xf32>
    tpu.vector_store %arg5[%c1_118, %c1_119, %c0_120], %93 {strides = array<i32>} : memref<18x18x128xf32, #tpu.memory_space<vmem>>, vector<16x16x128xf32>,
    %c0_121 = arith.constant 0 : index
    %c0_122 = arith.constant 0 : index
    %c0_123 = arith.constant 0 : index
    %95 = vector.load %arg5[%c0_121, %c0_122, %c0_123] : memref<18x18x128xf32, #tpu.memory_space<vmem>>, vector<16x16x128xf32>
    %96 = vector.shape_cast %95 : vector<16x16x128xf32> to vector<256x128xf32>
    %c0_124 = arith.constant 0 : index
    %c1_125 = arith.constant 1 : index
    %c0_126 = arith.constant 0 : index
    %97 = vector.load %arg5[%c0_124, %c1_125, %c0_126] : memref<18x18x128xf32, #tpu.memory_space<vmem>>, vector<16x16x128xf32>
    %98 = vector.shape_cast %97 : vector<16x16x128xf32> to vector<256x128xf32>
    %c0_127 = arith.constant 0 : index
    %c2_128 = arith.constant 2 : index
    %c0_129 = arith.constant 0 : index
    %99 = vector.load %arg5[%c0_127, %c2_128, %c0_129] : memref<18x18x128xf32, #tpu.memory_space<vmem>>, vector<16x16x128xf32>
    %100 = vector.shape_cast %99 : vector<16x16x128xf32> to vector<256x128xf32>
    %c1_130 = arith.constant 1 : index
    %c0_131 = arith.constant 0 : index
    %c0_132 = arith.constant 0 : index
    %101 = vector.load %arg5[%c1_130, %c0_131, %c0_132] : memref<18x18x128xf32, #tpu.memory_space<vmem>>, vector<16x16x128xf32>
    %102 = vector.shape_cast %101 : vector<16x16x128xf32> to vector<256x128xf32>
    %c1_133 = arith.constant 1 : index
    %c1_134 = arith.constant 1 : index
    %c0_135 = arith.constant 0 : index
    %103 = vector.load %arg5[%c1_133, %c1_134, %c0_135] : memref<18x18x128xf32, #tpu.memory_space<vmem>>, vector<16x16x128xf32>
    %104 = vector.shape_cast %103 : vector<16x16x128xf32> to vector<256x128xf32>
    %c1_136 = arith.constant 1 : index
    %c2_137 = arith.constant 2 : index
    %c0_138 = arith.constant 0 : index
    %105 = vector.load %arg5[%c1_136, %c2_137, %c0_138] : memref<18x18x128xf32, #tpu.memory_space<vmem>>, vector<16x16x128xf32>
    %106 = vector.shape_cast %105 : vector<16x16x128xf32> to vector<256x128xf32>
    %c2_139 = arith.constant 2 : index
    %c0_140 = arith.constant 0 : index
    %c0_141 = arith.constant 0 : index
    %107 = vector.load %arg5[%c2_139, %c0_140, %c0_141] : memref<18x18x128xf32, #tpu.memory_space<vmem>>, vector<16x16x128xf32>
    %108 = vector.shape_cast %107 : vector<16x16x128xf32> to vector<256x128xf32>
    %c2_142 = arith.constant 2 : index
    %c1_143 = arith.constant 1 : index
    %c0_144 = arith.constant 0 : index
    %109 = vector.load %arg5[%c2_142, %c1_143, %c0_144] : memref<18x18x128xf32, #tpu.memory_space<vmem>>, vector<16x16x128xf32>
    %110 = vector.shape_cast %109 : vector<16x16x128xf32> to vector<256x128xf32>
    %c2_145 = arith.constant 2 : index
    %c2_146 = arith.constant 2 : index
    %c0_147 = arith.constant 0 : index
    %111 = vector.load %arg5[%c2_145, %c2_146, %c0_147] : memref<18x18x128xf32, #tpu.memory_space<vmem>>, vector<16x16x128xf32>
    %112 = vector.shape_cast %111 : vector<16x16x128xf32> to vector<256x128xf32>
    %113 = tpu.concatenate %96, %98, %100, %102, %104, %106, %108, %110, %112 in 1 : vector<256x128xf32>, vector<256x128xf32>, vector<256x128xf32>, vector<256x128xf32>, vector<256x128xf32>, vector<256x128xf32>, vector<256x128xf32>, vector<256x128xf32>, vector<256x128xf32> -> vector<256x1152xf32>
    %c3 = arith.constant 3 : index
    %c0_148 = arith.constant 0 : index
    %c0_149 = arith.constant 0 : index
    %114 = vector.load %arg2[%c3, %c0_148, %c0_149] : memref<4x1152x128xf32, #tpu.memory_space<vmem>>, vector<1x1152x128xf32>
    %115 = vector.shape_cast %114 : vector<1x1152x128xf32> to vector<1152x128xf32>
    %cst_150 = arith.constant dense<0.000000e+00> : vector<256x128xf32>
    %116 = tpu.matmul %113, %115, %cst_150 {dimension_numbers = #tpu.dot_dimension_numbers<[1], [0], [0], [1], [0, 0, 1, 1], [], []>} : vector<256x1152xf32>, vector<1152x128xf32>, vector<256x128xf32> -> vector<256x128xf32>
    %c3_151 = arith.constant 3 : index
    %c0_152 = arith.constant 0 : index
    %c0_153 = arith.constant 0 : index
    %117 = vector.load %arg3[%c3_151, %c0_152, %c0_153] : memref<4x1x128xf32, #tpu.memory_space<vmem>>, vector<1x1x128xf32>
    %118 = vector.shape_cast %117 : vector<1x1x128xf32> to vector<1x128xf32>
    %119 = vector.broadcast %118 : vector<1x128xf32> to vector<256x128xf32>
    %120 = arith.addf %116, %119 : vector<256x128xf32>
    %cst_154 = arith.constant 0.000000e+00 : f32
    %121 = vector.broadcast %cst_154 : f32 to vector<256x128xf32>
    %122 = arith.maximumf %120, %121 : vector<256x128xf32>
    %123 = vector.shape_cast %122 : vector<256x128xf32> to vector<1x256x128xf32>
    %c0_155 = arith.constant 0 : index
    %c0_156 = arith.constant 0 : index
    %c0_157 = arith.constant 0 : index
    %124 = vector.load %arg4[%c0_155, %c0_156, %c0_157] : memref<1x256x128xf32, #tpu.memory_space<vmem>>, vector<1x256x128xf32>
    tpu.vector_store %arg4[%c0_155, %c0_156, %c0_157], %123 {strides = array<i32>} : memref<1x256x128xf32, #tpu.memory_space<vmem>>, vector<1x256x128xf32>,
    return
  }
  func.func @transform_0(%arg0: i32) -> (i32, i32, i32, i32) {
    %c0_i32 = arith.constant 0 : i32
    %c0_i32_0 = arith.constant 0 : i32
    %c0_i32_1 = arith.constant 0 : i32
    %c0_i32_2 = arith.constant 0 : i32
    return %arg0, %c0_i32, %c0_i32_0, %c0_i32_1 : i32, i32, i32, i32
  }
  func.func @transform_1(%arg0: i32) -> (i32, i32, i32) {
    %c0_i32 = arith.constant 0 : i32
    %c0_i32_0 = arith.constant 0 : i32
    %c0_i32_1 = arith.constant 0 : i32
    %c0_i32_2 = arith.constant 0 : i32
    return %c0_i32, %c0_i32_0, %c0_i32_1 : i32, i32, i32
  }
  func.func @transform_2(%arg0: i32) -> (i32, i32, i32) {
    %c0_i32 = arith.constant 0 : i32
    %c0_i32_0 = arith.constant 0 : i32
    %c0_i32_1 = arith.constant 0 : i32
    %c0_i32_2 = arith.constant 0 : i32
    return %c0_i32, %c0_i32_0, %c0_i32_1 : i32, i32, i32
  }
  func.func @transform_3(%arg0: i32) -> (i32, i32, i32) {
    %c0_i32 = arith.constant 0 : i32
    %c0_i32_0 = arith.constant 0 : i32
    %c0_i32_1 = arith.constant 0 : i32
    return %arg0, %c0_i32, %c0_i32_0 : i32, i32, i32
  }
}

</mosaic_0001>

<bundles_post_ra>
// kernel: mini_generator_forward.1
= control target key start
LH: loop header
LB: loop body
LE: loop exit
PB: predicated region body
PF: predicated region fallthrough
CT: control target
= control target key end

     0   :  { %8 = vsyncpa [#allocation4], 0  ;;  %s10115_s0 = inlined_call_operand.vmem [shape: f32[2,16,16,3], index: 0, kind: input, shape index: {}]   ;;  %s10116_s1 = inlined_call_operand.hbm [shape: f32[4,1152,128], index: 1, kind: input, shape index: {}]   ;;  %s10117_s2 = inlined_call_operand.hbm [shape: f32[4,1,128], index: 2, kind: input, shape index: {}]   ;;  %s10118_s3 = inlined_call_operand.vmem [shape: f32[2,256,128], index: 3, kind: output, shape index: {}]  }
   0x1   :  { %9 = vsyncpa [#allocation6], 0  ;;  %s6643_s12 = smov 0  }
   0x2 LB: > { %s125_s15 = sshll.u32 %s10116_s1, 4  ;;  %s6652_s16 = sadd.s32 4294967295, %s6614_s12   ;;  %s6614_s12 = sphi %s6643_s12, %s15_s12   ;;  %s126_s15 = int_to_ptr.hbm [resolvable:$true] %s125_s15 }
   0x3   : > { %p6479_p0 = scmp.ge.s32.totalorder %s6614_s12, 1  ;;  %p114_p1 = scmp.lt.s32.totalorder %s6614_s12, 3 }
   0x4   : > { %p6509_p2 = scmp.eq.s32.totalorder %s6652_s16, 0  ;;  %s6616_s18 = smov [#allocation3]  }
   0x5   : > { %p6657_p3 = pnand %p6479_p0, %p114_p1  ;;  %s127_s19 = sshll.u32 %s6616_s18, 4  ;;  %s128_s19 = int_to_ptr.vmem [resolvable:$true] %s127_s19 }
   0x6   : > { %s139_s22 = sshll.u32 %s10117_s2, 4  ;;  %s6617_s23 = smov [#allocation5]   ;;  %s140_s22 = int_to_ptr.hbm [resolvable:$true] %s139_s22 }
   0x7   : > { %p6502_p4 = pneg %p6657_p3  ;;  %s141_s24 = sshll.u32 %s6617_s23, 4  ;;  %s142_s24 = int_to_ptr.vmem [resolvable:$true] %s141_s24 }
   0x8   : > { %s6618_s25 = smov 128   ;;  %s6619_s26 = smov 8  }
   0x9   : > { %p6503_p5 = pnand %p6509_p2, %p6502_p4  ;;  %s6620_s27 = smov 16  }
   0xa   : > { %s6621_s28 = smov 1   ;;  %165 = sbr.rel (%p6657_p3) target bundleno = 2872 (0xb38), region = 32 }
   0xb   : > { %6505 = dma.hbm_to_vmem [thread:$0]  (!%p6503_p5), %s126_s15, 73728, %s128_s19, [#allocation4], %s6618_s25, %s6618_s25, %s6619_s26  }
   0xc   : > { %6508 = dma.hbm_to_vmem [thread:$0]  (!%p6503_p5), %s140_s22, 64, %s142_s24, [#allocation6], %s6620_s27, %s6620_s27, %s6621_s28  }
   0xf   : > { %6605 = dma.done.wait (%p6509_p2), [#allocation4], 73728  }
  0x10   : > { %6607 = vsyncadd (%p6509_p2), [#allocation4], 4294893568 }
  0x11   : > { %6609 = dma.done.wait (%p6509_p2), [#allocation6], 64  }
  0x12   : > { %6611 = vsyncadd (%p6509_p2), [#allocation6], 4294967232  ;;  %v6622_v0 = vmov 0.0   ;;  %v629_v1 = vld [vmem:[#allocation3 + $0x78] sm:$0xff]  ;;  %v628_v3 = vld [vmem:[#allocation3 + $0x70] sm:$0xff]  ;;  %p195_p6 = scmp.lt.s32.totalorder %s6652_s16, 1 }
  0x13   : > { %205 = vst [vmem:[#allocation2] sm:$0xff] %v6622_v0  ;;  %v661_v2 = vld [vmem:[#allocation3 + $0x178] sm:$0xff]  ;;  %762 = vmatpush.msra.mxu0 %v629_v1  ;;  %v660_v5 = vld [vmem:[#allocation3 + $0x170] sm:$0xff]  ;;  %v627_v7 = vld [vmem:[#allocation3 + $0x68] sm:$0xff]  ;;  %vm292_vm0 = vcmask 23552  }
  0x14   : > { %206 = vst [vmem:[#allocation2 + $0x8] sm:$0xff] %v6622_v0  ;;  %988 = vmatpush.msra.mxu2 %v661_v2  ;;  %v645_v4 = vld [vmem:[#allocation3 + $0xf8] sm:$0xff]  ;;  %v644_v8 = vld [vmem:[#allocation3 + $0xf0] sm:$0xff]  ;;  %v659_v9 = vld [vmem:[#allocation3 + $0x168] sm:$0xff]  ;;  %s10756_s16 = smov (!%p195_p6, %s6652_s16), 1 }
  0x15   : > { %207 = vst [vmem:[#allocation2 + $0x10] sm:$0x3] %v6622_v0  ;;  %v677_v6 = vld [vmem:[#allocation3 + $0x1f8] sm:$0xff]  ;;  %875 = vmatpush.msra.mxu1 %v645_v4  ;;  %763 = vmatpush.msra.mxu0 %v628_v3  ;;  %v676_v10 = vld [vmem:[#allocation3 + $0x1f0] sm:$0xff]  ;;  %v643_v11 = vld [vmem:[#allocation3 + $0xe8] sm:$0xff]  ;;  %s6492_s29 = sshll.u32 %s10756_s16, 8 }
  0x16   : > { %208 = vst [vmem:[#allocation2 + $0x18] sm:$0xff] %v6622_v0  ;;  %1101 = vmatpush.msra.mxu3 %v677_v6  ;;  %989 = vmatpush.msra.mxu2 %v660_v5  ;;  %v626_v12 = vld [vmem:[#allocation3 + $0x60] sm:$0xff]  ;;  %v675_v14 = vld [vmem:[#allocation3 + $0x1e8] sm:$0xff]  ;;  %v625_v17 = vld [vmem:[#allocation3 + $0x58] sm:$0xff]  ;;  %s6739_s5 = scalar_lea.vmem %s10115_s0, %s6492_s29  ;;  %s10034_s8 = scalar_lea.vmem %s10118_s3, %s6492_s29 }
  0x17   : > { %209 = vst [vmem:[#allocation2 + $0x20] sm:$0xff] %v6622_v0  ;;  %876 = vmatpush.msra.mxu1 %v644_v8  ;;  %v658_v13 = vld [vmem:[#allocation3 + $0x160] sm:$0xff]  ;;  %764 = vmatpush.msra.mxu0 %v627_v7  ;;  %v657_v18 = vld [vmem:[#allocation3 + $0x158] sm:$0xff]  ;;  %v624_v21 = vld [vmem:[#allocation3 + $0x50] sm:$0xff] }
  0x18   : > { %210 = vst [vmem:[#allocation2 + $0x28] sm:$0x3] %v6622_v0  ;;  %1102 = vmatpush.msra.mxu3 %v676_v10  ;;  %990 = vmatpush.msra.mxu2 %v659_v9  ;;  %v642_v15 = vld [vmem:[#allocation3 + $0xe0] sm:$0xff]  ;;  %v641_v19 = vld [vmem:[#allocation3 + $0xd8] sm:$0xff]  ;;  %v656_v22 = vld [vmem:[#allocation3 + $0x150] sm:$0xff] }
  0x19   : > { %211 = vst [vmem:[#allocation2 + $0x30] sm:$0xff] %v6622_v0  ;;  %v674_v16 = vld [vmem:[#allocation3 + $0x1e0] sm:$0xff]  ;;  %877 = vmatpush.msra.mxu1 %v643_v11  ;;  %765 = vmatpush.msra.mxu0 %v626_v12  ;;  %v673_v20 = vld [vmem:[#allocation3 + $0x1d8] sm:$0xff]  ;;  %v640_v23 = vld [vmem:[#allocation3 + $0xd0] sm:$0xff] }
  0x1a   : > { %212 = vst [vmem:[#allocation2 + $0x38] sm:$0xff] %v6622_v0  ;;  %1103 = vmatpush.msra.mxu3 %v675_v14  ;;  %991 = vmatpush.msra.mxu2 %v658_v13  ;;  %v672_v24 = vld [vmem:[#allocation3 + $0x1d0] sm:$0xff]  ;;  %v623_v25 = vld [vmem:[#allocation3 + $0x48] sm:$0xff]  ;;  %v622_v29 = vld [vmem:[#allocation3 + $0x40] sm:$0xff] }
  0x1b   : > { %213 = vst [vmem:[#allocation2 + $0x40] sm:$0x3] %v6622_v0  ;;  %878 = vmatpush.msra.mxu1 %v642_v15  ;;  %766 = vmatpush.msra.mxu0 %v625_v17  ;;  %v655_v26 = vld [vmem:[#allocation3 + $0x148] sm:$0xff]  ;;  %v654_v30 = vld [vmem:[#allocation3 + $0x140] sm:$0xff]  ;;  %v621_v33 = vld [vmem:[#allocation3 + $0x38] sm:$0xff] }
  0x1c   : > { %214 = vst [vmem:[#allocation2 + $0x48] sm:$0xff] %v6622_v0  ;;  %1104 = vmatpush.msra.mxu3 %v674_v16  ;;  %992 = vmatpush.msra.mxu2 %v657_v18  ;;  %v639_v27 = vld [vmem:[#allocation3 + $0xc8] sm:$0xff]  ;;  %v638_v31 = vld [vmem:[#allocation3 + $0xc0] sm:$0xff]  ;;  %v653_v34 = vld [vmem:[#allocation3 + $0x138] sm:$0xff] }
  0x1d   : > { %215 = vst [vmem:[#allocation2 + $0x50] sm:$0xff] %v6622_v0  ;;  %879 = vmatpush.msra.mxu1 %v641_v19  ;;  %767 = vmatpush.msra.mxu0 %v624_v21  ;;  %v671_v28 = vld [vmem:[#allocation3 + $0x1c8] sm:$0xff]  ;;  %v670_v32 = vld [vmem:[#allocation3 + $0x1c0] sm:$0xff]  ;;  %v637_v35 = vld [vmem:[#allocation3 + $0xb8] sm:$0xff] }
  0x1e   : > { %216 = vst [vmem:[#allocation2 + $0x58] sm:$0x3] %v6622_v0  ;;  %1105 = vmatpush.msra.mxu3 %v673_v20  ;;  %993 = vmatpush.msra.mxu2 %v656_v22  ;;  %v669_v36 = vld [vmem:[#allocation3 + $0x1b8] sm:$0xff]  ;;  %v620_v37 = vld [vmem:[#allocation3 + $0x30] sm:$0xff]  ;;  %v619_v41 = vld [vmem:[#allocation3 + $0x28] sm:$0xff] }
  0x1f   : > { %217 = vst [vmem:[#allocation2 + $0x60] sm:$0xff] %v6622_v0  ;;  %880 = vmatpush.msra.mxu1 %v640_v23  ;;  %768 = vmatpush.msra.mxu0 %v623_v25  ;;  %v652_v38 = vld [vmem:[#allocation3 + $0x130] sm:$0xff]  ;;  %v651_v42 = vld [vmem:[#allocation3 + $0x128] sm:$0xff]  ;;  %v618_v45 = vld [vmem:[#allocation3 + $0x20] sm:$0xff] }
  0x20   : > { %218 = vst [vmem:[#allocation2 + $0x68] sm:$0xff] %v6622_v0  ;;  %1106 = vmatpush.msra.mxu3 %v672_v24  ;;  %994 = vmatpush.msra.mxu2 %v655_v26  ;;  %v636_v39 = vld [vmem:[#allocation3 + $0xb0] sm:$0xff]  ;;  %v635_v43 = vld [vmem:[#allocation3 + $0xa8] sm:$0xff]  ;;  %v650_v46 = vld [vmem:[#allocation3 + $0x120] sm:$0xff] }
  0x21   : > { %219 = vst [vmem:[#allocation2 + $0x70] sm:$0x3] %v6622_v0  ;;  %881 = vmatpush.msra.mxu1 %v639_v27  ;;  %769 = vmatpush.msra.mxu0 %v622_v29  ;;  %v668_v40 = vld [vmem:[#allocation3 + $0x1b0] sm:$0xff]  ;;  %v667_v44 = vld [vmem:[#allocation3 + $0x1a8] sm:$0xff]  ;;  %v634_v47 = vld [vmem:[#allocation3 + $0xa0] sm:$0xff] }
  0x22   : > { %220 = vst [vmem:[#allocation2 + $0x78] sm:$0xff] %v6622_v0  ;;  %1107 = vmatpush.msra.mxu3 %v671_v28  ;;  %995 = vmatpush.msra.mxu2 %v654_v30  ;;  %v666_v48 = vld [vmem:[#allocation3 + $0x1a0] sm:$0xff]  ;;  %v617_v49 = vld [vmem:[#allocation3 + $0x18] sm:$0xff]  ;;  %v616_v53 = vld [vmem:[#allocation3 + $0x10] sm:$0xff] }
  0x23   : > { %221 = vst [vmem:[#allocation2 + $0x80] sm:$0xff] %v6622_v0  ;;  %882 = vmatpush.msra.mxu1 %v638_v31  ;;  %770 = vmatpush.msra.mxu0 %v621_v33  ;;  %v649_v50 = vld [vmem:[#allocation3 + $0x118] sm:$0xff]  ;;  %v648_v54 = vld [vmem:[#allocation3 + $0x110] sm:$0xff]  ;;  %v615_v57 = vld [vmem:[#allocation3 + $0x8] sm:$0xff] }
  0x24   : > { %222 = vst [vmem:[#allocation2 + $0x88] sm:$0x3] %v6622_v0  ;;  %1108 = vmatpush.msra.mxu3 %v670_v32  ;;  %996 = vmatpush.msra.mxu2 %v653_v34  ;;  %v633_v51 = vld [vmem:[#allocation3 + $0x98] sm:$0xff]  ;;  %v632_v55 = vld [vmem:[#allocation3 + $0x90] sm:$0xff]  ;;  %v647_v58 = vld [vmem:[#allocation3 + $0x108] sm:$0xff] }
  0x25   : > { %223 = vst [vmem:[#allocation2 + $0x90] sm:$0xff] %v6622_v0  ;;  %883 = vmatpush.msra.mxu1 %v637_v35  ;;  %771 = vmatpush.msra.mxu0 %v620_v37  ;;  %v665_v52 = vld [vmem:[#allocation3 + $0x198] sm:$0xff]  ;;  %v664_v56 = vld [vmem:[#allocation3 + $0x190] sm:$0xff]  ;;  %v631_v59 = vld [vmem:[#allocation3 + $0x88] sm:$0xff] }
  0x26   : > { %224 = vst [vmem:[#allocation2 + $0x98] sm:$0xff] %v6622_v0  ;;  %1109 = vmatpush.msra.mxu3 %v669_v36  ;;  %997 = vmatpush.msra.mxu2 %v652_v38  ;;  %v663_v60 = vld [vmem:[#allocation3 + $0x188] sm:$0xff]  ;;  %v614_v61 = vld [vmem:[#allocation3] sm:$0xff]  ;;  %v389_v63 = vld [vmem:[#allocation2 + $0x2] sm:$0xff] }
  0x27   : > { %225 = vst [vmem:[#allocation2 + $0xa0] sm:$0x3] %v6622_v0  ;;  %884 = vmatpush.msra.mxu1 %v636_v39  ;;  %772 = vmatpush.msra.mxu0 %v619_v41  ;;  %v646_v62 = vld [vmem:[#allocation3 + $0x100] sm:$0xff]  ;;  %v693_v1 = vld [vmem:[#allocation3 + $0x278] sm:$0xff]  ;;  %v692_v5 = vld [vmem:[#allocation3 + $0x270] sm:$0xff] }
  0x28   : > { %226 = vst [vmem:[#allocation2 + $0xa8] sm:$0xff] %v6622_v0  ;;  %1110 = vmatpush.msra.mxu3 %v668_v40  ;;  %998 = vmatpush.msra.mxu2 %v651_v42  ;;  %v630_v2 = vld [vmem:[#allocation3 + $0x80] sm:$0xff]  ;;  %v357_v4 = vld [vmem:[#allocation2 + $0x1] sm:$0xff]  ;;  %v262_v11 = vld [vmem:[%s6739_s5 + $0x18] sm:$0xff] }
  0x29   : > { %227 = vst [vmem:[#allocation2 + $0xb0] sm:$0xff] %v6622_v0  ;;  %885 = vmatpush.msra.mxu1 %v635_v43  ;;  %773 = vmatpush.msra.mxu0 %v618_v45  ;;  %v662_v3 = vld [vmem:[#allocation3 + $0x180] sm:$0xff]  ;;  %v259_v8 = vld [vmem:[%s6739_s5] sm:$0xff]  ;;  %v260_v9 = vld [vmem:[%s6739_s5 + $0x8] sm:$0xff] }
  0x2a   : > { %228 = vst [vmem:[#allocation2 + $0xb8] sm:$0x3] %v6622_v0  ;;  %1111 = vmatpush.msra.mxu3 %v667_v44  ;;  %999 = vmatpush.msra.mxu2 %v650_v46  ;;  %v390_v6 = vld [vmem:[#allocation2 + $0xa] sm:$0xff]  ;;  %v691_v12 = vld [vmem:[#allocation3 + $0x268] sm:$0xff]  ;;  %v263_v13 = vld [vmem:[%s6739_s5 + $0x20] sm:$0xff] }
  0x2b   : > { %229 = vst [vmem:[#allocation2 + $0xc0] sm:$0xff] %v6622_v0  ;;  %886 = vmatpush.msra.mxu1 %v634_v47  ;;  %774 = vmatpush.msra.mxu0 %v617_v49  ;;  %v358_v7 = vld [vmem:[#allocation2 + $0x9] sm:$0xff]  ;;  %v266_v25 = vld [vmem:[%s6739_s5 + $0x38] sm:$0xff]  ;;  %v267_v29 = vld [vmem:[%s6739_s5 + $0x40] sm:$0xff] }
  0x2c   : > { %230 = vst [vmem:[#allocation2 + $0xc8] sm:$0xff] %v6622_v0  ;;  %1112 = vmatpush.msra.mxu3 %v666_v48  ;;  %1000 = vmatpush.msra.mxu2 %v649_v50  ;;  %v261_v10 = vld [vmem:[%s6739_s5 + $0x10] sm:$0xff]  ;;  %v264_v16 = vld [vmem:[%s6739_s5 + $0x28] sm:$0xff]  ;;  %v688_v39 = vld [vmem:[#allocation3 + $0x250] sm:$0xff] }
  0x2d   : > { %231 = vst [vmem:[#allocation2 + $0xd0] sm:$0x3] %v6622_v0  ;;  %887 = vmatpush.msra.mxu1 %v633_v51  ;;  %775 = vmatpush.msra.mxu0 %v616_v53  ;;  %v265_v20 = vld [vmem:[%s6739_s5 + $0x30] sm:$0xff]  ;;  %v689_v30 = vld [vmem:[#allocation3 + $0x258] sm:$0xff]  ;;  %v270_v43 = vld [vmem:[%s6739_s5 + $0x58] sm:$0xff] }
  0x2e   : > { %232 = vst [vmem:[#allocation2 + $0xd8] sm:$0xff] %v6622_v0  ;;  %1113 = vmatpush.msra.mxu3 %v665_v52  ;;  %1001 = vmatpush.msra.mxu2 %v648_v54  ;;  %v690_v21 = vld [vmem:[#allocation3 + $0x260] sm:$0xff]  ;;  %v268_v34 = vld [vmem:[%s6739_s5 + $0x48] sm:$0xff]  ;;  %v271_v47 = vld [vmem:[%s6739_s5 + $0x60] sm:$0xff] }
  0x2f   : > { %233 = vst [vmem:[#allocation2 + $0xe0] sm:$0xff] %v6622_v0  ;;  %888 = vmatpush.msra.mxu1 %v632_v55  ;;  %776 = vmatpush.msra.mxu0 %v615_v57  ;;  %v269_v38 = vld [vmem:[%s6739_s5 + $0x50] sm:$0xff]  ;;  %v687_v48 = vld [vmem:[#allocation3 + $0x248] sm:$0xff]  ;;  %v272_v52 = vld [vmem:[%s6739_s5 + $0x68] sm:$0xff] }
  0x30   : > { %234 = vst [vmem:[#allocation2 + $0xe8] sm:$0x3] %v6622_v0  ;;  %1114 = vmatpush.msra.mxu3 %v664_v56  ;;  %1002 = vmatpush.msra.mxu2 %v647_v58  ;;  %v273_v56 = vld [vmem:[%s6739_s5 + $0x70] sm:$0xff] }
  0x31   : > { %235 = vst [vmem:[#allocation2 + $0xf0] sm:$0xff] %v6622_v0  ;;  %889 = vmatpush.msra.mxu1 %v631_v59  ;;  %777 = vmatpush.msra.mxu0 %v614_v61  ;;  %v686_v57 = vld [vmem:[#allocation3 + $0x240] sm:$0xff]  ;;  %v274_v61 = vld [vmem:[%s6739_s5 + $0x78] sm:$0xff] }
  0x32   : > { %236 = vst [vmem:[#allocation2 + $0xf8] sm:$0xff] %v6622_v0  ;;  %1115 = vmatpush.msra.mxu3 %v663_v60  ;;  %1003 = vmatpush.msra.mxu2 %v646_v62 }
  0x33   : > { %237 = vst [vmem:[#allocation2 + $0x100] sm:$0x3] %v6622_v0  ;;  %778 = vmatmul.f32.vlgmr.msra.gmra.mxu0 %v6622_v0  ;;  %1004 = vmatmul.f32.vlgmr.msra.gmra.mxu2 %v389_v63 }
  0x34   : > { %238 = vst [vmem:[#allocation2 + $0x108] sm:$0xff] %v6622_v0  ;;  %1214 = vmatpush.msrb.mxu0 %v693_v1  ;;  %890 = vmatpush.msra.mxu1 %v630_v2  ;;  %v275_v2 = vld [vmem:[%s6739_s5 + $0x80] sm:$0xff] }
  0x35   : > { %239 = vst [vmem:[#allocation2 + $0x110] sm:$0xff] %v6622_v0  ;;  %1116 = vmatpush.msra.mxu3 %v662_v3  ;;  %891 = vmatmul.f32.vlgmr.msra.gmra.mxu1 %v357_v4  ;;  %v709_v3 = vld [vmem:[#allocation3 + $0x2f8] sm:$0xff] }
  0x36   : > { %240 = vst [vmem:[#allocation2 + $0x118] sm:$0x3] %v6622_v0  ;;  %1215 = vmatpush.msrb.mxu0 %v692_v5  ;;  %v685_v4 = vld [vmem:[#allocation3 + $0x238] sm:$0xff]  ;;  %1327 = vmatpush.msrb.mxu1 %v709_v3 }
  0x37   : > { %241 = vst [vmem:[#allocation2 + $0x120] sm:$0xff] %v6622_v0 }
  0x38   : > { %242 = vst [vmem:[#allocation2 + $0x128] sm:$0xff] %v6622_v0  ;;  %1216 = vmatpush.msrb.mxu0 %v691_v12  ;;  %v277_v12 = vld [vmem:[%s6739_s5 + $0x90] sm:$0xff] }
  0x39   : > { %243 = vst [vmem:[#allocation2 + $0x130] sm:$0x3] %v6622_v0 }
  0x3a   : > { %244 = vst [vmem:[#allocation2 + $0x138] sm:$0xff] %v6622_v0  ;;  %1217 = vmatpush.msrb.mxu0 %v690_v21 }
  0x3b   : > { %245 = vst [vmem:[#allocation2 + $0x140] sm:$0xff] %v6622_v0  ;;  %781 = vmatmul.f32.gmra.mxu0 %v6622_v0  ;;  %1007 = vmatmul.f32.gmra.mxu2 %v390_v6 }
  0x3c   : > { %246 = vst [vmem:[#allocation2 + $0x148] sm:$0x3] %v6622_v0  ;;  %1218 = vmatpush.msrb.mxu0 %v689_v30 }
  0x3d   : > { %247 = vst [vmem:[#allocation2 + $0x150] sm:$0xff] %v6622_v0  ;;  %894 = vmatmul.f32.gmra.mxu1 %v358_v7 }
  0x3e   : > { %248 = vst [vmem:[#allocation2 + $0x158] sm:$0xff] %v6622_v0  ;;  %1219 = vmatpush.msrb.mxu0 %v688_v39 }
  0x3f   : > { %249 = vst [vmem:[#allocation2 + $0x160] sm:$0x3] %v6622_v0 }
  0x40   : > { %250 = vst [vmem:[#allocation2 + $0x168] sm:$0xff] %v6622_v0  ;;  %1220 = vmatpush.msrb.mxu0 %v687_v48 }
  0x41   : > { %251 = vst [vmem:[#allocation2 + $0x170] sm:$0xff] %v6622_v0 }
  0x42   : > { %252 = vst [vmem:[#allocation2 + $0x178] sm:$0x3] %v6622_v0  ;;  %1221 = vmatpush.msrb.mxu0 %v686_v57 }
  0x43   : > { %253 = vst [vmem:[#allocation2 + $0x180] sm:$0xff] %v6622_v0 }
  0x44   : > { %254 = vst [vmem:[#allocation2 + $0x188] sm:$0xff] %v6622_v0  ;;  %1222 = vmatpush.msrb.mxu0 %v685_v4 }
  0x45   : > { %255 = vst [vmem:[#allocation2 + $0x190] sm:$0x3] %v6622_v0 }
  0x46   : > { %256 = vst [vmem:[#allocation2 + $0x198] sm:$0xff] %v6622_v0 }
  0x47   : > { %257 = vst [vmem:[#allocation2 + $0x1a0] sm:$0xff] %v6622_v0 }
  0x48   : > { %258 = vst [vmem:[#allocation2 + $0x1a8] sm:$0x3] %v6622_v0 }
  0x49   : > { %293 = vst.msk [vmem:[#allocation2 + $0x19] sm:$0xff] %vm292_vm0, %v259_v8  ;;  %v276_v8 = vld [vmem:[%s6739_s5 + $0x88] sm:$0xff] }
  0x4a   : > { %294 = vst.msk [vmem:[#allocation2 + $0x21] sm:$0xff] %vm292_vm0, %v260_v9 }
  0x4b   : > { %295 = vst.msk [vmem:[#allocation2 + $0x31] sm:$0xff] %vm292_vm0, %v261_v10 }
  0x4c   : > { %296 = vst.msk [vmem:[#allocation2 + $0x39] sm:$0xff] %vm292_vm0, %v262_v11 }
  0x4d   : > { %297 = vst.msk [vmem:[#allocation2 + $0x49] sm:$0xff] %vm292_vm0, %v263_v13  ;;  %v708_v13 = vld [vmem:[#allocation3 + $0x2f0] sm:$0xff] }
  0x4e   : > { %298 = vst.msk [vmem:[#allocation2 + $0x51] sm:$0xff] %vm292_vm0, %v264_v16  ;;  %1328 = vmatpush.msrb.mxu1 %v708_v13  ;;  %v684_v16 = vld [vmem:[#allocation3 + $0x230] sm:$0xff] }
  0x4f   : > { %299 = vst.msk [vmem:[#allocation2 + $0x61] sm:$0xff] %vm292_vm0, %v265_v20  ;;  %1223 = vmatpush.msrb.mxu0 %v684_v16 }
  0x50   : > { %v421_v14 = vld [vmem:[#allocation2 + $0x18] sm:$0xff]  ;;  %300 = vst.msk [vmem:[#allocation2 + $0x69] sm:$0xff] %vm292_vm0, %v266_v25 }
  0x51   : > { %v359_v15 = vld [vmem:[#allocation2 + $0x19] sm:$0xff]  ;;  %1117 = vmatmul.f32.vlgmr.msra.gmra.mxu3 %v421_v14  ;;  %784 = vmatmul.f32.gmra.mxu0 %v421_v14  ;;  %v392_v18 = vld [vmem:[#allocation2 + $0x22] sm:$0xff]  ;;  %301 = vst.msk [vmem:[#allocation2 + $0x79] sm:$0xff] %vm292_vm0, %v267_v29 }
  0x52   : > { %v391_v0 = vld [vmem:[#allocation2 + $0x1a] sm:$0xff]  ;;  %897 = vmatmul.f32.gmra.mxu1 %v359_v15  ;;  %v423_v22 = vld [vmem:[#allocation2 + $0x30] sm:$0xff]  ;;  %302 = vst.msk [vmem:[#allocation2 + $0x81] sm:$0xff] %vm292_vm0, %v268_v34 }
  0x53   : > { %1010 = vmatmul.f32.gmra.mxu2 %v391_v0  ;;  %v422_v17 = vld [vmem:[#allocation2 + $0x20] sm:$0xff]  ;;  %v393_v23 = vld [vmem:[#allocation2 + $0x32] sm:$0xff]  ;;  %303 = vst.msk [vmem:[#allocation2 + $0x91] sm:$0xff] %vm292_vm0, %v269_v38 }
  0x54   : > { %v360_v19 = vld [vmem:[#allocation2 + $0x21] sm:$0xff]  ;;  %v361_v24 = vld [vmem:[#allocation2 + $0x31] sm:$0xff]  ;;  %v362_v28 = vld [vmem:[#allocation2 + $0x39] sm:$0xff]  ;;  %304 = vst.msk [vmem:[#allocation2 + $0x99] sm:$0xff] %vm292_vm0, %v270_v43 }
  0x55   : > { %v424_v26 = vld [vmem:[#allocation2 + $0x38] sm:$0xff]  ;;  %v425_v31 = vld [vmem:[#allocation2 + $0x48] sm:$0xff]  ;;  %v426_v35 = vld [vmem:[#allocation2 + $0x50] sm:$0xff]  ;;  %305 = vst.msk [vmem:[#allocation2 + $0xa9] sm:$0xff] %vm292_vm0, %v271_v47 }
  0x56   : > { %v394_v27 = vld [vmem:[#allocation2 + $0x3a] sm:$0xff]  ;;  %v395_v32 = vld [vmem:[#allocation2 + $0x4a] sm:$0xff]  ;;  %v396_v36 = vld [vmem:[#allocation2 + $0x52] sm:$0xff]  ;;  %306 = vst.msk [vmem:[#allocation2 + $0xb1] sm:$0xff] %vm292_vm0, %v272_v52 }
  0x57   : > { %v363_v33 = vld [vmem:[#allocation2 + $0x49] sm:$0xff]  ;;  %v364_v37 = vld [vmem:[#allocation2 + $0x51] sm:$0xff]  ;;  %v427_v40 = vld [vmem:[#allocation2 + $0x60] sm:$0xff]  ;;  %307 = vst.msk [vmem:[#allocation2 + $0xc1] sm:$0xff] %vm292_vm0, %v273_v56 }
  0x58   : > { %v397_v41 = vld [vmem:[#allocation2 + $0x62] sm:$0xff]  ;;  %v398_v45 = vld [vmem:[#allocation2 + $0x6a] sm:$0xff]  ;;  %v429_v49 = vld [vmem:[#allocation2 + $0x78] sm:$0xff]  ;;  %308 = vst.msk [vmem:[#allocation2 + $0xc9] sm:$0xff] %vm292_vm0, %v274_v61 }
  0x59   : > { %1120 = vmatmul.f32.gmra.mxu3 %v422_v17  ;;  %787 = vmatmul.f32.gmra.mxu0 %v422_v17  ;;  %v365_v42 = vld [vmem:[#allocation2 + $0x61] sm:$0xff]  ;;  %v366_v46 = vld [vmem:[#allocation2 + $0x69] sm:$0xff]  ;;  %v367_v51 = vld [vmem:[#allocation2 + $0x79] sm:$0xff]  ;;  %309 = vst.msk [vmem:[#allocation2 + $0xd9] sm:$0xff] %vm292_vm0, %v275_v2 }
  0x5a   : > { %900 = vmatmul.f32.gmra.mxu1 %v360_v19  ;;  %v428_v44 = vld [vmem:[#allocation2 + $0x68] sm:$0xff]  ;;  %v399_v50 = vld [vmem:[#allocation2 + $0x7a] sm:$0xff]  ;;  %v431_v58 = vld [vmem:[#allocation2 + $0x90] sm:$0xff]  ;;  %310 = vst.msk [vmem:[#allocation2 + $0xe1] sm:$0xff] %vm292_vm0, %v276_v8 }
  0x5b   : > { %1013 = vmatmul.f32.gmra.mxu2 %v392_v18  ;;  %v430_v53 = vld [vmem:[#allocation2 + $0x80] sm:$0xff]  ;;  %v401_v59 = vld [vmem:[#allocation2 + $0x92] sm:$0xff]  ;;  %311 = vst.msk [vmem:[#allocation2 + $0xf1] sm:$0xff] %vm292_vm0, %v277_v12  ;;  %v681_v12 = vld [vmem:[#allocation3 + $0x218] sm:$0xff] }
  0x5c   : > { %v400_v54 = vld [vmem:[#allocation2 + $0x82] sm:$0xff]  ;;  %v369_v60 = vld [vmem:[#allocation2 + $0x91] sm:$0xff]  ;;  %v402_v63 = vld [vmem:[#allocation2 + $0x9a] sm:$0xff] }
  0x5d   : > { %v368_v55 = vld [vmem:[#allocation2 + $0x81] sm:$0xff]  ;;  %v432_v62 = vld [vmem:[#allocation2 + $0x98] sm:$0xff]  ;;  %v403_v6 = vld [vmem:[#allocation2 + $0xaa] sm:$0xff] }
  0x5e   : > { %v370_v1 = vld [vmem:[#allocation2 + $0x99] sm:$0xff]  ;;  %v433_v5 = vld [vmem:[#allocation2 + $0xa8] sm:$0xff]  ;;  %v434_v9 = vld [vmem:[#allocation2 + $0xb0] sm:$0xff] }
  0x5f   : > { %v371_v7 = vld [vmem:[#allocation2 + $0xa9] sm:$0xff]  ;;  %v404_v10 = vld [vmem:[#allocation2 + $0xb2] sm:$0xff]  ;;  %v435_v0 = vld [vmem:[#allocation2 + $0xc0] sm:$0xff] }
  0x60   : > { %v372_v11 = vld [vmem:[#allocation2 + $0xb1] sm:$0xff]  ;;  %v405_v17 = vld [vmem:[#allocation2 + $0xc2] sm:$0xff]  ;;  %v375_v34 = vld [vmem:[#allocation2 + $0xd9] sm:$0xff] }
  0x61   : > { %1123 = vmatmul.f32.gmra.mxu3 %v423_v22  ;;  %790 = vmatmul.f32.gmra.mxu0 %v423_v22  ;;  %v373_v18 = vld [vmem:[#allocation2 + $0xc1] sm:$0xff]  ;;  %v278_v19 = vld [vmem:[%s6739_s5 + $0x98] sm:$0xff]  ;;  %v374_v25 = vld [vmem:[#allocation2 + $0xc9] sm:$0xff] }
  0x62   : > { %903 = vmatmul.f32.gmra.mxu1 %v361_v24  ;;  %312 = vst.msk [vmem:[#allocation2 + $0xf9] sm:$0xff] %vm292_vm0, %v278_v19  ;;  %v406_v24 = vld [vmem:[#allocation2 + $0xca] sm:$0xff]  ;;  %v683_v29 = vld [vmem:[#allocation3 + $0x228] sm:$0xff]  ;;  %v438_v38 = vld [vmem:[#allocation2 + $0xe0] sm:$0xff] }
  0x63   : > { %1016 = vmatmul.f32.gmra.mxu2 %v393_v23  ;;  %v436_v23 = vld [vmem:[#allocation2 + $0xc8] sm:$0xff]  ;;  %v437_v30 = vld [vmem:[#allocation2 + $0xd8] sm:$0xff]  ;;  %1224 = vmatpush.msrb.mxu0 %v683_v29  ;;  %v281_v43 = vld [vmem:[%s6739_s5 + $0xb0] sm:$0xff] }
  0x64   : > { %315 = vst.msk [vmem:[#allocation2 + $0x121] sm:$0xff] %vm292_vm0, %v281_v43  ;;  %v282_v56 = vld [vmem:[%s6739_s5 + $0xb8] sm:$0xff] }
  0x65   : > { %316 = vst.msk [vmem:[#allocation2 + $0x129] sm:$0xff] %vm292_vm0, %v282_v56 }
  0x69   : > { %1126 = vmatmul.f32.gmra.mxu3 %v424_v26  ;;  %793 = vmatmul.f32.gmra.mxu0 %v424_v26  ;;  %v279_v26 = vld [vmem:[%s6739_s5 + $0xa0] sm:$0xff] }
  0x6a   : > { %906 = vmatmul.f32.gmra.mxu1 %v362_v28  ;;  %313 = vst.msk [vmem:[#allocation2 + $0x109] sm:$0xff] %vm292_vm0, %v279_v26  ;;  %v410_v3 = vld [vmem:[#allocation2 + $0xfa] sm:$0xff] }
  0x6b   : > { %1019 = vmatmul.f32.gmra.mxu2 %v394_v27  ;;  %v707_v27 = vld [vmem:[#allocation3 + $0x2e8] sm:$0xff] }
  0x6c   : > { %1329 = vmatpush.msrb.mxu1 %v707_v27  ;;  %v378_v4 = vld [vmem:[#allocation2 + $0xf9] sm:$0xff] }
  0x71   : > { %1129 = vmatmul.f32.gmra.mxu3 %v425_v31  ;;  %796 = vmatmul.f32.gmra.mxu0 %v425_v31  ;;  %v441_v13 = vld [vmem:[#allocation2 + $0x108] sm:$0xff] }
  0x72   : > { %909 = vmatmul.f32.gmra.mxu1 %v363_v33  ;;  %v407_v33 = vld [vmem:[#allocation2 + $0xda] sm:$0xff]  ;;  %v379_v19 = vld [vmem:[#allocation2 + $0x109] sm:$0xff] }
  0x73   : > { %1022 = vmatmul.f32.gmra.mxu2 %v395_v32 }
  0x79   : > { %1132 = vmatmul.f32.gmra.mxu3 %v426_v35  ;;  %799 = vmatmul.f32.gmra.mxu0 %v426_v35  ;;  %v280_v35 = vld [vmem:[%s6739_s5 + $0xa8] sm:$0xff] }
  0x7a   : > { %912 = vmatmul.f32.gmra.mxu1 %v364_v37  ;;  %314 = vst.msk [vmem:[#allocation2 + $0x111] sm:$0xff] %vm292_vm0, %v280_v35 }
  0x7b   : > { %1025 = vmatmul.f32.gmra.mxu2 %v396_v36 }
  0x81   : > { %1135 = vmatmul.f32.gmra.mxu3 %v427_v40  ;;  %802 = vmatmul.f32.gmra.mxu0 %v427_v40  ;;  %v380_v35 = vld [vmem:[#allocation2 + $0x111] sm:$0xff] }
  0x82   : > { %915 = vmatmul.f32.gmra.mxu1 %v365_v42  ;;  %v376_v42 = vld [vmem:[#allocation2 + $0xe1] sm:$0xff] }
  0x83   : > { %1028 = vmatmul.f32.gmra.mxu2 %v397_v41  ;;  %v408_v41 = vld [vmem:[#allocation2 + $0xe2] sm:$0xff] }
  0x89   : > { %1138 = vmatmul.f32.gmra.mxu3 %v428_v44  ;;  %805 = vmatmul.f32.gmra.mxu0 %v428_v44  ;;  %v6805_v44 = vld [vmem:[#allocation5] ss:$0 sm:$0xff] }
  0x8a   : > { %918 = vmatmul.f32.gmra.mxu1 %v366_v46 }
  0x8b   : > { %1031 = vmatmul.f32.gmra.mxu2 %v398_v45  ;;  %v706_v45 = vld [vmem:[#allocation3 + $0x2e0] sm:$0xff] }
  0x8c   : > { %1330 = vmatpush.msrb.mxu1 %v706_v45  ;;  %v680_v45 = vld [vmem:[#allocation3 + $0x210] sm:$0xff] }
  0x91   : > { %1141 = vmatmul.f32.gmra.mxu3 %v429_v49  ;;  %808 = vmatmul.f32.gmra.mxu0 %v429_v49  ;;  %v682_v49 = vld [vmem:[#allocation3 + $0x220] sm:$0xff] }
  0x92   : > { %921 = vmatmul.f32.gmra.mxu1 %v367_v51  ;;  %1225 = vmatpush.msrb.mxu0 %v682_v49 }
  0x93   : > { %1034 = vmatmul.f32.gmra.mxu2 %v399_v50  ;;  %v439_v50 = vld [vmem:[#allocation2 + $0xf0] sm:$0xff] }
  0x94   : > { %1226 = vmatpush.msrb.mxu0 %v681_v12  ;;  %v725_v12 = vld [vmem:[#allocation3 + $0x378] sm:$0xff] }
  0x95   : > { %1440 = vmatpush.msrb.mxu2 %v725_v12  ;;  %v701_v12 = vld [vmem:[#allocation3 + $0x2b8] sm:$0xff] }
  0x96   : > { %1227 = vmatpush.msrb.mxu0 %v680_v45 }
  0x99   : > { %1144 = vmatmul.f32.gmra.mxu3 %v430_v53  ;;  %811 = vmatmul.f32.gmra.mxu0 %v430_v53 }
  0x9a   : > { %924 = vmatmul.f32.gmra.mxu1 %v368_v55  ;;  %v377_v55 = vld [vmem:[#allocation2 + $0xf1] sm:$0xff] }
  0x9b   : > { %1037 = vmatmul.f32.gmra.mxu2 %v400_v54  ;;  %v409_v54 = vld [vmem:[#allocation2 + $0xf2] sm:$0xff] }
  0xa1   : > { %1147 = vmatmul.f32.gmra.mxu3 %v431_v58  ;;  %814 = vmatmul.f32.gmra.mxu0 %v431_v58 }
  0xa2   : > { %927 = vmatmul.f32.gmra.mxu1 %v369_v60 }
  0xa3   : > { %1040 = vmatmul.f32.gmra.mxu2 %v401_v59 }
  0xa9   : > { %1150 = vmatmul.f32.gmra.mxu3 %v432_v62  ;;  %817 = vmatmul.f32.gmra.mxu0 %v432_v62  ;;  %v440_v62 = vld [vmem:[#allocation2 + $0xf8] sm:$0xff] }
  0xaa   : > { %930 = vmatmul.f32.gmra.mxu1 %v370_v1 }
  0xab   : > { %1043 = vmatmul.f32.gmra.mxu2 %v402_v63 }
  0xb0   : > { %v6784_v14 = vpop.f32.mrf.mxu0 }
  0xb1   : > { %1153 = vmatmul.f32.gmra.mxu3 %v433_v5  ;;  %820 = vmatmul.f32.gmra.mxu0 %v433_v5  ;;  %v283_v5 = vld [vmem:[%s6739_s5 + $0xc0] sm:$0xff] }
  0xb2   : > { %933 = vmatmul.f32.gmra.mxu1 %v371_v7  ;;  %v6786_v15 = vpop.f32.mrf.mxu1  ;;  %v705_v7 = vld [vmem:[#allocation3 + $0x2d8] sm:$0xff]  ;;  %317 = vst.msk [vmem:[#allocation2 + $0x139] sm:$0xff] %vm292_vm0, %v283_v5  ;;  %v703_v5 = vld [vmem:[#allocation3 + $0x2c8] sm:$0xff] }
  0xb3   : > { %1046 = vmatmul.f32.gmra.mxu2 %v403_v6  ;;  %1331 = vmatpush.msrb.mxu1 %v705_v7 }
  0xb6   : > { %v6789_v20 = vpop.f32.mrf.mxu2 }
  0xb8   : > { %v6792_v21 = vpop.f32.mrf.mxu0 }
  0xb9   : > { %1156 = vmatmul.f32.gmra.mxu3 %v434_v9  ;;  %823 = vmatmul.f32.gmra.mxu0 %v434_v9 }
  0xba   : > { %936 = vmatmul.f32.gmra.mxu1 %v372_v11  ;;  %v6794_v22 = vpop.f32.mrf.mxu1 }
  0xbb   : > { %1049 = vmatmul.f32.gmra.mxu2 %v404_v10 }
  0xbe   : > { %v6798_v28 = vpop.f32.mrf.mxu2 }
  0xc1   : > { %1159 = vmatmul.f32.gmra.mxu3 %v435_v0  ;;  %826 = vmatmul.f32.gmra.mxu0 %v435_v0 }
  0xc2   : > { %939 = vmatmul.f32.gmra.mxu1 %v373_v18  ;;  %v411_v18 = vld [vmem:[#allocation2 + $0x10a] sm:$0xff] }
  0xc3   : > { %1052 = vmatmul.f32.gmra.mxu2 %v405_v17 }
  0xc9   : > { %1162 = vmatmul.f32.gmra.mxu3 %v436_v23  ;;  %829 = vmatmul.f32.gmra.mxu0 %v436_v23  ;;  %v284_v23 = vld [vmem:[%s6739_s5 + $0xc8] sm:$0xff] }
  0xca   : > { %942 = vmatmul.f32.gmra.mxu1 %v374_v25  ;;  %318 = vst.msk [vmem:[#allocation2 + $0x141] sm:$0xff] %vm292_vm0, %v284_v23  ;;  %v288_v23 = vld [vmem:[%s6739_s5 + $0xe8] sm:$0xff] }
  0xcb   : > { %1055 = vmatmul.f32.gmra.mxu2 %v406_v24  ;;  %322 = vst.msk [vmem:[#allocation2 + $0x171] sm:$0xff] %vm292_vm0, %v288_v23  ;;  %v733_v23 = vld [vmem:[#allocation3 + $0x3b8] sm:$0xff] }
  0xce   : > { %v785_v31 = vpop.f32.mrf.mxu0 }
  0xcf   : > { %v898_v32 = vpop.f32.mrf.mxu1  ;;  %v786_v46 = vadd.f32 %v6805_v44, %v785_v31 }
  0xd1   : > { %1165 = vmatmul.f32.gmra.mxu3 %v437_v30  ;;  %832 = vmatmul.f32.gmra.mxu0 %v437_v30  ;;  %v899_v52 = vadd.f32 %v898_v32, %v786_v46  ;;  %v442_v30 = vld [vmem:[#allocation2 + $0x110] sm:$0xff]  ;;  %v443_v46 = vld [vmem:[#allocation2 + $0x120] sm:$0xff] }
  0xd2   : > { %945 = vmatmul.f32.gmra.mxu1 %v375_v34  ;;  %v412_v34 = vld [vmem:[#allocation2 + $0x112] sm:$0xff]  ;;  %v384_v45 = vld [vmem:[#allocation2 + $0x141] sm:$0xff] }
  0xd3   : > { %1058 = vmatmul.f32.gmra.mxu2 %v407_v33 }
  0xd4   : > { %v6802_v36 = vpop.f32.mrf.mxu3 }
  0xd6   : > { %v1011_v37 = vpop.f32.mrf.mxu2  ;;  %v788_v39 = vpop.f32.mrf.mxu0 }
  0xd7   : > { %v901_v40 = vpop.f32.mrf.mxu1  ;;  %v1012_v57 = vadd.f32 %v1011_v37, %v899_v52  ;;  %v789_v58 = vadd.f32 %v6805_v44, %v788_v39  ;;  %v285_v37 = vld [vmem:[%s6739_s5 + $0xd0] sm:$0xff]  ;;  %v704_v39 = vld [vmem:[#allocation3 + $0x2d0] sm:$0xff] }
  0xd8   : > { %319 = vst.msk [vmem:[#allocation2 + $0x151] sm:$0xff] %vm292_vm0, %v285_v37  ;;  %1332 = vmatpush.msrb.mxu1 %v704_v39  ;;  %v381_v52 = vld [vmem:[#allocation2 + $0x121] sm:$0xff]  ;;  %v739_v37 = vld [vmem:[#allocation3 + $0x3e8] sm:$0xff] }
  0xd9   : > { %1168 = vmatmul.f32.gmra.mxu3 %v438_v38  ;;  %835 = vmatmul.f32.gmra.mxu0 %v438_v38  ;;  %v902_v1 = vadd.f32 %v901_v40, %v789_v58 }
  0xda   : > { %948 = vmatmul.f32.gmra.mxu1 %v376_v42 }
  0xdb   : > { %1061 = vmatmul.f32.gmra.mxu2 %v408_v41  ;;  %1333 = vmatpush.msrb.mxu1 %v703_v5 }
  0xdc   : > { %v6809_v47 = vpop.f32.mrf.mxu3 }
  0xde   : > { %v1014_v48 = vpop.f32.mrf.mxu2  ;;  %v791_v51 = vpop.f32.mrf.mxu0 }
  0xdf   : > { %v904_v53 = vpop.f32.mrf.mxu1  ;;  %v1015_v6 = vadd.f32 %v1014_v48, %v902_v1  ;;  %v792_v8 = vadd.f32 %v6805_v44, %v791_v51  ;;  %v413_v51 = vld [vmem:[#allocation2 + $0x122] sm:$0xff]  ;;  %v414_v1 = vld [vmem:[#allocation2 + $0x12a] sm:$0xff] }
  0xe0   : > { %v385_v5 = vld [vmem:[#allocation2 + $0x151] sm:$0xff] }
  0xe1   : > { %1171 = vmatmul.f32.gmra.mxu3 %v439_v50  ;;  %838 = vmatmul.f32.gmra.mxu0 %v439_v50  ;;  %v905_v0 = vadd.f32 %v904_v53, %v792_v8  ;;  %v286_v53 = vld [vmem:[%s6739_s5 + $0xd8] sm:$0xff] }
  0xe2   : > { %951 = vmatmul.f32.gmra.mxu1 %v377_v55  ;;  %320 = vst.msk [vmem:[#allocation2 + $0x159] sm:$0xff] %vm292_vm0, %v286_v53  ;;  %v737_v53 = vld [vmem:[#allocation3 + $0x3d8] sm:$0xff] }
  0xe3   : > { %1064 = vmatmul.f32.gmra.mxu2 %v409_v54 }
  0xe4   : > { %v1124_v59 = vpop.f32.mrf.mxu3 }
  0xe5   : > { %v6814_v60 = vadd.f32 %v1124_v59, %v1012_v57  ;;  %v444_v59 = vld [vmem:[#allocation2 + $0x128] sm:$0xff] }
  0xe6   : > { %v1017_v61 = vpop.f32.mrf.mxu2  ;;  %v794_v63 = vpop.f32.mrf.mxu0 }
  0xe7   : > { %v907_v2 = vpop.f32.mrf.mxu1  ;;  %v1018_v24 = vadd.f32 %v1017_v61, %v905_v0  ;;  %v795_v25 = vadd.f32 %v6805_v44, %v794_v63 }
  0xe9   : > { %1174 = vmatmul.f32.gmra.mxu3 %v440_v62  ;;  %841 = vmatmul.f32.gmra.mxu0 %v440_v62  ;;  %v908_v32 = vadd.f32 %v907_v2, %v795_v25  ;;  %v382_v2 = vld [vmem:[#allocation2 + $0x129] sm:$0xff]  ;;  %v724_v25 = vld [vmem:[#allocation3 + $0x370] sm:$0xff] }
  0xea   : > { %954 = vmatmul.f32.gmra.mxu1 %v378_v4  ;;  %1441 = vmatpush.msrb.mxu2 %v724_v25 }
  0xeb   : > { %1067 = vmatmul.f32.gmra.mxu2 %v410_v3  ;;  %v287_v3 = vld [vmem:[%s6739_s5 + $0xe0] sm:$0xff] }
  0xec   : > { %v1127_v9 = vpop.f32.mrf.mxu3  ;;  %321 = vst.msk [vmem:[#allocation2 + $0x169] sm:$0xff] %vm292_vm0, %v287_v3 }
  0xed   : > { %v6819_v10 = vadd.f32 %v1127_v9, %v1015_v6 }
  0xee   : > { %v1020_v11 = vpop.f32.mrf.mxu2  ;;  %v797_v16 = vpop.f32.mrf.mxu0 }
  0xef   : > { %v910_v17 = vpop.f32.mrf.mxu1  ;;  %v1021_v38 = vadd.f32 %v1020_v11, %v908_v32  ;;  %v798_v40 = vadd.f32 %v6805_v44, %v797_v16  ;;  %v679_v11 = vld [vmem:[#allocation3 + $0x208] sm:$0xff] }
  0xf0   : > { %1228 = vmatpush.msrb.mxu0 %v679_v11 }
  0xf1   : > { %1177 = vmatmul.f32.gmra.mxu3 %v441_v13  ;;  %844 = vmatmul.f32.gmra.mxu0 %v441_v13  ;;  %v911_v49 = vadd.f32 %v910_v17, %v798_v40  ;;  %v445_v13 = vld [vmem:[#allocation2 + $0x138] sm:$0xff] }
  0xf2   : > { %957 = vmatmul.f32.gmra.mxu1 %v379_v19  ;;  %v383_v19 = vld [vmem:[#allocation2 + $0x139] sm:$0xff] }
  0xf3   : > { %1070 = vmatmul.f32.gmra.mxu2 %v411_v18  ;;  %v415_v18 = vld [vmem:[#allocation2 + $0x13a] sm:$0xff] }
  0xf4   : > { %v1130_v26 = vpop.f32.mrf.mxu3 }
  0xf5   : > { %v6824_v27 = vadd.f32 %v1130_v26, %v1018_v24  ;;  %v741_v26 = vld [vmem:[#allocation3 + $0x3f8] sm:$0xff] }
  0xf6   : > { %v1023_v29 = vpop.f32.mrf.mxu2  ;;  %v800_v31 = vpop.f32.mrf.mxu0  ;;  %1553 = vmatpush.msrb.mxu3 %v741_v26  ;;  %v699_v26 = vld [vmem:[#allocation3 + $0x2a8] sm:$0xff] }
  0xf7   : > { %v913_v33 = vpop.f32.mrf.mxu1  ;;  %v1024_v54 = vadd.f32 %v1023_v29, %v911_v49  ;;  %v801_v55 = vadd.f32 %v6805_v44, %v800_v31  ;;  %v740_v31 = vld [vmem:[#allocation3 + $0x3f0] sm:$0xff]  ;;  %v289_v49 = vld [vmem:[%s6739_s5 + $0xf0] sm:$0xff] }
  0xf8   : > { %1554 = vmatpush.msrb.mxu3 %v740_v31  ;;  %323 = vst.msk [vmem:[#allocation2 + $0x181] sm:$0xff] %vm292_vm0, %v289_v49  ;;  %v713_v49 = vld [vmem:[#allocation3 + $0x318] sm:$0xff] }
  0xf9   : > { %1180 = vmatmul.f32.gmra.mxu3 %v442_v30  ;;  %847 = vmatmul.f32.gmra.mxu0 %v442_v30  ;;  %v914_v62 = vadd.f32 %v913_v33, %v801_v55  ;;  %v723_v30 = vld [vmem:[#allocation3 + $0x368] sm:$0xff] }
  0xfa   : > { %960 = vmatmul.f32.gmra.mxu1 %v380_v35  ;;  %1442 = vmatpush.msrb.mxu2 %v723_v30  ;;  %v722_v35 = vld [vmem:[#allocation3 + $0x360] sm:$0xff] }
  0xfb   : > { %1073 = vmatmul.f32.gmra.mxu2 %v412_v34  ;;  %1555 = vmatpush.msrb.mxu3 %v739_v37  ;;  %v715_v37 = vld [vmem:[#allocation3 + $0x328] sm:$0xff] }
  0xfc   : > { %v1133_v41 = vpop.f32.mrf.mxu3  ;;  %1443 = vmatpush.msrb.mxu2 %v722_v35  ;;  %v386_v35 = vld [vmem:[#allocation2 + $0x159] sm:$0xff] }
  0xfd   : > { %v6829_v42 = vadd.f32 %v1133_v41, %v1021_v38  ;;  %v446_v38 = vld [vmem:[#allocation2 + $0x140] sm:$0xff] }
  0xfe   : > { %v1026_v43 = vpop.f32.mrf.mxu2  ;;  %v803_v48 = vpop.f32.mrf.mxu0 }
  0xff   : > { %v916_v50 = vpop.f32.mrf.mxu1  ;;  %v1027_v4 = vadd.f32 %v1026_v43, %v914_v62  ;;  %v804_v6 = vadd.f32 %v6805_v44, %v803_v48  ;;  %v416_v43 = vld [vmem:[#allocation2 + $0x142] sm:$0xff]  ;;  %v738_v48 = vld [vmem:[#allocation3 + $0x3e0] sm:$0xff] }
 0x100   : > { %1556 = vmatpush.msrb.mxu3 %v738_v48  ;;  %v447_v62 = vld [vmem:[#allocation2 + $0x150] sm:$0xff] }
 0x101   : > { %1183 = vmatmul.f32.gmra.mxu3 %v443_v46  ;;  %850 = vmatmul.f32.gmra.mxu0 %v443_v46  ;;  %v917_v0 = vadd.f32 %v916_v50, %v804_v6  ;;  %v721_v46 = vld [vmem:[#allocation3 + $0x358] sm:$0xff]  ;;  %v718_v6 = vld [vmem:[#allocation3 + $0x340] sm:$0xff] }
 0x102   : > { %963 = vmatmul.f32.gmra.mxu1 %v381_v52  ;;  %v720_v52 = vld [vmem:[#allocation3 + $0x350] sm:$0xff]  ;;  %1444 = vmatpush.msrb.mxu2 %v721_v46 }
 0x103   : > { %1076 = vmatmul.f32.gmra.mxu2 %v413_v51  ;;  %v702_v51 = vld [vmem:[#allocation3 + $0x2c0] sm:$0xff]  ;;  %1557 = vmatpush.msrb.mxu3 %v737_v53  ;;  %v696_v53 = vld [vmem:[#allocation3 + $0x290] sm:$0xff] }
 0x104   : > { %v1136_v56 = vpop.f32.mrf.mxu3  ;;  %1334 = vmatpush.msrb.mxu1 %v702_v51  ;;  %1445 = vmatpush.msrb.mxu2 %v720_v52 }
 0x105   : > { %v6834_v57 = vadd.f32 %v1136_v56, %v1024_v54  ;;  %v719_v56 = vld [vmem:[#allocation3 + $0x348] sm:$0xff] }
 0x106   : > { %v1029_v58 = vpop.f32.mrf.mxu2  ;;  %v806_v61 = vpop.f32.mrf.mxu0  ;;  %1446 = vmatpush.msrb.mxu2 %v719_v56  ;;  %1335 = vmatpush.msrb.mxu1 %v701_v12  ;;  %v757_v56 = vld [vmem:[#allocation3 + $0x478] sm:$0xff]  ;;  %v710_v12 = vld [vmem:[#allocation3 + $0x300] sm:$0xff] }
 0x107   : > { %v919_v63 = vpop.f32.mrf.mxu1  ;;  %v1030_v24 = vadd.f32 %v1029_v58, %v917_v0  ;;  %v807_v29 = vadd.f32 %v6805_v44, %v806_v61  ;;  %v736_v58 = vld [vmem:[#allocation3 + $0x3d0] sm:$0xff] }
 0x108   : > { %1558 = vmatpush.msrb.mxu3 %v736_v58  ;;  %1447 = vmatpush.msrb.mxu2 %v718_v6  ;;  %v711_v6 = vld [vmem:[#allocation3 + $0x308] sm:$0xff] }
 0x109   : > { %1186 = vmatmul.f32.gmra.mxu3 %v444_v59  ;;  %853 = vmatmul.f32.gmra.mxu0 %v444_v59  ;;  %v920_v40 = vadd.f32 %v919_v63, %v807_v29  ;;  %v448_v29 = vld [vmem:[#allocation2 + $0x158] sm:$0xff] }
 0x10a   : > { %966 = vmatmul.f32.gmra.mxu1 %v382_v2 }
 0x10b   : > { %1079 = vmatmul.f32.gmra.mxu2 %v414_v1  ;;  %v678_v1 = vld [vmem:[#allocation3 + $0x200] sm:$0xff] }
 0x10c   : > { %v1139_v7 = vpop.f32.mrf.mxu3  ;;  %1229 = vmatpush.msrb.mxu0 %v678_v1  ;;  %v712_v1 = vld [vmem:[#allocation3 + $0x310] sm:$0xff] }
 0x10d   : > { %v6839_v8 = vadd.f32 %v1139_v7, %v1027_v4  ;;  %v417_v4 = vld [vmem:[#allocation2 + $0x152] sm:$0xff] }
 0x10e   : > { %v1032_v9 = vpop.f32.mrf.mxu2  ;;  %v809_v16 = vpop.f32.mrf.mxu0  ;;  %v735_v7 = vld [vmem:[#allocation3 + $0x3c8] sm:$0xff]  ;;  %1666 = vmatpush.msra.mxu0 %v757_v56  ;;  %v454_v56 = vld [vmem:[#allocation2 + $0x21] sm:$0xff] }
 0x10f   : > { %v922_v17 = vpop.f32.mrf.mxu1  ;;  %v1033_v50 = vadd.f32 %v1032_v9, %v920_v40  ;;  %v810_v54 = vadd.f32 %v6805_v44, %v809_v16  ;;  %v290_v9 = vld [vmem:[%s6739_s5 + $0xf8] sm:$0xff]  ;;  %v734_v16 = vld [vmem:[#allocation3 + $0x3c0] sm:$0xff]  ;;  %1559 = vmatpush.msrb.mxu3 %v735_v7  ;;  %v728_v7 = vld [vmem:[#allocation3 + $0x390] sm:$0xff] }
 0x110   : > { %324 = vst.msk [vmem:[#allocation2 + $0x189] sm:$0xff] %vm292_vm0, %v290_v9  ;;  %v698_v40 = vld [vmem:[#allocation3 + $0x2a0] sm:$0xff] }
 0x111   : > { %1189 = vmatmul.f32.gmra.mxu3 %v445_v13  ;;  %856 = vmatmul.f32.gmra.mxu0 %v445_v13  ;;  %v923_v2 = vadd.f32 %v922_v17, %v810_v54  ;;  %v717_v13 = vld [vmem:[#allocation3 + $0x338] sm:$0xff]  ;;  %v700_v17 = vld [vmem:[#allocation3 + $0x2b0] sm:$0xff] }
 0x112   : > { %969 = vmatmul.f32.gmra.mxu1 %v383_v19  ;;  %v716_v19 = vld [vmem:[#allocation3 + $0x330] sm:$0xff]  ;;  %1448 = vmatpush.msrb.mxu2 %v717_v13  ;;  %v449_v54 = vld [vmem:[#allocation2 + $0x168] sm:$0xff]  ;;  %v727_v13 = vld [vmem:[#allocation3 + $0x388] sm:$0xff] }
 0x113   : > { %1082 = vmatmul.f32.gmra.mxu2 %v415_v18  ;;  %1560 = vmatpush.msrb.mxu3 %v734_v16 }
 0x114   : > { %v1142_v32 = vpop.f32.mrf.mxu3  ;;  %1336 = vmatpush.msrb.mxu1 %v700_v17  ;;  %1449 = vmatpush.msrb.mxu2 %v716_v19  ;;  %v450_v17 = vld [vmem:[#allocation2 + $0x170] sm:$0xff] }
 0x115   : > { %v6844_v33 = vadd.f32 %v1142_v32, %v1030_v24  ;;  %1561 = vmatpush.msrb.mxu3 %v733_v23 }
 0x116   : > { %v1035_v34 = vpop.f32.mrf.mxu2  ;;  %v812_v39 = vpop.f32.mrf.mxu0  ;;  %1337 = vmatpush.msrb.mxu1 %v699_v26  ;;  %1450 = vmatpush.msrb.mxu2 %v715_v37  ;;  %v388_v26 = vld [vmem:[#allocation2 + $0x171] sm:$0xff] }
 0x117   : > { %v6846_v41 = vpop.f32.mrf.mxu1  ;;  %v1036_v11 = vadd.f32 %v1035_v34, %v923_v2  ;;  %v813_v0 = vadd.f32 %v6805_v44, %v812_v39  ;;  %v418_v34 = vld [vmem:[#allocation2 + $0x15a] sm:$0xff]  ;;  %v729_v2 = vld [vmem:[#allocation3 + $0x398] sm:$0xff] }
 0x118   : > { %1338 = vmatpush.msrb.mxu1 %v698_v40  ;;  %v453_v40 = vld [vmem:[#allocation2 + $0x19] sm:$0xff] }
 0x119   : > { %1192 = vmatmul.f32.gmra.mxu3 %v446_v38  ;;  %859 = vmatmul.f32.gmra.mxu0 %v446_v38  ;;  %v926_v31 = vadd.f32 %v6846_v41, %v813_v0  ;;  %v732_v38 = vld [vmem:[#allocation3 + $0x3b0] sm:$0xff]  ;;  %v697_v41 = vld [vmem:[#allocation3 + $0x298] sm:$0xff] }
 0x11a   : > { %972 = vmatmul.f32.gmra.mxu1 %v384_v45  ;;  %v731_v45 = vld [vmem:[#allocation3 + $0x3a8] sm:$0xff]  ;;  %1562 = vmatpush.msrb.mxu3 %v732_v38  ;;  %v756_v38 = vld [vmem:[#allocation3 + $0x470] sm:$0xff] }
 0x11b   : > { %1085 = vmatmul.f32.gmra.mxu2 %v416_v43  ;;  %v714_v43 = vld [vmem:[#allocation3 + $0x320] sm:$0xff]  ;;  %1339 = vmatpush.msrb.mxu1 %v697_v41  ;;  %v485_v41 = vld [vmem:[#allocation2 + $0x1a] sm:$0xff] }
 0x11c   : > { %v1145_v55 = vpop.f32.mrf.mxu3  ;;  %1451 = vmatpush.msrb.mxu2 %v714_v43  ;;  %1563 = vmatpush.msrb.mxu3 %v731_v45 }
 0x11d   : > { %v6851_v59 = vadd.f32 %v1145_v55, %v1033_v50  ;;  %v730_v50 = vld [vmem:[#allocation3 + $0x3a0] sm:$0xff]  ;;  %1340 = vmatpush.msrb.mxu1 %v696_v53  ;;  %1667 = vmatpush.msra.mxu0 %v756_v38 }
 0x11e   : > { %v1038_v61 = vpop.f32.mrf.mxu2  ;;  %v815_v63 = vpop.f32.mrf.mxu0  ;;  %1452 = vmatpush.msrb.mxu2 %v713_v49  ;;  %1564 = vmatpush.msrb.mxu3 %v730_v50 }
 0x11f   : > { %v6853_v3 = vpop.f32.mrf.mxu1  ;;  %v1039_v39 = vadd.f32 %v1038_v61, %v926_v31  ;;  %v816_v46 = vadd.f32 %v6805_v44, %v815_v63  ;;  %v387_v63 = vld [vmem:[#allocation2 + $0x169] sm:$0xff] }
 0x120   : > { %1453 = vmatpush.msrb.mxu2 %v712_v1  ;;  %1565 = vmatpush.msrb.mxu3 %v729_v2 }
 0x121   : > { %1195 = vmatmul.f32.gmra.mxu3 %v447_v62  ;;  %862 = vmatmul.f32.gmra.mxu0 %v447_v62  ;;  %v929_v58 = vadd.f32 %v6853_v3, %v816_v46  ;;  %v419_v62 = vld [vmem:[#allocation2 + $0x16a] sm:$0xff] }
 0x122   : > { %975 = vmatmul.f32.gmra.mxu1 %v385_v5  ;;  %v695_v5 = vld [vmem:[#allocation3 + $0x288] sm:$0xff]  ;;  %v694_v3 = vld [vmem:[#allocation3 + $0x280] sm:$0xff]  ;;  %1454 = vmatpush.msrb.mxu2 %v711_v6 }
 0x123   : > { %1088 = vmatmul.f32.gmra.mxu2 %v417_v4  ;;  %1341 = vmatpush.msrb.mxu1 %v695_v5  ;;  %v518_v46 = vld [vmem:[#allocation2 + $0x30] sm:$0xff] }
 0x124   : > { %v1148_v18 = vpop.f32.mrf.mxu3  ;;  %1566 = vmatpush.msrb.mxu3 %v728_v7  ;;  %1455 = vmatpush.msrb.mxu2 %v710_v12  ;;  %v755_v7 = vld [vmem:[#allocation3 + $0x468] sm:$0xff] }
 0x125   : > { %v6858_v24 = vadd.f32 %v1148_v18, %v1036_v11  ;;  %1342 = vmatpush.msrb.mxu1 %v694_v3  ;;  %1668 = vmatpush.msra.mxu0 %v755_v7 }
 0x126   : > { %v1041_v25 = vpop.f32.mrf.mxu2  ;;  %v818_v30 = vpop.f32.mrf.mxu0  ;;  %1567 = vmatpush.msrb.mxu3 %v727_v13  ;;  %v520_v13 = vld [vmem:[#allocation2 + $0x48] sm:$0xff] }
 0x127   : > { %v6861_v32 = vpop.f32.mrf.mxu1  ;;  %v1042_v4 = vadd.f32 %v1041_v25, %v929_v58  ;;  %v819_v9 = vadd.f32 %v6805_v44, %v818_v30  ;;  %v420_v25 = vld [vmem:[#allocation2 + $0x172] sm:$0xff] }
 0x129   : > { %1198 = vmatmul.f32.gmra.mxu3 %v448_v29  ;;  %865 = vmatmul.f32.gmra.mxu0 %v448_v29  ;;  %v932_v19 = vadd.f32 %v6861_v32, %v819_v9  ;;  %v726_v29 = vld [vmem:[#allocation3 + $0x380] sm:$0xff]  ;;  %v451_v32 = vld [vmem:[#allocation2 + $0x180] sm:$0xff] }
 0x12a   : > { %978 = vmatmul.f32.gmra.mxu1 %v386_v35  ;;  %1568 = vmatpush.msrb.mxu3 %v726_v29  ;;  %v550_v9 = vld [vmem:[#allocation2 + $0x31] sm:$0xff] }
 0x12b   : > { %1091 = vmatmul.f32.gmra.mxu2 %v418_v34 }
 0x12c   : > { %v1151_v48 = vpop.f32.mrf.mxu3 }
 0x12d   : > { %v6864_v51 = vadd.f32 %v1151_v48, %v1039_v39 }
 0x12e   : > { %v1044_v52 = vpop.f32.mrf.mxu2  ;;  %v821_v55 = vpop.f32.mrf.mxu0 }
 0x12f   : > { %v934_v61 = vpop.f32.mrf.mxu1  ;;  %v1045_v30 = vadd.f32 %v1044_v52, %v932_v19  ;;  %v822_v31 = vadd.f32 %v6805_v44, %v821_v55 }
 0x131   : > { %1201 = vmatmul.f32.gmra.mxu3 %v449_v54  ;;  %868 = vmatmul.f32.gmra.mxu0 %v449_v54  ;;  %v935_v43 = vadd.f32 %v934_v61, %v822_v31  ;;  %v452_v54 = vld [vmem:[#allocation2 + $0x188] sm:$0xff]  ;;  %v519_v61 = vld [vmem:[#allocation2 + $0x38] sm:$0xff] }
 0x132   : > { %981 = vmatmul.f32.gmra.mxu1 %v387_v63  ;;  %v486_v63 = vld [vmem:[#allocation2 + $0x22] sm:$0xff] }
 0x133   : > { %1094 = vmatmul.f32.gmra.mxu2 %v419_v62 }
 0x134   : > { %v1154_v11 = vpop.f32.mrf.mxu3 }
 0x135   : > { %v6868_v16 = vadd.f32 %v1154_v11, %v1042_v4 }
 0x136   : > { %v1047_v0 = vpop.f32.mrf.mxu2  ;;  %v824_v18 = vpop.f32.mrf.mxu0 }
 0x137   : > { %v937_v23 = vpop.f32.mrf.mxu1  ;;  %v1048_v48 = vadd.f32 %v1047_v0, %v935_v43  ;;  %v825_v49 = vadd.f32 %v6805_v44, %v824_v18  ;;  %v487_v0 = vld [vmem:[#allocation2 + $0x32] sm:$0xff] }
 0x139   : > { %1204 = vmatmul.f32.gmra.mxu3 %v450_v17  ;;  %871 = vmatmul.f32.gmra.mxu0 %v450_v17  ;;  %v938_v58 = vadd.f32 %v937_v23, %v825_v49 }
 0x13a   : > { %984 = vmatmul.f32.gmra.mxu1 %v388_v26  ;;  %v551_v26 = vld [vmem:[#allocation2 + $0x39] sm:$0xff] }
 0x13b   : > { %1097 = vmatmul.f32.gmra.mxu2 %v420_v25 }
 0x13c   : > { %v1157_v34 = vpop.f32.mrf.mxu3 }
 0x13d   : > { %v6872_v35 = vadd.f32 %v1157_v34, %v1045_v30  ;;  %v521_v34 = vld [vmem:[#allocation2 + $0x50] sm:$0xff] }
 0x13e   : > { %v1050_v37 = vpop.f32.mrf.mxu2  ;;  %v827_v39 = vpop.f32.mrf.mxu0 }
 0x13f   : > { %10165 = vst [vmem:[#allocation9_spill] sm:$0xff] %v6872_v35  ;;  %v940_v45 = vpop.f32.mrf.mxu1  ;;  %v1051_v1 = vadd.f32 %v1050_v37, %v938_v58  ;;  %v828_v2 = vadd.f32 %v6805_v44, %v827_v39  ;;  %v488_v37 = vld [vmem:[#allocation2 + $0x3a] sm:$0xff] }
 0x141   : > { %1207 = vmatmul.f32.gmra.mxu3 %v451_v32  ;;  %1230 = vmatmul.f32.vlgmr.msrb.gmra.mxu0 %v453_v40  ;;  %v941_v11 = vadd.f32 %v940_v45, %v828_v2  ;;  %v754_v45 = vld [vmem:[#allocation3 + $0x460] sm:$0xff] }
 0x142   : > { %1343 = vmatmul.f32.vlgmr.msrb.gmra.mxu1 %v485_v41  ;;  %1669 = vmatpush.msra.mxu0 %v754_v45  ;;  %v525_v45 = vld [vmem:[#allocation2 + $0x80] sm:$0xff] }
 0x143   : > { %1456 = vmatmul.f32.vlgmr.msrb.gmra.mxu2 %v518_v46  ;;  %v552_v46 = vld [vmem:[#allocation2 + $0x49] sm:$0xff] }
 0x144   : > { %v1160_v50 = vpop.f32.mrf.mxu3 }
 0x145   : > { %v6875_v52 = vadd.f32 %v1160_v50, %v1048_v48  ;;  %v522_v50 = vld [vmem:[#allocation2 + $0x60] sm:$0xff] }
 0x146   : > { %v1053_v53 = vpop.f32.mrf.mxu2  ;;  %v830_v55 = vpop.f32.mrf.mxu0 }
 0x147   : > { %10166 = vst [vmem:[#allocation10_spill] sm:$0xff] %v6875_v52  ;;  %v943_v62 = vpop.f32.mrf.mxu1  ;;  %v1054_v17 = vadd.f32 %v1053_v53, %v941_v11  ;;  %v831_v18 = vadd.f32 %v6805_v44, %v830_v55  ;;  %v489_v53 = vld [vmem:[#allocation2 + $0x4a] sm:$0xff]  ;;  %v2134_v52 = vld [vmem:[#allocation3 + $0x490] sm:$0xff] }
 0x149   : > { %1210 = vmatmul.f32.gmra.mxu3 %v452_v54  ;;  %1233 = vmatmul.f32.gmra.mxu0 %v454_v56  ;;  %v944_v30 = vadd.f32 %v943_v62, %v831_v18 }
 0x14a   : > { %1346 = vmatmul.f32.gmra.mxu1 %v486_v63 }
 0x14b   : > { %1459 = vmatmul.f32.gmra.mxu2 %v519_v61  ;;  %v553_v61 = vld [vmem:[#allocation2 + $0x51] sm:$0xff] }
 0x14c   : > { %v1163_v4 = vpop.f32.mrf.mxu3 }
 0x14d   : > { %v6878_v5 = vadd.f32 %v1163_v4, %v1051_v1  ;;  %v523_v4 = vld [vmem:[#allocation2 + $0x68] sm:$0xff] }
 0x14e   : > { %v1056_v6 = vpop.f32.mrf.mxu2  ;;  %v833_v3 = vpop.f32.mrf.mxu0 }
 0x14f   : > { %10167 = vst [vmem:[#allocation11_spill] sm:$0xff] %v6878_v5  ;;  %v946_v12 = vpop.f32.mrf.mxu1  ;;  %v1057_v38 = vadd.f32 %v1056_v6, %v944_v30  ;;  %v834_v32 = vadd.f32 %v6805_v44, %v833_v3  ;;  %v6889_v6 = vld [vmem:[#allocation2 + $0x52] sm:$0xff] }
 0x151   : > { %1569 = vmatmul.f32.vlgmr.msrb.gmra.mxu3 %v550_v9  ;;  %1236 = vmatmul.f32.gmra.mxu0 %v550_v9  ;;  %v947_v48 = vadd.f32 %v946_v12, %v834_v32 }
 0x152   : > { %1349 = vmatmul.f32.gmra.mxu1 %v487_v0  ;;  %v554_v0 = vld [vmem:[#allocation2 + $0x61] sm:$0xff] }
 0x153   : > { %1462 = vmatmul.f32.gmra.mxu2 %v520_v13  ;;  %v753_v13 = vld [vmem:[#allocation3 + $0x458] sm:$0xff] }
 0x154   : > { %v1166_v19 = vpop.f32.mrf.mxu3  ;;  %1670 = vmatpush.msra.mxu0 %v753_v13 }
 0x155   : > { %v6881_v23 = vadd.f32 %v1166_v19, %v1054_v17 }
 0x156   : > { %v1059_v25 = vpop.f32.mrf.mxu2  ;;  %v836_v29 = vpop.f32.mrf.mxu0 }
 0x157   : > { %10168 = vst [vmem:[#allocation12_spill] sm:$0xff] %v6881_v23  ;;  %v949_v31 = vpop.f32.mrf.mxu1  ;;  %v1060_v54 = vadd.f32 %v1059_v25, %v947_v48  ;;  %v837_v55 = vadd.f32 %v6805_v44, %v836_v29  ;;  %v524_v25 = vld [vmem:[#allocation2 + $0x78] sm:$0xff] }
 0x159   : > { %1572 = vmatmul.f32.gmra.mxu3 %v551_v26  ;;  %1239 = vmatmul.f32.gmra.mxu0 %v551_v26  ;;  %v950_v1 = vadd.f32 %v949_v31, %v837_v55  ;;  %v6895_v26 = vld [vmem:[#allocation2 + $0x62] sm:$0xff]  ;;  %v556_v55 = vld [vmem:[#allocation2 + $0x79] sm:$0xff] }
 0x15a   : > { %1352 = vmatmul.f32.gmra.mxu1 %v488_v37 }
 0x15b   : > { %1465 = vmatmul.f32.gmra.mxu2 %v521_v34 }
 0x15c   : > { %v1169_v39 = vpop.f32.mrf.mxu3 }
 0x15d   : > { %v6884_v40 = vadd.f32 %v1169_v39, %v1057_v38  ;;  %v555_v38 = vld [vmem:[#allocation2 + $0x69] sm:$0xff] }
 0x15e   : > { %v1062_v43 = vpop.f32.mrf.mxu2  ;;  %v839_v41 = vpop.f32.mrf.mxu0 }
 0x15f   : > { %10169 = vst [vmem:[#allocation13_spill] sm:$0xff] %v6884_v40  ;;  %v952_v49 = vpop.f32.mrf.mxu1  ;;  %v1063_v7 = vadd.f32 %v1062_v43, %v950_v1  ;;  %v840_v9 = vadd.f32 %v6805_v44, %v839_v41  ;;  %v6907_v1 = vld [vmem:[#allocation2 + $0x7a] sm:$0xff]  ;;  %v2160_v40 = vld [vmem:[#allocation3 + $0x560] sm:$0xff] }
 0x161   : > { %1575 = vmatmul.f32.gmra.mxu3 %v552_v46  ;;  %1242 = vmatmul.f32.gmra.mxu0 %v552_v46  ;;  %v953_v18 = vadd.f32 %v952_v49, %v840_v9  ;;  %v6901_v46 = vld [vmem:[#allocation2 + $0x6a] sm:$0xff] }
 0x162   : > { %1355 = vmatmul.f32.gmra.mxu1 %v489_v53 }
 0x163   : > { %1468 = vmatmul.f32.gmra.mxu2 %v522_v50 }
 0x164   : > { %v1172_v56 = vpop.f32.mrf.mxu3 }
 0x165   : > { %v6887_v58 = vadd.f32 %v1172_v56, %v1060_v54  ;;  %v752_v54 = vld [vmem:[#allocation3 + $0x450] sm:$0xff] }
 0x166   : > { %v1065_v62 = vpop.f32.mrf.mxu2  ;;  %v842_v63 = vpop.f32.mrf.mxu0  ;;  %1671 = vmatpush.msra.mxu0 %v752_v54 }
 0x167   : > { %10170 = vst [vmem:[#allocation14_spill] sm:$0xff] %v6887_v58  ;;  %v955_v2 = vpop.f32.mrf.mxu1  ;;  %v1066_v29 = vadd.f32 %v1065_v62, %v953_v18  ;;  %v843_v30 = vadd.f32 %v6805_v44, %v842_v63  ;;  %v526_v63 = vld [vmem:[#allocation2 + $0x90] sm:$0xff]  ;;  %v527_v18 = vld [vmem:[#allocation2 + $0x98] sm:$0xff] }
 0x169   : > { %1578 = vmatmul.f32.gmra.mxu3 %v553_v61  ;;  %1245 = vmatmul.f32.gmra.mxu0 %v553_v61  ;;  %v956_v39 = vadd.f32 %v955_v2, %v843_v30 }
 0x16a   : > { %1358 = vmatmul.f32.gmra.mxu1 %v6889_v6 }
 0x16b   : > { %1471 = vmatmul.f32.gmra.mxu2 %v523_v4 }
 0x16c   : > { %v1175_v3 = vpop.f32.mrf.mxu3 }
 0x16d   : > { %v6893_v11 = vadd.f32 %v1175_v3, %v1063_v7 }
 0x16e   : > { %v1068_v12 = vpop.f32.mrf.mxu2  ;;  %v845_v17 = vpop.f32.mrf.mxu0 }
 0x16f   : > { %10171 = vst [vmem:[#allocation15_spill] sm:$0xff] %v6893_v11  ;;  %v958_v19 = vpop.f32.mrf.mxu1  ;;  %v1069_v41 = vadd.f32 %v1068_v12, %v956_v39  ;;  %v846_v48 = vadd.f32 %v6805_v44, %v845_v17  ;;  %v557_v12 = vld [vmem:[#allocation2 + $0x81] sm:$0xff] }
 0x170   : > { %v581_v11 = vld [vmem:[#allocation2 + $0x1a1] sm:$0xff] }
 0x171   : > { %1581 = vmatmul.f32.gmra.mxu3 %v554_v0  ;;  %1248 = vmatmul.f32.gmra.mxu0 %v554_v0  ;;  %v959_v62 = vadd.f32 %v958_v19, %v846_v48  ;;  %v6913_v19 = vld [vmem:[#allocation2 + $0x82] sm:$0xff]  ;;  %v6919_v48 = vld [vmem:[#allocation2 + $0x92] sm:$0xff] }
 0x172   : > { %1361 = vmatmul.f32.gmra.mxu1 %v6895_v26 }
 0x173   : > { %1474 = vmatmul.f32.gmra.mxu2 %v524_v25 }
 0x174   : > { %v1178_v31 = vpop.f32.mrf.mxu3 }
 0x175   : > { %v6899_v34 = vadd.f32 %v1178_v31, %v1066_v29 }
 0x176   : > { %v1071_v37 = vpop.f32.mrf.mxu2  ;;  %v848_v32 = vpop.f32.mrf.mxu0 }
 0x177   : > { %10172 = vst [vmem:[#allocation16_spill] sm:$0xff] %v6899_v34  ;;  %v961_v43 = vpop.f32.mrf.mxu1  ;;  %v1072_v2 = vadd.f32 %v1071_v37, %v959_v62  ;;  %v849_v4 = vadd.f32 %v6805_v44, %v848_v32  ;;  %v558_v32 = vld [vmem:[#allocation2 + $0x91] sm:$0xff]  ;;  %v559_v62 = vld [vmem:[#allocation2 + $0x99] sm:$0xff] }
 0x178   : > { %v2137_v34 = vld [vmem:[#allocation3 + $0x4a8] sm:$0xff] }
 0x179   : > { %1584 = vmatmul.f32.gmra.mxu3 %v555_v38  ;;  %1251 = vmatmul.f32.gmra.mxu0 %v555_v38  ;;  %v962_v0 = vadd.f32 %v961_v43, %v849_v4  ;;  %v751_v38 = vld [vmem:[#allocation3 + $0x448] sm:$0xff]  ;;  %v529_v4 = vld [vmem:[#allocation2 + $0xb0] sm:$0xff] }
 0x17a   : > { %1364 = vmatmul.f32.gmra.mxu1 %v6901_v46  ;;  %1672 = vmatpush.msra.mxu0 %v751_v38 }
 0x17b   : > { %1477 = vmatmul.f32.gmra.mxu2 %v525_v45 }
 0x17c   : > { %v1181_v49 = vpop.f32.mrf.mxu3 }
 0x17d   : > { %v6905_v50 = vadd.f32 %v1181_v49, %v1069_v41  ;;  %v528_v41 = vld [vmem:[#allocation2 + $0xa8] sm:$0xff] }
 0x17e   : > { %v1074_v53 = vpop.f32.mrf.mxu2  ;;  %v851_v56 = vpop.f32.mrf.mxu0 }
 0x17f   : > { %10173 = vst [vmem:[#allocation17_spill] sm:$0xff] %v6905_v50  ;;  %v964_v61 = vpop.f32.mrf.mxu1  ;;  %v1075_v25 = vadd.f32 %v1074_v53, %v962_v0  ;;  %v852_v29 = vadd.f32 %v6805_v44, %v851_v56 }
 0x181   : > { %1587 = vmatmul.f32.gmra.mxu3 %v556_v55  ;;  %1254 = vmatmul.f32.gmra.mxu0 %v556_v55  ;;  %v965_v43 = vadd.f32 %v964_v61, %v852_v29  ;;  %v560_v29 = vld [vmem:[#allocation2 + $0xa9] sm:$0xff] }
 0x182   : > { %1367 = vmatmul.f32.gmra.mxu1 %v6907_v1 }
 0x183   : > { %1480 = vmatmul.f32.gmra.mxu2 %v526_v63 }
 0x184   : > { %v1184_v7 = vpop.f32.mrf.mxu3 }
 0x185   : > { %v6911_v9 = vadd.f32 %v1184_v7, %v1072_v2  ;;  %v6925_v7 = vld [vmem:[#allocation2 + $0x9a] sm:$0xff] }
 0x186   : > { %v1077_v3 = vpop.f32.mrf.mxu2  ;;  %v854_v13 = vpop.f32.mrf.mxu0 }
 0x187   : > { %10174 = vst [vmem:[#allocation18_spill] sm:$0xff] %v6911_v9  ;;  %v967_v17 = vpop.f32.mrf.mxu1  ;;  %v1078_v49 = vadd.f32 %v1077_v3, %v965_v43  ;;  %v855_v53 = vadd.f32 %v6805_v44, %v854_v13  ;;  %v6931_v43 = vld [vmem:[#allocation2 + $0xaa] sm:$0xff]  ;;  %v582_v9 = vld [vmem:[#allocation2 + $0x32] sm:$0xff] }
 0x189   : > { %1590 = vmatmul.f32.gmra.mxu3 %v557_v12  ;;  %1257 = vmatmul.f32.gmra.mxu0 %v557_v12  ;;  %v968_v2 = vadd.f32 %v967_v17, %v855_v53 }
 0x18a   : > { %1370 = vmatmul.f32.gmra.mxu1 %v6913_v19 }
 0x18b   : > { %1483 = vmatmul.f32.gmra.mxu2 %v527_v18 }
 0x18c   : > { %v1187_v30 = vpop.f32.mrf.mxu3 }
 0x18d   : > { %v6917_v31 = vadd.f32 %v1187_v30, %v1075_v25  ;;  %v750_v25 = vld [vmem:[#allocation3 + $0x440] sm:$0xff] }
 0x18e   : > { %v1080_v37 = vpop.f32.mrf.mxu2  ;;  %v857_v39 = vpop.f32.mrf.mxu0  ;;  %1673 = vmatpush.msra.mxu0 %v750_v25 }
 0x18f   : > { %10175 = vst [vmem:[#allocation19_spill] sm:$0xff] %v6917_v31  ;;  %v970_v45 = vpop.f32.mrf.mxu1  ;;  %v1081_v12 = vadd.f32 %v1080_v37, %v968_v2  ;;  %v858_v3 = vadd.f32 %v6805_v44, %v857_v39  ;;  %v6934_v44 = vld [vmem:[#allocation5] ss:$0 sm:$0xff] }
 0x191   : > { %1593 = vmatmul.f32.gmra.mxu3 %v558_v32  ;;  %1260 = vmatmul.f32.gmra.mxu0 %v558_v32  ;;  %v971_v17 = vadd.f32 %v970_v45, %v858_v3  ;;  %v530_v32 = vld [vmem:[#allocation2 + $0xc0] sm:$0xff]  ;;  %v2147_v3 = vld [vmem:[#allocation3 + $0x4f8] sm:$0xff] }
 0x192   : > { %1373 = vmatmul.f32.gmra.mxu1 %v6919_v48 }
 0x193   : > { %1486 = vmatmul.f32.gmra.mxu2 %v528_v41  ;;  %2281 = vmatpush.msra.mxu1 %v2147_v3 }
 0x194   : > { %v1190_v54 = vpop.f32.mrf.mxu3 }
 0x195   : > { %v6923_v55 = vadd.f32 %v1190_v54, %v1078_v49  ;;  %v561_v54 = vld [vmem:[#allocation2 + $0xb1] sm:$0xff] }
 0x196   : > { %v1083_v56 = vpop.f32.mrf.mxu2  ;;  %v860_v63 = vpop.f32.mrf.mxu0 }
 0x197   : > { %10176 = vst [vmem:[#allocation20_spill] sm:$0xff] %v6923_v55  ;;  %v973_v61 = vpop.f32.mrf.mxu1  ;;  %v1084_v37 = vadd.f32 %v1083_v56, %v971_v17  ;;  %v861_v39 = vadd.f32 %v6934_v44, %v860_v63  ;;  %v749_v17 = vld [vmem:[#allocation3 + $0x438] sm:$0xff] }
 0x198   : > { %1674 = vmatpush.msra.mxu0 %v749_v17 }
 0x199   : > { %1596 = vmatmul.f32.gmra.mxu3 %v559_v62  ;;  %1263 = vmatmul.f32.gmra.mxu0 %v559_v62  ;;  %v974_v62 = vadd.f32 %v973_v61, %v861_v39  ;;  %v562_v61 = vld [vmem:[#allocation2 + $0xc1] sm:$0xff] }
 0x19a   : > { %1376 = vmatmul.f32.gmra.mxu1 %v6925_v7 }
 0x19b   : > { %1489 = vmatmul.f32.gmra.mxu2 %v529_v4  ;;  %v531_v4 = vld [vmem:[#allocation2 + $0xc8] sm:$0xff] }
 0x19c   : > { %v1193_v13 = vpop.f32.mrf.mxu3 }
 0x19d   : > { %v6929_v0 = vadd.f32 %v1193_v13, %v1081_v12  ;;  %v6939_v12 = vld [vmem:[#allocation2 + $0xb2] sm:$0xff] }
 0x19e   : > { %v1086_v18 = vpop.f32.mrf.mxu2  ;;  %v863_v30 = vpop.f32.mrf.mxu0 }
 0x19f   : > { %10177 = vst [vmem:[#allocation21_spill] sm:$0xff] %v6929_v0  ;;  %v976_v38 = vpop.f32.mrf.mxu1  ;;  %v1087_v56 = vadd.f32 %v1086_v18, %v974_v62  ;;  %v864_v63 = vadd.f32 %v6934_v44, %v863_v30  ;;  %v6945_v18 = vld [vmem:[#allocation2 + $0xc2] sm:$0xff]  ;;  %v780_v62 = vadd.f32 %v6934_v44, %v6784_v14 }
 0x1a1   : > { %1599 = vmatmul.f32.gmra.mxu3 %v560_v29  ;;  %1266 = vmatmul.f32.gmra.mxu0 %v560_v29 }
 0x1a2   : > { %1379 = vmatmul.f32.gmra.mxu1 %v6931_v43 }
 0x1a3   : > { %1492 = vmatmul.f32.gmra.mxu2 %v530_v32 }
 0x1a4   : > { %v1196_v41 = vpop.f32.mrf.mxu3 }
 0x1a5   : > { %v6937_v49 = vadd.f32 %v1196_v41, %v1084_v37  ;;  %v977_v37 = vadd.f32 %v976_v38, %v864_v63  ;;  %v532_v41 = vld [vmem:[#allocation2 + $0xd8] sm:$0xff]  ;;  %v563_v38 = vld [vmem:[#allocation2 + $0xc9] sm:$0xff] }
 0x1a6   : > { %v1089_v53 = vpop.f32.mrf.mxu2  ;;  %v866_v45 = vpop.f32.mrf.mxu0 }
 0x1a7   : > { %10178 = vst [vmem:[#allocation22_spill] sm:$0xff] %v6937_v49  ;;  %v979_v2 = vpop.f32.mrf.mxu1  ;;  %v867_v30 = vadd.f32 %v6934_v44, %v866_v45  ;;  %v6953_v49 = vld [vmem:[#allocation2 + $0xca] sm:$0xff]  ;;  %v2146_v45 = vld [vmem:[#allocation3 + $0x4f0] sm:$0xff] }
 0x1a8   : > { %2282 = vmatpush.msra.mxu1 %v2146_v45 }
 0x1a9   : > { %1602 = vmatmul.f32.gmra.mxu3 %v561_v54  ;;  %1269 = vmatmul.f32.gmra.mxu0 %v561_v54  ;;  %v1090_v54 = vadd.f32 %v1089_v53, %v977_v37  ;;  %v893_v53 = vadd.f32 %v6786_v15, %v780_v62  ;;  %v748_v15 = vld [vmem:[#allocation3 + $0x430] sm:$0xff] }
 0x1aa   : > { %1382 = vmatmul.f32.gmra.mxu1 %v6939_v12  ;;  %v564_v62 = vld [vmem:[#allocation2 + $0xd9] sm:$0xff]  ;;  %1675 = vmatpush.msra.mxu0 %v748_v15  ;;  %v565_v15 = vld [vmem:[#allocation2 + $0xe1] sm:$0xff] }
 0x1ab   : > { %1495 = vmatmul.f32.gmra.mxu2 %v531_v4  ;;  %v1006_v37 = vadd.f32 %v6789_v20, %v893_v53 }
 0x1ac   : > { %v1199_v13 = vpop.f32.mrf.mxu3 }
 0x1ad   : > { %v6943_v25 = vadd.f32 %v1199_v13, %v1087_v56  ;;  %v980_v13 = vadd.f32 %v979_v2, %v867_v30  ;;  %v783_v2 = vadd.f32 %v6934_v44, %v6792_v21 }
 0x1ae   : > { %v1092_v29 = vpop.f32.mrf.mxu2  ;;  %v869_v32 = vpop.f32.mrf.mxu0 }
 0x1af   : > { %10179 = vst [vmem:[#allocation23_spill] sm:$0xff] %v6943_v25  ;;  %v982_v39 = vpop.f32.mrf.mxu1  ;;  %v533_v25 = vld [vmem:[#allocation2 + $0xe0] sm:$0xff]  ;;  %v870_v14 = vadd.f32 %v6934_v44, %v869_v32  ;;  %v896_v32 = vadd.f32 %v6794_v22, %v783_v2 }
 0x1b1   : > { %1605 = vmatmul.f32.gmra.mxu3 %v562_v61  ;;  %1272 = vmatmul.f32.gmra.mxu0 %v562_v61  ;;  %v1093_v61 = vadd.f32 %v1092_v29, %v980_v13  ;;  %v1119_v29 = vadd.f32 %v6802_v36, %v1006_v37  ;;  %v983_v20 = vadd.f32 %v982_v39, %v870_v14  ;;  %v6964_v13 = vld [vmem:[#allocation2 + $0xda] sm:$0xff] }
 0x1b2   : > { %1385 = vmatmul.f32.gmra.mxu1 %v6945_v18 }
 0x1b3   : > { %1498 = vmatmul.f32.gmra.mxu2 %v532_v41 }
 0x1b4   : > { %v1202_v4 = vpop.f32.mrf.mxu3 }
 0x1b5   : > { %v6951_v56 = vadd.f32 %v1202_v4, %v1090_v54 }
 0x1b6   : > { %v1095_v3 = vpop.f32.mrf.mxu2  ;;  %v872_v63 = vpop.f32.mrf.mxu0 }
 0x1b7   : > { %10180 = vst [vmem:[#allocation24_spill] sm:$0xff] %v6951_v56  ;;  %v985_v17 = vpop.f32.mrf.mxu1  ;;  %v1096_v21 = vadd.f32 %v1095_v3, %v983_v20  ;;  %v873_v36 = vadd.f32 %v6934_v44, %v872_v63  ;;  %v2145_v44 = vld [vmem:[#allocation3 + $0x4e8] sm:$0xff]  ;;  %v2139_v56 = vld [vmem:[#allocation3 + $0x4b8] sm:$0xff] }
 0x1b8   : > { %2283 = vmatpush.msra.mxu1 %v2145_v44 }
 0x1b9   : > { %1608 = vmatmul.f32.gmra.mxu3 %v563_v38  ;;  %1275 = vmatmul.f32.gmra.mxu0 %v563_v38  ;;  %v534_v38 = vld [vmem:[#allocation2 + $0xf0] sm:$0xff] }
 0x1ba   : > { %1388 = vmatmul.f32.gmra.mxu1 %v6953_v49 }
 0x1bb   : > { %1501 = vmatmul.f32.gmra.mxu2 %v533_v25 }
 0x1bc   : > { %v1205_v41 = vpop.f32.mrf.mxu3 }
 0x1bd   : > { %v6961_v54 = vadd.f32 %v1205_v41, %v1093_v61  ;;  %v1009_v61 = vadd.f32 %v6798_v28, %v896_v32  ;;  %v747_v32 = vld [vmem:[#allocation3 + $0x428] sm:$0xff] }
 0x1be   : > { %v1098_v30 = vpop.f32.mrf.mxu2  ;;  %v1231_v4 = vpop.f32.mrf.mxu0  ;;  %1676 = vmatpush.msra.mxu0 %v747_v32  ;;  %v746_v32 = vld [vmem:[#allocation3 + $0x420] sm:$0xff] }
 0x1bf   : > { %10181 = vst [vmem:[#allocation25_spill] sm:$0xff] %v6961_v54  ;;  %v1344_v25 = vpop.f32.mrf.mxu1  ;;  %v1232_v53 = vadd.f32 %v1231_v4, %v1119_v29  ;;  %v1122_v41 = vadd.f32 %v6809_v47, %v1009_v61  ;;  %v986_v29 = vadd.f32 %v985_v17, %v873_v36  ;;  %v6973_v4 = vld [vmem:[#allocation2 + $0xe2] sm:$0xff]  ;;  %v566_v17 = vld [vmem:[#allocation2 + $0xf1] sm:$0xff] }
 0x1c0   : > { %v536_v36 = vld [vmem:[#allocation2 + $0x108] sm:$0xff]  ;;  %1677 = vmatpush.msra.mxu0 %v746_v32 }
 0x1c1   : > { %1611 = vmatmul.f32.gmra.mxu3 %v564_v62  ;;  %1278 = vmatmul.f32.gmra.mxu0 %v564_v62  ;;  %v1345_v37 = vadd.f32 %v1344_v25, %v1232_v53  ;;  %v535_v62 = vld [vmem:[#allocation2 + $0xf8] sm:$0xff]  ;;  %v1099_v20 = vadd.f32 %v1098_v30, %v986_v29  ;;  %v547_v54 = vld [vmem:[#allocation2 + $0x188] sm:$0xff] }
 0x1c2   : > { %1391 = vmatmul.f32.gmra.mxu1 %v6964_v13 }
 0x1c3   : > { %1504 = vmatmul.f32.gmra.mxu2 %v534_v38 }
 0x1c4   : > { %v1208_v45 = vpop.f32.mrf.mxu3 }
 0x1c5   : > { %v6970_v39 = vadd.f32 %v1208_v45, %v1096_v21  ;;  %v6978_v45 = vld [vmem:[#allocation2 + $0xf2] sm:$0xff] }
 0x1c6   : > { %v1457_v14 = vpop.f32.mrf.mxu2  ;;  %v1234_v2 = vpop.f32.mrf.mxu0 }
 0x1c7   : > { %10182 = vst [vmem:[#allocation26_spill] sm:$0xff] %v6970_v39  ;;  %v1458_v22 = vadd.f32 %v1457_v14, %v1345_v37  ;;  %v1347_v3 = vpop.f32.mrf.mxu1  ;;  %v1235_v28 = vadd.f32 %v1234_v2, %v1122_v41  ;;  %v567_v2 = vld [vmem:[#allocation2 + $0xf9] sm:$0xff]  ;;  %v2163_v39 = vld [vmem:[#allocation3 + $0x578] sm:$0xff] }
 0x1c8   : > { %2394 = vmatpush.msra.mxu2 %v2163_v39  ;;  %v7052_v39 = vld [vmem:[#allocation2] sm:$0xff] }
 0x1c9   : > { %1614 = vmatmul.f32.gmra.mxu3 %v565_v15  ;;  %1281 = vmatmul.f32.gmra.mxu0 %v565_v15  ;;  %v1348_v25 = vadd.f32 %v1347_v3, %v1235_v28  ;;  %v537_v28 = vld [vmem:[#allocation2 + $0x110] sm:$0xff] }
 0x1ca   : > { %1394 = vmatmul.f32.gmra.mxu1 %v6973_v4 }
 0x1cb   : > { %1507 = vmatmul.f32.gmra.mxu2 %v535_v62 }
 0x1cc   : > { %v1211_v63 = vpop.f32.mrf.mxu3 }
 0x1cd   : > { %v6976_v47 = vadd.f32 %v1211_v63, %v1099_v20  ;;  %v6984_v20 = vld [vmem:[#allocation2 + $0xfa] sm:$0xff] }
 0x1ce   : > { %v1460_v38 = vpop.f32.mrf.mxu2  ;;  %v1237_v21 = vpop.f32.mrf.mxu0 }
 0x1cf   : > { %10183 = vst [vmem:[#allocation27_spill] sm:$0xff] %v6976_v47  ;;  %v1461_v53 = vadd.f32 %v1460_v38, %v1348_v25  ;;  %v1350_v61 = vpop.f32.mrf.mxu1  ;;  %v1238_v30 = vadd.f32 %v1237_v21, %v6814_v60  ;;  %v2144_v60 = vld [vmem:[#allocation3 + $0x4e0] sm:$0xff] }
 0x1d0   : > { %2284 = vmatpush.msra.mxu1 %v2144_v60  ;;  %v539_v60 = vld [vmem:[#allocation2 + $0x128] sm:$0xff] }
 0x1d1   : > { %1617 = vmatmul.f32.gmra.mxu3 %v566_v17  ;;  %1284 = vmatmul.f32.gmra.mxu0 %v566_v17  ;;  %v1351_v14 = vadd.f32 %v1350_v61, %v1238_v30  ;;  %v568_v17 = vld [vmem:[#allocation2 + $0x109] sm:$0xff]  ;;  %v538_v30 = vld [vmem:[#allocation2 + $0x120] sm:$0xff] }
 0x1d2   : > { %1397 = vmatmul.f32.gmra.mxu1 %v6978_v45 }
 0x1d3   : > { %1510 = vmatmul.f32.gmra.mxu2 %v536_v36 }
 0x1d4   : > { %v1570_v37 = vpop.f32.mrf.mxu3 }
 0x1d5   : > { %v6982_v41 = vadd.f32 %v1570_v37, %v1458_v22 }
 0x1d6   : > { %v1463_v15 = vpop.f32.mrf.mxu2  ;;  %v1240_v3 = vpop.f32.mrf.mxu0 }
 0x1d7   : > { %v1464_v29 = vadd.f32 %v1463_v15, %v1351_v14  ;;  %v1353_v62 = vpop.f32.mrf.mxu1  ;;  %v1241_v44 = vadd.f32 %v1240_v3, %v6819_v10  ;;  %v6990_v10 = vld [vmem:[#allocation2 + $0x10a] sm:$0xff] }
 0x1d8   : > { %v569_v3 = vld [vmem:[#allocation2 + $0x111] sm:$0xff] }
 0x1d9   : > { %1620 = vmatmul.f32.gmra.mxu3 %v567_v2  ;;  %1287 = vmatmul.f32.gmra.mxu0 %v567_v2  ;;  %v1354_v22 = vadd.f32 %v1353_v62, %v1241_v44 }
 0x1da   : > { %1400 = vmatmul.f32.gmra.mxu1 %v6984_v20 }
 0x1db   : > { %1513 = vmatmul.f32.gmra.mxu2 %v537_v28 }
 0x1dc   : > { %v1573_v63 = vpop.f32.mrf.mxu3 }
 0x1dd   : > { %v6988_v25 = vadd.f32 %v1573_v63, %v1461_v53  ;;  %v6996_v63 = vld [vmem:[#allocation2 + $0x112] sm:$0xff] }
 0x1de   : > { %v1466_v38 = vpop.f32.mrf.mxu2  ;;  %v1243_v61 = vpop.f32.mrf.mxu0 }
 0x1df   : > { %v1467_v21 = vadd.f32 %v1466_v38, %v1354_v22  ;;  %v1356_v36 = vpop.f32.mrf.mxu1  ;;  %v1244_v37 = vadd.f32 %v1243_v61, %v6824_v27  ;;  %v2143_v27 = vld [vmem:[#allocation3 + $0x4d8] sm:$0xff] }
 0x1e0   : > { %2285 = vmatpush.msra.mxu1 %v2143_v27  ;;  %v745_v61 = vld [vmem:[#allocation3 + $0x418] sm:$0xff] }
 0x1e1   : > { %1623 = vmatmul.f32.gmra.mxu3 %v568_v17  ;;  %1290 = vmatmul.f32.gmra.mxu0 %v568_v17  ;;  %v1357_v53 = vadd.f32 %v1356_v36, %v1244_v37  ;;  %v570_v36 = vld [vmem:[#allocation2 + $0x121] sm:$0xff] }
 0x1e2   : > { %1403 = vmatmul.f32.gmra.mxu1 %v6990_v10  ;;  %1678 = vmatpush.msra.mxu0 %v745_v61  ;;  %v2142_v61 = vld [vmem:[#allocation3 + $0x4d0] sm:$0xff] }
 0x1e3   : > { %1516 = vmatmul.f32.gmra.mxu2 %v538_v30  ;;  %2286 = vmatpush.msra.mxu1 %v2142_v61  ;;  %v2141_v61 = vld [vmem:[#allocation3 + $0x4c8] sm:$0xff] }
 0x1e4   : > { %v1576_v14 = vpop.f32.mrf.mxu3 }
 0x1e5   : > { %v6994_v15 = vadd.f32 %v1576_v14, %v1464_v29  ;;  %2287 = vmatpush.msra.mxu1 %v2141_v61  ;;  %v7035_v61 = vld [vmem:[#allocation2 + $0x15a] sm:$0xff] }
 0x1e6   : > { %v1469_v2 = vpop.f32.mrf.mxu2  ;;  %v1246_v28 = vpop.f32.mrf.mxu0 }
 0x1e7   : > { %v1470_v62 = vadd.f32 %v1469_v2, %v1357_v53  ;;  %v1359_v44 = vpop.f32.mrf.mxu1  ;;  %v1247_v22 = vadd.f32 %v1246_v28, %v6829_v42  ;;  %v540_v53 = vld [vmem:[#allocation2 + $0x138] sm:$0xff]  ;;  %v7002_v42 = vld [vmem:[#allocation2 + $0x122] sm:$0xff] }
 0x1e9   : > { %1626 = vmatmul.f32.gmra.mxu3 %v569_v3  ;;  %1293 = vmatmul.f32.gmra.mxu0 %v569_v3  ;;  %v1360_v29 = vadd.f32 %v1359_v44, %v1247_v22 }
 0x1ea   : > { %1406 = vmatmul.f32.gmra.mxu1 %v6996_v63 }
 0x1eb   : > { %1519 = vmatmul.f32.gmra.mxu2 %v539_v60  ;;  %v571_v60 = vld [vmem:[#allocation2 + $0x129] sm:$0xff] }
 0x1ec   : > { %v1579_v38 = vpop.f32.mrf.mxu3 }
 0x1ed   : > { %v7000_v32 = vadd.f32 %v1579_v38, %v1467_v21  ;;  %v541_v38 = vld [vmem:[#allocation2 + $0x140] sm:$0xff] }
 0x1ee   : > { %v1472_v17 = vpop.f32.mrf.mxu2  ;;  %v1249_v37 = vpop.f32.mrf.mxu0 }
 0x1ef   : > { %v1473_v30 = vadd.f32 %v1472_v17, %v1360_v29  ;;  %v1362_v14 = vpop.f32.mrf.mxu1  ;;  %v1250_v2 = vadd.f32 %v1249_v37, %v6834_v57  ;;  %v7008_v29 = vld [vmem:[#allocation2 + $0x12a] sm:$0xff] }
 0x1f1   : > { %1629 = vmatmul.f32.gmra.mxu3 %v570_v36  ;;  %1296 = vmatmul.f32.gmra.mxu0 %v570_v36  ;;  %v1363_v21 = vadd.f32 %v1362_v14, %v1250_v2  ;;  %v572_v2 = vld [vmem:[#allocation2 + $0x139] sm:$0xff] }
 0x1f2   : > { %1409 = vmatmul.f32.gmra.mxu1 %v7002_v42 }
 0x1f3   : > { %1522 = vmatmul.f32.gmra.mxu2 %v540_v53  ;;  %v744_v53 = vld [vmem:[#allocation3 + $0x410] sm:$0xff] }
 0x1f4   : > { %v1582_v3 = vpop.f32.mrf.mxu3  ;;  %1679 = vmatpush.msra.mxu0 %v744_v53  ;;  %v574_v53 = vld [vmem:[#allocation2 + $0x151] sm:$0xff] }
 0x1f5   : > { %v7006_v28 = vadd.f32 %v1582_v3, %v1470_v62 }
 0x1f6   : > { %v1475_v44 = vpop.f32.mrf.mxu2  ;;  %v1252_v27 = vpop.f32.mrf.mxu0 }
 0x1f7   : > { %v1476_v22 = vadd.f32 %v1475_v44, %v1363_v21  ;;  %v1253_v17 = vadd.f32 %v1252_v27, %v6839_v8  ;;  %v1365_v57 = vpop.f32.mrf.mxu1  ;;  %v542_v8 = vld [vmem:[#allocation2 + $0x150] sm:$0xff]  ;;  %v7016_v44 = vld [vmem:[#allocation2 + $0x13a] sm:$0xff] }
 0x1f9   : > { %1632 = vmatmul.f32.gmra.mxu3 %v571_v60  ;;  %1299 = vmatmul.f32.gmra.mxu0 %v571_v60  ;;  %v1366_v62 = vadd.f32 %v1365_v57, %v1253_v17  ;;  %v543_v17 = vld [vmem:[#allocation2 + $0x158] sm:$0xff]  ;;  %v7023_v57 = vld [vmem:[#allocation2 + $0x142] sm:$0xff] }
 0x1fa   : > { %1412 = vmatmul.f32.gmra.mxu1 %v7008_v29 }
 0x1fb   : > { %1525 = vmatmul.f32.gmra.mxu2 %v541_v38 }
 0x1fc   : > { %v1585_v36 = vpop.f32.mrf.mxu3 }
 0x1fd   : > { %v7012_v37 = vadd.f32 %v1585_v36, %v1473_v30  ;;  %v573_v30 = vld [vmem:[#allocation2 + $0x141] sm:$0xff] }
 0x1fe   : > { %v1478_v14 = vpop.f32.mrf.mxu2  ;;  %v7014_v21 = vpop.f32.mrf.mxu0 }
 0x1ff   : > { %v1479_v3 = vadd.f32 %v1478_v14, %v1366_v62  ;;  %v743_v14 = vld [vmem:[#allocation3 + $0x408] sm:$0xff] }
 0x200   : > { %1680 = vmatpush.msra.mxu0 %v743_v14  ;;  %v576_v14 = vld [vmem:[#allocation2 + $0x169] sm:$0xff] }
 0x201   : > { %1635 = vmatmul.f32.gmra.mxu3 %v572_v2  ;;  %1302 = vmatmul.f32.gmra.mxu0 %v572_v2  ;;  %v544_v2 = vld [vmem:[#allocation2 + $0x168] sm:$0xff] }
 0x202   : > { %1415 = vmatmul.f32.gmra.mxu1 %v7016_v44 }
 0x203   : > { %1528 = vmatmul.f32.gmra.mxu2 %v542_v8  ;;  %v7030_v8 = vld [vmem:[#allocation2 + $0x152] sm:$0xff] }
 0x204   : > { %v1588_v60 = vpop.f32.mrf.mxu3 }
 0x205   : > { %v7019_v27 = vadd.f32 %v1588_v60, %v1476_v22  ;;  %v575_v60 = vld [vmem:[#allocation2 + $0x159] sm:$0xff] }
 0x206   : > { %v7021_v38 = vpop.f32.mrf.mxu0  ;;  %v7064_v50 = vpop.f32.mrf.mxu2 }
 0x209   : > { %1638 = vmatmul.f32.gmra.mxu3 %v573_v30  ;;  %1305 = vmatmul.f32.gmra.mxu0 %v573_v30 }
 0x20a   : > { %1418 = vmatmul.f32.gmra.mxu1 %v7023_v57 }
 0x20b   : > { %1531 = vmatmul.f32.gmra.mxu2 %v543_v17  ;;  %v545_v17 = vld [vmem:[#allocation2 + $0x170] sm:$0xff] }
 0x20c   : > { %v1591_v36 = vpop.f32.mrf.mxu3 }
 0x20d   : > { %v7026_v62 = vadd.f32 %v1591_v36, %v1479_v3  ;;  %v2140_v3 = vld [vmem:[#allocation3 + $0x4c0] sm:$0xff] }
 0x20e   : > { %v7028_v22 = vpop.f32.mrf.mxu0  ;;  %2288 = vmatpush.msra.mxu1 %v2140_v3  ;;  %v742_v36 = vld [vmem:[#allocation3 + $0x400] sm:$0xff]  ;;  %v7070_v23 = vpop.f32.mrf.mxu2 }
 0x20f   : > { %1681 = vmatpush.msra.mxu0 %v742_v36  ;;  %v7045_v3 = vld [vmem:[#allocation2 + $0x172] sm:$0xff]  ;;  %v2162_v36 = vld [vmem:[#allocation3 + $0x570] sm:$0xff] }
 0x210   : > { %2289 = vmatpush.msra.mxu1 %v2139_v56  ;;  %2395 = vmatpush.msra.mxu2 %v2162_v36  ;;  %v7058_v56 = vld [vmem:[#allocation2 + $0x18a] sm:$0xff]  ;;  %v2161_v36 = vld [vmem:[#allocation3 + $0x568] sm:$0xff] }
 0x211   : > { %1641 = vmatmul.f32.gmra.mxu3 %v574_v53  ;;  %1308 = vmatmul.f32.gmra.mxu0 %v574_v53  ;;  %v546_v53 = vld [vmem:[#allocation2 + $0x180] sm:$0xff]  ;;  %10188 = vst [vmem:[#allocation32_spill] sm:$0xff] %v7058_v56 }
 0x212   : > { %1421 = vmatmul.f32.gmra.mxu1 %v7030_v8  ;;  %2396 = vmatpush.msra.mxu2 %v2161_v36  ;;  %v584_v36 = vld [vmem:[#allocation2 + $0x4a] sm:$0xff] }
 0x213   : > { %1534 = vmatmul.f32.gmra.mxu2 %v544_v2  ;;  %v7040_v2 = vld [vmem:[#allocation2 + $0x16a] sm:$0xff] }
 0x214   : > { %2397 = vmatpush.msra.mxu2 %v2160_v40 }
 0x216   : > { %v7033_v30 = vpop.f32.mrf.mxu0 }
 0x219   : > { %1644 = vmatmul.f32.gmra.mxu3 %v575_v60  ;;  %1311 = vmatmul.f32.gmra.mxu0 %v575_v60  ;;  %v577_v60 = vld [vmem:[#allocation2 + $0x171] sm:$0xff] }
 0x21a   : > { %1424 = vmatmul.f32.gmra.mxu1 %v7035_v61 }
 0x21b   : > { %1537 = vmatmul.f32.gmra.mxu2 %v545_v17 }
 0x21e   : > { %v7038_v47 = vpop.f32.mrf.mxu0 }
 0x221   : > { %1647 = vmatmul.f32.gmra.mxu3 %v576_v14  ;;  %1314 = vmatmul.f32.gmra.mxu0 %v576_v14  ;;  %v578_v14 = vld [vmem:[#allocation2 + $0x181] sm:$0xff] }
 0x222   : > { %1427 = vmatmul.f32.gmra.mxu1 %v7040_v2 }
 0x223   : > { %1540 = vmatmul.f32.gmra.mxu2 %v546_v53  ;;  %v7050_v53 = vld [vmem:[#allocation2 + $0x182] sm:$0xff] }
 0x224   : > { %10186 = vst [vmem:[#allocation30_spill] sm:$0xff] %v7050_v53 }
 0x226   : > { %v7043_v17 = vpop.f32.mrf.mxu0 }
 0x227   : > { %10184 = vst [vmem:[#allocation28_spill] sm:$0xff] %v7043_v17  ;;  %v2157_v17 = vld [vmem:[#allocation3 + $0x548] sm:$0xff] }
 0x229   : > { %1650 = vmatmul.f32.gmra.mxu3 %v577_v60  ;;  %1317 = vmatmul.f32.gmra.mxu0 %v577_v60  ;;  %v2138_v60 = vld [vmem:[#allocation3 + $0x4b0] sm:$0xff] }
 0x22a   : > { %1430 = vmatmul.f32.gmra.mxu1 %v7045_v3 }
 0x22b   : > { %1543 = vmatmul.f32.gmra.mxu2 %v547_v54  ;;  %v579_v54 = vld [vmem:[#allocation2 + $0x189] sm:$0xff]  ;;  %2290 = vmatpush.msra.mxu1 %v2138_v60  ;;  %v7066_v60 = vpop.f32.mrf.mxu1 }
 0x22d   : > { %2291 = vmatpush.msra.mxu1 %v2137_v34  ;;  %v2159_v34 = vld [vmem:[#allocation3 + $0x558] sm:$0xff] }
 0x22e   : > { %v7048_v0 = vpop.f32.mrf.mxu0  ;;  %2398 = vmatpush.msra.mxu2 %v2159_v34 }
 0x22f   : > { %10185 = vst [vmem:[#allocation29_spill] sm:$0xff] %v7048_v0 }
 0x231   : > { %1653 = vmatmul.f32.gmra.mxu3 %v578_v14  ;;  %1320 = vmatmul.f32.gmra.mxu0 %v578_v14  ;;  %v580_v14 = vld [vmem:[#allocation2 + $0x199] sm:$0xff] }
 0x232   : > { %1433 = vmatmul.f32.gmra.mxu1 %v7050_v53 }
 0x233   : > { %1546 = vmatmul.f32.gmra.mxu2 %v7052_v39 }
 0x236   : > { %v7056_v55 = vpop.f32.mrf.mxu0 }
 0x237   : > { %10187 = vst [vmem:[#allocation31_spill] sm:$0xff] %v7056_v55  ;;  %v2136_v55 = vld [vmem:[#allocation3 + $0x4a0] sm:$0xff] }
 0x238   : > { %2292 = vmatpush.msra.mxu1 %v2136_v55 }
 0x239   : > { %1656 = vmatmul.f32.gmra.mxu3 %v579_v54  ;;  %1323 = vmatmul.f32.gmra.mxu0 %v579_v54  ;;  %v583_v54 = vld [vmem:[#allocation2 + $0x3a] sm:$0xff] }
 0x23a   : > { %1436 = vmatmul.f32.gmra.mxu1 %v7058_v56 }
 0x23b   : > { %1549 = vmatmul.f32.gmra.mxu2 %v7052_v39 }
 0x23e   : > { %v7062_v31 = vpop.f32.mrf.mxu0 }
 0x23f   : > { %10189 = vst [vmem:[#allocation33_spill] sm:$0xff] %v7062_v31 }
 0x241   : > { %1659 = vmatmul.f32.gmra.mxu3 %v580_v14  ;;  %1682 = vmatmul.f32.vlgmr.msra.gmra.mxu0 %v582_v9  ;;  %v7074_v9 = vpop.f32.mrf.mxu1  ;;  %v7076_v14 = vpop.f32.mrf.mxu3 }
 0x246   : > { %v7068_v58 = vpop.f32.mrf.mxu0 }
 0x247   : > { %10190 = vst [vmem:[#allocation34_spill] sm:$0xff] %v7068_v58  ;;  %v7080_v58 = vpop.f32.mrf.mxu2 }
 0x249   : > { %1662 = vmatmul.f32.gmra.mxu3 %v581_v11  ;;  %1685 = vmatmul.f32.gmra.mxu0 %v583_v54  ;;  %v7083_v11 = vpop.f32.mrf.mxu1  ;;  %v7087_v40 = vpop.f32.mrf.mxu3 }
 0x24e   : > { %v7072_v31 = vpop.f32.mrf.mxu0 }
 0x24f   : > { %10191 = vst [vmem:[#allocation35_spill] sm:$0xff] %v7072_v31 }
 0x251   : > { %1688 = vmatmul.f32.gmra.mxu0 %v584_v36  ;;  %v7090_v36 = vpop.f32.mrf.mxu2  ;;  %v7092_v31 = vpop.f32.mrf.mxu1 }
 0x252   : > { %v7096_v56 = vpop.f32.mrf.mxu3 }
 0x256   : > { %v7078_v5 = vpop.f32.mrf.mxu0 }
 0x257   : > { %10192 = vst [vmem:[#allocation36_spill] sm:$0xff] %v7078_v5  ;;  %v2135_v5 = vld [vmem:[#allocation3 + $0x498] sm:$0xff] }
 0x258   : > { %2293 = vmatpush.msra.mxu1 %v2135_v5 }
 0x259   : > { %1691 = vmatmul.f32.gmra.mxu0 %v6889_v6  ;;  %v7099_v6 = vpop.f32.mrf.mxu2  ;;  %v7101_v34 = vpop.f32.mrf.mxu1 }
 0x25a   : > { %2294 = vmatpush.msra.mxu1 %v2134_v52 }
 0x25e   : > { %v7085_v54 = vpop.f32.mrf.mxu0 }
 0x25f   : > { %10193 = vst [vmem:[#allocation37_spill] sm:$0xff] %v7085_v54  ;;  %v2158_v54 = vld [vmem:[#allocation3 + $0x550] sm:$0xff] }
 0x260   : > { %2399 = vmatpush.msra.mxu2 %v2158_v54 }
 0x261   : > { %1694 = vmatmul.f32.gmra.mxu0 %v6895_v26  ;;  %v7106_v26 = vpop.f32.mrf.mxu3  ;;  %v7108_v53 = vpop.f32.mrf.mxu2 }
 0x262   : > { %10196 = vst [vmem:[#allocation40_spill] sm:$0xff] %v7108_v53  ;;  %2400 = vmatpush.msra.mxu2 %v2157_v17  ;;  %v2133_v53 = vld [vmem:[#allocation3 + $0x488] sm:$0xff] }
 0x263   : > { %2295 = vmatpush.msra.mxu1 %v2133_v53  ;;  %v2177_v17 = vld [vmem:[#allocation3 + $0x5e8] sm:$0xff] }
 0x264   : > { %v2173_v53 = vld [vmem:[#allocation3 + $0x5c8] sm:$0xff] }
 0x266   : > { %v7094_v55 = vpop.f32.mrf.mxu0 }
 0x267   : > { %10194 = vst [vmem:[#allocation38_spill] sm:$0xff] %v7094_v55  ;;  %v7112_v55 = vpop.f32.mrf.mxu1 }
 0x268   : > { %10198 = vst [vmem:[#allocation42_spill] sm:$0xff] %v7112_v55 }
 0x269   : > { %1697 = vmatmul.f32.gmra.mxu0 %v6901_v46  ;;  %v7115_v46 = vpop.f32.mrf.mxu3  ;;  %v7119_v54 = vpop.f32.mrf.mxu2 }
 0x26a   : > { %10199 = vst [vmem:[#allocation43_spill] sm:$0xff] %v7115_v46  ;;  %v2156_v46 = vld [vmem:[#allocation3 + $0x540] sm:$0xff] }
 0x26b   : > { %10201 = vst [vmem:[#allocation45_spill] sm:$0xff] %v7119_v54  ;;  %2401 = vmatpush.msra.mxu2 %v2156_v46 }
 0x26e   : > { %v7103_v0 = vpop.f32.mrf.mxu0 }
 0x26f   : > { %10195 = vst [vmem:[#allocation39_spill] sm:$0xff] %v7103_v0  ;;  %v2179_v0 = vld [vmem:[#allocation3 + $0x5f8] sm:$0xff] }
 0x270   : > { %2507 = vmatpush.msra.mxu3 %v2179_v0 }
 0x271   : > { %1700 = vmatmul.f32.gmra.mxu0 %v6907_v1  ;;  %v7122_v1 = vpop.f32.mrf.mxu1 }
 0x272   : > { %10202 = vst [vmem:[#allocation46_spill] sm:$0xff] %v7122_v1  ;;  %v2175_v1 = vld [vmem:[#allocation3 + $0x5d8] sm:$0xff] }
 0x276   : > { %v7110_v5 = vpop.f32.mrf.mxu0 }
 0x277   : > { %10197 = vst [vmem:[#allocation41_spill] sm:$0xff] %v7110_v5  ;;  %v2178_v5 = vld [vmem:[#allocation3 + $0x5f0] sm:$0xff] }
 0x278   : > { %2508 = vmatpush.msra.mxu3 %v2178_v5  ;;  %v2154_v5 = vld [vmem:[#allocation3 + $0x530] sm:$0xff] }
 0x279   : > { %1703 = vmatmul.f32.gmra.mxu0 %v6913_v19  ;;  %v7126_v19 = vpop.f32.mrf.mxu3  ;;  %v7131_v54 = vpop.f32.mrf.mxu1 }
 0x27a   : > { %10205 = vst [vmem:[#allocation49_spill] sm:$0xff] %v7131_v54  ;;  %2509 = vmatpush.msra.mxu3 %v2177_v17  ;;  %v2172_v17 = vld [vmem:[#allocation3 + $0x5c0] sm:$0xff] }
 0x27e   : > { %v7117_v35 = vpop.f32.mrf.mxu0 }
 0x27f   : > { %10200 = vst [vmem:[#allocation44_spill] sm:$0xff] %v7117_v35  ;;  %v7129_v35 = vpop.f32.mrf.mxu2 }
 0x280   : > { %10204 = vst [vmem:[#allocation48_spill] sm:$0xff] %v7129_v35 }
 0x281   : > { %1706 = vmatmul.f32.gmra.mxu0 %v6919_v48  ;;  %v2176_v48 = vld [vmem:[#allocation3 + $0x5e0] sm:$0xff]  ;;  %v7135_v0 = vpop.f32.mrf.mxu3  ;;  %v7140_v54 = vpop.f32.mrf.mxu1 }
 0x282   : > { %2510 = vmatpush.msra.mxu3 %v2176_v48  ;;  %v2132_v48 = vld [vmem:[#allocation3 + $0x480] sm:$0xff]  ;;  %10208 = vst [vmem:[#allocation52_spill] sm:$0xff] %v7140_v54 }
 0x283   : > { %2296 = vmatpush.msra.mxu1 %v2132_v48  ;;  %v2167_v48 = vld [vmem:[#allocation3 + $0x598] sm:$0xff] }
 0x284   : > { %2511 = vmatpush.msra.mxu3 %v2175_v1  ;;  %v2153_v1 = vld [vmem:[#allocation3 + $0x528] sm:$0xff]  ;;  %2297 = vmatmul.f32.vlgmr.msra.gmra.mxu1 %v7052_v39 }
 0x286   : > { %v7124_v52 = vpop.f32.mrf.mxu0 }
 0x287   : > { %10203 = vst [vmem:[#allocation47_spill] sm:$0xff] %v7124_v52  ;;  %v2174_v52 = vld [vmem:[#allocation3 + $0x5d0] sm:$0xff]  ;;  %v7138_v35 = vpop.f32.mrf.mxu2 }
 0x288   : > { %2512 = vmatpush.msra.mxu3 %v2174_v52  ;;  %10207 = vst [vmem:[#allocation51_spill] sm:$0xff] %v7138_v35  ;;  %v2152_v52 = vld [vmem:[#allocation3 + $0x520] sm:$0xff]  ;;  %v2150_v35 = vld [vmem:[#allocation3 + $0x510] sm:$0xff] }
 0x289   : > { %1709 = vmatmul.f32.gmra.mxu0 %v6925_v7  ;;  %v2155_v7 = vld [vmem:[#allocation3 + $0x538] sm:$0xff] }
 0x28a   : > { %2402 = vmatpush.msra.mxu2 %v2155_v7  ;;  %2513 = vmatpush.msra.mxu3 %v2173_v53  ;;  %v2151_v7 = vld [vmem:[#allocation3 + $0x518] sm:$0xff]  ;;  %v7146_v53 = vpop.f32.mrf.mxu3 }
 0x28c   : > { %2403 = vmatpush.msra.mxu2 %v2154_v5  ;;  %2514 = vmatpush.msra.mxu3 %v2172_v17  ;;  %v2169_v5 = vld [vmem:[#allocation3 + $0x5a8] sm:$0xff]  ;;  %v2168_v17 = vld [vmem:[#allocation3 + $0x5a0] sm:$0xff] }
 0x28d   : > { %2300 = vmatmul.f32.gmra.mxu1 %v7052_v39  ;;  %v2211_v39 = vld [vmem:[#allocation3 + $0x6f8] sm:$0xff] }
 0x28e   : > { %v7133_v55 = vpop.f32.mrf.mxu0  ;;  %2404 = vmatpush.msra.mxu2 %v2153_v1  ;;  %v2149_v1 = vld [vmem:[#allocation3 + $0x508] sm:$0xff]  ;;  %2733 = vmatpush.msrb.mxu1 %v2211_v39 }
 0x28f   : > { %10206 = vst [vmem:[#allocation50_spill] sm:$0xff] %v7133_v55  ;;  %v2171_v55 = vld [vmem:[#allocation3 + $0x5b8] sm:$0xff] }
 0x290   : > { %2515 = vmatpush.msra.mxu3 %v2171_v55  ;;  %2405 = vmatpush.msra.mxu2 %v2152_v52  ;;  %v2148_v55 = vld [vmem:[#allocation3 + $0x500] sm:$0xff]  ;;  %v1875_v52 = vld [vmem:[#allocation2 + $0x1] sm:$0xff] }
 0x291   : > { %1712 = vmatmul.f32.gmra.mxu0 %v6931_v43  ;;  %v2170_v43 = vld [vmem:[#allocation3 + $0x5b0] sm:$0xff] }
 0x292   : > { %2516 = vmatpush.msra.mxu3 %v2170_v43  ;;  %2406 = vmatpush.msra.mxu2 %v2151_v7  ;;  %v7153_v43 = vpop.f32.mrf.mxu1  ;;  %v7156_v7 = vpop.f32.mrf.mxu3 }
 0x294   : > { %2517 = vmatpush.msra.mxu3 %v2169_v5  ;;  %2407 = vmatpush.msra.mxu2 %v2150_v35  ;;  %v2165_v35 = vld [vmem:[#allocation3 + $0x588] sm:$0xff]  ;;  %v2164_v5 = vld [vmem:[#allocation3 + $0x580] sm:$0xff] }
 0x296   : > { %v7142_v46 = vpop.f32.mrf.mxu0  ;;  %2518 = vmatpush.msra.mxu3 %v2168_v17  ;;  %2408 = vmatpush.msra.mxu2 %v2149_v1  ;;  %v1907_v17 = vld [vmem:[#allocation2 + $0x2] sm:$0xff] }
 0x297   : > { %10209 = vst [vmem:[#allocation53_spill] sm:$0xff] %v7142_v46  ;;  %v7148_v46 = vpop.f32.mrf.mxu2  ;;  %v2195_v1 = vld [vmem:[#allocation3 + $0x678] sm:$0xff] }
 0x298   : > { %10210 = vst [vmem:[#allocation54_spill] sm:$0xff] %v7148_v46  ;;  %2519 = vmatpush.msra.mxu3 %v2167_v48  ;;  %2409 = vmatpush.msra.mxu2 %v2148_v55  ;;  %v1908_v55 = vld [vmem:[#allocation2 + $0xa] sm:$0xff] }
 0x299   : > { %1715 = vmatmul.f32.gmra.mxu0 %v6939_v12  ;;  %v2166_v12 = vld [vmem:[#allocation3 + $0x590] sm:$0xff]  ;;  %2410 = vmatmul.f32.vlgmr.msra.gmra.mxu2 %v1875_v52 }
 0x29a   : > { %2520 = vmatpush.msra.mxu3 %v2166_v12  ;;  %2620 = vmatpush.msrb.mxu0 %v2195_v1  ;;  %v7163_v12 = vpop.f32.mrf.mxu1  ;;  %v2194_v52 = vld [vmem:[#allocation3 + $0x670] sm:$0xff] }
 0x29c   : > { %2521 = vmatpush.msra.mxu3 %v2165_v35  ;;  %v2210_v35 = vld [vmem:[#allocation3 + $0x6f0] sm:$0xff]  ;;  %2621 = vmatpush.msrb.mxu0 %v2194_v52 }
 0x29d   : > { %2734 = vmatpush.msrb.mxu1 %v2210_v35 }
 0x29e   : > { %v7150_v54 = vpop.f32.mrf.mxu0  ;;  %2522 = vmatpush.msra.mxu3 %v2164_v5  ;;  %v7167_v5 = vpop.f32.mrf.mxu3 }
 0x29f   : > { %10211 = vst [vmem:[#allocation55_spill] sm:$0xff] %v7150_v54  ;;  %2523 = vmatmul.f32.vlgmr.msra.gmra.mxu3 %v1907_v17  ;;  %v7160_v48 = vpop.f32.mrf.mxu2 }
 0x2a1   : > { %1718 = vmatmul.f32.gmra.mxu0 %v6945_v18  ;;  %v1876_v18 = vld [vmem:[#allocation2 + $0x9] sm:$0xff] }
 0x2a2   : > { %2413 = vmatmul.f32.gmra.mxu2 %v1876_v18  ;;  %v7172_v1 = vpop.f32.mrf.mxu1  ;;  %v2193_v18 = vld [vmem:[#allocation3 + $0x668] sm:$0xff] }
 0x2a3   : > { %10215 = vst [vmem:[#allocation59_spill] sm:$0xff] %v7172_v1  ;;  %2622 = vmatpush.msrb.mxu0 %v2193_v18 }
 0x2a6   : > { %v7158_v54 = vpop.f32.mrf.mxu0  ;;  %v7176_v39 = vpop.f32.mrf.mxu3 }
 0x2a7   : > { %10212 = vst [vmem:[#allocation56_spill] sm:$0xff] %v7158_v54  ;;  %2526 = vmatmul.f32.gmra.mxu3 %v1908_v55  ;;  %v7170_v17 = vpop.f32.mrf.mxu2  ;;  %v2209_v54 = vld [vmem:[#allocation3 + $0x6e8] sm:$0xff] }
 0x2a8   : > { %10214 = vst [vmem:[#allocation58_spill] sm:$0xff] %v7170_v17  ;;  %2735 = vmatpush.msrb.mxu1 %v2209_v54 }
 0x2a9   : > { %1721 = vmatmul.f32.gmra.mxu0 %v6953_v49 }
 0x2aa   : > { %v7181_v52 = vpop.f32.mrf.mxu1 }
 0x2ae   : > { %v7165_v46 = vpop.f32.mrf.mxu0  ;;  %v7185_v17 = vpop.f32.mrf.mxu3 }
 0x2af   : > { %10213 = vst [vmem:[#allocation57_spill] sm:$0xff] %v7165_v46  ;;  %v7179_v46 = vpop.f32.mrf.mxu2 }
 0x2b0   : > { %10217 = vst [vmem:[#allocation61_spill] sm:$0xff] %v7179_v46 }
 0x2b1   : > { %1724 = vmatmul.f32.gmra.mxu0 %v6964_v13 }
 0x2b2   : > { %v7190_v46 = vpop.f32.mrf.mxu1 }
 0x2b6   : > { %v7174_v49 = vpop.f32.mrf.mxu0 }
 0x2b7   : > { %10216 = vst [vmem:[#allocation60_spill] sm:$0xff] %v7174_v49  ;;  %v7187_v49 = vpop.f32.mrf.mxu2 }
 0x2b8   : > { %10218 = vst [vmem:[#allocation62_spill] sm:$0xff] %v7187_v49 }
 0x2b9   : > { %1727 = vmatmul.f32.gmra.mxu0 %v6973_v4 }
 0x2be   : > { %v1683_v55 = vpop.f32.mrf.mxu0 }
 0x2bf   : > { %v1684_v13 = vadd.f32 %v1683_v55, %v6982_v41  ;;  %v2208_v41 = vld [vmem:[#allocation3 + $0x6e0] sm:$0xff]  ;;  %v7196_v55 = vpop.f32.mrf.mxu3 }
 0x2c0   : > { %2736 = vmatpush.msrb.mxu1 %v2208_v41 }
 0x2c1   : > { %v1779_v35 = vmax.f32 %v1684_v13, 0.0  ;;  %1730 = vmatmul.f32.gmra.mxu0 %v6978_v45  ;;  %v2192_v45 = vld [vmem:[#allocation3 + $0x660] sm:$0xff] }
 0x2c2   : > { %2623 = vmatpush.msrb.mxu0 %v2192_v45 }
 0x2c3   : > { %1811 = vst [vmem:[#allocation2 + $0x19] sm:$0xff] %v1779_v35  ;;  %2416 = vmatmul.f32.gmra.mxu2 %v1779_v35  ;;  %v7199_v35 = vpop.f32.mrf.mxu2 }
 0x2c4   : > { %10219 = vst [vmem:[#allocation63_spill] sm:$0xff] %v7199_v35  ;;  %v2191_v35 = vld [vmem:[#allocation3 + $0x658] sm:$0xff] }
 0x2c5   : > { %2624 = vmatpush.msrb.mxu0 %v2191_v35 }
 0x2c6   : > { %v1686_v4 = vpop.f32.mrf.mxu0 }
 0x2c7   : > { %v1687_v1 = vadd.f32 %v1686_v4, %v6988_v25  ;;  %v7207_v45 = vpop.f32.mrf.mxu3 }
 0x2c9   : > { %v1780_v54 = vmax.f32 %v1687_v1, 0.0  ;;  %1733 = vmatmul.f32.gmra.mxu0 %v6984_v20  ;;  %v7202_v20 = vpop.f32.mrf.mxu1 }
 0x2ca   : > { %v7193_v18 = vld [vmem:[#allocation2 + $0x18] sm:$0xff]  ;;  %10220 = vst [vmem:[#allocation64_spill] sm:$0xff] %v7202_v20 }
 0x2cb   : > { %1812 = vst [vmem:[#allocation2 + $0x21] sm:$0xff] %v1780_v54  ;;  %2303 = vmatmul.f32.gmra.mxu1 %v7193_v18  ;;  %2419 = vmatmul.f32.gmra.mxu2 %v1780_v54 }
 0x2ce   : > { %v1689_v13 = vpop.f32.mrf.mxu0 }
 0x2cf   : > { %v1690_v25 = vadd.f32 %v1689_v13, %v6994_v15  ;;  %v7211_v13 = vpop.f32.mrf.mxu2 }
 0x2d0   : > { %10221 = vst [vmem:[#allocation65_spill] sm:$0xff] %v7211_v13 }
 0x2d1   : > { %v1781_v1 = vmax.f32 %v1690_v25, 0.0  ;;  %1736 = vmatmul.f32.gmra.mxu0 %v6990_v10 }
 0x2d2   : > { %v7204_v4 = vld [vmem:[#allocation2 + $0x20] sm:$0xff] }
 0x2d3   : > { %v1909_v49 = vld [vmem:[#allocation2 + $0x1a] sm:$0xff]  ;;  %1813 = vst [vmem:[#allocation2 + $0x31] sm:$0xff] %v1781_v1  ;;  %2306 = vmatmul.f32.gmra.mxu1 %v7204_v4  ;;  %2422 = vmatmul.f32.gmra.mxu2 %v1781_v1  ;;  %v1910_v25 = vld [vmem:[#allocation2 + $0x22] sm:$0xff]  ;;  %v7216_v1 = vpop.f32.mrf.mxu1 }
 0x2d4   : > { %2529 = vmatmul.f32.gmra.mxu3 %v1909_v49  ;;  %v2207_v49 = vld [vmem:[#allocation3 + $0x6d8] sm:$0xff] }
 0x2d5   : > { %2737 = vmatpush.msrb.mxu1 %v2207_v49 }
 0x2d6   : > { %v1692_v54 = vpop.f32.mrf.mxu0 }
 0x2d7   : > { %v1693_v15 = vadd.f32 %v1692_v54, %v7000_v32 }
 0x2d9   : > { %v1782_v41 = vmax.f32 %v1693_v15, 0.0  ;;  %1739 = vmatmul.f32.gmra.mxu0 %v6996_v63  ;;  %v7219_v63 = vpop.f32.mrf.mxu3 }
 0x2da   : > { %v7213_v10 = vld [vmem:[#allocation2 + $0x30] sm:$0xff] }
 0x2db   : > { %1814 = vst [vmem:[#allocation2 + $0x39] sm:$0xff] %v1782_v41  ;;  %2309 = vmatmul.f32.gmra.mxu1 %v7213_v10  ;;  %2425 = vmatmul.f32.gmra.mxu2 %v1782_v41  ;;  %v7227_v35 = vpop.f32.mrf.mxu1 }
 0x2dc   : > { %2532 = vmatmul.f32.gmra.mxu3 %v1910_v25  ;;  %v7225_v25 = vpop.f32.mrf.mxu2  ;;  %10223 = vst [vmem:[#allocation67_spill] sm:$0xff] %v7227_v35 }
 0x2dd   : > { %10222 = vst [vmem:[#allocation66_spill] sm:$0xff] %v7225_v25  ;;  %v2206_v25 = vld [vmem:[#allocation3 + $0x6d0] sm:$0xff] }
 0x2de   : > { %v1695_v32 = vpop.f32.mrf.mxu0  ;;  %2738 = vmatpush.msrb.mxu1 %v2206_v25 }
 0x2df   : > { %v1696_v54 = vadd.f32 %v1695_v32, %v7006_v28 }
 0x2e1   : > { %v1783_v15 = vmax.f32 %v1696_v54, 0.0  ;;  %1742 = vmatmul.f32.gmra.mxu0 %v7002_v42  ;;  %v7233_v54 = vpop.f32.mrf.mxu3 }
 0x2e2   : > { %v7222_v13 = vld [vmem:[#allocation2 + $0x38] sm:$0xff]  ;;  %10224 = vst [vmem:[#allocation68_spill] sm:$0xff] %v7233_v54 }
 0x2e3   : > { %v1911_v20 = vld [vmem:[#allocation2 + $0x32] sm:$0xff]  ;;  %1815 = vst [vmem:[#allocation2 + $0x49] sm:$0xff] %v1783_v15  ;;  %2312 = vmatmul.f32.gmra.mxu1 %v7222_v13  ;;  %2428 = vmatmul.f32.gmra.mxu2 %v1783_v15  ;;  %v1912_v42 = vld [vmem:[#allocation2 + $0x3a] sm:$0xff] }
 0x2e4   : > { %2535 = vmatmul.f32.gmra.mxu3 %v1911_v20  ;;  %v2190_v20 = vld [vmem:[#allocation3 + $0x650] sm:$0xff]  ;;  %v7236_v15 = vpop.f32.mrf.mxu2 }
 0x2e5   : > { %2625 = vmatpush.msrb.mxu0 %v2190_v20 }
 0x2e6   : > { %v1698_v41 = vpop.f32.mrf.mxu0 }
 0x2e7   : > { %v1699_v28 = vadd.f32 %v1698_v41, %v7012_v37 }
 0x2e9   : > { %v1784_v49 = vmax.f32 %v1699_v28, 0.0  ;;  %1745 = vmatmul.f32.gmra.mxu0 %v7008_v29  ;;  %v7239_v29 = vpop.f32.mrf.mxu1  ;;  %v7247_v25 = vpop.f32.mrf.mxu3 }
 0x2ea   : > { %v7231_v32 = vld [vmem:[#allocation2 + $0x48] sm:$0xff] }
 0x2eb   : > { %1816 = vst [vmem:[#allocation2 + $0x51] sm:$0xff] %v1784_v49  ;;  %2315 = vmatmul.f32.gmra.mxu1 %v7231_v32  ;;  %2431 = vmatmul.f32.gmra.mxu2 %v1784_v49 }
 0x2ec   : > { %2538 = vmatmul.f32.gmra.mxu3 %v1912_v42  ;;  %v1256_v42 = vadd.f32 %v7014_v21, %v6844_v33 }
 0x2ee   : > { %v1701_v37 = vpop.f32.mrf.mxu0 }
 0x2ef   : > { %v1702_v41 = vadd.f32 %v1701_v37, %v7019_v27  ;;  %v1369_v27 = vadd.f32 %v7066_v60, %v1256_v42  ;;  %v7251_v37 = vpop.f32.mrf.mxu2  ;;  %v2205_v60 = vld [vmem:[#allocation3 + $0x6c8] sm:$0xff] }
 0x2f0   : > { %2739 = vmatpush.msrb.mxu1 %v2205_v60 }
 0x2f1   : > { %v1785_v28 = vmax.f32 %v1702_v41, 0.0  ;;  %1748 = vmatmul.f32.gmra.mxu0 %v7016_v44  ;;  %v1482_v44 = vadd.f32 %v7064_v50, %v1369_v27  ;;  %v7255_v33 = vpop.f32.mrf.mxu1 }
 0x2f2   : > { %v7242_v35 = vld [vmem:[#allocation2 + $0x50] sm:$0xff] }
 0x2f3   : > { %v1913_v54 = vld [vmem:[#allocation2 + $0x4a] sm:$0xff]  ;;  %1817 = vst [vmem:[#allocation2 + $0x61] sm:$0xff] %v1785_v28  ;;  %2318 = vmatmul.f32.gmra.mxu1 %v7242_v35  ;;  %2434 = vmatmul.f32.gmra.mxu2 %v1785_v28  ;;  %v1259_v28 = vadd.f32 %v7021_v38, %v6851_v59  ;;  %v1595_v50 = vadd.f32 %v7076_v14, %v1482_v44 }
 0x2f4   : > { %2541 = vmatmul.f32.gmra.mxu3 %v1913_v54  ;;  %v1914_v54 = vld [vmem:[#allocation2 + $0x52] sm:$0xff]  ;;  %v1262_v14 = vadd.f32 %v7028_v22, %v6858_v24 }
 0x2f5   : > { %v1372_v42 = vadd.f32 %v7074_v9, %v1259_v28 }
 0x2f6   : > { %v1704_v49 = vpop.f32.mrf.mxu0 }
 0x2f7   : > { %v1705_v20 = vadd.f32 %v1704_v49, %v7026_v62  ;;  %v2189_v62 = vld [vmem:[#allocation3 + $0x648] sm:$0xff]  ;;  %v7264_v49 = vpop.f32.mrf.mxu3  ;;  %v7268_v38 = vpop.f32.mrf.mxu2 }
 0x2f8   : > { %2626 = vmatpush.msrb.mxu0 %v2189_v62 }
 0x2f9   : > { %v1786_v41 = vmax.f32 %v1705_v20, 0.0  ;;  %1751 = vmatmul.f32.gmra.mxu0 %v7023_v57  ;;  %v1485_v20 = vadd.f32 %v7070_v23, %v1372_v42  ;;  %v7275_v9 = vpop.f32.mrf.mxu1 }
 0x2fa   : > { %v7257_v21 = vld [vmem:[#allocation2 + $0x60] sm:$0xff] }
 0x2fb   : > { %1818 = vst [vmem:[#allocation2 + $0x69] sm:$0xff] %v1786_v41  ;;  %2321 = vmatmul.f32.gmra.mxu1 %v7257_v21  ;;  %2437 = vmatmul.f32.gmra.mxu2 %v1786_v41  ;;  %v1598_v23 = vadd.f32 %v7087_v40, %v1485_v20  ;;  %v2188_v40 = vld [vmem:[#allocation3 + $0x640] sm:$0xff] }
 0x2fc   : > { %2544 = vmatmul.f32.gmra.mxu3 %v1914_v54  ;;  %2627 = vmatpush.msrb.mxu0 %v2188_v40 }
 0x2fe   : > { %v1707_v57 = vpop.f32.mrf.mxu0 }
 0x2ff   : > { %v1708_v27 = vadd.f32 %v1707_v57, %v1595_v50  ;;  %v7280_v60 = vpop.f32.mrf.mxu3  ;;  %v1265_v57 = vadd.f32 %v7033_v30, %v6864_v51  ;;  %v7288_v42 = vpop.f32.mrf.mxu2 }
 0x301   : > { %v1787_v59 = vmax.f32 %v1708_v27, 0.0  ;;  %1754 = vmatmul.f32.gmra.mxu0 %v7030_v8  ;;  %v1375_v8 = vadd.f32 %v7083_v11, %v1262_v14  ;;  %v2204_v11 = vld [vmem:[#allocation3 + $0x6c0] sm:$0xff]  ;;  %v1378_v20 = vadd.f32 %v7092_v31, %v1265_v57  ;;  %v2186_v31 = vld [vmem:[#allocation3 + $0x630] sm:$0xff] }
 0x302   : > { %v7270_v54 = vld [vmem:[#allocation2 + $0x68] sm:$0xff]  ;;  %2740 = vmatpush.msrb.mxu1 %v2204_v11  ;;  %v10225_v11 = vld [vmem:[#allocation9_spill] sm:$0xff] }
 0x303   : > { %v1915_v41 = vld [vmem:[#allocation2 + $0x62] sm:$0xff]  ;;  %1819 = vst [vmem:[#allocation2 + $0x79] sm:$0xff] %v1787_v59  ;;  %2324 = vmatmul.f32.gmra.mxu1 %v7270_v54  ;;  %2440 = vmatmul.f32.gmra.mxu2 %v1787_v59  ;;  %v1488_v62 = vadd.f32 %v7080_v58, %v1375_v8  ;;  %v1916_v22 = vld [vmem:[#allocation2 + $0x6a] sm:$0xff]  ;;  %v1491_v51 = vadd.f32 %v7090_v36, %v1378_v20 }
 0x304   : > { %2547 = vmatmul.f32.gmra.mxu3 %v1915_v41  ;;  %v2227_v36 = vld [vmem:[#allocation3 + $0x778] sm:$0xff] }
 0x305   : > { %v1601_v58 = vadd.f32 %v7096_v56, %v1488_v62  ;;  %v2187_v56 = vld [vmem:[#allocation3 + $0x638] sm:$0xff]  ;;  %v1604_v8 = vadd.f32 %v7106_v26, %v1491_v51  ;;  %2846 = vmatpush.msrb.mxu2 %v2227_v36 }
 0x306   : > { %v1710_v44 = vpop.f32.mrf.mxu0  ;;  %2628 = vmatpush.msrb.mxu0 %v2187_v56  ;;  %v10226_v26 = vld [vmem:[#allocation28_spill] sm:$0xff] }
 0x307   : > { %v1711_v28 = vadd.f32 %v1710_v44, %v1598_v23  ;;  %v1268_v23 = vadd.f32 %v7038_v47, %v6868_v16  ;;  %v7300_v44 = vpop.f32.mrf.mxu3  ;;  %v2203_v20 = vld [vmem:[#allocation3 + $0x6b8] sm:$0xff] }
 0x308   : > { %2629 = vmatpush.msrb.mxu0 %v2186_v31  ;;  %2741 = vmatpush.msrb.mxu1 %v2203_v20  ;;  %v2182_v31 = vld [vmem:[#allocation3 + $0x610] sm:$0xff] }
 0x309   : > { %v1788_v50 = vmax.f32 %v1711_v28, 0.0  ;;  %1757 = vmatmul.f32.gmra.mxu0 %v7035_v61  ;;  %v7291_v61 = vpop.f32.mrf.mxu1  ;;  %v1381_v16 = vadd.f32 %v7101_v34, %v1268_v23  ;;  %v2184_v34 = vld [vmem:[#allocation3 + $0x620] sm:$0xff]  ;;  %v2226_v20 = vld [vmem:[#allocation3 + $0x770] sm:$0xff] }
 0x30a   : > { %v7283_v24 = vld [vmem:[#allocation2 + $0x78] sm:$0xff]  ;;  %2847 = vmatpush.msrb.mxu2 %v2226_v20 }
 0x30b   : > { %1820 = vst [vmem:[#allocation2 + $0x81] sm:$0xff] %v1788_v50  ;;  %2327 = vmatmul.f32.gmra.mxu1 %v7283_v24  ;;  %2443 = vmatmul.f32.gmra.mxu2 %v1788_v50  ;;  %v1494_v50 = vadd.f32 %v7099_v6, %v1381_v16 }
 0x30c   : > { %2550 = vmatmul.f32.gmra.mxu3 %v1916_v22 }
 0x30e   : > { %v1713_v27 = vpop.f32.mrf.mxu0 }
 0x30f   : > { %v1714_v59 = vadd.f32 %v1713_v27, %v1601_v58  ;;  %v1271_v58 = vadd.f32 %v10226_v26, %v10225_v11  ;;  %v2185_v27 = vld [vmem:[#allocation3 + $0x628] sm:$0xff]  ;;  %v7317_v51 = vpop.f32.mrf.mxu3 }
 0x310   : > { %2630 = vmatpush.msrb.mxu0 %v2185_v27  ;;  %v10231_v11 = vld [vmem:[#allocation10_spill] sm:$0xff]  ;;  %v10232_v26 = vld [vmem:[#allocation29_spill] sm:$0xff] }
 0x311   : > { %v1789_v30 = vmax.f32 %v1714_v59, 0.0  ;;  %1760 = vmatmul.f32.gmra.mxu0 %v7040_v2  ;;  %v7304_v2 = vpop.f32.mrf.mxu2  ;;  %v7307_v62 = vpop.f32.mrf.mxu1  ;;  %v10227_v59 = vld [vmem:[#allocation43_spill] sm:$0xff]  ;;  %v1274_v27 = vadd.f32 %v10232_v26, %v10231_v11 }
 0x312   : > { %v7296_v41 = vld [vmem:[#allocation2 + $0x80] sm:$0xff]  ;;  %v1607_v6 = vadd.f32 %v10227_v59, %v1494_v50  ;;  %2631 = vmatpush.msrb.mxu0 %v2184_v34  ;;  %v2180_v34 = vld [vmem:[#allocation3 + $0x600] sm:$0xff] }
 0x313   : > { %v1917_v14 = vld [vmem:[#allocation2 + $0x7a] sm:$0xff]  ;;  %1821 = vst [vmem:[#allocation2 + $0x91] sm:$0xff] %v1789_v30  ;;  %2330 = vmatmul.f32.gmra.mxu1 %v7296_v41  ;;  %2446 = vmatmul.f32.gmra.mxu2 %v1789_v30  ;;  %v1918_v40 = vld [vmem:[#allocation2 + $0x82] sm:$0xff] }
 0x314   : > { %2553 = vmatmul.f32.gmra.mxu3 %v1917_v14  ;;  %v10228_v14 = vld [vmem:[#allocation42_spill] sm:$0xff]  ;;  %v10237_v26 = vld [vmem:[#allocation11_spill] sm:$0xff] }
 0x315   : > { %v1384_v23 = vadd.f32 %v10228_v14, %v1271_v58  ;;  %v2181_v58 = vld [vmem:[#allocation3 + $0x608] sm:$0xff] }
 0x316   : > { %v1716_v28 = vpop.f32.mrf.mxu0 }
 0x317   : > { %v1717_v47 = vadd.f32 %v1716_v28, %v1604_v8  ;;  %v10229_v8 = vld [vmem:[#allocation40_spill] sm:$0xff]  ;;  %v7333_v14 = vpop.f32.mrf.mxu3 }
 0x318   : > { %v1497_v28 = vadd.f32 %v10229_v8, %v1384_v23 }
 0x319   : > { %v1790_v22 = vmax.f32 %v1717_v47, 0.0  ;;  %1763 = vmatmul.f32.gmra.mxu0 %v7045_v3  ;;  %v2183_v3 = vld [vmem:[#allocation3 + $0x618] sm:$0xff]  ;;  %v7320_v36 = vpop.f32.mrf.mxu2  ;;  %v10230_v47 = vld [vmem:[#allocation30_spill] sm:$0xff] }
 0x31a   : > { %v7311_v57 = vld [vmem:[#allocation2 + $0x90] sm:$0xff]  ;;  %2632 = vmatpush.msrb.mxu0 %v2183_v3  ;;  %v1610_v59 = vadd.f32 %v7126_v19, %v1497_v28  ;;  %v10233_v3 = vld [vmem:[#allocation46_spill] sm:$0xff]  ;;  %v10238_v19 = vld [vmem:[#allocation31_spill] sm:$0xff] }
 0x31b   : > { %1822 = vst [vmem:[#allocation2 + $0x99] sm:$0xff] %v1790_v22  ;;  %2333 = vmatmul.f32.gmra.mxu1 %v7311_v57  ;;  %2449 = vmatmul.f32.gmra.mxu2 %v1790_v22  ;;  %v7324_v22 = vpop.f32.mrf.mxu1  ;;  %v1277_v28 = vadd.f32 %v10238_v19, %v10237_v26 }
 0x31c   : > { %2556 = vmatmul.f32.gmra.mxu3 %v1918_v40  ;;  %2633 = vmatpush.msrb.mxu0 %v2182_v31 }
 0x31e   : > { %v1719_v30 = vpop.f32.mrf.mxu0  ;;  %2634 = vmatpush.msrb.mxu0 %v2181_v58 }
 0x31f   : > { %v1720_v56 = vadd.f32 %v1719_v30, %v1607_v6  ;;  %v1387_v30 = vadd.f32 %v10233_v3, %v1274_v27  ;;  %v2202_v27 = vld [vmem:[#allocation3 + $0x6b0] sm:$0xff] }
 0x320   : > { %2635 = vmatpush.msrb.mxu0 %v2180_v34  ;;  %2742 = vmatpush.msrb.mxu1 %v2202_v27  ;;  %v10246_v27 = vld [vmem:[#allocation33_spill] sm:$0xff] }
 0x321   : > { %v1791_v16 = vmax.f32 %v1720_v56, 0.0  ;;  %1766 = vmatmul.f32.gmra.mxu0 %v10230_v47  ;;  %v10234_v56 = vld [vmem:[#allocation45_spill] sm:$0xff]  ;;  %v10235_v47 = vld [vmem:[#allocation32_spill] sm:$0xff] }
 0x322   : > { %v7326_v50 = vld [vmem:[#allocation2 + $0x98] sm:$0xff]  ;;  %v1500_v31 = vadd.f32 %v10234_v56, %v1387_v30 }
 0x323   : > { %v1919_v40 = vld [vmem:[#allocation2 + $0x92] sm:$0xff]  ;;  %1823 = vst [vmem:[#allocation2 + $0xa9] sm:$0xff] %v1791_v16  ;;  %2336 = vmatmul.f32.gmra.mxu1 %v7326_v50  ;;  %2452 = vmatmul.f32.gmra.mxu2 %v1791_v16  ;;  %v1920_v16 = vld [vmem:[#allocation2 + $0x9a] sm:$0xff]  ;;  %v7344_v58 = vpop.f32.mrf.mxu1 }
 0x324   : > { %2559 = vmatmul.f32.gmra.mxu3 %v1919_v40  ;;  %v7337_v40 = vpop.f32.mrf.mxu2  ;;  %10239 = vst [vmem:[#allocation28_spill] sm:$0xff] %v7344_v58  ;;  %v1613_v34 = vadd.f32 %v7135_v0, %v1500_v31  ;;  %v2225_v0 = vld [vmem:[#allocation3 + $0x768] sm:$0xff] }
 0x325   : > { %10236 = vst [vmem:[#allocation9_spill] sm:$0xff] %v7337_v40  ;;  %2848 = vmatpush.msrb.mxu2 %v2225_v0 }
 0x326   : > { %v1722_v6 = vpop.f32.mrf.mxu0 }
 0x327   : > { %v1723_v23 = vadd.f32 %v1722_v6, %v1610_v59  ;;  %v612_v59 = vld [vmem:[#allocation2 + $0x19a] sm:$0xff] }
 0x328   : > { %v10240_v6 = vld [vmem:[#allocation49_spill] sm:$0xff] }
 0x329   : > { %v1792_v8 = vmax.f32 %v1723_v23, 0.0  ;;  %1769 = vmatmul.f32.gmra.mxu0 %v10235_v47  ;;  %v1390_v3 = vadd.f32 %v10240_v6, %v1277_v28  ;;  %v10241_v23 = vld [vmem:[#allocation48_spill] sm:$0xff]  ;;  %v7349_v47 = vpop.f32.mrf.mxu3 }
 0x32a   : > { %v7339_v11 = vld [vmem:[#allocation2 + $0xa8] sm:$0xff]  ;;  %10242 = vst [vmem:[#allocation43_spill] sm:$0xff] %v7349_v47  ;;  %v10251_v47 = vld [vmem:[#allocation34_spill] sm:$0xff] }
 0x32b   : > { %1824 = vst [vmem:[#allocation2 + $0xb1] sm:$0xff] %v1792_v8  ;;  %2339 = vmatmul.f32.gmra.mxu1 %v7339_v11  ;;  %2455 = vmatmul.f32.gmra.mxu2 %v1792_v8  ;;  %v1503_v56 = vadd.f32 %v10241_v23, %v1390_v3  ;;  %v10245_v8 = vld [vmem:[#allocation12_spill] sm:$0xff]  ;;  %v7358_v31 = vpop.f32.mrf.mxu1 }
 0x32c   : > { %2562 = vmatmul.f32.gmra.mxu3 %v1920_v16  ;;  %v7353_v40 = vpop.f32.mrf.mxu2  ;;  %v1280_v58 = vadd.f32 %v10246_v27, %v10245_v8  ;;  %10247 = vst [vmem:[#allocation30_spill] sm:$0xff] %v7358_v31 }
 0x32d   : > { %10244 = vst [vmem:[#allocation40_spill] sm:$0xff] %v7353_v40  ;;  %v1616_v28 = vadd.f32 %v7146_v53, %v1503_v56  ;;  %v2201_v53 = vld [vmem:[#allocation3 + $0x6a8] sm:$0xff] }
 0x32e   : > { %v1725_v20 = vpop.f32.mrf.mxu0  ;;  %2743 = vmatpush.msrb.mxu1 %v2201_v53 }
 0x32f   : > { %v1726_v30 = vadd.f32 %v1725_v20, %v1613_v34  ;;  %v613_v20 = vld [vmem:[#allocation2 + $0x1a2] sm:$0xff] }
 0x331   : > { %v1793_v26 = vmax.f32 %v1726_v30, 0.0  ;;  %1772 = vmatmul.f32.gmra.mxu0 %v612_v59  ;;  %v10248_v59 = vld [vmem:[#allocation52_spill] sm:$0xff]  ;;  %v10249_v30 = vld [vmem:[#allocation51_spill] sm:$0xff]  ;;  %v7367_v31 = vpop.f32.mrf.mxu3 }
 0x332   : > { %v7351_v19 = vld [vmem:[#allocation2 + $0xb0] sm:$0xff]  ;;  %v1393_v6 = vadd.f32 %v10248_v59, %v1280_v58 }
 0x333   : > { %10243 = vst [vmem:[#allocation42_spill] sm:$0xff] %v7351_v19  ;;  %v1921_v16 = vld [vmem:[#allocation2 + $0xaa] sm:$0xff]  ;;  %2342 = vmatmul.f32.gmra.mxu1 %v7351_v19  ;;  %2458 = vmatmul.f32.gmra.mxu2 %v1793_v26  ;;  %v1922_v27 = vld [vmem:[#allocation2 + $0xb2] sm:$0xff]  ;;  %v7373_v0 = vpop.f32.mrf.mxu1 }
 0x334   : > { %1825 = vst [vmem:[#allocation2 + $0xc1] sm:$0xff] %v1793_v26  ;;  %2565 = vmatmul.f32.gmra.mxu3 %v1921_v16  ;;  %v1506_v23 = vadd.f32 %v10249_v30, %v1393_v6  ;;  %v10250_v16 = vld [vmem:[#allocation13_spill] sm:$0xff]  ;;  %v7370_v56 = vpop.f32.mrf.mxu2  ;;  %v10254_v30 = vld [vmem:[#allocation14_spill] sm:$0xff] }
 0x335   : > { %v1283_v19 = vadd.f32 %v10251_v47, %v10250_v16  ;;  %10252 = vst [vmem:[#allocation10_spill] sm:$0xff] %v7370_v56  ;;  %v10253_v47 = vld [vmem:[#allocation54_spill] sm:$0xff] }
 0x336   : > { %v1728_v34 = vpop.f32.mrf.mxu0  ;;  %v1619_v58 = vadd.f32 %v7156_v7, %v1506_v23  ;;  %v2224_v7 = vld [vmem:[#allocation3 + $0x760] sm:$0xff] }
 0x337   : > { %v1729_v3 = vadd.f32 %v1728_v34, %v1616_v28  ;;  %v1396_v28 = vadd.f32 %v7153_v43, %v1283_v19  ;;  %2849 = vmatpush.msrb.mxu2 %v2224_v7  ;;  %v7398_v7 = vld [vmem:[#allocation5 + $0x1] ss:$0 sm:$0xff] }
 0x339   : > { %v1794_v40 = vmax.f32 %v1729_v3, 0.0  ;;  %1775 = vmatmul.f32.gmra.mxu0 %v613_v20  ;;  %v1509_v20 = vadd.f32 %v10253_v47, %v1396_v28  ;;  %v7382_v16 = vpop.f32.mrf.mxu3 }
 0x33b   : > { %v7363_v8 = vld [vmem:[#allocation2 + $0xc0] sm:$0xff]  ;;  %1826 = vst [vmem:[#allocation2 + $0xc9] sm:$0xff] %v1794_v40  ;;  %2461 = vmatmul.f32.gmra.mxu2 %v1794_v40  ;;  %v1622_v43 = vadd.f32 %v7167_v5, %v1509_v20  ;;  %v2200_v5 = vld [vmem:[#allocation3 + $0x6a0] sm:$0xff] }
 0x33c   : > { %2345 = vmatmul.f32.gmra.mxu1 %v7363_v8  ;;  %2568 = vmatmul.f32.gmra.mxu3 %v1922_v27  ;;  %v10255_v27 = vld [vmem:[#allocation35_spill] sm:$0xff] }
 0x33d   : > { %v1286_v40 = vadd.f32 %v10255_v27, %v10254_v30  ;;  %v10257_v30 = vld [vmem:[#allocation36_spill] sm:$0xff]  ;;  %2744 = vmatpush.msrb.mxu1 %v2200_v5 }
 0x33e   : > { %v1731_v26 = vpop.f32.mrf.mxu0 }
 0x33f   : > { %v1732_v34 = vadd.f32 %v1731_v26, %v1619_v58 }
 0x341   : > { %v1795_v59 = vmax.f32 %v1732_v34, 0.0  ;;  %2636 = vmatmul.f32.vlgmr.msrb.gmra.mxu0 %v7193_v18  ;;  %v1399_v18 = vadd.f32 %v7163_v12, %v1286_v40  ;;  %v7395_v20 = vpop.f32.mrf.mxu3 }
 0x342   : > { %v7378_v6 = vld [vmem:[#allocation2 + $0xc8] sm:$0xff]  ;;  %10258 = vst [vmem:[#allocation29_spill] sm:$0xff] %v7395_v20 }
 0x343   : > { %v1923_v3 = vld [vmem:[#allocation2 + $0xc2] sm:$0xff]  ;;  %1827 = vst [vmem:[#allocation2 + $0xd9] sm:$0xff] %v1795_v59  ;;  %2464 = vmatmul.f32.gmra.mxu2 %v1795_v59  ;;  %v1512_v26 = vadd.f32 %v7160_v48, %v1399_v18  ;;  %v1924_v47 = vld [vmem:[#allocation2 + $0xca] sm:$0xff] }
 0x344   : > { %2348 = vmatmul.f32.gmra.mxu1 %v7378_v6  ;;  %2571 = vmatmul.f32.gmra.mxu3 %v1923_v3  ;;  %v10256_v3 = vld [vmem:[#allocation15_spill] sm:$0xff]  ;;  %v10260_v18 = vld [vmem:[#allocation58_spill] sm:$0xff] }
 0x345   : > { %v1289_v59 = vadd.f32 %v10257_v30, %v10256_v3  ;;  %v1625_v12 = vadd.f32 %v7176_v39, %v1512_v26  ;;  %v10261_v26 = vld [vmem:[#allocation16_spill] sm:$0xff]  ;;  %v10262_v30 = vld [vmem:[#allocation37_spill] sm:$0xff] }
 0x346   : > { %v1734_v19 = vpop.f32.mrf.mxu0  ;;  %v2417_v23 = vpop.f32.mrf.mxu2  ;;  %v1292_v5 = vadd.f32 %v10262_v30, %v10261_v26  ;;  %v10263_v26 = vld [vmem:[#allocation61_spill] sm:$0xff] }
 0x347   : > { %v1735_v53 = vadd.f32 %v1734_v19, %v1622_v43 }
 0x348   : > { %v2304_v58 = vpop.f32.mrf.mxu1 }
 0x349   : > { %v1796_v28 = vmax.f32 %v1735_v53, 0.0  ;;  %2639 = vmatmul.f32.gmra.mxu0 %v7204_v4  ;;  %v10259_v4 = vld [vmem:[#allocation59_spill] sm:$0xff]  ;;  %v2305_v3 = vadd.f32 %v7398_v7, %v2304_v58 }
 0x34a   : > { %v7389_v34 = vld [vmem:[#allocation2 + $0xd8] sm:$0xff]  ;;  %v1402_v40 = vadd.f32 %v10259_v4, %v1289_v59  ;;  %v2223_v59 = vld [vmem:[#allocation3 + $0x758] sm:$0xff] }
 0x34b   : > { %1828 = vst [vmem:[#allocation2 + $0xe1] sm:$0xff] %v1796_v28  ;;  %2467 = vmatmul.f32.gmra.mxu2 %v1796_v28 }
 0x34c   : > { %2351 = vmatmul.f32.gmra.mxu1 %v7389_v34  ;;  %2574 = vmatmul.f32.gmra.mxu3 %v1924_v47  ;;  %v1515_v53 = vadd.f32 %v10260_v18, %v1402_v40 }
 0x34d   : > { %2850 = vmatpush.msrb.mxu2 %v2223_v59 }
 0x34e   : > { %v1737_v48 = vpop.f32.mrf.mxu0  ;;  %v2420_v27 = vpop.f32.mrf.mxu2 }
 0x34f   : > { %v1738_v43 = vadd.f32 %v1737_v48, %v1625_v12  ;;  %v1628_v12 = vadd.f32 %v7185_v17, %v1515_v53  ;;  %v2418_v48 = vadd.f32 %v2417_v23, %v2305_v3  ;;  %v10264_v23 = vld [vmem:[#allocation17_spill] sm:$0xff]  ;;  %v10265_v53 = vld [vmem:[#allocation38_spill] sm:$0xff] }
 0x350   : > { %v2307_v19 = vpop.f32.mrf.mxu1  ;;  %v1295_v3 = vadd.f32 %v10265_v53, %v10264_v23 }
 0x351   : > { %v1797_v47 = vmax.f32 %v1738_v43, 0.0  ;;  %2642 = vmatmul.f32.gmra.mxu0 %v7213_v10  ;;  %v1405_v10 = vadd.f32 %v7181_v52, %v1292_v5  ;;  %v2308_v56 = vadd.f32 %v7398_v7, %v2307_v19  ;;  %v2199_v52 = vld [vmem:[#allocation3 + $0x698] sm:$0xff] }
 0x352   : > { %v7403_v28 = vld [vmem:[#allocation2 + $0xe0] sm:$0xff]  ;;  %2745 = vmatpush.msrb.mxu1 %v2199_v52 }
 0x353   : > { %v1925_v39 = vld [vmem:[#allocation2 + $0xda] sm:$0xff]  ;;  %1829 = vst [vmem:[#allocation2 + $0xf1] sm:$0xff] %v1797_v47  ;;  %2470 = vmatmul.f32.gmra.mxu2 %v1797_v47  ;;  %v1518_v30 = vadd.f32 %v10263_v26, %v1405_v10  ;;  %v1926_v17 = vld [vmem:[#allocation2 + $0xe2] sm:$0xff]  ;;  %v2421_v59 = vadd.f32 %v2420_v27, %v2308_v56 }
 0x354   : > { %2354 = vmatmul.f32.gmra.mxu1 %v7403_v28  ;;  %2577 = vmatmul.f32.gmra.mxu3 %v1925_v39  ;;  %v10267_v56 = vld [vmem:[#allocation18_spill] sm:$0xff]  ;;  %v10268_v27 = vld [vmem:[#allocation39_spill] sm:$0xff] }
 0x355   : > { %v1631_v5 = vadd.f32 %v7196_v55, %v1518_v30  ;;  %v1298_v30 = vadd.f32 %v10268_v27, %v10267_v56  ;;  %v2198_v27 = vld [vmem:[#allocation3 + $0x690] sm:$0xff] }
 0x356   : > { %v1740_v58 = vpop.f32.mrf.mxu0  ;;  %v2423_v18 = vpop.f32.mrf.mxu2  ;;  %2746 = vmatpush.msrb.mxu1 %v2198_v27 }
 0x357   : > { %v2530_v4 = vpop.f32.mrf.mxu3  ;;  %v1741_v40 = vadd.f32 %v1740_v58, %v1628_v12 }
 0x358   : > { %v7410_v43 = vadd.f32 %v2530_v4, %v2418_v48  ;;  %v2310_v20 = vpop.f32.mrf.mxu1 }
 0x359   : > { %v1798_v39 = vmax.f32 %v1741_v40, 0.0  ;;  %2645 = vmatmul.f32.gmra.mxu0 %v7222_v13  ;;  %v1408_v13 = vadd.f32 %v7190_v46, %v1295_v3  ;;  %v10266_v40 = vld [vmem:[#allocation62_spill] sm:$0xff]  ;;  %v2311_v23 = vadd.f32 %v7398_v7, %v2310_v20 }
 0x35a   : > { %v7415_v47 = vld [vmem:[#allocation2 + $0xf0] sm:$0xff]  ;;  %v2222_v46 = vld [vmem:[#allocation3 + $0x750] sm:$0xff] }
 0x35b   : > { %1830 = vst [vmem:[#allocation2 + $0xf9] sm:$0xff] %v1798_v39  ;;  %2473 = vmatmul.f32.gmra.mxu2 %v1798_v39  ;;  %v1521_v26 = vadd.f32 %v10266_v40, %v1408_v13  ;;  %v2424_v3 = vadd.f32 %v2423_v18, %v2311_v23  ;;  %v10271_v18 = vld [vmem:[#allocation19_spill] sm:$0xff] }
 0x35c   : > { %2357 = vmatmul.f32.gmra.mxu1 %v7415_v47  ;;  %2580 = vmatmul.f32.gmra.mxu3 %v1926_v17 }
 0x35d   : > { %v1634_v53 = vadd.f32 %v7207_v45, %v1521_v26  ;;  %2851 = vmatpush.msrb.mxu2 %v2222_v46  ;;  %v10272_v26 = vld [vmem:[#allocation41_spill] sm:$0xff] }
 0x35e   : > { %v1743_v19 = vpop.f32.mrf.mxu0  ;;  %v2426_v4 = vpop.f32.mrf.mxu2  ;;  %v1301_v23 = vadd.f32 %v10272_v26, %v10271_v18  ;;  %v10276_v18 = vld [vmem:[#allocation68_spill] sm:$0xff] }
 0x35f   : > { %v2533_v12 = vpop.f32.mrf.mxu3  ;;  %v1744_v48 = vadd.f32 %v1743_v19, %v1631_v5  ;;  %v10269_v5 = vld [vmem:[#allocation64_spill] sm:$0xff] }
 0x360   : > { %v7422_v58 = vadd.f32 %v2533_v12, %v2421_v59  ;;  %v2313_v10 = vpop.f32.mrf.mxu1 }
 0x361   : > { %v1799_v17 = vmax.f32 %v1744_v48, 0.0  ;;  %2648 = vmatmul.f32.gmra.mxu0 %v7231_v32  ;;  %v1411_v32 = vadd.f32 %v10269_v5, %v1298_v30  ;;  %v10270_v48 = vld [vmem:[#allocation63_spill] sm:$0xff]  ;;  %v2314_v56 = vadd.f32 %v7398_v7, %v2313_v10 }
 0x362   : > { %v7427_v39 = vld [vmem:[#allocation2 + $0xf8] sm:$0xff] }
 0x363   : > { %v1927_v55 = vld [vmem:[#allocation2 + $0xf2] sm:$0xff]  ;;  %1831 = vst [vmem:[#allocation2 + $0x109] sm:$0xff] %v1799_v17  ;;  %2476 = vmatmul.f32.gmra.mxu2 %v1799_v17  ;;  %v1524_v40 = vadd.f32 %v10270_v48, %v1411_v32  ;;  %v1928_v45 = vld [vmem:[#allocation2 + $0xfa] sm:$0xff]  ;;  %v2427_v46 = vadd.f32 %v2426_v4, %v2314_v56 }
 0x364   : > { %2360 = vmatmul.f32.gmra.mxu1 %v7427_v39  ;;  %2583 = vmatmul.f32.gmra.mxu3 %v1927_v55  ;;  %v10273_v32 = vld [vmem:[#allocation65_spill] sm:$0xff]  ;;  %v10274_v4 = vld [vmem:[#allocation20_spill] sm:$0xff] }
 0x365   : > { %v1637_v30 = vadd.f32 %v7219_v63, %v1524_v40  ;;  %v10275_v40 = vld [vmem:[#allocation44_spill] sm:$0xff] }
 0x366   : > { %v1746_v20 = vpop.f32.mrf.mxu0  ;;  %v2429_v12 = vpop.f32.mrf.mxu2  ;;  %v1304_v56 = vadd.f32 %v10275_v40, %v10274_v4 }
 0x367   : > { %v2536_v52 = vpop.f32.mrf.mxu3  ;;  %v1747_v59 = vadd.f32 %v1746_v20, %v1634_v53 }
 0x368   : > { %v7434_v19 = vadd.f32 %v2536_v52, %v2424_v3  ;;  %v2316_v13 = vpop.f32.mrf.mxu1 }
 0x369   : > { %v1800_v55 = vmax.f32 %v1747_v59, 0.0  ;;  %2651 = vmatmul.f32.gmra.mxu0 %v7242_v35  ;;  %v1414_v35 = vadd.f32 %v7216_v1, %v1301_v23  ;;  %v2317_v48 = vadd.f32 %v7398_v7, %v2316_v13  ;;  %v2221_v1 = vld [vmem:[#allocation3 + $0x748] sm:$0xff] }
 0x36a   : > { %v7439_v17 = vld [vmem:[#allocation2 + $0x108] sm:$0xff]  ;;  %2852 = vmatpush.msrb.mxu2 %v2221_v1 }
 0x36b   : > { %1832 = vst [vmem:[#allocation2 + $0x111] sm:$0xff] %v1800_v55  ;;  %2479 = vmatmul.f32.gmra.mxu2 %v1800_v55  ;;  %v1527_v59 = vadd.f32 %v10273_v32, %v1414_v35  ;;  %v2430_v23 = vadd.f32 %v2429_v12, %v2317_v48  ;;  %v10280_v48 = vld [vmem:[#allocation47_spill] sm:$0xff] }
 0x36c   : > { %2363 = vmatmul.f32.gmra.mxu1 %v7439_v17  ;;  %2586 = vmatmul.f32.gmra.mxu3 %v1928_v45 }
 0x36d   : > { %v1640_v26 = vadd.f32 %v10276_v18, %v1527_v59  ;;  %v10279_v59 = vld [vmem:[#allocation21_spill] sm:$0xff] }
 0x36e   : > { %v1749_v10 = vpop.f32.mrf.mxu0  ;;  %v2432_v52 = vpop.f32.mrf.mxu2  ;;  %v1307_v40 = vadd.f32 %v10280_v48, %v10279_v59 }
 0x36f   : > { %v2539_v53 = vpop.f32.mrf.mxu3  ;;  %v1750_v3 = vadd.f32 %v1749_v10, %v1637_v30  ;;  %v10277_v30 = vld [vmem:[#allocation67_spill] sm:$0xff] }
 0x370   : > { %v7446_v20 = vadd.f32 %v2539_v53, %v2427_v46  ;;  %v2319_v5 = vpop.f32.mrf.mxu1 }
 0x371   : > { %v1801_v45 = vmax.f32 %v1750_v3, 0.0  ;;  %2654 = vmatmul.f32.gmra.mxu0 %v7257_v21  ;;  %v1417_v21 = vadd.f32 %v10277_v30, %v1304_v56  ;;  %v10278_v3 = vld [vmem:[#allocation66_spill] sm:$0xff]  ;;  %v2320_v4 = vadd.f32 %v7398_v7, %v2319_v5 }
 0x372   : > { %v7451_v55 = vld [vmem:[#allocation2 + $0x110] sm:$0xff]  ;;  %v2197_v56 = vld [vmem:[#allocation3 + $0x688] sm:$0xff] }
 0x373   : > { %v1929_v63 = vld [vmem:[#allocation2 + $0x10a] sm:$0xff]  ;;  %1833 = vst [vmem:[#allocation2 + $0x121] sm:$0xff] %v1801_v45  ;;  %2482 = vmatmul.f32.gmra.mxu2 %v1801_v45  ;;  %v1530_v32 = vadd.f32 %v10278_v3, %v1417_v21  ;;  %v1930_v12 = vld [vmem:[#allocation2 + $0x112] sm:$0xff]  ;;  %2747 = vmatpush.msrb.mxu1 %v2197_v56  ;;  %v2433_v18 = vadd.f32 %v2432_v52, %v2320_v4  ;;  %v10281_v52 = vld [vmem:[#allocation22_spill] sm:$0xff] }
 0x374   : > { %2366 = vmatmul.f32.gmra.mxu1 %v7451_v55  ;;  %2589 = vmatmul.f32.gmra.mxu3 %v1929_v63 }
 0x375   : > { %v1643_v1 = vadd.f32 %v7247_v25, %v1530_v32  ;;  %v10282_v32 = vld [vmem:[#allocation50_spill] sm:$0xff] }
 0x376   : > { %v1752_v13 = vpop.f32.mrf.mxu0  ;;  %v2435_v53 = vpop.f32.mrf.mxu2  ;;  %v1310_v4 = vadd.f32 %v10282_v32, %v10281_v52 }
 0x377   : > { %v2542_v27 = vpop.f32.mrf.mxu3  ;;  %v1753_v46 = vadd.f32 %v1752_v13, %v1640_v26 }
 0x378   : > { %v7458_v10 = vadd.f32 %v2542_v27, %v2430_v23  ;;  %v2322_v35 = vpop.f32.mrf.mxu1  ;;  %v1423_v48 = vadd.f32 %v7255_v33, %v1310_v4  ;;  %v2242_v33 = vld [vmem:[#allocation3 + $0x7f0] sm:$0xff] }
 0x379   : > { %v1802_v63 = vmax.f32 %v1753_v46, 0.0  ;;  %2657 = vmatmul.f32.gmra.mxu0 %v7270_v54  ;;  %v1420_v54 = vadd.f32 %v7239_v29, %v1307_v40  ;;  %v2323_v46 = vadd.f32 %v7398_v7, %v2322_v35  ;;  %v2243_v29 = vld [vmem:[#allocation3 + $0x7f8] sm:$0xff] }
 0x37a   : > { %v7463_v45 = vld [vmem:[#allocation2 + $0x120] sm:$0xff]  ;;  %2959 = vmatpush.msrb.mxu3 %v2243_v29 }
 0x37b   : > { %1834 = vst [vmem:[#allocation2 + $0x129] sm:$0xff] %v1802_v63  ;;  %2485 = vmatmul.f32.gmra.mxu2 %v1802_v63  ;;  %v1533_v21 = vadd.f32 %v7236_v15, %v1420_v54  ;;  %v2436_v35 = vadd.f32 %v2435_v53, %v2323_v46  ;;  %v10283_v53 = vld [vmem:[#allocation23_spill] sm:$0xff] }
 0x37c   : > { %2369 = vmatmul.f32.gmra.mxu1 %v7463_v45  ;;  %2592 = vmatmul.f32.gmra.mxu3 %v1930_v12  ;;  %v2220_v12 = vld [vmem:[#allocation3 + $0x740] sm:$0xff] }
 0x37d   : > { %v1646_v15 = vadd.f32 %v7264_v49, %v1533_v21  ;;  %2853 = vmatpush.msrb.mxu2 %v2220_v12  ;;  %v10284_v21 = vld [vmem:[#allocation53_spill] sm:$0xff]  ;;  %2960 = vmatpush.msrb.mxu3 %v2242_v33 }
 0x37e   : > { %v1755_v5 = vpop.f32.mrf.mxu0  ;;  %v2438_v27 = vpop.f32.mrf.mxu2  ;;  %v1313_v46 = vadd.f32 %v10284_v21, %v10283_v53  ;;  %v2238_v53 = vld [vmem:[#allocation3 + $0x7d0] sm:$0xff] }
 0x37f   : > { %v2545_v26 = vpop.f32.mrf.mxu3  ;;  %v1756_v23 = vadd.f32 %v1755_v5, %v1643_v1  ;;  %v1536_v5 = vadd.f32 %v7251_v37, %v1423_v48  ;;  %v2196_v37 = vld [vmem:[#allocation3 + $0x680] sm:$0xff] }
 0x380   : > { %v7470_v13 = vadd.f32 %v2545_v26, %v2433_v18  ;;  %v2325_v30 = vpop.f32.mrf.mxu1  ;;  %2748 = vmatpush.msrb.mxu1 %v2196_v37  ;;  %v1426_v29 = vadd.f32 %v7275_v9, %v1313_v46  ;;  %v10286_v9 = vld [vmem:[#allocation55_spill] sm:$0xff]  ;;  %v2236_v46 = vld [vmem:[#allocation3 + $0x7c0] sm:$0xff] }
 0x381   : > { %v1803_v3 = vmax.f32 %v1756_v23, 0.0  ;;  %2660 = vmatmul.f32.gmra.mxu0 %v7283_v24  ;;  %v2326_v26 = vadd.f32 %v7398_v7, %v2325_v30  ;;  %v1649_v30 = vadd.f32 %v7280_v60, %v1536_v5  ;;  %v2216_v37 = vld [vmem:[#allocation3 + $0x720] sm:$0xff] }
 0x382   : > { %v7475_v63 = vld [vmem:[#allocation2 + $0x128] sm:$0xff]  ;;  %v1539_v48 = vadd.f32 %v7268_v38, %v1426_v29  ;;  %v2217_v38 = vld [vmem:[#allocation3 + $0x728] sm:$0xff] }
 0x383   : > { %v1931_v25 = vld [vmem:[#allocation2 + $0x122] sm:$0xff]  ;;  %1835 = vst [vmem:[#allocation2 + $0x139] sm:$0xff] %v1803_v3  ;;  %2488 = vmatmul.f32.gmra.mxu2 %v1803_v3  ;;  %v1932_v49 = vld [vmem:[#allocation2 + $0x12a] sm:$0xff]  ;;  %v2241_v3 = vld [vmem:[#allocation3 + $0x7e8] sm:$0xff]  ;;  %v2439_v52 = vadd.f32 %v2438_v27, %v2326_v26 }
 0x384   : > { %2372 = vmatmul.f32.gmra.mxu1 %v7475_v63  ;;  %2595 = vmatmul.f32.gmra.mxu3 %v1931_v25  ;;  %v2219_v25 = vld [vmem:[#allocation3 + $0x738] sm:$0xff]  ;;  %v1652_v21 = vadd.f32 %v7300_v44, %v1539_v48  ;;  %v10287_v48 = vld [vmem:[#allocation25_spill] sm:$0xff] }
 0x385   : > { %2854 = vmatpush.msrb.mxu2 %v2219_v25  ;;  %2961 = vmatpush.msrb.mxu3 %v2241_v3  ;;  %v10285_v26 = vld [vmem:[#allocation24_spill] sm:$0xff] }
 0x386   : > { %v1758_v59 = vpop.f32.mrf.mxu0  ;;  %v2441_v1 = vpop.f32.mrf.mxu2 }
 0x387   : > { %v2548_v24 = vpop.f32.mrf.mxu3  ;;  %v1759_v40 = vadd.f32 %v1758_v59, %v1646_v15  ;;  %v2239_v59 = vld [vmem:[#allocation3 + $0x7d8] sm:$0xff] }
 0x388   : > { %v7482_v56 = vadd.f32 %v2548_v24, %v2436_v35  ;;  %v2328_v18 = vpop.f32.mrf.mxu1 }
 0x389   : > { %v1804_v54 = vmax.f32 %v1759_v40, 0.0  ;;  %2663 = vmatmul.f32.gmra.mxu0 %v7296_v41  ;;  %v2240_v41 = vld [vmem:[#allocation3 + $0x7e0] sm:$0xff]  ;;  %v2329_v60 = vadd.f32 %v7398_v7, %v2328_v18  ;;  %v2237_v18 = vld [vmem:[#allocation3 + $0x7c8] sm:$0xff] }
 0x38a   : > { %v7487_v23 = vld [vmem:[#allocation2 + $0x138] sm:$0xff]  ;;  %2962 = vmatpush.msrb.mxu3 %v2240_v41 }
 0x38b   : > { %1836 = vst [vmem:[#allocation2 + $0x141] sm:$0xff] %v1804_v54  ;;  %2491 = vmatmul.f32.gmra.mxu2 %v1804_v54  ;;  %v1316_v54 = vadd.f32 %v10286_v9, %v10285_v26  ;;  %v2259_v26 = vld [vmem:[#allocation3 + $0x878] sm:$0xff] }
 0x38c   : > { %2375 = vmatmul.f32.gmra.mxu1 %v7487_v23  ;;  %2598 = vmatmul.f32.gmra.mxu3 %v1932_v49  ;;  %v2218_v49 = vld [vmem:[#allocation3 + $0x730] sm:$0xff] }
 0x38d   : > { %2963 = vmatpush.msrb.mxu3 %v2239_v59  ;;  %2855 = vmatpush.msrb.mxu2 %v2218_v49  ;;  %v1429_v25 = vadd.f32 %v7291_v61, %v1316_v54  ;;  %v2215_v61 = vld [vmem:[#allocation3 + $0x718] sm:$0xff]  ;;  %v2232_v54 = vld [vmem:[#allocation3 + $0x7a0] sm:$0xff] }
 0x38e   : > { %v1761_v32 = vpop.f32.mrf.mxu0  ;;  %v2444_v35 = vpop.f32.mrf.mxu2  ;;  %3072 = vmatpush.msra.mxu0 %v2259_v26  ;;  %v2275_v49 = vld [vmem:[#allocation3 + $0x8f8] sm:$0xff] }
 0x38f   : > { %v2551_v4 = vpop.f32.mrf.mxu3  ;;  %v1762_v12 = vadd.f32 %v1761_v32, %v1649_v30  ;;  %2964 = vmatpush.msrb.mxu3 %v2238_v53  ;;  %2856 = vmatpush.msrb.mxu2 %v2217_v38  ;;  %v2235_v32 = vld [vmem:[#allocation3 + $0x7b8] sm:$0xff]  ;;  %v1542_v29 = vadd.f32 %v7288_v42, %v1429_v25  ;;  %v2214_v42 = vld [vmem:[#allocation3 + $0x710] sm:$0xff] }
 0x390   : > { %v7494_v15 = vadd.f32 %v2551_v4, %v2439_v52  ;;  %v2331_v24 = vpop.f32.mrf.mxu1  ;;  %3185 = vmatpush.msra.mxu1 %v2275_v49 }
 0x391   : > { %v1805_v27 = vmax.f32 %v1762_v12, 0.0  ;;  %2666 = vmatmul.f32.gmra.mxu0 %v7311_v57  ;;  %v2442_v57 = vadd.f32 %v2441_v1, %v2329_v60  ;;  %2965 = vmatpush.msrb.mxu3 %v2237_v18  ;;  %v2332_v44 = vadd.f32 %v7398_v7, %v2331_v24  ;;  %v10288_v60 = vld [vmem:[#allocation56_spill] sm:$0xff]  ;;  %v2233_v24 = vld [vmem:[#allocation3 + $0x7a8] sm:$0xff] }
 0x392   : > { %v7499_v40 = vld [vmem:[#allocation2 + $0x140] sm:$0xff]  ;;  %2857 = vmatpush.msrb.mxu2 %v2216_v37  ;;  %v2213_v18 = vld [vmem:[#allocation3 + $0x708] sm:$0xff] }
 0x393   : > { %v1933_v5 = vld [vmem:[#allocation2 + $0x13a] sm:$0xff]  ;;  %1837 = vst [vmem:[#allocation2 + $0x151] sm:$0xff] %v1805_v27  ;;  %2494 = vmatmul.f32.gmra.mxu2 %v1805_v27  ;;  %2966 = vmatpush.msrb.mxu3 %v2236_v46  ;;  %v1934_v59 = vld [vmem:[#allocation2 + $0x142] sm:$0xff]  ;;  %v1319_v27 = vadd.f32 %v10288_v60, %v10287_v48  ;;  %v2445_v9 = vadd.f32 %v2444_v35, %v2332_v44 }
 0x394   : > { %2378 = vmatmul.f32.gmra.mxu1 %v7499_v40  ;;  %2601 = vmatmul.f32.gmra.mxu3 %v1933_v5  ;;  %v2234_v5 = vld [vmem:[#allocation3 + $0x7b0] sm:$0xff] }
 0x395   : > { %2967 = vmatpush.msrb.mxu3 %v2235_v32  ;;  %2858 = vmatpush.msrb.mxu2 %v2215_v61  ;;  %v10289_v44 = vld [vmem:[#allocation26_spill] sm:$0xff]  ;;  %v2228_v61 = vld [vmem:[#allocation3 + $0x780] sm:$0xff] }
 0x396   : > { %v1764_v33 = vpop.f32.mrf.mxu0  ;;  %v2447_v41 = vpop.f32.mrf.mxu2 }
 0x397   : > { %v2554_v3 = vpop.f32.mrf.mxu3  ;;  %v1765_v30 = vadd.f32 %v1764_v33, %v1652_v21  ;;  %2968 = vmatpush.msrb.mxu3 %v2234_v5  ;;  %v1432_v21 = vadd.f32 %v7307_v62, %v1319_v27  ;;  %2859 = vmatpush.msrb.mxu2 %v2214_v42 }
 0x398   : > { %v7506_v52 = vadd.f32 %v2554_v3, %v2442_v57  ;;  %v2334_v4 = vpop.f32.mrf.mxu1  ;;  %v2231_v3 = vld [vmem:[#allocation3 + $0x798] sm:$0xff] }
 0x399   : > { %v1806_v1 = vmax.f32 %v1765_v30, 0.0  ;;  %2669 = vmatmul.f32.gmra.mxu0 %v7326_v50  ;;  %v1655_v50 = vadd.f32 %v7317_v51, %v1542_v29  ;;  %2969 = vmatpush.msrb.mxu3 %v2233_v24  ;;  %v1545_v51 = vadd.f32 %v7304_v2, %v1432_v21  ;;  %v2335_v35 = vadd.f32 %v7398_v7, %v2334_v4  ;;  %v2230_v30 = vld [vmem:[#allocation3 + $0x790] sm:$0xff]  ;;  %v2212_v29 = vld [vmem:[#allocation3 + $0x700] sm:$0xff]  ;;  %v2229_v2 = vld [vmem:[#allocation3 + $0x788] sm:$0xff] }
 0x39a   : > { %v7511_v12 = vld [vmem:[#allocation2 + $0x150] sm:$0xff]  ;;  %2860 = vmatpush.msrb.mxu2 %v2213_v18  ;;  %v2274_v21 = vld [vmem:[#allocation3 + $0x8f0] sm:$0xff] }
 0x39b   : > { %1838 = vst [vmem:[#allocation2 + $0x159] sm:$0xff] %v1806_v1  ;;  %2497 = vmatmul.f32.gmra.mxu2 %v1806_v1  ;;  %2970 = vmatpush.msrb.mxu3 %v2232_v54  ;;  %v10290_v1 = vld [vmem:[#allocation57_spill] sm:$0xff]  ;;  %v1658_v4 = vadd.f32 %v7333_v14, %v1545_v51  ;;  %v10292_v14 = vld [vmem:[#allocation42_spill] sm:$0xff] }
 0x39c   : > { %2381 = vmatmul.f32.gmra.mxu1 %v7511_v12  ;;  %2604 = vmatmul.f32.gmra.mxu3 %v1934_v59  ;;  %v1322_v59 = vadd.f32 %v10290_v1, %v10289_v44  ;;  %v10298_v1 = vld [vmem:[#allocation9_spill] sm:$0xff] }
 0x39d   : > { %2971 = vmatpush.msrb.mxu3 %v2231_v3  ;;  %2861 = vmatpush.msrb.mxu2 %v2212_v29 }
 0x39e   : > { %v1767_v53 = vpop.f32.mrf.mxu0  ;;  %v2450_v33 = vpop.f32.mrf.mxu2  ;;  %v1435_v27 = vadd.f32 %v7324_v22, %v1322_v59  ;;  %v10294_v22 = vld [vmem:[#allocation60_spill] sm:$0xff]  ;;  %3186 = vmatpush.msra.mxu1 %v2274_v21 }
 0x39f   : > { %v2557_v38 = vpop.f32.mrf.mxu3  ;;  %v1768_v57 = vadd.f32 %v1767_v53, %v1655_v50  ;;  %2972 = vmatpush.msrb.mxu3 %v2230_v30 }
 0x3a0   : > { %v7518_v46 = vadd.f32 %v2557_v38, %v2445_v9  ;;  %v2337_v37 = vpop.f32.mrf.mxu1  ;;  %v1548_v50 = vadd.f32 %v7320_v36, %v1435_v27  ;;  %v10293_v38 = vld [vmem:[#allocation27_spill] sm:$0xff] }
 0x3a1   : > { %v1807_v25 = vmax.f32 %v1768_v57, 0.0  ;;  %2672 = vmatmul.f32.gmra.mxu0 %v7339_v11  ;;  %v2448_v11 = vadd.f32 %v2447_v41, %v2335_v35  ;;  %2973 = vmatpush.msrb.mxu3 %v2229_v2  ;;  %v2338_v9 = vadd.f32 %v7398_v7, %v2337_v37  ;;  %v2258_v41 = vld [vmem:[#allocation3 + $0x870] sm:$0xff]  ;;  %v1325_v18 = vadd.f32 %v10294_v22, %v10293_v38  ;;  %v10296_v35 = vld [vmem:[#allocation28_spill] sm:$0xff] }
 0x3a2   : > { %v7523_v32 = vld [vmem:[#allocation2 + $0x158] sm:$0xff]  ;;  %3073 = vmatpush.msra.mxu0 %v2258_v41  ;;  %v10295_v36 = vld [vmem:[#allocation43_spill] sm:$0xff] }
 0x3a3   : > { %v1935_v62 = vld [vmem:[#allocation2 + $0x152] sm:$0xff]  ;;  %1839 = vst [vmem:[#allocation2 + $0x169] sm:$0xff] %v1807_v25  ;;  %2500 = vmatmul.f32.gmra.mxu2 %v1807_v25  ;;  %2974 = vmatpush.msrb.mxu3 %v2228_v61  ;;  %v1936_v53 = vld [vmem:[#allocation2 + $0x15a] sm:$0xff]  ;;  %v1661_v57 = vadd.f32 %v10295_v36, %v1548_v50  ;;  %v2451_v3 = vadd.f32 %v2450_v33, %v2338_v9 }
 0x3a4   : > { %2384 = vmatmul.f32.gmra.mxu1 %v7523_v32  ;;  %2607 = vmatmul.f32.gmra.mxu3 %v1935_v62  ;;  %v1438_v25 = vadd.f32 %v10296_v35, %v1325_v18  ;;  %v2003_v33 = vld [vmem:[#allocation2 + $0x1a] sm:$0xff]  ;;  %v2005_v35 = vld [vmem:[#allocation2 + $0x32] sm:$0xff] }
 0x3a5   : > { %v2257_v41 = vld [vmem:[#allocation3 + $0x868] sm:$0xff] }
 0x3a6   : > { %v1770_v48 = vpop.f32.mrf.mxu0  ;;  %v2453_v24 = vpop.f32.mrf.mxu2  ;;  %v1551_v59 = vadd.f32 %v10298_v1, %v1438_v25  ;;  %v1971_v38 = vld [vmem:[#allocation2 + $0x19] sm:$0xff]  ;;  %3074 = vmatpush.msra.mxu0 %v2257_v41  ;;  %v2007_v41 = vld [vmem:[#allocation2 + $0x4a] sm:$0xff] }
 0x3a7   : > { %v2560_v60 = vpop.f32.mrf.mxu3  ;;  %v1771_v5 = vadd.f32 %v1770_v48, %v1658_v4 }
 0x3a8   : > { %v7530_v42 = vadd.f32 %v2560_v60, %v2448_v11  ;;  %v2340_v26 = vpop.f32.mrf.mxu1  ;;  %v1664_v48 = vadd.f32 %v7367_v31, %v1551_v59  ;;  %v2004_v31 = vld [vmem:[#allocation2 + $0x22] sm:$0xff] }
 0x3a9   : > { %v1808_v54 = vmax.f32 %v1771_v5, 0.0  ;;  %2675 = vmatmul.f32.gmra.mxu0 %v10292_v14  ;;  %v2341_v2 = vadd.f32 %v7398_v7, %v2340_v26 }
 0x3aa   : > { %10291 = vst [vmem:[#allocation46_spill] sm:$0xff] %v7530_v42  ;;  %v7535_v49 = vld [vmem:[#allocation2 + $0x168] sm:$0xff] }
 0x3ab   : > { %1840 = vst [vmem:[#allocation2 + $0x171] sm:$0xff] %v1808_v54  ;;  %2503 = vmatmul.f32.gmra.mxu2 %v1808_v54  ;;  %v2454_v60 = vadd.f32 %v2453_v24, %v2341_v2  ;;  %v2273_v24 = vld [vmem:[#allocation3 + $0x8e8] sm:$0xff] }
 0x3ac   : > { %2387 = vmatmul.f32.gmra.mxu1 %v7535_v49  ;;  %2610 = vmatmul.f32.gmra.mxu3 %v1936_v53 }
 0x3ad   : > { %3187 = vmatpush.msra.mxu1 %v2273_v24 }
 0x3ae   : > { %v1773_v37 = vpop.f32.mrf.mxu0  ;;  %v2456_v29 = vpop.f32.mrf.mxu2 }
 0x3af   : > { %v2563_v51 = vpop.f32.mrf.mxu3  ;;  %v1774_v30 = vadd.f32 %v1773_v37, %v1661_v57  ;;  %v1972_v37 = vld [vmem:[#allocation2 + $0x21] sm:$0xff] }
 0x3b0   : > { %v7542_v62 = vadd.f32 %v2563_v51, %v2451_v3  ;;  %v2343_v44 = vpop.f32.mrf.mxu1  ;;  %v2035_v51 = vld [vmem:[#allocation2 + $0x30] sm:$0xff] }
 0x3b1   : > { %v1809_v4 = vmax.f32 %v1774_v30, 0.0  ;;  %2678 = vmatmul.f32.gmra.mxu0 %v7363_v8  ;;  %v2344_v8 = vadd.f32 %v7398_v7, %v2343_v44 }
 0x3b2   : > { %10297 = vst [vmem:[#allocation45_spill] sm:$0xff] %v7542_v62  ;;  %v7547_v11 = vld [vmem:[#allocation2 + $0x170] sm:$0xff]  ;;  %v7714_v62 = vld [vmem:[#allocation2 + $0xd9] sm:$0xff] }
 0x3b3   : > { %v1937_v61 = vld [vmem:[#allocation2 + $0x16a] sm:$0xff]  ;;  %1841 = vst [vmem:[#allocation2 + $0x181] sm:$0xff] %v1809_v4  ;;  %2862 = vmatmul.f32.vlgmr.msrb.gmra.mxu2 %v2003_v33  ;;  %v1938_v53 = vld [vmem:[#allocation2 + $0x172] sm:$0xff]  ;;  %v2457_v22 = vadd.f32 %v2456_v29, %v2344_v8  ;;  %v2006_v33 = vld [vmem:[#allocation2 + $0x3a] sm:$0xff] }
 0x3b4   : > { %2390 = vmatmul.f32.gmra.mxu1 %v7547_v11  ;;  %2613 = vmatmul.f32.gmra.mxu3 %v1937_v61  ;;  %v2256_v4 = vld [vmem:[#allocation3 + $0x860] sm:$0xff]  ;;  %v2036_v61 = vld [vmem:[#allocation2 + $0x38] sm:$0xff] }
 0x3b5   : > { %3075 = vmatpush.msra.mxu0 %v2256_v4  ;;  %v7576_v8 = vld [vmem:[#allocation2 + $0x39] sm:$0xff]  ;;  %v7594_v4 = vld [vmem:[#allocation2 + $0x51] sm:$0xff] }
 0x3b6   : > { %v1776_v27 = vpop.f32.mrf.mxu0  ;;  %v2459_v26 = vpop.f32.mrf.mxu2 }
 0x3b7   : > { %v2566_v5 = vpop.f32.mrf.mxu3  ;;  %v1777_v50 = vadd.f32 %v1776_v27, %v1664_v48  ;;  %v2272_v48 = vld [vmem:[#allocation3 + $0x8e0] sm:$0xff] }
 0x3b8   : > { %v7551_v9 = vadd.f32 %v2566_v5, %v2454_v60  ;;  %3188 = vmatpush.msra.mxu1 %v2272_v48 }
 0x3b9   : > { %v2346_v54 = vpop.f32.mrf.mxu1  ;;  %v1810_v14 = vmax.f32 %v1777_v50, 0.0  ;;  %2681 = vmatmul.f32.gmra.mxu0 %v7378_v6 }
 0x3ba   : > { %10299 = vst [vmem:[#allocation32_spill] sm:$0xff] %v7551_v9  ;;  %v2347_v6 = vadd.f32 %v7398_v7, %v2346_v54 }
 0x3bb   : > { %1842 = vst [vmem:[#allocation2 + $0x189] sm:$0xff] %v1810_v14  ;;  %2865 = vmatmul.f32.gmra.mxu2 %v2004_v31  ;;  %v2037_v14 = vld [vmem:[#allocation2 + $0x48] sm:$0xff] }
 0x3bc   : > { %2616 = vmatmul.f32.gmra.mxu3 %v1938_v53  ;;  %2749 = vmatmul.f32.vlgmr.msrb.gmra.mxu1 %v1971_v38  ;;  %v2460_v25 = vadd.f32 %v2459_v26, %v2347_v6  ;;  %v2038_v6 = vld [vmem:[#allocation2 + $0x50] sm:$0xff] }
 0x3be   : > { %v7555_v21 = vpop.f32.mrf.mxu0  ;;  %v2462_v57 = vpop.f32.mrf.mxu2 }
 0x3bf   : > { %v2569_v18 = vpop.f32.mrf.mxu3 }
 0x3c0   : > { %v7557_v36 = vadd.f32 %v2569_v18, %v2457_v22 }
 0x3c1   : > { %v2349_v3 = vpop.f32.mrf.mxu1  ;;  %2684 = vmatmul.f32.gmra.mxu0 %v7389_v34  ;;  %v7567_v34 = vld [vmem:[#allocation2 + $0x31] sm:$0xff] }
 0x3c2   : > { %10300 = vst [vmem:[#allocation11_spill] sm:$0xff] %v7557_v36  ;;  %v2350_v2 = vadd.f32 %v7398_v7, %v2349_v3  ;;  %v7585_v3 = vld [vmem:[#allocation2 + $0x49] sm:$0xff] }
 0x3c3   : > { %2868 = vmatmul.f32.gmra.mxu2 %v2005_v35 }
 0x3c4   : > { %2752 = vmatmul.f32.gmra.mxu1 %v1972_v37  ;;  %2975 = vmatmul.f32.vlgmr.msrb.gmra.mxu3 %v2035_v51  ;;  %v2463_v60 = vadd.f32 %v2462_v57, %v2350_v2  ;;  %v2008_v37 = vld [vmem:[#allocation2 + $0x52] sm:$0xff]  ;;  %v2271_v51 = vld [vmem:[#allocation3 + $0x8d8] sm:$0xff] }
 0x3c5   : > { %3189 = vmatpush.msra.mxu1 %v2271_v51 }
 0x3c6   : > { %v7561_v29 = vpop.f32.mrf.mxu0  ;;  %v2465_v1 = vpop.f32.mrf.mxu2 }
 0x3c7   : > { %v2572_v30 = vpop.f32.mrf.mxu3 }
 0x3c8   : > { %v7563_v44 = vadd.f32 %v2572_v30, %v2460_v25 }
 0x3c9   : > { %v2352_v59 = vpop.f32.mrf.mxu1  ;;  %2687 = vmatmul.f32.gmra.mxu0 %v7403_v28 }
 0x3ca   : > { %10301 = vst [vmem:[#allocation31_spill] sm:$0xff] %v7563_v44  ;;  %v2353_v54 = vadd.f32 %v7398_v7, %v2352_v59 }
 0x3cb   : > { %2871 = vmatmul.f32.gmra.mxu2 %v2006_v33  ;;  %v2009_v33 = vld [vmem:[#allocation2 + $0x62] sm:$0xff] }
 0x3cc   : > { %2755 = vmatmul.f32.gmra.mxu1 %v7567_v34  ;;  %2978 = vmatmul.f32.gmra.mxu3 %v2036_v61  ;;  %v2466_v53 = vadd.f32 %v2465_v1, %v2353_v54  ;;  %v2039_v61 = vld [vmem:[#allocation2 + $0x60] sm:$0xff] }
 0x3ce   : > { %v7570_v5 = vpop.f32.mrf.mxu0  ;;  %v2468_v26 = vpop.f32.mrf.mxu2 }
 0x3cf   : > { %v2575_v27 = vpop.f32.mrf.mxu3 }
 0x3d0   : > { %v7572_v50 = vadd.f32 %v2575_v27, %v2463_v60 }
 0x3d1   : > { %v2355_v28 = vpop.f32.mrf.mxu1  ;;  %2690 = vmatmul.f32.gmra.mxu0 %v7415_v47  ;;  %v2255_v47 = vld [vmem:[#allocation3 + $0x858] sm:$0xff] }
 0x3d2   : > { %10302 = vst [vmem:[#allocation49_spill] sm:$0xff] %v7572_v50  ;;  %v2356_v57 = vadd.f32 %v7398_v7, %v2355_v28  ;;  %3076 = vmatpush.msra.mxu0 %v2255_v47 }
 0x3d3   : > { %2874 = vmatmul.f32.gmra.mxu2 %v2007_v41  ;;  %v7603_v41 = vld [vmem:[#allocation2 + $0x61] sm:$0xff] }
 0x3d4   : > { %2758 = vmatmul.f32.gmra.mxu1 %v7576_v8  ;;  %2981 = vmatmul.f32.gmra.mxu3 %v2037_v14  ;;  %v2469_v35 = vadd.f32 %v2468_v26, %v2356_v57 }
 0x3d6   : > { %v7579_v31 = vpop.f32.mrf.mxu0  ;;  %v2471_v22 = vpop.f32.mrf.mxu2 }
 0x3d7   : > { %v2578_v38 = vpop.f32.mrf.mxu3 }
 0x3d8   : > { %v7581_v24 = vadd.f32 %v2578_v38, %v2466_v53  ;;  %v2040_v53 = vld [vmem:[#allocation2 + $0x68] sm:$0xff] }
 0x3d9   : > { %v2358_v18 = vpop.f32.mrf.mxu1  ;;  %2693 = vmatmul.f32.gmra.mxu0 %v7427_v39  ;;  %v2010_v38 = vld [vmem:[#allocation2 + $0x6a] sm:$0xff] }
 0x3da   : > { %10303 = vst [vmem:[#allocation48_spill] sm:$0xff] %v7581_v24  ;;  %v2359_v2 = vadd.f32 %v7398_v7, %v2358_v18  ;;  %v2049_v24 = vld [vmem:[#allocation2 + $0xd8] sm:$0xff] }
 0x3db   : > { %2877 = vmatmul.f32.gmra.mxu2 %v2008_v37 }
 0x3dc   : > { %2761 = vmatmul.f32.gmra.mxu1 %v7585_v3  ;;  %2984 = vmatmul.f32.gmra.mxu3 %v2038_v6  ;;  %v2472_v48 = vadd.f32 %v2471_v22, %v2359_v2  ;;  %v2270_v22 = vld [vmem:[#allocation3 + $0x8d0] sm:$0xff] }
 0x3dd   : > { %3190 = vmatpush.msra.mxu1 %v2270_v22 }
 0x3de   : > { %v7588_v30 = vpop.f32.mrf.mxu0  ;;  %v2474_v59 = vpop.f32.mrf.mxu2 }
 0x3df   : > { %v2581_v25 = vpop.f32.mrf.mxu3 }
 0x3e0   : > { %v7590_v1 = vadd.f32 %v2581_v25, %v2469_v35  ;;  %v7612_v35 = vld [vmem:[#allocation2 + $0x69] sm:$0xff]  ;;  %v2041_v25 = vld [vmem:[#allocation2 + $0x78] sm:$0xff] }
 0x3e1   : > { %v2361_v39 = vpop.f32.mrf.mxu1  ;;  %2696 = vmatmul.f32.gmra.mxu0 %v7439_v17  ;;  %v2254_v17 = vld [vmem:[#allocation3 + $0x850] sm:$0xff] }
 0x3e2   : > { %10304 = vst [vmem:[#allocation12_spill] sm:$0xff] %v7590_v1  ;;  %v2362_v14 = vadd.f32 %v7398_v7, %v2361_v39  ;;  %3077 = vmatpush.msra.mxu0 %v2254_v17  ;;  %v2011_v39 = vld [vmem:[#allocation2 + $0x7a] sm:$0xff] }
 0x3e3   : > { %2880 = vmatmul.f32.gmra.mxu2 %v2009_v33  ;;  %v2042_v17 = vld [vmem:[#allocation2 + $0x80] sm:$0xff] }
 0x3e4   : > { %2764 = vmatmul.f32.gmra.mxu1 %v7594_v4  ;;  %2987 = vmatmul.f32.gmra.mxu3 %v2039_v61  ;;  %v2475_v18 = vadd.f32 %v2474_v59, %v2362_v14  ;;  %v7621_v14 = vld [vmem:[#allocation2 + $0x79] sm:$0xff] }
 0x3e6   : > { %v7597_v27 = vpop.f32.mrf.mxu0  ;;  %v2477_v28 = vpop.f32.mrf.mxu2 }
 0x3e7   : > { %v2584_v60 = vpop.f32.mrf.mxu3 }
 0x3e8   : > { %v7599_v26 = vadd.f32 %v2584_v60, %v2472_v48 }
 0x3e9   : > { %v2364_v54 = vpop.f32.mrf.mxu1  ;;  %2699 = vmatmul.f32.gmra.mxu0 %v7451_v55 }
 0x3ea   : > { %10305 = vst [vmem:[#allocation33_spill] sm:$0xff] %v7599_v26  ;;  %v2365_v51 = vadd.f32 %v7398_v7, %v2364_v54  ;;  %v7671_v26 = vld [vmem:[#allocation2 + $0xb1] sm:$0xff] }
 0x3eb   : > { %2883 = vmatmul.f32.gmra.mxu2 %v2010_v38 }
 0x3ec   : > { %2767 = vmatmul.f32.gmra.mxu1 %v7603_v41  ;;  %2990 = vmatmul.f32.gmra.mxu3 %v2040_v53  ;;  %v2478_v59 = vadd.f32 %v2477_v28, %v2365_v51  ;;  %v2012_v28 = vld [vmem:[#allocation2 + $0x82] sm:$0xff]  ;;  %v2269_v53 = vld [vmem:[#allocation3 + $0x8c8] sm:$0xff] }
 0x3ed   : > { %3191 = vmatpush.msra.mxu1 %v2269_v53  ;;  %v7639_v53 = vld [vmem:[#allocation2 + $0x91] sm:$0xff] }
 0x3ee   : > { %v7606_v47 = vpop.f32.mrf.mxu0  ;;  %v2480_v37 = vpop.f32.mrf.mxu2 }
 0x3ef   : > { %v2587_v57 = vpop.f32.mrf.mxu3 }
 0x3f0   : > { %v7608_v6 = vadd.f32 %v2587_v57, %v2475_v18 }
 0x3f1   : > { %v2367_v55 = vpop.f32.mrf.mxu1  ;;  %2702 = vmatmul.f32.gmra.mxu0 %v7463_v45  ;;  %v2253_v45 = vld [vmem:[#allocation3 + $0x848] sm:$0xff] }
 0x3f2   : > { %10306 = vst [vmem:[#allocation52_spill] sm:$0xff] %v7608_v6  ;;  %v2368_v54 = vadd.f32 %v7398_v7, %v2367_v55  ;;  %3078 = vmatpush.msra.mxu0 %v2253_v45  ;;  %v7659_v6 = vld [vmem:[#allocation2 + $0xa9] sm:$0xff] }
 0x3f3   : > { %2886 = vmatmul.f32.gmra.mxu2 %v2011_v39  ;;  %v2043_v39 = vld [vmem:[#allocation2 + $0x90] sm:$0xff] }
 0x3f4   : > { %2770 = vmatmul.f32.gmra.mxu1 %v7612_v35  ;;  %2993 = vmatmul.f32.gmra.mxu3 %v2041_v25  ;;  %v2481_v38 = vadd.f32 %v2480_v37, %v2368_v54  ;;  %v7630_v25 = vld [vmem:[#allocation2 + $0x81] sm:$0xff] }
 0x3f6   : > { %v7615_v61 = vpop.f32.mrf.mxu0  ;;  %v2483_v48 = vpop.f32.mrf.mxu2 }
 0x3f7   : > { %v2590_v2 = vpop.f32.mrf.mxu3 }
 0x3f8   : > { %v7617_v33 = vadd.f32 %v2590_v2, %v2478_v59  ;;  %v2013_v59 = vld [vmem:[#allocation2 + $0x92] sm:$0xff] }
 0x3f9   : > { %v2370_v60 = vpop.f32.mrf.mxu1  ;;  %2705 = vmatmul.f32.gmra.mxu0 %v7475_v63 }
 0x3fa   : > { %10307 = vst [vmem:[#allocation51_spill] sm:$0xff] %v7617_v33  ;;  %v2371_v51 = vadd.f32 %v7398_v7, %v2370_v60  ;;  %v2247_v33 = vld [vmem:[#allocation3 + $0x818] sm:$0xff] }
 0x3fb   : > { %2889 = vmatmul.f32.gmra.mxu2 %v2012_v28 }
 0x3fc   : > { %2773 = vmatmul.f32.gmra.mxu1 %v7621_v14  ;;  %2996 = vmatmul.f32.gmra.mxu3 %v2042_v17  ;;  %v2484_v37 = vadd.f32 %v2483_v48, %v2371_v51  ;;  %v2014_v48 = vld [vmem:[#allocation2 + $0x9a] sm:$0xff] }
 0x3fe   : > { %v7624_v18 = vpop.f32.mrf.mxu0  ;;  %v2486_v55 = vpop.f32.mrf.mxu2 }
 0x3ff   : > { %v2593_v22 = vpop.f32.mrf.mxu3 }
 0x400   : > { %v7626_v57 = vadd.f32 %v2593_v22, %v2481_v38  ;;  %v2044_v38 = vld [vmem:[#allocation2 + $0x98] sm:$0xff]  ;;  %v2268_v22 = vld [vmem:[#allocation3 + $0x8c0] sm:$0xff] }
 0x401   : > { %v2373_v63 = vpop.f32.mrf.mxu1  ;;  %2708 = vmatmul.f32.gmra.mxu0 %v7487_v23  ;;  %v2252_v23 = vld [vmem:[#allocation3 + $0x840] sm:$0xff]  ;;  %3192 = vmatpush.msra.mxu1 %v2268_v22 }
 0x402   : > { %10308 = vst [vmem:[#allocation13_spill] sm:$0xff] %v7626_v57  ;;  %v2374_v60 = vadd.f32 %v7398_v7, %v2373_v63  ;;  %3079 = vmatpush.msra.mxu0 %v2252_v23  ;;  %v7646_v63 = vld [vmem:[#allocation5 + $0x1] ss:$0 sm:$0xff]  ;;  %v2251_v23 = vld [vmem:[#allocation3 + $0x838] sm:$0xff] }
 0x403   : > { %2892 = vmatmul.f32.gmra.mxu2 %v2013_v59 }
 0x404   : > { %2776 = vmatmul.f32.gmra.mxu1 %v7630_v25  ;;  %2999 = vmatmul.f32.gmra.mxu3 %v2043_v39  ;;  %v2487_v51 = vadd.f32 %v2486_v55, %v2374_v60  ;;  %v2015_v55 = vld [vmem:[#allocation2 + $0xaa] sm:$0xff]  ;;  %v2250_v60 = vld [vmem:[#allocation3 + $0x830] sm:$0xff] }
 0x405   : > { %3080 = vmatpush.msra.mxu0 %v2251_v23 }
 0x406   : > { %v7633_v54 = vpop.f32.mrf.mxu0  ;;  %v2489_v17 = vpop.f32.mrf.mxu2 }
 0x407   : > { %v2596_v2 = vpop.f32.mrf.mxu3  ;;  %3081 = vmatpush.msra.mxu0 %v2250_v60  ;;  %v2246_v60 = vld [vmem:[#allocation3 + $0x810] sm:$0xff] }
 0x408   : > { %v7635_v45 = vadd.f32 %v2596_v2, %v2484_v37 }
 0x409   : > { %v2376_v28 = vpop.f32.mrf.mxu1  ;;  %2711 = vmatmul.f32.gmra.mxu0 %v7499_v40 }
 0x40a   : > { %10309 = vst [vmem:[#allocation34_spill] sm:$0xff] %v7635_v45  ;;  %v2377_v2 = vadd.f32 %v7646_v63, %v2376_v28  ;;  %v2045_v45 = vld [vmem:[#allocation2 + $0xa8] sm:$0xff] }
 0x40b   : > { %2895 = vmatmul.f32.gmra.mxu2 %v2014_v48  ;;  %v3666_v48 = vld [vmem:[#allocation3 + $0x978] sm:$0xff] }
 0x40c   : > { %2779 = vmatmul.f32.gmra.mxu1 %v7639_v53  ;;  %3002 = vmatmul.f32.gmra.mxu3 %v2044_v38  ;;  %v7650_v38 = vld [vmem:[#allocation2 + $0x99] sm:$0xff]  ;;  %v2490_v22 = vadd.f32 %v2489_v17, %v2377_v2  ;;  %v2267_v2 = vld [vmem:[#allocation3 + $0x8b8] sm:$0xff] }
 0x40d   : > { %3800 = vmatpush.msra.mxu2 %v3666_v48  ;;  %v7662_v17 = vld [vmem:[#allocation2 + $0xb2] sm:$0xff]  ;;  %3193 = vmatpush.msra.mxu1 %v2267_v2 }
 0x40e   : > { %v7642_v59 = vpop.f32.mrf.mxu0  ;;  %v2492_v7 = vpop.f32.mrf.mxu2 }
 0x40f   : > { %v2599_v39 = vpop.f32.mrf.mxu3 }
 0x410   : > { %v7644_v37 = vadd.f32 %v2599_v39, %v2487_v51 }
 0x411   : > { %v2379_v40 = vpop.f32.mrf.mxu1  ;;  %2714 = vmatmul.f32.gmra.mxu0 %v7511_v12 }
 0x412   : > { %10310 = vst [vmem:[#allocation54_spill] sm:$0xff] %v7644_v37  ;;  %v2249_v37 = vld [vmem:[#allocation3 + $0x828] sm:$0xff]  ;;  %v2380_v23 = vadd.f32 %v7646_v63, %v2379_v40 }
 0x413   : > { %2898 = vmatmul.f32.gmra.mxu2 %v2015_v55  ;;  %3082 = vmatpush.msra.mxu0 %v2249_v37  ;;  %v2046_v55 = vld [vmem:[#allocation2 + $0xb0] sm:$0xff] }
 0x414   : > { %2782 = vmatmul.f32.gmra.mxu1 %v7650_v38  ;;  %3005 = vmatmul.f32.gmra.mxu3 %v2045_v45  ;;  %v2248_v45 = vld [vmem:[#allocation3 + $0x820] sm:$0xff]  ;;  %v2493_v37 = vadd.f32 %v2492_v7, %v2380_v23  ;;  %v7674_v7 = vld [vmem:[#allocation2 + $0xc2] sm:$0xff] }
 0x415   : > { %3083 = vmatpush.msra.mxu0 %v2248_v45  ;;  %v3665_v23 = vld [vmem:[#allocation3 + $0x970] sm:$0xff] }
 0x416   : > { %v7653_v39 = vpop.f32.mrf.mxu0  ;;  %v2495_v12 = vpop.f32.mrf.mxu2  ;;  %3801 = vmatpush.msra.mxu2 %v3665_v23 }
 0x417   : > { %v2602_v51 = vpop.f32.mrf.mxu3  ;;  %10311 = vst [vmem:[#allocation14_spill] sm:$0xff] %v7653_v39  ;;  %3084 = vmatpush.msra.mxu0 %v2247_v33  ;;  %v2047_v33 = vld [vmem:[#allocation2 + $0xc0] sm:$0xff] }
 0x418   : > { %v7655_v28 = vadd.f32 %v2602_v51, %v2490_v22  ;;  %v2245_v51 = vld [vmem:[#allocation3 + $0x808] sm:$0xff] }
 0x419   : > { %v2382_v57 = vpop.f32.mrf.mxu1  ;;  %2717 = vmatmul.f32.gmra.mxu0 %v7523_v32 }
 0x41a   : > { %10312 = vst [vmem:[#allocation35_spill] sm:$0xff] %v7655_v28  ;;  %3085 = vmatpush.msra.mxu0 %v2246_v60  ;;  %v2244_v28 = vld [vmem:[#allocation3 + $0x800] sm:$0xff] }
 0x41b   : > { %2901 = vmatmul.f32.gmra.mxu2 %v7662_v17 }
 0x41c   : > { %2785 = vmatmul.f32.gmra.mxu1 %v7659_v6  ;;  %3008 = vmatmul.f32.gmra.mxu3 %v2046_v55  ;;  %v2383_v55 = vadd.f32 %v7646_v63, %v2382_v57 }
 0x41d   : > { %3086 = vmatpush.msra.mxu0 %v2245_v51 }
 0x41e   : > { %v7665_v32 = vpop.f32.mrf.mxu0  ;;  %v2498_v22 = vpop.f32.mrf.mxu2  ;;  %v2496_v2 = vadd.f32 %v2495_v12, %v2383_v55  ;;  %v2266_v12 = vld [vmem:[#allocation3 + $0x8b0] sm:$0xff] }
 0x41f   : > { %v2605_v40 = vpop.f32.mrf.mxu3  ;;  %10313 = vst [vmem:[#allocation15_spill] sm:$0xff] %v7665_v32  ;;  %3087 = vmatpush.msra.mxu0 %v2244_v28  ;;  %v7683_v28 = vld [vmem:[#allocation2 + $0xc1] sm:$0xff]  ;;  %3194 = vmatpush.msra.mxu1 %v2266_v12 }
 0x420   : > { %v7667_v48 = vadd.f32 %v2605_v40, %v2493_v37  ;;  %v10319_v12 = vld [vmem:[#allocation30_spill] sm:$0xff] }
 0x421   : > { %v2385_v45 = vpop.f32.mrf.mxu1  ;;  %2720 = vmatmul.f32.gmra.mxu0 %v7535_v49  ;;  %v10325_v32 = vld [vmem:[#allocation10_spill] sm:$0xff] }
 0x422   : > { %10314 = vst [vmem:[#allocation36_spill] sm:$0xff] %v7667_v48  ;;  %v2386_v51 = vadd.f32 %v7646_v63, %v2385_v45  ;;  %v7686_v48 = vld [vmem:[#allocation2 + $0xca] sm:$0xff] }
 0x423   : > { %2904 = vmatmul.f32.gmra.mxu2 %v7674_v7 }
 0x424   : > { %2788 = vmatmul.f32.gmra.mxu1 %v7671_v26  ;;  %3011 = vmatmul.f32.gmra.mxu3 %v2047_v33  ;;  %v2048_v33 = vld [vmem:[#allocation2 + $0xc8] sm:$0xff]  ;;  %v2499_v55 = vadd.f32 %v2498_v22, %v2386_v51  ;;  %v7700_v22 = vld [vmem:[#allocation2 + $0xda] sm:$0xff] }
 0x425   : > { %v3664_v51 = vld [vmem:[#allocation3 + $0x968] sm:$0xff] }
 0x426   : > { %v7677_v37 = vpop.f32.mrf.mxu0  ;;  %v2501_v49 = vpop.f32.mrf.mxu2  ;;  %3802 = vmatpush.msra.mxu2 %v3664_v51  ;;  %v2302_v51 = vadd.f32 %v7646_v63, %v7373_v0  ;;  %v2021_v0 = vld [vmem:[#allocation2 + $0xf2] sm:$0xff] }
 0x427   : > { %v2608_v60 = vpop.f32.mrf.mxu3  ;;  %10315 = vst [vmem:[#allocation59_spill] sm:$0xff] %v7677_v37 }
 0x428   : > { %v7679_v57 = vadd.f32 %v2608_v60, %v2496_v2  ;;  %v2415_v42 = vadd.f32 %v10325_v32, %v2302_v51 }
 0x429   : > { %v2388_v40 = vpop.f32.mrf.mxu1  ;;  %2723 = vmatmul.f32.gmra.mxu0 %v7547_v11 }
 0x42a   : > { %10316 = vst [vmem:[#allocation58_spill] sm:$0xff] %v7679_v57  ;;  %v7693_v57 = vld [vmem:[#allocation2 + $0x180] sm:$0xff]  ;;  %v2389_v1 = vadd.f32 %v7646_v63, %v2388_v40 }
 0x42b   : > { %2907 = vmatmul.f32.gmra.mxu2 %v7686_v48 }
 0x42c   : > { %2791 = vmatmul.f32.gmra.mxu1 %v7683_v28  ;;  %3014 = vmatmul.f32.gmra.mxu3 %v2048_v33  ;;  %v7697_v33 = vld [vmem:[#allocation2 + $0xc9] sm:$0xff] }
 0x42e   : > { %v7689_v2 = vpop.f32.mrf.mxu0  ;;  %v2504_v45 = vpop.f32.mrf.mxu2 }
 0x42f   : > { %v2611_v23 = vpop.f32.mrf.mxu3  ;;  %10317 = vst [vmem:[#allocation16_spill] sm:$0xff] %v7689_v2  ;;  %v7709_v2 = vld [vmem:[#allocation2 + $0x188] sm:$0xff] }
 0x430   : > { %v7691_v60 = vadd.f32 %v2611_v23, %v2499_v55  ;;  %v2299_v55 = vadd.f32 %v7646_v63, %v10319_v12  ;;  %v2502_v23 = vadd.f32 %v2501_v49, %v2389_v1  ;;  %v2050_v12 = vld [vmem:[#allocation2 + $0xe0] sm:$0xff]  ;;  %v2265_v49 = vld [vmem:[#allocation3 + $0x8a8] sm:$0xff] }
 0x431   : > { %v2391_v11 = vpop.f32.mrf.mxu1  ;;  %2726 = vmatmul.f32.gmra.mxu0 %v7693_v57  ;;  %v7717_v1 = vld [vmem:[#allocation2 + $0xe2] sm:$0xff]  ;;  %3195 = vmatpush.msra.mxu1 %v2265_v49 }
 0x432   : > { %10318 = vst [vmem:[#allocation37_spill] sm:$0xff] %v7691_v60  ;;  %v2392_v37 = vadd.f32 %v7646_v63, %v2391_v11  ;;  %v7730_v49 = vld [vmem:[#allocation2 + $0xe1] sm:$0xff]  ;;  %v10326_v63 = vld [vmem:[#allocation29_spill] sm:$0xff] }
 0x433   : > { %2910 = vmatmul.f32.gmra.mxu2 %v7700_v22 }
 0x434   : > { %2794 = vmatmul.f32.gmra.mxu1 %v7697_v33  ;;  %3017 = vmatmul.f32.gmra.mxu3 %v2049_v24  ;;  %v10322_v24 = vld [vmem:[#allocation40_spill] sm:$0xff]  ;;  %v2505_v11 = vadd.f32 %v2504_v45, %v2392_v37 }
 0x435   : > { %v2412_v9 = vadd.f32 %v10322_v24, %v2299_v55 }
 0x436   : > { %v7705_v40 = vpop.f32.mrf.mxu0  ;;  %v2863_v44 = vpop.f32.mrf.mxu2 }
 0x437   : > { %v2614_v60 = vpop.f32.mrf.mxu3  ;;  %10320 = vst [vmem:[#allocation61_spill] sm:$0xff] %v7705_v40 }
 0x438   : > { %v7707_v50 = vadd.f32 %v2614_v60, %v2502_v23  ;;  %v2525_v60 = vadd.f32 %v7382_v16, %v2412_v9  ;;  %v2051_v16 = vld [vmem:[#allocation2 + $0xf0] sm:$0xff] }
 0x439   : > { %v2750_v36 = vpop.f32.mrf.mxu1  ;;  %2729 = vmatmul.f32.gmra.mxu0 %v7709_v2  ;;  %v3663_v9 = vld [vmem:[#allocation3 + $0x960] sm:$0xff] }
 0x43a   : > { %10321 = vst [vmem:[#allocation17_spill] sm:$0xff] %v7707_v50  ;;  %v2638_v24 = vadd.f32 %v7555_v21, %v2525_v60  ;;  %v2528_v21 = vadd.f32 %v10326_v63, %v2415_v42  ;;  %3803 = vmatpush.msra.mxu2 %v3663_v9  ;;  %v2052_v42 = vld [vmem:[#allocation2 + $0xf8] sm:$0xff] }
 0x43b   : > { %2913 = vmatmul.f32.gmra.mxu2 %v7717_v1 }
 0x43c   : > { %2797 = vmatmul.f32.gmra.mxu1 %v7714_v62  ;;  %3020 = vmatmul.f32.gmra.mxu3 %v2050_v12  ;;  %v2751_v39 = vadd.f32 %v2750_v36, %v2638_v24  ;;  %v2641_v36 = vadd.f32 %v7561_v29, %v2528_v21  ;;  %v2264_v29 = vld [vmem:[#allocation3 + $0x8a0] sm:$0xff] }
 0x43d   : > { %3196 = vmatpush.msra.mxu1 %v2264_v29 }
 0x43e   : > { %v7723_v23 = vpop.f32.mrf.mxu0  ;;  %v2866_v12 = vpop.f32.mrf.mxu2  ;;  %v2864_v37 = vadd.f32 %v2863_v44, %v2751_v39  ;;  %v2022_v39 = vld [vmem:[#allocation2 + $0xfa] sm:$0xff] }
 0x43f   : > { %v2617_v55 = vpop.f32.mrf.mxu3  ;;  %10323 = vst [vmem:[#allocation38_spill] sm:$0xff] %v7723_v23 }
 0x440   : > { %v7726_v50 = vadd.f32 %v2617_v55, %v2505_v11 }
 0x441   : > { %v2753_v40 = vpop.f32.mrf.mxu1  ;;  %3088 = vmatmul.f32.vlgmr.msra.gmra.mxu0 %v7567_v34  ;;  %v2644_v34 = vadd.f32 %v7570_v5, %v7410_v43 }
 0x442   : > { %10324 = vst [vmem:[#allocation62_spill] sm:$0xff] %v7726_v50  ;;  %v2754_v55 = vadd.f32 %v2753_v40, %v2641_v36  ;;  %v2647_v40 = vadd.f32 %v7579_v31, %v7422_v58  ;;  %v2023_v36 = vld [vmem:[#allocation2 + $0x10a] sm:$0xff]  ;;  %v2650_v31 = vadd.f32 %v7588_v30, %v7434_v19  ;;  %v2653_v30 = vadd.f32 %v7597_v27, %v7446_v20 }
 0x443   : > { %2916 = vmatmul.f32.gmra.mxu2 %v2021_v0  ;;  %v2656_v27 = vadd.f32 %v7606_v47, %v7458_v10  ;;  %v2659_v47 = vadd.f32 %v7615_v61, %v7470_v13 }
 0x444   : > { %2800 = vmatmul.f32.gmra.mxu1 %v7730_v49  ;;  %3023 = vmatmul.f32.gmra.mxu3 %v2051_v16  ;;  %v7742_v16 = vld [vmem:[#allocation2 + $0xf1] sm:$0xff]  ;;  %v2867_v43 = vadd.f32 %v2866_v12, %v2754_v55 }
 0x446   : > { %v7734_v45 = vpop.f32.mrf.mxu0  ;;  %v2869_v51 = vpop.f32.mrf.mxu2 }
 0x447   : > { %10327 = vst [vmem:[#allocation18_spill] sm:$0xff] %v7734_v45  ;;  %v2976_v60 = vpop.f32.mrf.mxu3 }
 0x448   : > { %v7739_v32 = vadd.f32 %v2976_v60, %v2864_v37  ;;  %v7752_v37 = vld [vmem:[#allocation2 + $0xf9] sm:$0xff]  ;;  %v2053_v60 = vld [vmem:[#allocation2 + $0x108] sm:$0xff] }
 0x449   : > { %v2756_v11 = vpop.f32.mrf.mxu1  ;;  %3091 = vmatmul.f32.gmra.mxu0 %v7576_v8 }
 0x44a   : > { %v2757_v24 = vadd.f32 %v2756_v11, %v2644_v34  ;;  %v3662_v34 = vld [vmem:[#allocation3 + $0x958] sm:$0xff] }
 0x44b   : > { %2919 = vmatmul.f32.gmra.mxu2 %v2022_v39  ;;  %v2054_v39 = vld [vmem:[#allocation2 + $0x110] sm:$0xff] }
 0x44c   : > { %2803 = vmatmul.f32.gmra.mxu1 %v7742_v16  ;;  %3026 = vmatmul.f32.gmra.mxu3 %v2052_v42  ;;  %v2870_v44 = vadd.f32 %v2869_v51, %v2757_v24  ;;  %v7762_v42 = vld [vmem:[#allocation2 + $0x109] sm:$0xff] }
 0x44d   : > { %3804 = vmatpush.msra.mxu2 %v3662_v34  ;;  %v2025_v34 = vld [vmem:[#allocation2 + $0x122] sm:$0xff] }
 0x44e   : > { %v7745_v5 = vpop.f32.mrf.mxu0  ;;  %v2872_v8 = vpop.f32.mrf.mxu2 }
 0x44f   : > { %10328 = vst [vmem:[#allocation39_spill] sm:$0xff] %v7745_v5  ;;  %v2979_v0 = vpop.f32.mrf.mxu3  ;;  %v2103_v5 = vld [vmem:[#allocation2 + $0x62] sm:$0xff] }
 0x450   : > { %v7749_v9 = vadd.f32 %v2979_v0, %v2867_v43  ;;  %v2024_v43 = vld [vmem:[#allocation2 + $0x112] sm:$0xff]  ;;  %v2263_v0 = vld [vmem:[#allocation3 + $0x898] sm:$0xff] }
 0x451   : > { %v2759_v63 = vpop.f32.mrf.mxu1  ;;  %3094 = vmatmul.f32.gmra.mxu0 %v7585_v3  ;;  %3197 = vmatpush.msra.mxu1 %v2263_v0  ;;  %v2026_v0 = vld [vmem:[#allocation2 + $0x12a] sm:$0xff] }
 0x452   : > { %v2760_v21 = vadd.f32 %v2759_v63, %v2647_v40 }
 0x453   : > { %2922 = vmatmul.f32.gmra.mxu2 %v2023_v36 }
 0x454   : > { %2806 = vmatmul.f32.gmra.mxu1 %v7752_v37  ;;  %3029 = vmatmul.f32.gmra.mxu3 %v2053_v60  ;;  %v2873_v12 = vadd.f32 %v2872_v8, %v2760_v21  ;;  %v7772_v21 = vld [vmem:[#allocation2 + $0x111] sm:$0xff]  ;;  %v2055_v60 = vld [vmem:[#allocation2 + $0x120] sm:$0xff] }
 0x456   : > { %v7755_v51 = vpop.f32.mrf.mxu0  ;;  %v2875_v3 = vpop.f32.mrf.mxu2 }
 0x457   : > { %10329 = vst [vmem:[#allocation64_spill] sm:$0xff] %v7755_v51  ;;  %v2982_v58 = vpop.f32.mrf.mxu3  ;;  %v3678_v51 = vld [vmem:[#allocation3 + $0x9d8] sm:$0xff] }
 0x458   : > { %v7759_v11 = vadd.f32 %v2982_v58, %v2870_v44  ;;  %v3661_v58 = vld [vmem:[#allocation3 + $0x950] sm:$0xff] }
 0x459   : > { %v2762_v55 = vpop.f32.mrf.mxu1  ;;  %3097 = vmatmul.f32.gmra.mxu0 %v7594_v4  ;;  %3805 = vmatpush.msra.mxu2 %v3661_v58  ;;  %v2027_v58 = vld [vmem:[#allocation2 + $0x13a] sm:$0xff] }
 0x45a   : > { %v2763_v24 = vadd.f32 %v2762_v55, %v2650_v31 }
 0x45b   : > { %2925 = vmatmul.f32.gmra.mxu2 %v2024_v43 }
 0x45c   : > { %2809 = vmatmul.f32.gmra.mxu1 %v7762_v42  ;;  %3032 = vmatmul.f32.gmra.mxu3 %v2054_v39  ;;  %v2876_v29 = vadd.f32 %v2875_v3, %v2763_v24  ;;  %v7782_v24 = vld [vmem:[#allocation2 + $0x121] sm:$0xff] }
 0x45d   : > { %v2056_v39 = vld [vmem:[#allocation2 + $0x128] sm:$0xff] }
 0x45e   : > { %v7765_v40 = vpop.f32.mrf.mxu0  ;;  %v2878_v4 = vpop.f32.mrf.mxu2 }
 0x45f   : > { %10330 = vst [vmem:[#allocation63_spill] sm:$0xff] %v7765_v40  ;;  %v2985_v19 = vpop.f32.mrf.mxu3  ;;  %v3654_v40 = vld [vmem:[#allocation3 + $0x918] sm:$0xff] }
 0x460   : > { %v7769_v44 = vadd.f32 %v2985_v19, %v2873_v12  ;;  %v2262_v19 = vld [vmem:[#allocation3 + $0x890] sm:$0xff] }
 0x461   : > { %v2765_v8 = vpop.f32.mrf.mxu1  ;;  %3100 = vmatmul.f32.gmra.mxu0 %v7603_v41  ;;  %3198 = vmatpush.msra.mxu1 %v2262_v19 }
 0x462   : > { %v2766_v63 = vadd.f32 %v2765_v8, %v2653_v30  ;;  %v7792_v8 = vld [vmem:[#allocation2 + $0x129] sm:$0xff] }
 0x463   : > { %2928 = vmatmul.f32.gmra.mxu2 %v2025_v34 }
 0x464   : > { %2812 = vmatmul.f32.gmra.mxu1 %v7772_v21  ;;  %3035 = vmatmul.f32.gmra.mxu3 %v2055_v60  ;;  %v2879_v36 = vadd.f32 %v2878_v4, %v2766_v63  ;;  %v2057_v63 = vld [vmem:[#allocation2 + $0x138] sm:$0xff] }
 0x466   : > { %v7775_v31 = vpop.f32.mrf.mxu0  ;;  %v2881_v3 = vpop.f32.mrf.mxu2 }
 0x467   : > { %10331 = vst [vmem:[#allocation19_spill] sm:$0xff] %v7775_v31  ;;  %v2988_v20 = vpop.f32.mrf.mxu3 }
 0x468   : > { %v7779_v12 = vadd.f32 %v2988_v20, %v2876_v29  ;;  %v3660_v20 = vld [vmem:[#allocation3 + $0x948] sm:$0xff] }
 0x469   : > { %v2768_v41 = vpop.f32.mrf.mxu1  ;;  %3103 = vmatmul.f32.gmra.mxu0 %v7612_v35  ;;  %3806 = vmatpush.msra.mxu2 %v3660_v20 }
 0x46a   : > { %v2769_v55 = vadd.f32 %v2768_v41, %v2656_v27  ;;  %v2058_v41 = vld [vmem:[#allocation2 + $0x140] sm:$0xff] }
 0x46b   : > { %2931 = vmatmul.f32.gmra.mxu2 %v2026_v0 }
 0x46c   : > { %2815 = vmatmul.f32.gmra.mxu1 %v7782_v24  ;;  %3038 = vmatmul.f32.gmra.mxu3 %v2056_v39  ;;  %v2882_v43 = vadd.f32 %v2881_v3, %v2769_v55  ;;  %v2028_v3 = vld [vmem:[#allocation2 + $0x142] sm:$0xff]  ;;  %v2261_v55 = vld [vmem:[#allocation3 + $0x888] sm:$0xff] }
 0x46d   : > { %3199 = vmatpush.msra.mxu1 %v2261_v55  ;;  %v3658_v55 = vld [vmem:[#allocation3 + $0x938] sm:$0xff] }
 0x46e   : > { %v7785_v30 = vpop.f32.mrf.mxu0  ;;  %v2884_v60 = vpop.f32.mrf.mxu2 }
 0x46f   : > { %10332 = vst [vmem:[#allocation41_spill] sm:$0xff] %v7785_v30  ;;  %v2991_v10 = vpop.f32.mrf.mxu3  ;;  %v2101_v30 = vld [vmem:[#allocation2 + $0x4a] sm:$0xff] }
 0x470   : > { %v7789_v29 = vadd.f32 %v2991_v10, %v2879_v36  ;;  %v2059_v10 = vld [vmem:[#allocation2 + $0x150] sm:$0xff] }
 0x471   : > { %v2771_v35 = vpop.f32.mrf.mxu1  ;;  %3106 = vmatmul.f32.gmra.mxu0 %v7621_v14  ;;  %v7802_v14 = vld [vmem:[#allocation2 + $0x139] sm:$0xff] }
 0x472   : > { %v2772_v4 = vadd.f32 %v2771_v35, %v2659_v47  ;;  %v2029_v47 = vld [vmem:[#allocation2 + $0x152] sm:$0xff] }
 0x473   : > { %2934 = vmatmul.f32.gmra.mxu2 %v2027_v58  ;;  %v3659_v35 = vld [vmem:[#allocation3 + $0x940] sm:$0xff] }
 0x474   : > { %2818 = vmatmul.f32.gmra.mxu1 %v7792_v8  ;;  %3041 = vmatmul.f32.gmra.mxu3 %v2057_v63  ;;  %v2885_v34 = vadd.f32 %v2884_v60, %v2772_v4  ;;  %v7820_v60 = vld [vmem:[#allocation2 + $0x151] sm:$0xff] }
 0x475   : > { %3807 = vmatpush.msra.mxu2 %v3659_v35  ;;  %v2260_v58 = vld [vmem:[#allocation3 + $0x880] sm:$0xff] }
 0x476   : > { %v7795_v27 = vpop.f32.mrf.mxu0  ;;  %3200 = vmatpush.msra.mxu1 %v2260_v58  ;;  %v7836_v35 = vld [vmem:[#allocation2 + $0x169] sm:$0xff] }
 0x477   : > { %10333 = vst [vmem:[#allocation65_spill] sm:$0xff] %v7795_v27  ;;  %v2994_v13 = vpop.f32.mrf.mxu3  ;;  %3808 = vmatpush.msra.mxu2 %v3658_v55  ;;  %v3681_v55 = vld [vmem:[#allocation3 + $0x9f0] sm:$0xff] }
 0x478   : > { %v7797_v61 = vadd.f32 %v2994_v13, %v2882_v43 }
 0x479   : > { %v7799_v36 = vpop.f32.mrf.mxu1  ;;  %3109 = vmatmul.f32.gmra.mxu0 %v7630_v25  ;;  %v7812_v25 = vld [vmem:[#allocation2 + $0x141] sm:$0xff] }
 0x47b   : > { %2937 = vmatmul.f32.gmra.mxu2 %v2028_v3  ;;  %v2061_v3 = vld [vmem:[#allocation2 + $0x168] sm:$0xff] }
 0x47c   : > { %2821 = vmatmul.f32.gmra.mxu1 %v7802_v14  ;;  %3044 = vmatmul.f32.gmra.mxu3 %v2058_v41  ;;  %v7828_v41 = vld [vmem:[#allocation2 + $0x159] sm:$0xff] }
 0x47e   : > { %v7805_v39 = vpop.f32.mrf.mxu0 }
 0x47f   : > { %10334 = vst [vmem:[#allocation20_spill] sm:$0xff] %v7805_v39  ;;  %v2997_v0 = vpop.f32.mrf.mxu3  ;;  %v7890_v39 = vpop.f32.mrf.mxu2 }
 0x480   : > { %v7807_v19 = vadd.f32 %v2997_v0, %v2885_v34  ;;  %v2060_v34 = vld [vmem:[#allocation2 + $0x158] sm:$0xff]  ;;  %v3682_v0 = vld [vmem:[#allocation3 + $0x9f8] sm:$0xff] }
 0x481   : > { %v7809_v43 = vpop.f32.mrf.mxu1  ;;  %3112 = vmatmul.f32.gmra.mxu0 %v7639_v53  ;;  %v2030_v53 = vld [vmem:[#allocation2 + $0x15a] sm:$0xff]  ;;  %3913 = vmatpush.msra.mxu3 %v3682_v0 }
 0x483   : > { %2940 = vmatmul.f32.gmra.mxu2 %v2029_v47  ;;  %3914 = vmatpush.msra.mxu3 %v3681_v55 }
 0x484   : > { %2824 = vmatmul.f32.gmra.mxu1 %v7812_v25  ;;  %3047 = vmatmul.f32.gmra.mxu3 %v2059_v10 }
 0x486   : > { %v7815_v4 = vpop.f32.mrf.mxu0 }
 0x487   : > { %10335 = vst [vmem:[#allocation44_spill] sm:$0xff] %v7815_v4 }
 0x489   : > { %v7817_v63 = vpop.f32.mrf.mxu1  ;;  %3115 = vmatmul.f32.gmra.mxu0 %v7650_v38  ;;  %v2031_v38 = vld [vmem:[#allocation2 + $0x16a] sm:$0xff] }
 0x48b   : > { %2943 = vmatmul.f32.gmra.mxu2 %v2030_v53 }
 0x48c   : > { %2827 = vmatmul.f32.gmra.mxu1 %v7820_v60  ;;  %3050 = vmatmul.f32.gmra.mxu3 %v2060_v34  ;;  %v7839_v34 = vld [vmem:[#allocation2 + $0x172] sm:$0xff] }
 0x48e   : > { %v7823_v20 = vpop.f32.mrf.mxu0 }
 0x48f   : > { %10336 = vst [vmem:[#allocation68_spill] sm:$0xff] %v7823_v20 }
 0x491   : > { %v7825_v13 = vpop.f32.mrf.mxu1  ;;  %3118 = vmatmul.f32.gmra.mxu0 %v7659_v6  ;;  %v2062_v6 = vld [vmem:[#allocation2 + $0x170] sm:$0xff] }
 0x493   : > { %2946 = vmatmul.f32.gmra.mxu2 %v2031_v38  ;;  %v3657_v38 = vld [vmem:[#allocation3 + $0x930] sm:$0xff] }
 0x494   : > { %2830 = vmatmul.f32.gmra.mxu1 %v7828_v41  ;;  %3053 = vmatmul.f32.gmra.mxu3 %v2061_v3  ;;  %v7847_v3 = vld [vmem:[#allocation2 + $0x171] sm:$0xff] }
 0x495   : > { %3809 = vmatpush.msra.mxu2 %v3657_v38  ;;  %v7871_v38 = vld [vmem:[#allocation2 + $0x189] sm:$0xff] }
 0x496   : > { %v7831_v10 = vpop.f32.mrf.mxu0 }
 0x497   : > { %10337 = vst [vmem:[#allocation67_spill] sm:$0xff] %v7831_v10 }
 0x499   : > { %v7833_v47 = vpop.f32.mrf.mxu1  ;;  %3121 = vmatmul.f32.gmra.mxu0 %v7671_v26  ;;  %v7851_v26 = vld [vmem:[#allocation2 + $0x182] sm:$0xff] }
 0x49a   : > { %10340 = vst [vmem:[#allocation47_spill] sm:$0xff] %v7851_v26 }
 0x49b   : > { %2949 = vmatmul.f32.gmra.mxu2 %v7839_v34 }
 0x49c   : > { %2833 = vmatmul.f32.gmra.mxu1 %v7836_v35  ;;  %3056 = vmatmul.f32.gmra.mxu3 %v2062_v6 }
 0x49e   : > { %v7842_v53 = vpop.f32.mrf.mxu0 }
 0x49f   : > { %10338 = vst [vmem:[#allocation66_spill] sm:$0xff] %v7842_v53 }
 0x4a1   : > { %v7844_v58 = vpop.f32.mrf.mxu1  ;;  %3124 = vmatmul.f32.gmra.mxu0 %v7683_v28  ;;  %v7859_v28 = vld [vmem:[#allocation2 + $0x181] sm:$0xff] }
 0x4a2   : > { %10339 = vst [vmem:[#allocation21_spill] sm:$0xff] %v7844_v58 }
 0x4a3   : > { %2952 = vmatmul.f32.gmra.mxu2 %v7851_v26  ;;  %v3651_v26 = vld [vmem:[#allocation3 + $0x900] sm:$0xff] }
 0x4a4   : > { %2836 = vmatmul.f32.gmra.mxu1 %v7847_v3  ;;  %3059 = vmatmul.f32.gmra.mxu3 %v7693_v57  ;;  %v7863_v57 = vld [vmem:[#allocation2 + $0x18a] sm:$0xff] }
 0x4a5   : > { %10343 = vst [vmem:[#allocation23_spill] sm:$0xff] %v7863_v57 }
 0x4a6   : > { %v7854_v0 = vpop.f32.mrf.mxu0 }
 0x4a7   : > { %10341 = vst [vmem:[#allocation22_spill] sm:$0xff] %v7854_v0  ;;  %v3656_v0 = vld [vmem:[#allocation3 + $0x928] sm:$0xff] }
 0x4a8   : > { %3810 = vmatpush.msra.mxu2 %v3656_v0  ;;  %v2100_v0 = vld [vmem:[#allocation2 + $0x3a] sm:$0xff] }
 0x4a9   : > { %v7856_v6 = vpop.f32.mrf.mxu1  ;;  %3127 = vmatmul.f32.gmra.mxu0 %v7697_v33  ;;  %v7874_v33 = vld [vmem:[#allocation2] sm:$0xff] }
 0x4aa   : > { %10342 = vst [vmem:[#allocation50_spill] sm:$0xff] %v7856_v6  ;;  %v2107_v6 = vld [vmem:[#allocation2 + $0x92] sm:$0xff] }
 0x4ab   : > { %2955 = vmatmul.f32.gmra.mxu2 %v7863_v57 }
 0x4ac   : > { %2839 = vmatmul.f32.gmra.mxu1 %v7859_v28  ;;  %3062 = vmatmul.f32.gmra.mxu3 %v7709_v2  ;;  %v3680_v2 = vld [vmem:[#allocation3 + $0x9e8] sm:$0xff] }
 0x4ad   : > { %3915 = vmatpush.msra.mxu3 %v3680_v2  ;;  %v3655_v2 = vld [vmem:[#allocation3 + $0x920] sm:$0xff] }
 0x4ae   : > { %v7866_v50 = vpop.f32.mrf.mxu0  ;;  %3811 = vmatpush.msra.mxu2 %v3655_v2  ;;  %v2102_v2 = vld [vmem:[#allocation2 + $0x52] sm:$0xff] }
 0x4af   : > { %10344 = vst [vmem:[#allocation53_spill] sm:$0xff] %v7866_v50  ;;  %v2099_v50 = vld [vmem:[#allocation2 + $0x32] sm:$0xff] }
 0x4b0   : > { %3812 = vmatpush.msra.mxu2 %v3654_v40  ;;  %v2104_v40 = vld [vmem:[#allocation2 + $0x6a] sm:$0xff] }
 0x4b1   : > { %v7868_v55 = vpop.f32.mrf.mxu1  ;;  %3130 = vmatmul.f32.gmra.mxu0 %v7714_v62  ;;  %v7883_v62 = vpop.f32.mrf.mxu3 }
 0x4b2   : > { %10345 = vst [vmem:[#allocation24_spill] sm:$0xff] %v7868_v55  ;;  %v3676_v55 = vld [vmem:[#allocation3 + $0x9c8] sm:$0xff] }
 0x4b4   : > { %2842 = vmatmul.f32.gmra.mxu1 %v7871_v38  ;;  %3065 = vmatmul.f32.gmra.mxu3 %v7874_v33 }
 0x4b6   : > { %v7877_v53 = vpop.f32.mrf.mxu0 }
 0x4b7   : > { %10346 = vst [vmem:[#allocation55_spill] sm:$0xff] %v7877_v53  ;;  %v3679_v53 = vld [vmem:[#allocation3 + $0x9e0] sm:$0xff] }
 0x4b8   : > { %3916 = vmatpush.msra.mxu3 %v3679_v53 }
 0x4b9   : > { %v7879_v10 = vpop.f32.mrf.mxu1  ;;  %3133 = vmatmul.f32.gmra.mxu0 %v7730_v49  ;;  %v7894_v27 = vpop.f32.mrf.mxu3 }
 0x4ba   : > { %10347 = vst [vmem:[#allocation25_spill] sm:$0xff] %v7879_v10  ;;  %3917 = vmatpush.msra.mxu3 %v3678_v51  ;;  %v3653_v51 = vld [vmem:[#allocation3 + $0x910] sm:$0xff] }
 0x4bb   : > { %3813 = vmatpush.msra.mxu2 %v3653_v51  ;;  %v2105_v10 = vld [vmem:[#allocation2 + $0x7a] sm:$0xff]  ;;  %v2106_v51 = vld [vmem:[#allocation2 + $0x82] sm:$0xff] }
 0x4bc   : > { %3068 = vmatmul.f32.gmra.mxu3 %v7874_v33  ;;  %3201 = vmatmul.f32.vlgmr.msra.gmra.mxu1 %v2099_v50 }
 0x4be   : > { %v7885_v20 = vpop.f32.mrf.mxu0 }
 0x4c1   : > { %v7887_v4 = vpop.f32.mrf.mxu1  ;;  %3136 = vmatmul.f32.gmra.mxu0 %v7742_v16  ;;  %v7901_v16 = vpop.f32.mrf.mxu2 }
 0x4c2   : > { %10348 = vst [vmem:[#allocation56_spill] sm:$0xff] %v7887_v4  ;;  %v7906_v53 = vpop.f32.mrf.mxu3 }
 0x4c4   : > { %3204 = vmatmul.f32.gmra.mxu1 %v2100_v0 }
 0x4c6   : > { %v7892_v49 = vpop.f32.mrf.mxu0 }
 0x4c9   : > { %v7896_v50 = vpop.f32.mrf.mxu1  ;;  %3139 = vmatmul.f32.gmra.mxu0 %v7752_v37 }
 0x4ca   : > { %10349 = vst [vmem:[#allocation26_spill] sm:$0xff] %v7896_v50 }
 0x4cc   : > { %3207 = vmatmul.f32.gmra.mxu1 %v2101_v30  ;;  %v7913_v30 = vpop.f32.mrf.mxu2 }
 0x4ce   : > { %v7899_v31 = vpop.f32.mrf.mxu0 }
 0x4d1   : > { %v7903_v0 = vpop.f32.mrf.mxu1  ;;  %3142 = vmatmul.f32.gmra.mxu0 %v7762_v42 }
 0x4d2   : > { %10350 = vst [vmem:[#allocation57_spill] sm:$0xff] %v7903_v0  ;;  %v7915_v0 = vpop.f32.mrf.mxu3 }
 0x4d4   : > { %3210 = vmatmul.f32.gmra.mxu1 %v2102_v2  ;;  %v3677_v2 = vld [vmem:[#allocation3 + $0x9d0] sm:$0xff]  ;;  %v7922_v45 = vpop.f32.mrf.mxu2 }
 0x4d5   : > { %3918 = vmatpush.msra.mxu3 %v3677_v2  ;;  %v3652_v2 = vld [vmem:[#allocation3 + $0x908] sm:$0xff] }
 0x4d6   : > { %v7908_v50 = vpop.f32.mrf.mxu0  ;;  %3814 = vmatpush.msra.mxu2 %v3652_v2  ;;  %v2108_v2 = vld [vmem:[#allocation2 + $0x9a] sm:$0xff] }
 0x4d7   : > { %3919 = vmatpush.msra.mxu3 %v3676_v55 }
 0x4d8   : > { %3815 = vmatpush.msra.mxu2 %v3651_v26  ;;  %v3671_v26 = vld [vmem:[#allocation3 + $0x9a0] sm:$0xff] }
 0x4d9   : > { %v7910_v37 = vpop.f32.mrf.mxu1  ;;  %3145 = vmatmul.f32.gmra.mxu0 %v7772_v21  ;;  %3816 = vmatmul.f32.vlgmr.msra.gmra.mxu2 %v7874_v33 }
 0x4da   : > { %10351 = vst [vmem:[#allocation42_spill] sm:$0xff] %v7910_v37  ;;  %v7924_v21 = vpop.f32.mrf.mxu3 }
 0x4dc   : > { %3213 = vmatmul.f32.gmra.mxu1 %v2103_v5 }
 0x4de   : > { %v7917_v42 = vpop.f32.mrf.mxu0 }
 0x4e1   : > { %v7919_v4 = vpop.f32.mrf.mxu1  ;;  %3148 = vmatmul.f32.gmra.mxu0 %v7782_v24  ;;  %3819 = vmatmul.f32.gmra.mxu2 %v7874_v33  ;;  %v3730_v33 = vld [vmem:[#allocation3 + $0xb78] sm:$0xff] }
 0x4e2   : > { %10352 = vst [vmem:[#allocation27_spill] sm:$0xff] %v7919_v4  ;;  %v7931_v4 = vpop.f32.mrf.mxu2  ;;  %4252 = vmatpush.msrb.mxu2 %v3730_v33 }
 0x4e4   : > { %3216 = vmatmul.f32.gmra.mxu1 %v2104_v40  ;;  %v7935_v40 = vpop.f32.mrf.mxu3 }
 0x4e5   : > { %10354 = vst [vmem:[#allocation43_spill] sm:$0xff] %v7935_v40  ;;  %v3675_v40 = vld [vmem:[#allocation3 + $0x9c0] sm:$0xff] }
 0x4e6   : > { %v7926_v37 = vpop.f32.mrf.mxu0  ;;  %3920 = vmatpush.msra.mxu3 %v3675_v40  ;;  %v3694_v40 = vld [vmem:[#allocation3 + $0xa58] sm:$0xff] }
 0x4e9   : > { %v7928_v5 = vpop.f32.mrf.mxu1  ;;  %3151 = vmatmul.f32.gmra.mxu0 %v7792_v8 }
 0x4ea   : > { %10353 = vst [vmem:[#allocation60_spill] sm:$0xff] %v7928_v5  ;;  %v7942_v8 = vpop.f32.mrf.mxu2 }
 0x4eb   : > { %10356 = vst [vmem:[#allocation9_spill] sm:$0xff] %v7942_v8  ;;  %v2109_v8 = vld [vmem:[#allocation2 + $0xaa] sm:$0xff] }
 0x4ec   : > { %3219 = vmatmul.f32.gmra.mxu1 %v2105_v10  ;;  %v7947_v57 = vpop.f32.mrf.mxu3 }
 0x4ed   : > { %10358 = vst [vmem:[#allocation40_spill] sm:$0xff] %v7947_v57 }
 0x4ee   : > { %v7933_v24 = vpop.f32.mrf.mxu0 }
 0x4f1   : > { %v7937_v23 = vpop.f32.mrf.mxu1  ;;  %3154 = vmatmul.f32.gmra.mxu0 %v7802_v14 }
 0x4f2   : > { %10355 = vst [vmem:[#allocation28_spill] sm:$0xff] %v7937_v23  ;;  %v7954_v55 = vpop.f32.mrf.mxu2 }
 0x4f3   : > { %10360 = vst [vmem:[#allocation29_spill] sm:$0xff] %v7954_v55  ;;  %v3672_v55 = vld [vmem:[#allocation3 + $0x9a8] sm:$0xff] }
 0x4f4   : > { %3222 = vmatmul.f32.gmra.mxu1 %v2106_v51  ;;  %v3698_v51 = vld [vmem:[#allocation3 + $0xa78] sm:$0xff] }
 0x4f5   : > { %4026 = vmatpush.msrb.mxu0 %v3698_v51  ;;  %v3673_v51 = vld [vmem:[#allocation3 + $0x9b0] sm:$0xff] }
 0x4f6   : > { %v7940_v5 = vpop.f32.mrf.mxu0 }
 0x4f9   : > { %v7944_v10 = vpop.f32.mrf.mxu1  ;;  %3157 = vmatmul.f32.gmra.mxu0 %v7812_v25  ;;  %v7956_v25 = vpop.f32.mrf.mxu3 }
 0x4fa   : > { %10357 = vst [vmem:[#allocation30_spill] sm:$0xff] %v7944_v10  ;;  %v3697_v10 = vld [vmem:[#allocation3 + $0xa70] sm:$0xff] }
 0x4fb   : > { %10361 = vst [vmem:[#allocation69_spill] sm:$0xff] %v7956_v25  ;;  %4027 = vmatpush.msrb.mxu0 %v3697_v10  ;;  %v3693_v10 = vld [vmem:[#allocation3 + $0xa50] sm:$0xff]  ;;  %v7964_v25 = vpop.f32.mrf.mxu2 }
 0x4fc   : > { %3225 = vmatmul.f32.gmra.mxu1 %v2107_v6 }
 0x4fe   : > { %v7949_v23 = vpop.f32.mrf.mxu0 }
 0x501   : > { %v7951_v14 = vpop.f32.mrf.mxu1  ;;  %3160 = vmatmul.f32.gmra.mxu0 %v7820_v60  ;;  %v3696_v60 = vld [vmem:[#allocation3 + $0xa68] sm:$0xff]  ;;  %v7966_v58 = vpop.f32.mrf.mxu3 }
 0x502   : > { %10359 = vst [vmem:[#allocation10_spill] sm:$0xff] %v7951_v14  ;;  %v3674_v14 = vld [vmem:[#allocation3 + $0x9b8] sm:$0xff]  ;;  %4028 = vmatpush.msrb.mxu0 %v3696_v60  ;;  %v3692_v60 = vld [vmem:[#allocation3 + $0xa48] sm:$0xff] }
 0x503   : > { %3921 = vmatpush.msra.mxu3 %v3674_v14 }
 0x504   : > { %3228 = vmatmul.f32.gmra.mxu1 %v2108_v2  ;;  %v3695_v2 = vld [vmem:[#allocation3 + $0xa60] sm:$0xff] }
 0x505   : > { %3922 = vmatpush.msra.mxu3 %v3673_v51  ;;  %4029 = vmatpush.msrb.mxu0 %v3695_v2  ;;  %v3691_v2 = vld [vmem:[#allocation3 + $0xa40] sm:$0xff] }
 0x506   : > { %v7958_v6 = vpop.f32.mrf.mxu0 }
 0x507   : > { %3923 = vmatpush.msra.mxu3 %v3672_v55  ;;  %4030 = vmatpush.msrb.mxu0 %v3694_v40  ;;  %v3668_v55 = vld [vmem:[#allocation3 + $0x988] sm:$0xff]  ;;  %v3690_v40 = vld [vmem:[#allocation3 + $0xa38] sm:$0xff] }
 0x509   : > { %v7961_v57 = vpop.f32.mrf.mxu1  ;;  %3163 = vmatmul.f32.gmra.mxu0 %v7828_v41  ;;  %3924 = vmatpush.msra.mxu3 %v3671_v26  ;;  %v3670_v41 = vld [vmem:[#allocation3 + $0x998] sm:$0xff]  ;;  %v3667_v26 = vld [vmem:[#allocation3 + $0x980] sm:$0xff] }
 0x50a   : > { %10362 = vst [vmem:[#allocation70_spill] sm:$0xff] %v7961_v57  ;;  %4031 = vmatpush.msrb.mxu0 %v3693_v10  ;;  %v3689_v10 = vld [vmem:[#allocation3 + $0xa30] sm:$0xff] }
 0x50b   : > { %3925 = vmatpush.msra.mxu3 %v3670_v41  ;;  %v3394_v57 = vld [vmem:[#allocation2 + $0x1] sm:$0xff] }
 0x50c   : > { %3231 = vmatmul.f32.gmra.mxu1 %v2109_v8  ;;  %4032 = vmatpush.msrb.mxu0 %v3692_v60  ;;  %v3669_v8 = vld [vmem:[#allocation3 + $0x990] sm:$0xff]  ;;  %v7979_v60 = vpop.f32.mrf.mxu3 }
 0x50d   : > { %3926 = vmatpush.msra.mxu3 %v3669_v8 }
 0x50e   : > { %v7968_v14 = vpop.f32.mrf.mxu0  ;;  %4033 = vmatpush.msrb.mxu0 %v3691_v2  ;;  %v3714_v2 = vld [vmem:[#allocation3 + $0xaf8] sm:$0xff] }
 0x50f   : > { %3927 = vmatpush.msra.mxu3 %v3668_v55  ;;  %4139 = vmatpush.msrb.mxu1 %v3714_v2 }
 0x510   : > { %4034 = vmatpush.msrb.mxu0 %v3690_v40  ;;  %v3686_v40 = vld [vmem:[#allocation3 + $0xa18] sm:$0xff] }
 0x511   : > { %v7971_v51 = vpop.f32.mrf.mxu1  ;;  %3166 = vmatmul.f32.gmra.mxu0 %v7836_v35  ;;  %3928 = vmatpush.msra.mxu3 %v3667_v26  ;;  %v3688_v35 = vld [vmem:[#allocation3 + $0xa28] sm:$0xff]  ;;  %v3395_v26 = vld [vmem:[#allocation2 + $0x9] sm:$0xff] }
 0x512   : > { %10363 = vst [vmem:[#allocation71_spill] sm:$0xff] %v7971_v51  ;;  %v7975_v51 = vpop.f32.mrf.mxu2  ;;  %4035 = vmatpush.msrb.mxu0 %v3689_v10  ;;  %3929 = vmatmul.f32.vlgmr.msra.gmra.mxu3 %v3394_v57  ;;  %v3685_v10 = vld [vmem:[#allocation3 + $0xa10] sm:$0xff] }
 0x514   : > { %3234 = vmatmul.f32.gmra.mxu1 %v7662_v17  ;;  %4036 = vmatpush.msrb.mxu0 %v3688_v35  ;;  %v3687_v17 = vld [vmem:[#allocation3 + $0xa20] sm:$0xff]  ;;  %v7992_v35 = vpop.f32.mrf.mxu3 }
 0x515   : > { %10366 = vst [vmem:[#allocation74_spill] sm:$0xff] %v7992_v35 }
 0x516   : > { %v7977_v41 = vpop.f32.mrf.mxu0  ;;  %4037 = vmatpush.msrb.mxu0 %v3687_v17  ;;  %v3729_v17 = vld [vmem:[#allocation3 + $0xb70] sm:$0xff] }
 0x517   : > { %4253 = vmatpush.msrb.mxu2 %v3729_v17  ;;  %v3728_v17 = vld [vmem:[#allocation3 + $0xb68] sm:$0xff] }
 0x518   : > { %4038 = vmatpush.msrb.mxu0 %v3686_v40 }
 0x519   : > { %v7981_v8 = vpop.f32.mrf.mxu1  ;;  %3169 = vmatmul.f32.gmra.mxu0 %v7847_v3  ;;  %v3684_v3 = vld [vmem:[#allocation3 + $0xa08] sm:$0xff]  ;;  %4254 = vmatpush.msrb.mxu2 %v3728_v17  ;;  %v3093_v17 = vadd.f32 %v7892_v49, %v7749_v9  ;;  %v3096_v9 = vadd.f32 %v7899_v31, %v7759_v11  ;;  %v3099_v11 = vadd.f32 %v7908_v50, %v7769_v44 }
 0x51a   : > { %10364 = vst [vmem:[#allocation72_spill] sm:$0xff] %v7981_v8  ;;  %3932 = vmatmul.f32.gmra.mxu3 %v3395_v26  ;;  %v7987_v57 = vpop.f32.mrf.mxu2  ;;  %4039 = vmatpush.msrb.mxu0 %v3685_v10  ;;  %v3713_v10 = vld [vmem:[#allocation3 + $0xaf0] sm:$0xff]  ;;  %v3090_v8 = vadd.f32 %v7885_v20, %v7739_v32  ;;  %v3102_v44 = vadd.f32 %v7917_v42, %v7779_v12 }
 0x51b   : > { %4140 = vmatpush.msrb.mxu1 %v3713_v10  ;;  %v2115_v10 = vld [vmem:[#allocation2 + $0xf2] sm:$0xff]  ;;  %v3105_v12 = vadd.f32 %v7926_v37, %v7789_v29  ;;  %v3108_v29 = vadd.f32 %v7933_v24, %v7797_v61 }
 0x51c   : > { %3237 = vmatmul.f32.gmra.mxu1 %v7674_v7  ;;  %4040 = vmatpush.msrb.mxu0 %v3684_v3  ;;  %v3683_v7 = vld [vmem:[#allocation3 + $0xa00] sm:$0xff] }
 0x51e   : > { %v7985_v55 = vpop.f32.mrf.mxu0  ;;  %4041 = vmatpush.msrb.mxu0 %v3683_v7 }
 0x521   : > { %v7989_v33 = vpop.f32.mrf.mxu1  ;;  %3172 = vmatmul.f32.gmra.mxu0 %v7859_v28  ;;  %v8003_v28 = vpop.f32.mrf.mxu3 }
 0x522   : > { %10365 = vst [vmem:[#allocation73_spill] sm:$0xff] %v7989_v33  ;;  %v8000_v40 = vpop.f32.mrf.mxu2 }
 0x523   : > { %10368 = vst [vmem:[#allocation76_spill] sm:$0xff] %v8000_v40 }
 0x524   : > { %3240 = vmatmul.f32.gmra.mxu1 %v7686_v48  ;;  %10369 = vst [vmem:[#allocation77_spill] sm:$0xff] %v8003_v28  ;;  %v2097_v48 = vld [vmem:[#allocation2 + $0x199] sm:$0xff] }
 0x526   : > { %v7995_v2 = vpop.f32.mrf.mxu0 }
 0x529   : > { %v7997_v26 = vpop.f32.mrf.mxu1  ;;  %3175 = vmatmul.f32.gmra.mxu0 %v7871_v38  ;;  %v8012_v38 = vpop.f32.mrf.mxu3 }
 0x52a   : > { %10367 = vst [vmem:[#allocation75_spill] sm:$0xff] %v7997_v26  ;;  %v8010_v7 = vpop.f32.mrf.mxu2 }
 0x52b   : > { %10371 = vst [vmem:[#allocation79_spill] sm:$0xff] %v8010_v7 }
 0x52c   : > { %3243 = vmatmul.f32.gmra.mxu1 %v7700_v22  ;;  %10372 = vst [vmem:[#allocation80_spill] sm:$0xff] %v8012_v38  ;;  %v2098_v22 = vld [vmem:[#allocation2 + $0x1a1] sm:$0xff] }
 0x52d   : > { %v3426_v38 = vld [vmem:[#allocation2 + $0x2] sm:$0xff] }
 0x52e   : > { %v8005_v33 = vpop.f32.mrf.mxu0 }
 0x531   : > { %v8007_v3 = vpop.f32.mrf.mxu1  ;;  %3178 = vmatmul.f32.gmra.mxu0 %v2097_v48  ;;  %v8024_v40 = vpop.f32.mrf.mxu3 }
 0x532   : > { %10370 = vst [vmem:[#allocation78_spill] sm:$0xff] %v8007_v3  ;;  %v8018_v48 = vpop.f32.mrf.mxu2 }
 0x533   : > { %10373 = vst [vmem:[#allocation81_spill] sm:$0xff] %v8024_v40 }
 0x534   : > { %3246 = vmatmul.f32.gmra.mxu1 %v7717_v1  ;;  %v3712_v1 = vld [vmem:[#allocation3 + $0xae8] sm:$0xff] }
 0x535   : > { %4141 = vmatpush.msrb.mxu1 %v3712_v1 }
 0x536   : > { %v8014_v26 = vpop.f32.mrf.mxu0 }
 0x539   : > { %v3202_v28 = vpop.f32.mrf.mxu1  ;;  %3181 = vmatmul.f32.gmra.mxu0 %v2098_v22 }
 0x53a   : > { %v3203_v35 = vadd.f32 %v3202_v28, %v3090_v8  ;;  %v2116_v8 = vld [vmem:[#allocation2 + $0xfa] sm:$0xff]  ;;  %v8033_v49 = vpop.f32.mrf.mxu2 }
 0x53c   : > { %v3298_v3 = vmax.f32 %v3203_v35, 0.0  ;;  %3249 = vmatmul.f32.gmra.mxu1 %v2115_v10  ;;  %v3427_v10 = vld [vmem:[#allocation2 + $0xa] sm:$0xff] }
 0x53e   : > { %3330 = vst [vmem:[#allocation2 + $0x19] sm:$0xff] %v3298_v3  ;;  %3935 = vmatmul.f32.gmra.mxu3 %v3298_v3  ;;  %v8020_v7 = vpop.f32.mrf.mxu0  ;;  %v3727_v3 = vld [vmem:[#allocation3 + $0xb60] sm:$0xff] }
 0x53f   : > { %4255 = vmatpush.msrb.mxu2 %v3727_v3 }
 0x541   : > { %v3205_v32 = vpop.f32.mrf.mxu1  ;;  %4042 = vmatmul.f32.vlgmr.msrb.gmra.mxu0 %v3426_v38 }
 0x542   : > { %v3206_v20 = vadd.f32 %v3205_v32, %v3093_v17  ;;  %v8035_v17 = vpop.f32.mrf.mxu3  ;;  %v2117_v32 = vld [vmem:[#allocation2 + $0x10a] sm:$0xff] }
 0x543   : > { %10374 = vst [vmem:[#allocation82_spill] sm:$0xff] %v8035_v17 }
 0x544   : > { %v3299_v35 = vmax.f32 %v3206_v20, 0.0  ;;  %3252 = vmatmul.f32.gmra.mxu1 %v2116_v8 }
 0x545   : > { %v8026_v28 = vld [vmem:[#allocation2 + $0x18] sm:$0xff] }
 0x546   : > { %3331 = vst [vmem:[#allocation2 + $0x21] sm:$0xff] %v3299_v35  ;;  %3822 = vmatmul.f32.gmra.mxu2 %v8026_v28  ;;  %3938 = vmatmul.f32.gmra.mxu3 %v3299_v35  ;;  %v8029_v22 = vpop.f32.mrf.mxu0  ;;  %v3711_v35 = vld [vmem:[#allocation3 + $0xae0] sm:$0xff] }
 0x547   : > { %4142 = vmatpush.msrb.mxu1 %v3711_v35 }
 0x549   : > { %v3208_v38 = vpop.f32.mrf.mxu1  ;;  %4045 = vmatmul.f32.gmra.mxu0 %v3427_v10 }
 0x54a   : > { %v3209_v1 = vadd.f32 %v3208_v38, %v3096_v9  ;;  %v8044_v38 = vpop.f32.mrf.mxu2  ;;  %v8046_v17 = vpop.f32.mrf.mxu3 }
 0x54b   : > { %10375 = vst [vmem:[#allocation83_spill] sm:$0xff] %v8044_v38 }
 0x54c   : > { %v3300_v20 = vmax.f32 %v3209_v1, 0.0  ;;  %3255 = vmatmul.f32.gmra.mxu1 %v2117_v32  ;;  %v2118_v1 = vld [vmem:[#allocation2 + $0x112] sm:$0xff]  ;;  %10376 = vst [vmem:[#allocation84_spill] sm:$0xff] %v8046_v17 }
 0x54d   : > { %v8037_v8 = vld [vmem:[#allocation2 + $0x20] sm:$0xff] }
 0x54e   : > { %3332 = vst [vmem:[#allocation2 + $0x31] sm:$0xff] %v3300_v20  ;;  %3825 = vmatmul.f32.gmra.mxu2 %v8037_v8  ;;  %3941 = vmatmul.f32.gmra.mxu3 %v3300_v20  ;;  %v8040_v3 = vpop.f32.mrf.mxu0  ;;  %v3428_v10 = vld [vmem:[#allocation2 + $0x1a] sm:$0xff]  ;;  %v3726_v20 = vld [vmem:[#allocation3 + $0xb58] sm:$0xff] }
 0x54f   : > { %4256 = vmatpush.msrb.mxu2 %v3726_v20 }
 0x551   : > { %v3211_v31 = vpop.f32.mrf.mxu1  ;;  %4048 = vmatmul.f32.gmra.mxu0 %v3428_v10  ;;  %v2119_v10 = vld [vmem:[#allocation2 + $0x122] sm:$0xff] }
 0x552   : > { %v3212_v9 = vadd.f32 %v3211_v31, %v3099_v11  ;;  %v3429_v11 = vld [vmem:[#allocation2 + $0x22] sm:$0xff]  ;;  %v8060_v20 = vpop.f32.mrf.mxu3 }
 0x553   : > { %10378 = vst [vmem:[#allocation86_spill] sm:$0xff] %v8060_v20 }
 0x554   : > { %v3301_v32 = vmax.f32 %v3212_v9, 0.0  ;;  %3258 = vmatmul.f32.gmra.mxu1 %v2118_v1  ;;  %v8055_v1 = vpop.f32.mrf.mxu2 }
 0x555   : > { %v8048_v40 = vld [vmem:[#allocation2 + $0x30] sm:$0xff]  ;;  %10377 = vst [vmem:[#allocation85_spill] sm:$0xff] %v8055_v1 }
 0x556   : > { %3333 = vst [vmem:[#allocation2 + $0x39] sm:$0xff] %v3301_v32  ;;  %3828 = vmatmul.f32.gmra.mxu2 %v8048_v40  ;;  %3944 = vmatmul.f32.gmra.mxu3 %v3301_v32  ;;  %v8051_v35 = vpop.f32.mrf.mxu0  ;;  %v3710_v32 = vld [vmem:[#allocation3 + $0xad8] sm:$0xff] }
 0x557   : > { %4143 = vmatpush.msrb.mxu1 %v3710_v32 }
 0x559   : > { %v3214_v50 = vpop.f32.mrf.mxu1  ;;  %4051 = vmatmul.f32.gmra.mxu0 %v3429_v11  ;;  %v2120_v11 = vld [vmem:[#allocation2 + $0x12a] sm:$0xff] }
 0x55a   : > { %v3215_v31 = vadd.f32 %v3214_v50, %v3102_v44  ;;  %v8075_v37 = vpop.f32.mrf.mxu3 }
 0x55b   : > { %10380 = vst [vmem:[#allocation88_spill] sm:$0xff] %v8075_v37 }
 0x55c   : > { %v3302_v9 = vmax.f32 %v3215_v31, 0.0  ;;  %3261 = vmatmul.f32.gmra.mxu1 %v2119_v10  ;;  %v8069_v20 = vpop.f32.mrf.mxu2 }
 0x55d   : > { %v8057_v17 = vld [vmem:[#allocation2 + $0x38] sm:$0xff]  ;;  %10379 = vst [vmem:[#allocation87_spill] sm:$0xff] %v8069_v20 }
 0x55e   : > { %3334 = vst [vmem:[#allocation2 + $0x49] sm:$0xff] %v3302_v9  ;;  %3831 = vmatmul.f32.gmra.mxu2 %v8057_v17  ;;  %3947 = vmatmul.f32.gmra.mxu3 %v3302_v9  ;;  %v8062_v38 = vpop.f32.mrf.mxu0  ;;  %v3430_v44 = vld [vmem:[#allocation2 + $0x32] sm:$0xff]  ;;  %v3725_v9 = vld [vmem:[#allocation3 + $0xb50] sm:$0xff] }
 0x55f   : > { %4257 = vmatpush.msrb.mxu2 %v3725_v9  ;;  %v3709_v9 = vld [vmem:[#allocation3 + $0xad0] sm:$0xff] }
 0x560   : > { %4144 = vmatpush.msrb.mxu1 %v3709_v9 }
 0x561   : > { %v3217_v42 = vpop.f32.mrf.mxu1  ;;  %4054 = vmatmul.f32.gmra.mxu0 %v3430_v44 }
 0x562   : > { %v3218_v50 = vadd.f32 %v3217_v42, %v3105_v12  ;;  %v3431_v42 = vld [vmem:[#allocation2 + $0x3a] sm:$0xff] }
 0x564   : > { %v3303_v31 = vmax.f32 %v3218_v50, 0.0  ;;  %3264 = vmatmul.f32.gmra.mxu1 %v2120_v11  ;;  %v2121_v50 = vld [vmem:[#allocation2 + $0x13a] sm:$0xff] }
 0x565   : > { %v8066_v10 = vld [vmem:[#allocation2 + $0x48] sm:$0xff] }
 0x566   : > { %3335 = vst [vmem:[#allocation2 + $0x51] sm:$0xff] %v3303_v31  ;;  %3834 = vmatmul.f32.gmra.mxu2 %v8066_v10  ;;  %3950 = vmatmul.f32.gmra.mxu3 %v3303_v31  ;;  %v8071_v32 = vpop.f32.mrf.mxu0  ;;  %v2662_v31 = vadd.f32 %v7624_v18, %v7482_v56  ;;  %v8089_v56 = vpop.f32.mrf.mxu3  ;;  %v2122_v18 = vld [vmem:[#allocation2 + $0x142] sm:$0xff] }
 0x568   : > { %v2775_v24 = vadd.f32 %v7799_v36, %v2662_v31  ;;  %v2665_v36 = vadd.f32 %v7633_v54, %v7494_v15  ;;  %v2123_v15 = vld [vmem:[#allocation2 + $0x152] sm:$0xff] }
 0x569   : > { %v3220_v12 = vpop.f32.mrf.mxu1  ;;  %4057 = vmatmul.f32.gmra.mxu0 %v3431_v42 }
 0x56a   : > { %v3221_v44 = vadd.f32 %v3220_v12, %v3108_v29  ;;  %v3111_v29 = vadd.f32 %v7940_v5, %v7807_v19  ;;  %v8087_v12 = vpop.f32.mrf.mxu2  ;;  %v3724_v5 = vld [vmem:[#allocation3 + $0xb48] sm:$0xff]  ;;  %v2778_v9 = vadd.f32 %v7809_v43, %v2665_v36  ;;  %v2668_v43 = vadd.f32 %v7642_v59, %v7506_v52 }
 0x56b   : > { %4258 = vmatpush.msrb.mxu2 %v3724_v5 }
 0x56c   : > { %v3304_v11 = vmax.f32 %v3221_v44, 0.0  ;;  %3267 = vmatmul.f32.gmra.mxu1 %v2121_v50  ;;  %v2891_v54 = vadd.f32 %v7901_v16, %v2778_v9  ;;  %v2781_v16 = vadd.f32 %v7817_v63, %v2668_v43 }
 0x56d   : > { %v8077_v1 = vld [vmem:[#allocation2 + $0x50] sm:$0xff] }
 0x56e   : > { %3336 = vst [vmem:[#allocation2 + $0x61] sm:$0xff] %v3304_v11  ;;  %3837 = vmatmul.f32.gmra.mxu2 %v8077_v1  ;;  %3953 = vmatmul.f32.gmra.mxu3 %v3304_v11  ;;  %v8082_v61 = vpop.f32.mrf.mxu0  ;;  %v3432_v44 = vld [vmem:[#allocation2 + $0x4a] sm:$0xff]  ;;  %v2888_v11 = vadd.f32 %v7890_v39, %v2775_v24  ;;  %v2894_v52 = vadd.f32 %v7913_v30, %v2781_v16 }
 0x570   : > { %v3001_v19 = vadd.f32 %v7883_v62, %v2888_v11  ;;  %v3007_v63 = vadd.f32 %v7906_v53, %v2894_v52 }
 0x571   : > { %v3223_v42 = vpop.f32.mrf.mxu1  ;;  %4060 = vmatmul.f32.gmra.mxu0 %v3432_v44 }
 0x572   : > { %v3224_v50 = vadd.f32 %v3223_v42, %v3111_v29  ;;  %v3114_v39 = vadd.f32 %v7949_v23, %v3001_v19  ;;  %v3433_v29 = vld [vmem:[#allocation2 + $0x52] sm:$0xff]  ;;  %v8102_v44 = vpop.f32.mrf.mxu2  ;;  %v3004_v23 = vadd.f32 %v7894_v27, %v2891_v54 }
 0x574   : > { %v3305_v37 = vmax.f32 %v3224_v50, 0.0  ;;  %3270 = vmatmul.f32.gmra.mxu1 %v2122_v18  ;;  %v3708_v18 = vld [vmem:[#allocation3 + $0xac8] sm:$0xff]  ;;  %v3117_v36 = vadd.f32 %v7958_v6, %v3004_v23  ;;  %v3723_v6 = vld [vmem:[#allocation3 + $0xb40] sm:$0xff] }
 0x575   : > { %v8092_v20 = vld [vmem:[#allocation2 + $0x60] sm:$0xff]  ;;  %4145 = vmatpush.msrb.mxu1 %v3708_v18  ;;  %4259 = vmatpush.msrb.mxu2 %v3723_v6 }
 0x576   : > { %3337 = vst [vmem:[#allocation2 + $0x69] sm:$0xff] %v3305_v37  ;;  %3840 = vmatmul.f32.gmra.mxu2 %v8092_v20  ;;  %3956 = vmatmul.f32.gmra.mxu3 %v3305_v37  ;;  %v8098_v31 = vpop.f32.mrf.mxu0  ;;  %v8105_v37 = vpop.f32.mrf.mxu3 }
 0x579   : > { %v3226_v24 = vpop.f32.mrf.mxu1  ;;  %4063 = vmatmul.f32.gmra.mxu0 %v3433_v29  ;;  %v10381_v29 = vld [vmem:[#allocation14_spill] sm:$0xff] }
 0x57a   : > { %v3227_v42 = vadd.f32 %v3226_v24, %v3114_v39  ;;  %v2124_v39 = vld [vmem:[#allocation2 + $0x15a] sm:$0xff]  ;;  %v8118_v27 = vpop.f32.mrf.mxu2 }
 0x57c   : > { %v3306_v62 = vmax.f32 %v3227_v42, 0.0  ;;  %3273 = vmatmul.f32.gmra.mxu1 %v2123_v15  ;;  %v2671_v42 = vadd.f32 %v10381_v29, %v7518_v46  ;;  %v2125_v46 = vld [vmem:[#allocation2 + $0x16a] sm:$0xff] }
 0x57d   : > { %v8107_v50 = vld [vmem:[#allocation2 + $0x68] sm:$0xff] }
 0x57e   : > { %3338 = vst [vmem:[#allocation2 + $0x79] sm:$0xff] %v3306_v62  ;;  %3843 = vmatmul.f32.gmra.mxu2 %v8107_v50  ;;  %3959 = vmatmul.f32.gmra.mxu3 %v3306_v62  ;;  %v8113_v11 = vpop.f32.mrf.mxu0  ;;  %v3434_v5 = vld [vmem:[#allocation2 + $0x62] sm:$0xff]  ;;  %v8126_v15 = vpop.f32.mrf.mxu3  ;;  %v2784_v30 = vadd.f32 %v7825_v13, %v2671_v42  ;;  %v3120_v62 = vadd.f32 %v7968_v14, %v3007_v63  ;;  %v3435_v23 = vld [vmem:[#allocation2 + $0x6a] sm:$0xff] }
 0x57f   : > { %v3707_v13 = vld [vmem:[#allocation3 + $0xac0] sm:$0xff]  ;;  %v3706_v14 = vld [vmem:[#allocation3 + $0xab8] sm:$0xff]  ;;  %v3705_v42 = vld [vmem:[#allocation3 + $0xab0] sm:$0xff] }
 0x580   : > { %v2897_v53 = vadd.f32 %v7922_v45, %v2784_v30  ;;  %4146 = vmatpush.msrb.mxu1 %v3707_v13  ;;  %v3702_v13 = vld [vmem:[#allocation3 + $0xa98] sm:$0xff] }
 0x581   : > { %v3229_v19 = vpop.f32.mrf.mxu1  ;;  %4066 = vmatmul.f32.gmra.mxu0 %v3434_v5  ;;  %v10383_v5 = vld [vmem:[#allocation15_spill] sm:$0xff] }
 0x582   : > { %v3230_v9 = vadd.f32 %v3229_v19, %v3117_v36  ;;  %v10382_v19 = vld [vmem:[#allocation46_spill] sm:$0xff]  ;;  %v8139_v52 = vpop.f32.mrf.mxu2  ;;  %4147 = vmatpush.msrb.mxu1 %v3706_v14 }
 0x584   : > { %v3307_v59 = vmax.f32 %v3230_v9, 0.0  ;;  %3276 = vmatmul.f32.gmra.mxu1 %v2124_v39  ;;  %v2674_v9 = vadd.f32 %v10383_v5, %v10382_v19  ;;  %v3010_v39 = vadd.f32 %v7915_v0, %v2897_v53  ;;  %v3704_v53 = vld [vmem:[#allocation3 + $0xaa8] sm:$0xff]  ;;  %v3746_v5 = vld [vmem:[#allocation3 + $0xbf8] sm:$0xff] }
 0x585   : > { %v8120_v24 = vld [vmem:[#allocation2 + $0x78] sm:$0xff]  ;;  %4148 = vmatpush.msrb.mxu1 %v3705_v42  ;;  %4365 = vmatpush.msrb.mxu3 %v3746_v5  ;;  %v3701_v42 = vld [vmem:[#allocation3 + $0xa90] sm:$0xff] }
 0x586   : > { %3339 = vst [vmem:[#allocation2 + $0x81] sm:$0xff] %v3307_v59  ;;  %3846 = vmatmul.f32.gmra.mxu2 %v8120_v24  ;;  %3962 = vmatmul.f32.gmra.mxu3 %v3307_v59  ;;  %v8128_v54 = vpop.f32.mrf.mxu0  ;;  %v2787_v45 = vadd.f32 %v7833_v47, %v2674_v9  ;;  %v3123_v29 = vadd.f32 %v7977_v41, %v3010_v39  ;;  %v8145_v63 = vpop.f32.mrf.mxu3  ;;  %v10385_v47 = vld [vmem:[#allocation59_spill] sm:$0xff]  ;;  %v10386_v9 = vld [vmem:[#allocation21_spill] sm:$0xff] }
 0x587   : > { %4149 = vmatpush.msrb.mxu1 %v3704_v53 }
 0x589   : > { %v3232_v43 = vpop.f32.mrf.mxu1  ;;  %4069 = vmatmul.f32.gmra.mxu0 %v3435_v23 }
 0x58a   : > { %v3233_v18 = vadd.f32 %v3232_v43, %v3120_v62  ;;  %v2900_v62 = vadd.f32 %v7931_v4, %v2787_v45  ;;  %v3722_v4 = vld [vmem:[#allocation3 + $0xb38] sm:$0xff]  ;;  %v8159_v14 = vpop.f32.mrf.mxu2 }
 0x58b   : > { %4260 = vmatpush.msrb.mxu2 %v3722_v4  ;;  %v3699_v4 = vld [vmem:[#allocation3 + $0xa80] sm:$0xff] }
 0x58c   : > { %v3308_v16 = vmax.f32 %v3233_v18, 0.0  ;;  %3279 = vmatmul.f32.gmra.mxu1 %v2125_v46  ;;  %v10384_v18 = vld [vmem:[#allocation45_spill] sm:$0xff]  ;;  %v3013_v41 = vadd.f32 %v7924_v21, %v2900_v62 }
 0x58d   : > { %v8133_v36 = vld [vmem:[#allocation2 + $0x80] sm:$0xff]  ;;  %v2677_v46 = vadd.f32 %v10385_v47, %v10384_v18  ;;  %v10389_v18 = vld [vmem:[#allocation32_spill] sm:$0xff] }
 0x58e   : > { %3340 = vst [vmem:[#allocation2 + $0x91] sm:$0xff] %v3308_v16  ;;  %3849 = vmatmul.f32.gmra.mxu2 %v8133_v36  ;;  %3965 = vmatmul.f32.gmra.mxu3 %v3308_v16  ;;  %v8141_v59 = vpop.f32.mrf.mxu0  ;;  %v3436_v0 = vld [vmem:[#allocation2 + $0x7a] sm:$0xff]  ;;  %v3703_v16 = vld [vmem:[#allocation3 + $0xaa0] sm:$0xff]  ;;  %v3126_v39 = vadd.f32 %v7985_v55, %v3013_v41  ;;  %v3437_v45 = vld [vmem:[#allocation2 + $0x82] sm:$0xff] }
 0x58f   : > { %4150 = vmatpush.msrb.mxu1 %v3703_v16  ;;  %v10390_v47 = vld [vmem:[#allocation16_spill] sm:$0xff]  ;;  %v10391_v41 = vld [vmem:[#allocation43_spill] sm:$0xff]  ;;  %v3700_v16 = vld [vmem:[#allocation3 + $0xa88] sm:$0xff] }
 0x591   : > { %v3235_v6 = vpop.f32.mrf.mxu1  ;;  %4072 = vmatmul.f32.gmra.mxu0 %v3436_v0  ;;  %4151 = vmatpush.msrb.mxu1 %v3702_v13  ;;  %v10387_v0 = vld [vmem:[#allocation9_spill] sm:$0xff] }
 0x592   : > { %v3236_v30 = vadd.f32 %v3235_v6, %v3123_v29  ;;  %v8161_v6 = vpop.f32.mrf.mxu3 }
 0x593   : > { %4152 = vmatpush.msrb.mxu1 %v3701_v42  ;;  %v10393_v42 = vld [vmem:[#allocation29_spill] sm:$0xff] }
 0x594   : > { %v3309_v43 = vmax.f32 %v3236_v30, 0.0  ;;  %3282 = vmatmul.f32.gmra.mxu1 %v7839_v34  ;;  %v2790_v34 = vadd.f32 %v10386_v9, %v2677_v46  ;;  %v2680_v46 = vadd.f32 %v10390_v47, %v10389_v18  ;;  %v10392_v9 = vld [vmem:[#allocation50_spill] sm:$0xff]  ;;  %v10396_v47 = vld [vmem:[#allocation11_spill] sm:$0xff] }
 0x595   : > { %v8149_v23 = vld [vmem:[#allocation2 + $0x90] sm:$0xff]  ;;  %4153 = vmatpush.msrb.mxu1 %v3700_v16  ;;  %v3721_v16 = vld [vmem:[#allocation3 + $0xb30] sm:$0xff] }
 0x596   : > { %3341 = vst [vmem:[#allocation2 + $0x99] sm:$0xff] %v3309_v43  ;;  %3852 = vmatmul.f32.gmra.mxu2 %v8149_v23  ;;  %3968 = vmatmul.f32.gmra.mxu3 %v3309_v43  ;;  %v8155_v19 = vpop.f32.mrf.mxu0  ;;  %v2903_v30 = vadd.f32 %v10387_v0, %v2790_v34  ;;  %v10388_v43 = vld [vmem:[#allocation47_spill] sm:$0xff]  ;;  %v2793_v34 = vadd.f32 %v10392_v9, %v2680_v46  ;;  %v10397_v46 = vld [vmem:[#allocation61_spill] sm:$0xff] }
 0x597   : > { %4154 = vmatpush.msrb.mxu1 %v3699_v4  ;;  %v3745_v4 = vld [vmem:[#allocation3 + $0xbf0] sm:$0xff]  ;;  %4261 = vmatpush.msrb.mxu2 %v3721_v16 }
 0x598   : > { %v3016_v53 = vadd.f32 %v10391_v41, %v2903_v30  ;;  %v2906_v0 = vadd.f32 %v10393_v42, %v2793_v34  ;;  %v2683_v41 = vadd.f32 %v10397_v46, %v10396_v47  ;;  %4366 = vmatpush.msrb.mxu3 %v3745_v4  ;;  %v10399_v34 = vld [vmem:[#allocation24_spill] sm:$0xff]  ;;  %v2129_v42 = vld [vmem:[#allocation2 + $0x19a] sm:$0xff]  ;;  %v10401_v16 = vld [vmem:[#allocation31_spill] sm:$0xff] }
 0x599   : > { %v3238_v21 = vpop.f32.mrf.mxu1  ;;  %4075 = vmatmul.f32.gmra.mxu0 %v3437_v45  ;;  %v10402_v4 = vld [vmem:[#allocation38_spill] sm:$0xff] }
 0x59a   : > { %v3239_v29 = vadd.f32 %v3238_v21, %v3126_v39  ;;  %v3129_v39 = vadd.f32 %v7995_v2, %v3016_v53  ;;  %v10398_v2 = vld [vmem:[#allocation40_spill] sm:$0xff] }
 0x59b   : > { %v3019_v53 = vadd.f32 %v10398_v2, %v2906_v0 }
 0x59c   : > { %v3310_v62 = vmax.f32 %v3239_v29, 0.0  ;;  %3285 = vmatmul.f32.gmra.mxu1 %v10388_v43  ;;  %v8175_v29 = vpop.f32.mrf.mxu2  ;;  %v8179_v43 = vpop.f32.mrf.mxu3 }
 0x59d   : > { %v8165_v55 = vld [vmem:[#allocation2 + $0x98] sm:$0xff]  ;;  %10395 = vst [vmem:[#allocation14_spill] sm:$0xff] %v8179_v43 }
 0x59e   : > { %3342 = vst [vmem:[#allocation2 + $0xa9] sm:$0xff] %v3310_v62  ;;  %3855 = vmatmul.f32.gmra.mxu2 %v8165_v55  ;;  %3971 = vmatmul.f32.gmra.mxu3 %v3310_v62  ;;  %v8171_v5 = vpop.f32.mrf.mxu0  ;;  %v3438_v21 = vld [vmem:[#allocation2 + $0x92] sm:$0xff]  ;;  %v10394_v62 = vld [vmem:[#allocation23_spill] sm:$0xff] }
 0x5a1   : > { %v3241_v13 = vpop.f32.mrf.mxu1  ;;  %4078 = vmatmul.f32.gmra.mxu0 %v3438_v21 }
 0x5a2   : > { %v3242_v45 = vadd.f32 %v3241_v13, %v3129_v39  ;;  %v2796_v39 = vadd.f32 %v10399_v34, %v2683_v41  ;;  %v3132_v13 = vadd.f32 %v8005_v33, %v3019_v53  ;;  %v2686_v41 = vadd.f32 %v10402_v4, %v10401_v16  ;;  %v10403_v34 = vld [vmem:[#allocation69_spill] sm:$0xff] }
 0x5a4   : > { %v3311_v30 = vmax.f32 %v3242_v45, 0.0  ;;  %3288 = vmatmul.f32.gmra.mxu1 %v10394_v62  ;;  %v3439_v45 = vld [vmem:[#allocation2 + $0x9a] sm:$0xff]  ;;  %v2909_v0 = vadd.f32 %v7964_v25, %v2796_v39  ;;  %v8196_v2 = vpop.f32.mrf.mxu3 }
 0x5a5   : > { %v8181_v18 = vld [vmem:[#allocation2 + $0xa8] sm:$0xff]  ;;  %10400 = vst [vmem:[#allocation46_spill] sm:$0xff] %v8196_v2  ;;  %v10404_v25 = vld [vmem:[#allocation25_spill] sm:$0xff] }
 0x5a6   : > { %3343 = vst [vmem:[#allocation2 + $0xb1] sm:$0xff] %v3311_v30  ;;  %3858 = vmatmul.f32.gmra.mxu2 %v8181_v18  ;;  %3974 = vmatmul.f32.gmra.mxu3 %v3311_v30  ;;  %v8187_v9 = vpop.f32.mrf.mxu0  ;;  %v8192_v30 = vpop.f32.mrf.mxu2  ;;  %v3022_v33 = vadd.f32 %v10403_v34, %v2909_v0  ;;  %v2799_v39 = vadd.f32 %v10404_v25, %v2686_v41  ;;  %v10406_v34 = vld [vmem:[#allocation18_spill] sm:$0xff] }
 0x5a8   : > { %v2912_v2 = vadd.f32 %v7975_v51, %v2799_v39  ;;  %v10408_v39 = vld [vmem:[#allocation56_spill] sm:$0xff] }
 0x5a9   : > { %v3244_v21 = vpop.f32.mrf.mxu1  ;;  %4081 = vmatmul.f32.gmra.mxu0 %v3439_v45 }
 0x5aa   : > { %v3245_v62 = vadd.f32 %v3244_v21, %v3132_v13  ;;  %v3135_v13 = vadd.f32 %v8014_v26, %v3022_v33  ;;  %v3025_v41 = vadd.f32 %v7966_v58, %v2912_v2  ;;  %v3720_v26 = vld [vmem:[#allocation3 + $0xb28] sm:$0xff] }
 0x5ab   : > { %v3744_v33 = vld [vmem:[#allocation3 + $0xbe8] sm:$0xff]  ;;  %4262 = vmatpush.msrb.mxu2 %v3720_v26 }
 0x5ac   : > { %v3312_v47 = vmax.f32 %v3245_v62, 0.0  ;;  %3291 = vmatmul.f32.gmra.mxu1 %v2129_v42  ;;  %v2130_v42 = vld [vmem:[#allocation2 + $0x1a2] sm:$0xff]  ;;  %v8217_v51 = vpop.f32.mrf.mxu3  ;;  %4367 = vmatpush.msrb.mxu3 %v3744_v33 }
 0x5ad   : > { %v8194_v46 = vld [vmem:[#allocation2 + $0xb0] sm:$0xff]  ;;  %10407 = vst [vmem:[#allocation15_spill] sm:$0xff] %v8217_v51 }
 0x5ae   : > { %3344 = vst [vmem:[#allocation2 + $0xc1] sm:$0xff] %v3312_v47  ;;  %3861 = vmatmul.f32.gmra.mxu2 %v8194_v46  ;;  %3977 = vmatmul.f32.gmra.mxu3 %v3312_v47  ;;  %v8202_v53 = vpop.f32.mrf.mxu0  ;;  %v3440_v45 = vld [vmem:[#allocation2 + $0xaa] sm:$0xff]  ;;  %v8209_v4 = vpop.f32.mrf.mxu2  ;;  %v10405_v47 = vld [vmem:[#allocation49_spill] sm:$0xff] }
 0x5af   : > { %v2689_v43 = vadd.f32 %v10406_v34, %v10405_v47  ;;  %v10409_v47 = vld [vmem:[#allocation48_spill] sm:$0xff]  ;;  %v10410_v34 = vld [vmem:[#allocation39_spill] sm:$0xff] }
 0x5b0   : > { %v2692_v51 = vadd.f32 %v10410_v34, %v10409_v47  ;;  %v10416_v34 = vld [vmem:[#allocation74_spill] sm:$0xff] }
 0x5b1   : > { %v3247_v21 = vpop.f32.mrf.mxu1  ;;  %4084 = vmatmul.f32.gmra.mxu0 %v3440_v45 }
 0x5b2   : > { %v3248_v62 = vadd.f32 %v3247_v21, %v3135_v13  ;;  %v2802_v13 = vadd.f32 %v10408_v39, %v2689_v43  ;;  %v3138_v21 = vadd.f32 %v8020_v7, %v3025_v41  ;;  %v10412_v41 = vld [vmem:[#allocation26_spill] sm:$0xff] }
 0x5b4   : > { %v3313_v16 = vmax.f32 %v3248_v62, 0.0  ;;  %3294 = vmatmul.f32.gmra.mxu1 %v2130_v42  ;;  %v3441_v42 = vld [vmem:[#allocation2 + $0xb2] sm:$0xff]  ;;  %v2915_v58 = vadd.f32 %v7987_v57, %v2802_v13  ;;  %v2805_v57 = vadd.f32 %v10412_v41, %v2692_v51 }
 0x5b5   : > { %v8207_v0 = vld [vmem:[#allocation2 + $0xc0] sm:$0xff]  ;;  %v3743_v51 = vld [vmem:[#allocation3 + $0xbe0] sm:$0xff] }
 0x5b6   : > { %3345 = vst [vmem:[#allocation2 + $0xc9] sm:$0xff] %v3313_v16  ;;  %3864 = vmatmul.f32.gmra.mxu2 %v8207_v0  ;;  %3980 = vmatmul.f32.gmra.mxu3 %v3313_v16  ;;  %v8215_v25 = vpop.f32.mrf.mxu0  ;;  %v3028_v26 = vadd.f32 %v7979_v60, %v2915_v58  ;;  %v8231_v43 = vpop.f32.mrf.mxu2  ;;  %v10414_v58 = vld [vmem:[#allocation12_spill] sm:$0xff]  ;;  %v10418_v41 = vld [vmem:[#allocation57_spill] sm:$0xff] }
 0x5b7   : > { %10411 = vst [vmem:[#allocation45_spill] sm:$0xff] %v8231_v43  ;;  %4368 = vmatpush.msrb.mxu3 %v3743_v51  ;;  %v10422_v51 = vld [vmem:[#allocation77_spill] sm:$0xff] }
 0x5b8   : > { %v3141_v33 = vadd.f32 %v8029_v22, %v3028_v26  ;;  %v3719_v22 = vld [vmem:[#allocation3 + $0xb20] sm:$0xff] }
 0x5b9   : > { %v3250_v45 = vpop.f32.mrf.mxu1  ;;  %4087 = vmatmul.f32.gmra.mxu0 %v3441_v42  ;;  %4263 = vmatpush.msrb.mxu2 %v3719_v22 }
 0x5ba   : > { %v3251_v62 = vadd.f32 %v3250_v45, %v3138_v21  ;;  %v10413_v45 = vld [vmem:[#allocation76_spill] sm:$0xff] }
 0x5bb   : > { %v2918_v42 = vadd.f32 %v10413_v45, %v2805_v57 }
 0x5bc   : > { %v3314_v2 = vmax.f32 %v3251_v62, 0.0  ;;  %4155 = vmatmul.f32.vlgmr.msrb.gmra.mxu1 %v8026_v28 }
 0x5bd   : > { %v8223_v16 = vld [vmem:[#allocation2 + $0xc8] sm:$0xff]  ;;  %v3031_v43 = vadd.f32 %v10416_v34, %v2918_v42 }
 0x5be   : > { %3346 = vst [vmem:[#allocation2 + $0xd9] sm:$0xff] %v3314_v2  ;;  %3867 = vmatmul.f32.gmra.mxu2 %v8223_v16  ;;  %3983 = vmatmul.f32.gmra.mxu3 %v3314_v2  ;;  %v8229_v7 = vpop.f32.mrf.mxu0  ;;  %v3442_v39 = vld [vmem:[#allocation2 + $0xc2] sm:$0xff]  ;;  %v10415_v2 = vld [vmem:[#allocation64_spill] sm:$0xff] }
 0x5bf   : > { %v2695_v47 = vadd.f32 %v10415_v2, %v10414_v58  ;;  %v10419_v58 = vld [vmem:[#allocation79_spill] sm:$0xff] }
 0x5c1   : > { %v3253_v28 = vpop.f32.mrf.mxu1  ;;  %v3936_v13 = vpop.f32.mrf.mxu3  ;;  %4090 = vmatmul.f32.gmra.mxu0 %v3442_v39  ;;  %v2808_v57 = vadd.f32 %v10418_v41, %v2695_v47 }
 0x5c2   : > { %v3254_v21 = vadd.f32 %v3253_v28, %v3141_v33  ;;  %v8247_v33 = vld [vmem:[#allocation5 + $0x2] ss:$0 sm:$0xff] }
 0x5c3   : > { %v2921_v2 = vadd.f32 %v10419_v58, %v2808_v57 }
 0x5c4   : > { %v3315_v60 = vmax.f32 %v3254_v21, 0.0  ;;  %4158 = vmatmul.f32.gmra.mxu1 %v8037_v8  ;;  %v3144_v8 = vadd.f32 %v8040_v3, %v3031_v43  ;;  %v3443_v21 = vld [vmem:[#allocation2 + $0xca] sm:$0xff]  ;;  %v10420_v3 = vld [vmem:[#allocation33_spill] sm:$0xff] }
 0x5c5   : > { %v8237_v62 = vld [vmem:[#allocation2 + $0xd8] sm:$0xff]  ;;  %v10421_v43 = vld [vmem:[#allocation63_spill] sm:$0xff]  ;;  %v3034_v41 = vadd.f32 %v10422_v51, %v2921_v2 }
 0x5c6   : > { %3347 = vst [vmem:[#allocation2 + $0xe1] sm:$0xff] %v3315_v60  ;;  %3870 = vmatmul.f32.gmra.mxu2 %v8237_v62  ;;  %3986 = vmatmul.f32.gmra.mxu3 %v3315_v60  ;;  %v8243_v26 = vpop.f32.mrf.mxu0  ;;  %v2698_v22 = vadd.f32 %v10421_v43, %v10420_v3  ;;  %v10425_v51 = vld [vmem:[#allocation19_spill] sm:$0xff] }
 0x5c7   : > { %10417 = vst [vmem:[#allocation59_spill] sm:$0xff] %v8243_v26 }
 0x5c9   : > { %v3256_v28 = vpop.f32.mrf.mxu1  ;;  %v3823_v39 = vpop.f32.mrf.mxu2  ;;  %4093 = vmatmul.f32.gmra.mxu0 %v3443_v21 }
 0x5ca   : > { %v3257_v45 = vadd.f32 %v3256_v28, %v3144_v8  ;;  %v3824_v42 = vadd.f32 %v8247_v33, %v3823_v39  ;;  %v3939_v60 = vpop.f32.mrf.mxu3  ;;  %v10423_v28 = vld [vmem:[#allocation42_spill] sm:$0xff] }
 0x5cb   : > { %v2811_v57 = vadd.f32 %v10423_v28, %v2698_v22  ;;  %v10424_v22 = vld [vmem:[#allocation52_spill] sm:$0xff] }
 0x5cc   : > { %v3316_v34 = vmax.f32 %v3257_v45, 0.0  ;;  %v8251_v26 = vadd.f32 %v3936_v13, %v3824_v42  ;;  %4161 = vmatmul.f32.gmra.mxu1 %v8048_v40  ;;  %v3147_v13 = vadd.f32 %v8051_v35, %v3034_v41  ;;  %v2701_v35 = vadd.f32 %v10425_v51, %v10424_v22  ;;  %v10426_v41 = vld [vmem:[#allocation80_spill] sm:$0xff] }
 0x5cd   : > { %v8254_v47 = vld [vmem:[#allocation2 + $0xe0] sm:$0xff]  ;;  %v2924_v2 = vadd.f32 %v8018_v48, %v2811_v57 }
 0x5ce   : > { %3348 = vst [vmem:[#allocation2 + $0xf1] sm:$0xff] %v3316_v34  ;;  %3873 = vmatmul.f32.gmra.mxu2 %v8254_v47  ;;  %3989 = vmatmul.f32.gmra.mxu3 %v3316_v34  ;;  %v8260_v8 = vpop.f32.mrf.mxu0  ;;  %v3444_v40 = vld [vmem:[#allocation2 + $0xda] sm:$0xff]  ;;  %v10427_v48 = vld [vmem:[#allocation27_spill] sm:$0xff] }
 0x5cf   : > { %v3037_v28 = vadd.f32 %v10426_v41, %v2924_v2 }
 0x5d1   : > { %v3259_v39 = vpop.f32.mrf.mxu1  ;;  %v3826_v21 = vpop.f32.mrf.mxu2  ;;  %4096 = vmatmul.f32.gmra.mxu0 %v3444_v40 }
 0x5d2   : > { %v3260_v45 = vadd.f32 %v3259_v39, %v3147_v13  ;;  %v3827_v42 = vadd.f32 %v8247_v33, %v3826_v21  ;;  %v3942_v58 = vpop.f32.mrf.mxu3  ;;  %v3718_v13 = vld [vmem:[#allocation3 + $0xb18] sm:$0xff] }
 0x5d3   : > { %v3742_v39 = vld [vmem:[#allocation3 + $0xbd8] sm:$0xff]  ;;  %4264 = vmatpush.msrb.mxu2 %v3718_v13 }
 0x5d4   : > { %v3317_v3 = vmax.f32 %v3260_v45, 0.0  ;;  %v8266_v43 = vadd.f32 %v3939_v60, %v3827_v42  ;;  %4164 = vmatmul.f32.gmra.mxu1 %v8057_v17  ;;  %4369 = vmatpush.msrb.mxu3 %v3742_v39  ;;  %v2814_v60 = vadd.f32 %v10427_v48, %v2701_v35  ;;  %v3150_v17 = vadd.f32 %v8062_v38, %v3037_v28  ;;  %v3445_v45 = vld [vmem:[#allocation2 + $0xe2] sm:$0xff]  ;;  %v10429_v39 = vld [vmem:[#allocation41_spill] sm:$0xff] }
 0x5d5   : > { %v8269_v34 = vld [vmem:[#allocation2 + $0xf0] sm:$0xff]  ;;  %v10428_v35 = vld [vmem:[#allocation51_spill] sm:$0xff] }
 0x5d6   : > { %3349 = vst [vmem:[#allocation2 + $0xf9] sm:$0xff] %v3317_v3  ;;  %3876 = vmatmul.f32.gmra.mxu2 %v8269_v34  ;;  %3992 = vmatmul.f32.gmra.mxu3 %v3317_v3  ;;  %v8275_v21 = vpop.f32.mrf.mxu0  ;;  %v2927_v3 = vadd.f32 %v8033_v49, %v2814_v60  ;;  %v2704_v38 = vadd.f32 %v10429_v39, %v10428_v35  ;;  %v10430_v28 = vld [vmem:[#allocation81_spill] sm:$0xff]  ;;  %v10433_v35 = vld [vmem:[#allocation83_spill] sm:$0xff] }
 0x5d8   : > { %v3040_v48 = vadd.f32 %v10430_v28, %v2927_v3 }
 0x5d9   : > { %v3262_v57 = vpop.f32.mrf.mxu1  ;;  %v3829_v40 = vpop.f32.mrf.mxu2  ;;  %4099 = vmatmul.f32.gmra.mxu0 %v3445_v45 }
 0x5da   : > { %v3263_v42 = vadd.f32 %v3262_v57, %v3150_v17  ;;  %v3830_v2 = vadd.f32 %v8247_v33, %v3829_v40  ;;  %v3945_v22 = vpop.f32.mrf.mxu3  ;;  %v10432_v57 = vld [vmem:[#allocation60_spill] sm:$0xff] }
 0x5db   : > { %v2817_v49 = vadd.f32 %v10432_v57, %v2704_v38  ;;  %v10435_v38 = vld [vmem:[#allocation13_spill] sm:$0xff] }
 0x5dc   : > { %v3318_v51 = vmax.f32 %v3263_v42, 0.0  ;;  %v8281_v41 = vadd.f32 %v3942_v58, %v3830_v2  ;;  %4167 = vmatmul.f32.gmra.mxu1 %v8066_v10  ;;  %v3153_v58 = vadd.f32 %v8071_v32, %v3040_v48  ;;  %v10436_v57 = vld [vmem:[#allocation65_spill] sm:$0xff]  ;;  %v10437_v48 = vld [vmem:[#allocation82_spill] sm:$0xff] }
 0x5dd   : > { %v8284_v13 = vld [vmem:[#allocation2 + $0xf8] sm:$0xff]  ;;  %v2930_v3 = vadd.f32 %v10433_v35, %v2817_v49  ;;  %v2707_v32 = vadd.f32 %v10436_v57, %v10435_v38 }
 0x5de   : > { %3350 = vst [vmem:[#allocation2 + $0x109] sm:$0xff] %v3318_v51  ;;  %3879 = vmatmul.f32.gmra.mxu2 %v8284_v13  ;;  %3995 = vmatmul.f32.gmra.mxu3 %v3318_v51  ;;  %v8290_v17 = vpop.f32.mrf.mxu0  ;;  %v3446_v10 = vld [vmem:[#allocation2 + $0xf2] sm:$0xff] }
 0x5df   : > { %10431 = vst [vmem:[#allocation21_spill] sm:$0xff] %v8290_v17  ;;  %v3043_v17 = vadd.f32 %v10437_v48, %v2930_v3  ;;  %v10439_v57 = vld [vmem:[#allocation85_spill] sm:$0xff] }
 0x5e1   : > { %v3265_v60 = vpop.f32.mrf.mxu1  ;;  %v3832_v40 = vpop.f32.mrf.mxu2  ;;  %4102 = vmatmul.f32.gmra.mxu0 %v3446_v10 }
 0x5e2   : > { %v3266_v45 = vadd.f32 %v3265_v60, %v3153_v58  ;;  %v3833_v42 = vadd.f32 %v8247_v33, %v3832_v40  ;;  %v3948_v2 = vpop.f32.mrf.mxu3  ;;  %v3717_v58 = vld [vmem:[#allocation3 + $0xb10] sm:$0xff] }
 0x5e3   : > { %v3741_v60 = vld [vmem:[#allocation3 + $0xbd0] sm:$0xff]  ;;  %4265 = vmatpush.msrb.mxu2 %v3717_v58 }
 0x5e4   : > { %v3319_v39 = vmax.f32 %v3266_v45, 0.0  ;;  %v8296_v28 = vadd.f32 %v3945_v22, %v3833_v42  ;;  %4170 = vmatmul.f32.gmra.mxu1 %v8077_v1  ;;  %4370 = vmatpush.msrb.mxu3 %v3741_v60  ;;  %v10438_v22 = vld [vmem:[#allocation28_spill] sm:$0xff]  ;;  %v3156_v1 = vadd.f32 %v8082_v61, %v3043_v17  ;;  %v3447_v42 = vld [vmem:[#allocation2 + $0xfa] sm:$0xff] }
 0x5e5   : > { %v8299_v51 = vld [vmem:[#allocation2 + $0x108] sm:$0xff]  ;;  %v2820_v49 = vadd.f32 %v10438_v22, %v2707_v32  ;;  %v10440_v32 = vld [vmem:[#allocation34_spill] sm:$0xff] }
 0x5e6   : > { %10434 = vst [vmem:[#allocation9_spill] sm:$0xff] %v8296_v28  ;;  %3882 = vmatmul.f32.gmra.mxu2 %v8299_v51  ;;  %3998 = vmatmul.f32.gmra.mxu3 %v3319_v39  ;;  %v8305_v40 = vpop.f32.mrf.mxu0  ;;  %v10441_v60 = vld [vmem:[#allocation20_spill] sm:$0xff] }
 0x5e7   : > { %3351 = vst [vmem:[#allocation2 + $0x111] sm:$0xff] %v3319_v39  ;;  %v2933_v39 = vadd.f32 %v10439_v57, %v2820_v49  ;;  %v2710_v61 = vadd.f32 %v10441_v60, %v10440_v32  ;;  %v10442_v17 = vld [vmem:[#allocation84_spill] sm:$0xff]  ;;  %v10445_v32 = vld [vmem:[#allocation87_spill] sm:$0xff] }
 0x5e9   : > { %v3268_v10 = vpop.f32.mrf.mxu1  ;;  %v3835_v45 = vpop.f32.mrf.mxu2  ;;  %4105 = vmatmul.f32.gmra.mxu0 %v3447_v42  ;;  %v3046_v22 = vadd.f32 %v10442_v17, %v2933_v39 }
 0x5ea   : > { %v3269_v35 = vadd.f32 %v3268_v10, %v3156_v1  ;;  %v3836_v3 = vadd.f32 %v8247_v33, %v3835_v45  ;;  %v3951_v38 = vpop.f32.mrf.mxu3  ;;  %v10444_v10 = vld [vmem:[#allocation30_spill] sm:$0xff] }
 0x5eb   : > { %v2823_v49 = vadd.f32 %v10444_v10, %v2710_v61  ;;  %v10446_v61 = vld [vmem:[#allocation54_spill] sm:$0xff]  ;;  %v10447_v10 = vld [vmem:[#allocation44_spill] sm:$0xff] }
 0x5ec   : > { %v3320_v48 = vmax.f32 %v3269_v35, 0.0  ;;  %v8311_v28 = vadd.f32 %v3948_v2, %v3836_v3  ;;  %4173 = vmatmul.f32.gmra.mxu1 %v8092_v20  ;;  %v3159_v2 = vadd.f32 %v8098_v31, %v3046_v22  ;;  %v2713_v31 = vadd.f32 %v10447_v10, %v10446_v61  ;;  %v10448_v22 = vld [vmem:[#allocation86_spill] sm:$0xff] }
 0x5ed   : > { %v2936_v39 = vadd.f32 %v10445_v32, %v2823_v49 }
 0x5ee   : > { %v8314_v58 = vld [vmem:[#allocation2 + $0x110] sm:$0xff]  ;;  %3352 = vst [vmem:[#allocation2 + $0x121] sm:$0xff] %v3320_v48  ;;  %4001 = vmatmul.f32.gmra.mxu3 %v3320_v48  ;;  %v8320_v1 = vpop.f32.mrf.mxu0 }
 0x5ef   : > { %3885 = vmatmul.f32.gmra.mxu2 %v8314_v58  ;;  %10443 = vst [vmem:[#allocation47_spill] sm:$0xff] %v8320_v1  ;;  %v3448_v20 = vld [vmem:[#allocation2 + $0x10a] sm:$0xff]  ;;  %v3049_v1 = vadd.f32 %v10448_v22, %v2936_v39 }
 0x5f1   : > { %v3271_v45 = vpop.f32.mrf.mxu1  ;;  %v3838_v42 = vpop.f32.mrf.mxu2  ;;  %4108 = vmatmul.f32.gmra.mxu0 %v3448_v20 }
 0x5f2   : > { %v3272_v35 = vadd.f32 %v3271_v45, %v3159_v2  ;;  %v3839_v3 = vadd.f32 %v8247_v33, %v3838_v42  ;;  %v3954_v57 = vpop.f32.mrf.mxu3  ;;  %v3716_v2 = vld [vmem:[#allocation3 + $0xb08] sm:$0xff] }
 0x5f3   : > { %v3740_v45 = vld [vmem:[#allocation3 + $0xbc8] sm:$0xff]  ;;  %4266 = vmatpush.msrb.mxu2 %v3716_v2 }
 0x5f4   : > { %v3321_v60 = vmax.f32 %v3272_v35, 0.0  ;;  %v8326_v17 = vadd.f32 %v3951_v38, %v3839_v3  ;;  %4176 = vmatmul.f32.gmra.mxu1 %v8107_v50  ;;  %4371 = vmatpush.msrb.mxu3 %v3740_v45  ;;  %v10449_v38 = vld [vmem:[#allocation10_spill] sm:$0xff]  ;;  %v3162_v50 = vadd.f32 %v8113_v11, %v3049_v1  ;;  %v3449_v3 = vld [vmem:[#allocation2 + $0x112] sm:$0xff] }
 0x5f5   : > { %v8329_v48 = vld [vmem:[#allocation2 + $0x120] sm:$0xff]  ;;  %v2826_v49 = vadd.f32 %v10449_v38, %v2713_v31  ;;  %v10451_v45 = vld [vmem:[#allocation68_spill] sm:$0xff] }
 0x5f6   : > { %3353 = vst [vmem:[#allocation2 + $0x129] sm:$0xff] %v3321_v60  ;;  %4004 = vmatmul.f32.gmra.mxu3 %v3321_v60  ;;  %v8335_v42 = vpop.f32.mrf.mxu0  ;;  %v10450_v31 = vld [vmem:[#allocation35_spill] sm:$0xff]  ;;  %v10452_v1 = vld [vmem:[#allocation88_spill] sm:$0xff] }
 0x5f7   : > { %3888 = vmatmul.f32.gmra.mxu2 %v8329_v48  ;;  %v2939_v60 = vadd.f32 %v8087_v12, %v2826_v49  ;;  %v2716_v11 = vadd.f32 %v10451_v45, %v10450_v31 }
 0x5f9   : > { %v3274_v20 = vpop.f32.mrf.mxu1  ;;  %v3841_v35 = vpop.f32.mrf.mxu2  ;;  %4111 = vmatmul.f32.gmra.mxu0 %v3449_v3  ;;  %v3052_v38 = vadd.f32 %v10452_v1, %v2939_v60  ;;  %v10455_v1 = vld [vmem:[#allocation67_spill] sm:$0xff] }
 0x5fa   : > { %v3275_v32 = vadd.f32 %v3274_v20, %v3162_v50  ;;  %v3842_v39 = vadd.f32 %v8247_v33, %v3841_v35  ;;  %v3957_v61 = vpop.f32.mrf.mxu3  ;;  %v10453_v20 = vld [vmem:[#allocation70_spill] sm:$0xff] }
 0x5fb   : > { %v2829_v12 = vadd.f32 %v10453_v20, %v2716_v11  ;;  %v10454_v11 = vld [vmem:[#allocation36_spill] sm:$0xff] }
 0x5fc   : > { %v3322_v10 = vmax.f32 %v3275_v32, 0.0  ;;  %v8341_v22 = vadd.f32 %v3954_v57, %v3842_v39  ;;  %4179 = vmatmul.f32.gmra.mxu1 %v8120_v24  ;;  %v3165_v57 = vadd.f32 %v8128_v54, %v3052_v38  ;;  %v2719_v54 = vadd.f32 %v10455_v1, %v10454_v11  ;;  %v3762_v20 = vld [vmem:[#allocation3 + $0xc78] sm:$0xff] }
 0x5fd   : > { %v8344_v2 = vld [vmem:[#allocation2 + $0x128] sm:$0xff]  ;;  %v2942_v60 = vadd.f32 %v8102_v44, %v2829_v12  ;;  %4478 = vmatpush.msra.mxu0 %v3762_v20 }
 0x5fe   : > { %3354 = vst [vmem:[#allocation2 + $0x139] sm:$0xff] %v3322_v10  ;;  %4007 = vmatmul.f32.gmra.mxu3 %v3322_v10  ;;  %v8350_v50 = vpop.f32.mrf.mxu0  ;;  %v3450_v24 = vld [vmem:[#allocation2 + $0x122] sm:$0xff] }
 0x5ff   : > { %3891 = vmatmul.f32.gmra.mxu2 %v8344_v2  ;;  %v3055_v38 = vadd.f32 %v8089_v56, %v2942_v60  ;;  %v3451_v60 = vld [vmem:[#allocation2 + $0x12a] sm:$0xff] }
 0x601   : > { %v3277_v49 = vpop.f32.mrf.mxu1  ;;  %v3844_v35 = vpop.f32.mrf.mxu2  ;;  %4114 = vmatmul.f32.gmra.mxu0 %v3450_v24  ;;  %v3738_v24 = vld [vmem:[#allocation3 + $0xbb8] sm:$0xff] }
 0x602   : > { %v3278_v3 = vadd.f32 %v3277_v49, %v3165_v57  ;;  %v3845_v32 = vadd.f32 %v8247_v33, %v3844_v35  ;;  %v3960_v39 = vpop.f32.mrf.mxu3  ;;  %v3739_v57 = vld [vmem:[#allocation3 + $0xbc0] sm:$0xff]  ;;  %v3761_v49 = vld [vmem:[#allocation3 + $0xc70] sm:$0xff]  ;;  %v3168_v35 = vadd.f32 %v8141_v59, %v3055_v38 }
 0x603   : > { %4372 = vmatpush.msrb.mxu3 %v3739_v57  ;;  %4479 = vmatpush.msra.mxu0 %v3761_v49  ;;  %v10457_v38 = vld [vmem:[#allocation58_spill] sm:$0xff] }
 0x604   : > { %v3323_v31 = vmax.f32 %v3278_v3, 0.0  ;;  %v8356_v45 = vadd.f32 %v3957_v61, %v3845_v32  ;;  %4182 = vmatmul.f32.gmra.mxu1 %v8133_v36  ;;  %v3715_v61 = vld [vmem:[#allocation3 + $0xb00] sm:$0xff]  ;;  %v10456_v36 = vld [vmem:[#allocation71_spill] sm:$0xff]  ;;  %v3760_v3 = vld [vmem:[#allocation3 + $0xc68] sm:$0xff] }
 0x605   : > { %v8359_v10 = vld [vmem:[#allocation2 + $0x138] sm:$0xff]  ;;  %v2832_v12 = vadd.f32 %v10456_v36, %v2719_v54  ;;  %4267 = vmatpush.msrb.mxu2 %v3715_v61  ;;  %4373 = vmatpush.msrb.mxu3 %v3738_v24  ;;  %v3759_v24 = vld [vmem:[#allocation3 + $0xc60] sm:$0xff] }
 0x606   : > { %3355 = vst [vmem:[#allocation2 + $0x141] sm:$0xff] %v3323_v31  ;;  %4010 = vmatmul.f32.gmra.mxu3 %v3323_v31  ;;  %v8365_v44 = vpop.f32.mrf.mxu0  ;;  %4480 = vmatpush.msra.mxu0 %v3760_v3  ;;  %v10458_v61 = vld [vmem:[#allocation66_spill] sm:$0xff] }
 0x607   : > { %3894 = vmatmul.f32.gmra.mxu2 %v8359_v10  ;;  %v2945_v20 = vadd.f32 %v8118_v27, %v2832_v12  ;;  %v2722_v36 = vadd.f32 %v10458_v61, %v10457_v38  ;;  %v3736_v3 = vld [vmem:[#allocation3 + $0xba8] sm:$0xff]  ;;  %v3734_v61 = vld [vmem:[#allocation3 + $0xb98] sm:$0xff] }
 0x608   : > { %4481 = vmatpush.msra.mxu0 %v3759_v24 }
 0x609   : > { %v3280_v56 = vpop.f32.mrf.mxu1  ;;  %v3847_v32 = vpop.f32.mrf.mxu2  ;;  %4117 = vmatmul.f32.gmra.mxu0 %v3451_v60  ;;  %v3058_v49 = vadd.f32 %v8105_v37, %v2945_v20  ;;  %v3757_v60 = vld [vmem:[#allocation3 + $0xc50] sm:$0xff] }
 0x60a   : > { %v3281_v31 = vadd.f32 %v3280_v56, %v3168_v35  ;;  %v3848_v11 = vadd.f32 %v8247_v33, %v3847_v32  ;;  %v3963_v1 = vpop.f32.mrf.mxu3  ;;  %v3737_v35 = vld [vmem:[#allocation3 + $0xbb0] sm:$0xff]  ;;  %v3735_v32 = vld [vmem:[#allocation3 + $0xba0] sm:$0xff] }
 0x60b   : > { %4374 = vmatpush.msrb.mxu3 %v3737_v35  ;;  %v3171_v56 = vadd.f32 %v8155_v19, %v3058_v49  ;;  %v3756_v35 = vld [vmem:[#allocation3 + $0xc48] sm:$0xff] }
 0x60c   : > { %v3324_v57 = vmax.f32 %v3281_v31, 0.0  ;;  %v8371_v54 = vadd.f32 %v3960_v39, %v3848_v11  ;;  %4185 = vmatmul.f32.gmra.mxu1 %v8149_v23  ;;  %v3758_v39 = vld [vmem:[#allocation3 + $0xc58] sm:$0xff] }
 0x60d   : > { %v8374_v59 = vld [vmem:[#allocation2 + $0x140] sm:$0xff]  ;;  %v10459_v23 = vld [vmem:[#allocation72_spill] sm:$0xff]  ;;  %4375 = vmatpush.msrb.mxu3 %v3736_v3  ;;  %4482 = vmatpush.msra.mxu0 %v3758_v39  ;;  %v10460_v3 = vld [vmem:[#allocation37_spill] sm:$0xff] }
 0x60e   : > { %3356 = vst [vmem:[#allocation2 + $0x151] sm:$0xff] %v3324_v57  ;;  %4013 = vmatmul.f32.gmra.mxu3 %v3324_v57  ;;  %v8380_v27 = vpop.f32.mrf.mxu0  ;;  %v2835_v12 = vadd.f32 %v10459_v23, %v2722_v36  ;;  %v3452_v11 = vld [vmem:[#allocation2 + $0x13a] sm:$0xff] }
 0x60f   : > { %3897 = vmatmul.f32.gmra.mxu2 %v8374_v59  ;;  %4376 = vmatpush.msrb.mxu3 %v3735_v32  ;;  %v10461_v39 = vld [vmem:[#allocation22_spill] sm:$0xff] }
 0x610   : > { %4483 = vmatpush.msra.mxu0 %v3757_v60  ;;  %v2948_v36 = vadd.f32 %v8139_v52, %v2835_v12  ;;  %v2725_v23 = vadd.f32 %v10461_v39, %v10460_v3  ;;  %v3733_v32 = vld [vmem:[#allocation3 + $0xb90] sm:$0xff]  ;;  %v3755_v52 = vld [vmem:[#allocation3 + $0xc40] sm:$0xff]  ;;  %v3732_v12 = vld [vmem:[#allocation3 + $0xb88] sm:$0xff] }
 0x611   : > { %v3283_v31 = vpop.f32.mrf.mxu1  ;;  %v3850_v37 = vpop.f32.mrf.mxu2  ;;  %4120 = vmatmul.f32.gmra.mxu0 %v3452_v11  ;;  %4377 = vmatpush.msrb.mxu3 %v3734_v61  ;;  %v10462_v60 = vld [vmem:[#allocation73_spill] sm:$0xff] }
 0x612   : > { %v3284_v20 = vadd.f32 %v3283_v31, %v3171_v56  ;;  %v3851_v57 = vadd.f32 %v8247_v33, %v3850_v37  ;;  %v3966_v38 = vpop.f32.mrf.mxu3  ;;  %4484 = vmatpush.msra.mxu0 %v3756_v35  ;;  %v3061_v56 = vadd.f32 %v8126_v15, %v2948_v36  ;;  %v2838_v31 = vadd.f32 %v10462_v60, %v2725_v23  ;;  %v3731_v11 = vld [vmem:[#allocation3 + $0xb80] sm:$0xff]  ;;  %v3453_v35 = vld [vmem:[#allocation2 + $0x142] sm:$0xff]  ;;  %v3752_v39 = vld [vmem:[#allocation3 + $0xc28] sm:$0xff] }
 0x613   : > { %4378 = vmatpush.msrb.mxu3 %v3733_v32  ;;  %v3751_v32 = vld [vmem:[#allocation3 + $0xc20] sm:$0xff] }
 0x614   : > { %v3325_v24 = vmax.f32 %v3284_v20, 0.0  ;;  %v8386_v19 = vadd.f32 %v3963_v1, %v3851_v57  ;;  %4188 = vmatmul.f32.gmra.mxu1 %v8165_v55  ;;  %4485 = vmatpush.msra.mxu0 %v3755_v52  ;;  %v3754_v55 = vld [vmem:[#allocation3 + $0xc38] sm:$0xff]  ;;  %v3174_v37 = vadd.f32 %v8171_v5, %v3061_v56  ;;  %v3753_v20 = vld [vmem:[#allocation3 + $0xc30] sm:$0xff]  ;;  %v2951_v23 = vadd.f32 %v8159_v14, %v2838_v31  ;;  %v10464_v60 = vld [vmem:[#allocation53_spill] sm:$0xff] }
 0x615   : > { %v8389_v49 = vld [vmem:[#allocation2 + $0x150] sm:$0xff]  ;;  %v3794_v57 = vld [vmem:[#allocation3 + $0xd78] sm:$0xff]  ;;  %4379 = vmatpush.msrb.mxu3 %v3732_v12 }
 0x616   : > { %3357 = vst [vmem:[#allocation2 + $0x159] sm:$0xff] %v3325_v24  ;;  %4016 = vmatmul.f32.gmra.mxu3 %v3325_v24  ;;  %v8395_v1 = vpop.f32.mrf.mxu0  ;;  %4486 = vmatpush.msra.mxu0 %v3754_v55  ;;  %v3778_v52 = vld [vmem:[#allocation3 + $0xcf8] sm:$0xff]  ;;  %v10463_v55 = vld [vmem:[#allocation17_spill] sm:$0xff] }
 0x617   : > { %3900 = vmatmul.f32.gmra.mxu2 %v8389_v49  ;;  %4380 = vmatpush.msrb.mxu3 %v3731_v11  ;;  %v3750_v14 = vld [vmem:[#allocation3 + $0xc18] sm:$0xff] }
 0x618   : > { %4704 = vmatpush.msra.mxu2 %v3794_v57  ;;  %4487 = vmatpush.msra.mxu0 %v3753_v20  ;;  %v3064_v57 = vadd.f32 %v8145_v63, %v2951_v23  ;;  %v3749_v20 = vld [vmem:[#allocation3 + $0xc10] sm:$0xff] }
 0x619   : > { %v3286_v15 = vpop.f32.mrf.mxu1  ;;  %v3853_v61 = vpop.f32.mrf.mxu2  ;;  %4123 = vmatmul.f32.gmra.mxu0 %v3453_v35  ;;  %4591 = vmatpush.msra.mxu1 %v3778_v52 }
 0x61a   : > { %v3287_v36 = vadd.f32 %v3286_v15, %v3174_v37  ;;  %v3854_v24 = vadd.f32 %v8247_v33, %v3853_v61  ;;  %v3969_v3 = vpop.f32.mrf.mxu3  ;;  %4488 = vmatpush.msra.mxu0 %v3752_v39  ;;  %v2728_v37 = vadd.f32 %v10464_v60, %v10463_v55  ;;  %v3748_v39 = vld [vmem:[#allocation3 + $0xc08] sm:$0xff]  ;;  %v10467_v60 = vld [vmem:[#allocation55_spill] sm:$0xff] }
 0x61b   : > { %v10466_v55 = vld [vmem:[#allocation62_spill] sm:$0xff] }
 0x61c   : > { %v3326_v5 = vmax.f32 %v3287_v36, 0.0  ;;  %v8401_v56 = vadd.f32 %v3966_v38, %v3854_v24  ;;  %4191 = vmatmul.f32.gmra.mxu1 %v8181_v18  ;;  %4489 = vmatpush.msra.mxu0 %v3751_v32  ;;  %v10465_v38 = vld [vmem:[#allocation75_spill] sm:$0xff]  ;;  %v3177_v18 = vadd.f32 %v8187_v9, %v3064_v57  ;;  %v3747_v9 = vld [vmem:[#allocation3 + $0xc00] sm:$0xff] }
 0x61d   : > { %v8404_v12 = vld [vmem:[#allocation2 + $0x158] sm:$0xff]  ;;  %v2841_v31 = vadd.f32 %v10465_v38, %v2728_v37  ;;  %v2731_v37 = vadd.f32 %v10467_v60, %v10466_v55 }
 0x61e   : > { %3358 = vst [vmem:[#allocation2 + $0x169] sm:$0xff] %v3326_v5  ;;  %4019 = vmatmul.f32.gmra.mxu3 %v3326_v5  ;;  %v8412_v11 = vpop.f32.mrf.mxu0  ;;  %v3454_v35 = vld [vmem:[#allocation2 + $0x152] sm:$0xff]  ;;  %4490 = vmatpush.msra.mxu0 %v3750_v14  ;;  %v3793_v14 = vld [vmem:[#allocation3 + $0xd70] sm:$0xff] }
 0x61f   : > { %3903 = vmatmul.f32.gmra.mxu2 %v8404_v12  ;;  %v2954_v23 = vadd.f32 %v8175_v29, %v2841_v31  ;;  %v10468_v29 = vld [vmem:[#allocation78_spill] sm:$0xff] }
 0x620   : > { %4491 = vmatpush.msra.mxu0 %v3749_v20  ;;  %4705 = vmatpush.msra.mxu2 %v3793_v14 }
 0x621   : > { %v3289_v15 = vpop.f32.mrf.mxu1  ;;  %v3856_v61 = vpop.f32.mrf.mxu2  ;;  %4126 = vmatmul.f32.gmra.mxu0 %v3454_v35  ;;  %v3067_v57 = vadd.f32 %v8161_v6, %v2954_v23 }
 0x622   : > { %v3290_v36 = vadd.f32 %v3289_v15, %v3177_v18  ;;  %v3857_v63 = vadd.f32 %v8247_v33, %v3856_v61  ;;  %v3972_v24 = vpop.f32.mrf.mxu3  ;;  %4492 = vmatpush.msra.mxu0 %v3748_v39  ;;  %v3455_v18 = vld [vmem:[#allocation2 + $0x15a] sm:$0xff] }
 0x623   : > { %v3777_v39 = vld [vmem:[#allocation3 + $0xcf0] sm:$0xff] }
 0x624   : > { %v3327_v5 = vmax.f32 %v3290_v36, 0.0  ;;  %v8416_v32 = vadd.f32 %v3969_v3, %v3857_v63  ;;  %4194 = vmatmul.f32.gmra.mxu1 %v8194_v46  ;;  %4493 = vmatpush.msra.mxu0 %v3747_v9  ;;  %v2844_v3 = vadd.f32 %v10468_v29, %v2731_v37  ;;  %v3180_v46 = vadd.f32 %v8202_v53, %v3067_v57  ;;  %v3522_v53 = vld [vmem:[#allocation2 + $0x1a] sm:$0xff] }
 0x625   : > { %v8419_v52 = vld [vmem:[#allocation2 + $0x168] sm:$0xff]  ;;  %4592 = vmatpush.msra.mxu1 %v3777_v39  ;;  %v3524_v39 = vld [vmem:[#allocation2 + $0x32] sm:$0xff] }
 0x626   : > { %3359 = vst [vmem:[#allocation2 + $0x171] sm:$0xff] %v3327_v5  ;;  %4022 = vmatmul.f32.gmra.mxu3 %v3327_v5  ;;  %v8427_v20 = vpop.f32.mrf.mxu0  ;;  %v2957_v35 = vadd.f32 %v8192_v30, %v2844_v3  ;;  %v10470_v5 = vld [vmem:[#allocation14_spill] sm:$0xff] }
 0x627   : > { %3906 = vmatmul.f32.gmra.mxu2 %v8419_v52 }
 0x628   : > { %v3070_v9 = vadd.f32 %v10470_v5, %v2957_v35 }
 0x629   : > { %v3292_v38 = vpop.f32.mrf.mxu1  ;;  %v3859_v31 = vpop.f32.mrf.mxu2  ;;  %4129 = vmatmul.f32.gmra.mxu0 %v3455_v18 }
 0x62a   : > { %v3293_v15 = vadd.f32 %v3292_v38, %v3180_v46  ;;  %v3860_v61 = vadd.f32 %v8247_v33, %v3859_v31  ;;  %v3975_v6 = vpop.f32.mrf.mxu3  ;;  %v3183_v55 = vadd.f32 %v8215_v25, %v3070_v9  ;;  %v3490_v46 = vld [vmem:[#allocation2 + $0x19] sm:$0xff]  ;;  %v3523_v38 = vld [vmem:[#allocation2 + $0x22] sm:$0xff] }
 0x62b   : > { %v3792_v25 = vld [vmem:[#allocation3 + $0xd68] sm:$0xff] }
 0x62c   : > { %v3328_v36 = vmax.f32 %v3293_v15, 0.0  ;;  %v8431_v63 = vadd.f32 %v3972_v24, %v3860_v61  ;;  %4197 = vmatmul.f32.gmra.mxu1 %v8207_v0  ;;  %4706 = vmatpush.msra.mxu2 %v3792_v25 }
 0x62d   : > { %v8434_v23 = vld [vmem:[#allocation2 + $0x170] sm:$0xff] }
 0x62e   : > { %10469 = vst [vmem:[#allocation32_spill] sm:$0xff] %v8431_v63  ;;  %4381 = vmatmul.f32.vlgmr.msrb.gmra.mxu3 %v3522_v53  ;;  %v3456_v37 = vld [vmem:[#allocation2 + $0x16a] sm:$0xff]  ;;  %v8440_v14 = vpop.f32.mrf.mxu0  ;;  %v3457_v15 = vld [vmem:[#allocation2 + $0x172] sm:$0xff] }
 0x62f   : > { %3360 = vst [vmem:[#allocation2 + $0x181] sm:$0xff] %v3328_v36  ;;  %3909 = vmatmul.f32.gmra.mxu2 %v8434_v23 }
 0x630   : > { %10471 = vst [vmem:[#allocation16_spill] sm:$0xff] %v8440_v14  ;;  %v8587_v14 = vld [vmem:[#allocation2 + $0xb1] sm:$0xff] }
 0x631   : > { %v3295_v60 = vpop.f32.mrf.mxu1  ;;  %v3862_v30 = vpop.f32.mrf.mxu2  ;;  %4132 = vmatmul.f32.gmra.mxu0 %v3456_v37 }
 0x632   : > { %v3296_v24 = vadd.f32 %v3295_v60, %v3183_v55  ;;  %v3863_v57 = vadd.f32 %v8247_v33, %v3862_v30  ;;  %v3978_v0 = vpop.f32.mrf.mxu3  ;;  %v3554_v55 = vld [vmem:[#allocation2 + $0x30] sm:$0xff] }
 0x634   : > { %v3329_v29 = vmax.f32 %v3296_v24, 0.0  ;;  %v8442_v3 = vadd.f32 %v3975_v6, %v3863_v57  ;;  %4200 = vmatmul.f32.gmra.mxu1 %v8223_v16  ;;  %v3776_v16 = vld [vmem:[#allocation3 + $0xce8] sm:$0xff]  ;;  %v3491_v6 = vld [vmem:[#allocation2 + $0x21] sm:$0xff]  ;;  %v3791_v57 = vld [vmem:[#allocation3 + $0xd60] sm:$0xff] }
 0x635   : > { %4593 = vmatpush.msra.mxu1 %v3776_v16  ;;  %v3525_v24 = vld [vmem:[#allocation2 + $0x3a] sm:$0xff]  ;;  %4707 = vmatpush.msra.mxu2 %v3791_v57  ;;  %v3790_v57 = vld [vmem:[#allocation3 + $0xd58] sm:$0xff] }
 0x636   : > { %10472 = vst [vmem:[#allocation43_spill] sm:$0xff] %v8442_v3  ;;  %4384 = vmatmul.f32.gmra.mxu3 %v3523_v38  ;;  %v8451_v53 = vpop.f32.mrf.mxu0  ;;  %v3555_v38 = vld [vmem:[#allocation2 + $0x38] sm:$0xff] }
 0x637   : > { %3361 = vst [vmem:[#allocation2 + $0x189] sm:$0xff] %v3329_v29  ;;  %4268 = vmatmul.f32.vlgmr.msrb.gmra.mxu2 %v3490_v46 }
 0x638   : > { %10474 = vst [vmem:[#allocation29_spill] sm:$0xff] %v8451_v53  ;;  %4708 = vmatpush.msra.mxu2 %v3790_v57  ;;  %v3786_v53 = vld [vmem:[#allocation3 + $0xd38] sm:$0xff] }
 0x639   : > { %v3865_v31 = vpop.f32.mrf.mxu2  ;;  %v8445_v18 = vpop.f32.mrf.mxu1  ;;  %4135 = vmatmul.f32.gmra.mxu0 %v3457_v15 }
 0x63a   : > { %v3866_v61 = vadd.f32 %v8247_v33, %v3865_v31  ;;  %v3981_v35 = vpop.f32.mrf.mxu3 }
 0x63c   : > { %v8448_v36 = vadd.f32 %v3978_v0, %v3866_v61  ;;  %4203 = vmatmul.f32.gmra.mxu1 %v8237_v62  ;;  %v8459_v62 = vld [vmem:[#allocation2 + $0x31] sm:$0xff]  ;;  %v8470_v61 = vld [vmem:[#allocation2 + $0x39] sm:$0xff] }
 0x63e   : > { %10473 = vst [vmem:[#allocation50_spill] sm:$0xff] %v8448_v36  ;;  %4387 = vmatmul.f32.gmra.mxu3 %v3524_v39  ;;  %v8462_v0 = vpop.f32.mrf.mxu0  ;;  %v3556_v39 = vld [vmem:[#allocation2 + $0x48] sm:$0xff] }
 0x63f   : > { %4271 = vmatmul.f32.gmra.mxu2 %v3491_v6  ;;  %10476 = vst [vmem:[#allocation11_spill] sm:$0xff] %v8462_v0  ;;  %v8557_v0 = vld [vmem:[#allocation2 + $0x99] sm:$0xff]  ;;  %v8559_v36 = vld [vmem:[#allocation2 + $0xaa] sm:$0xff] }
 0x640   : > { %10493 = vst [vmem:[#allocation74_spill] sm:$0xff] %v8559_v36 }
 0x641   : > { %v3868_v5 = vpop.f32.mrf.mxu2  ;;  %v8453_v9 = vpop.f32.mrf.mxu1  ;;  %4494 = vmatmul.f32.vlgmr.msra.gmra.mxu0 %v3554_v55 }
 0x642   : > { %v3869_v60 = vadd.f32 %v8247_v33, %v3868_v5  ;;  %v3984_v30 = vpop.f32.mrf.mxu3 }
 0x644   : > { %v8456_v37 = vadd.f32 %v3981_v35, %v3869_v60  ;;  %4206 = vmatmul.f32.gmra.mxu1 %v8254_v47  ;;  %v3775_v47 = vld [vmem:[#allocation3 + $0xce0] sm:$0xff] }
 0x645   : > { %v3526_v35 = vld [vmem:[#allocation2 + $0x4a] sm:$0xff]  ;;  %4594 = vmatpush.msra.mxu1 %v3775_v47 }
 0x646   : > { %10475 = vst [vmem:[#allocation23_spill] sm:$0xff] %v8456_v37  ;;  %4390 = vmatmul.f32.gmra.mxu3 %v3525_v24  ;;  %v8475_v5 = vpop.f32.mrf.mxu0  ;;  %v3527_v24 = vld [vmem:[#allocation2 + $0x52] sm:$0xff] }
 0x647   : > { %4274 = vmatmul.f32.gmra.mxu2 %v8459_v62  ;;  %10478 = vst [vmem:[#allocation40_spill] sm:$0xff] %v8475_v5  ;;  %v3561_v5 = vld [vmem:[#allocation2 + $0x80] sm:$0xff] }
 0x649   : > { %v3871_v29 = vpop.f32.mrf.mxu2  ;;  %v8464_v46 = vpop.f32.mrf.mxu1  ;;  %4497 = vmatmul.f32.gmra.mxu0 %v3555_v38 }
 0x64a   : > { %v3872_v25 = vadd.f32 %v8247_v33, %v3871_v29  ;;  %v3987_v31 = vpop.f32.mrf.mxu3 }
 0x64c   : > { %v8467_v15 = vadd.f32 %v3984_v30, %v3872_v25  ;;  %4209 = vmatmul.f32.gmra.mxu1 %v8269_v34  ;;  %v8481_v34 = vld [vmem:[#allocation2 + $0x49] sm:$0xff] }
 0x64d   : > { %v3557_v25 = vld [vmem:[#allocation2 + $0x50] sm:$0xff] }
 0x64e   : > { %10477 = vst [vmem:[#allocation61_spill] sm:$0xff] %v8467_v15  ;;  %4393 = vmatmul.f32.gmra.mxu3 %v3526_v35 }
 0x64f   : > { %4277 = vmatmul.f32.gmra.mxu2 %v8470_v61 }
 0x651   : > { %v3874_v16 = vpop.f32.mrf.mxu2  ;;  %v8473_v6 = vpop.f32.mrf.mxu1  ;;  %4500 = vmatmul.f32.gmra.mxu0 %v3556_v39  ;;  %v8492_v39 = vld [vmem:[#allocation2 + $0x51] sm:$0xff] }
 0x652   : > { %v3875_v55 = vadd.f32 %v8247_v33, %v3874_v16  ;;  %v3990_v60 = vpop.f32.mrf.mxu3 }
 0x654   : > { %v8478_v30 = vadd.f32 %v3987_v31, %v3875_v55  ;;  %4212 = vmatmul.f32.gmra.mxu1 %v8284_v13  ;;  %v8487_v31 = vpop.f32.mrf.mxu0  ;;  %v3774_v13 = vld [vmem:[#allocation3 + $0xcd8] sm:$0xff] }
 0x655   : > { %10480 = vst [vmem:[#allocation31_spill] sm:$0xff] %v8487_v31  ;;  %v3528_v55 = vld [vmem:[#allocation2 + $0x62] sm:$0xff]  ;;  %4595 = vmatpush.msra.mxu1 %v3774_v13 }
 0x656   : > { %10479 = vst [vmem:[#allocation24_spill] sm:$0xff] %v8478_v30  ;;  %4396 = vmatmul.f32.gmra.mxu3 %v3527_v24  ;;  %v3789_v13 = vld [vmem:[#allocation3 + $0xd50] sm:$0xff] }
 0x657   : > { %4280 = vmatmul.f32.gmra.mxu2 %v8481_v34 }
 0x658   : > { %4709 = vmatpush.msra.mxu2 %v3789_v13 }
 0x659   : > { %v3877_v29 = vpop.f32.mrf.mxu2  ;;  %v8484_v38 = vpop.f32.mrf.mxu1  ;;  %4503 = vmatmul.f32.gmra.mxu0 %v3557_v25 }
 0x65a   : > { %v3878_v47 = vadd.f32 %v8247_v33, %v3877_v29  ;;  %v3993_v35 = vpop.f32.mrf.mxu3  ;;  %v3558_v29 = vld [vmem:[#allocation2 + $0x60] sm:$0xff] }
 0x65c   : > { %v8489_v16 = vadd.f32 %v3990_v60, %v3878_v47  ;;  %4215 = vmatmul.f32.gmra.mxu1 %v8299_v51  ;;  %v8501_v51 = vld [vmem:[#allocation2 + $0x61] sm:$0xff]  ;;  %v3529_v47 = vld [vmem:[#allocation2 + $0x6a] sm:$0xff] }
 0x65e   : > { %10481 = vst [vmem:[#allocation38_spill] sm:$0xff] %v8489_v16  ;;  %4399 = vmatmul.f32.gmra.mxu3 %v3528_v55  ;;  %v8503_v16 = vpop.f32.mrf.mxu0 }
 0x65f   : > { %4283 = vmatmul.f32.gmra.mxu2 %v8492_v39  ;;  %10483 = vst [vmem:[#allocation25_spill] sm:$0xff] %v8503_v16  ;;  %v3530_v16 = vld [vmem:[#allocation2 + $0x7a] sm:$0xff] }
 0x661   : > { %v3880_v24 = vpop.f32.mrf.mxu2  ;;  %v8495_v57 = vpop.f32.mrf.mxu1  ;;  %4506 = vmatmul.f32.gmra.mxu0 %v3558_v29 }
 0x662   : > { %v3881_v25 = vadd.f32 %v8247_v33, %v3880_v24  ;;  %v3996_v30 = vpop.f32.mrf.mxu3  ;;  %v3559_v24 = vld [vmem:[#allocation2 + $0x68] sm:$0xff] }
 0x664   : > { %v8498_v60 = vadd.f32 %v3993_v35, %v3881_v25  ;;  %4218 = vmatmul.f32.gmra.mxu1 %v8314_v58  ;;  %v3773_v58 = vld [vmem:[#allocation3 + $0xcd0] sm:$0xff] }
 0x665   : > { %4596 = vmatpush.msra.mxu1 %v3773_v58  ;;  %v3531_v58 = vld [vmem:[#allocation2 + $0x82] sm:$0xff] }
 0x666   : > { %10482 = vst [vmem:[#allocation69_spill] sm:$0xff] %v8498_v60  ;;  %4402 = vmatmul.f32.gmra.mxu3 %v3529_v47  ;;  %v8512_v60 = vld [vmem:[#allocation2 + $0x69] sm:$0xff]  ;;  %v8515_v47 = vpop.f32.mrf.mxu0 }
 0x667   : > { %4286 = vmatmul.f32.gmra.mxu2 %v8501_v51  ;;  %10485 = vst [vmem:[#allocation18_spill] sm:$0xff] %v8515_v47 }
 0x669   : > { %v3883_v55 = vpop.f32.mrf.mxu2  ;;  %v8506_v31 = vpop.f32.mrf.mxu1  ;;  %4509 = vmatmul.f32.gmra.mxu0 %v3559_v24 }
 0x66a   : > { %v3884_v29 = vadd.f32 %v8247_v33, %v3883_v55  ;;  %v3999_v35 = vpop.f32.mrf.mxu3  ;;  %v3560_v55 = vld [vmem:[#allocation2 + $0x78] sm:$0xff] }
 0x66c   : > { %v8509_v25 = vadd.f32 %v3996_v30, %v3884_v29  ;;  %4221 = vmatmul.f32.gmra.mxu1 %v8329_v48  ;;  %v8523_v48 = vld [vmem:[#allocation2 + $0x79] sm:$0xff] }
 0x66e   : > { %10484 = vst [vmem:[#allocation49_spill] sm:$0xff] %v8509_v25  ;;  %4405 = vmatmul.f32.gmra.mxu3 %v3530_v16  ;;  %v3788_v16 = vld [vmem:[#allocation3 + $0xd48] sm:$0xff]  ;;  %v8528_v37 = vpop.f32.mrf.mxu0 }
 0x66f   : > { %4289 = vmatmul.f32.gmra.mxu2 %v8512_v60  ;;  %10487 = vst [vmem:[#allocation48_spill] sm:$0xff] %v8528_v37  ;;  %v3562_v37 = vld [vmem:[#allocation2 + $0x90] sm:$0xff] }
 0x670   : > { %4710 = vmatpush.msra.mxu2 %v3788_v16 }
 0x671   : > { %v8517_v15 = vpop.f32.mrf.mxu1  ;;  %4512 = vmatmul.f32.gmra.mxu0 %v3560_v55 }
 0x672   : > { %v3886_v13 = vpop.f32.mrf.mxu2  ;;  %v4002_v30 = vpop.f32.mrf.mxu3 }
 0x673   : > { %v3887_v24 = vadd.f32 %v8247_v33, %v3886_v13 }
 0x674   : > { %4224 = vmatmul.f32.gmra.mxu1 %v8344_v2  ;;  %v3772_v2 = vld [vmem:[#allocation3 + $0xcc8] sm:$0xff] }
 0x675   : > { %v8520_v29 = vadd.f32 %v3999_v35, %v3887_v24  ;;  %v8534_v24 = vld [vmem:[#allocation2 + $0x81] sm:$0xff]  ;;  %4597 = vmatpush.msra.mxu1 %v3772_v2 }
 0x676   : > { %4408 = vmatmul.f32.gmra.mxu3 %v3531_v58  ;;  %v3532_v58 = vld [vmem:[#allocation2 + $0x92] sm:$0xff]  ;;  %v8547_v2 = vld [vmem:[#allocation2 + $0x9a] sm:$0xff] }
 0x677   : > { %10486 = vst [vmem:[#allocation56_spill] sm:$0xff] %v8520_v29  ;;  %4292 = vmatmul.f32.gmra.mxu2 %v8523_v48 }
 0x678   : > { %10491 = vst [vmem:[#allocation12_spill] sm:$0xff] %v8547_v2 }
 0x679   : > { %v8526_v47 = vpop.f32.mrf.mxu1  ;;  %4515 = vmatmul.f32.gmra.mxu0 %v3561_v5 }
 0x67a   : > { %v3889_v25 = vpop.f32.mrf.mxu2  ;;  %v4005_v35 = vpop.f32.mrf.mxu3 }
 0x67b   : > { %v3890_v13 = vadd.f32 %v8247_v33, %v3889_v25 }
 0x67c   : > { %4227 = vmatmul.f32.gmra.mxu1 %v8359_v10  ;;  %v8545_v10 = vld [vmem:[#allocation2 + $0x91] sm:$0xff] }
 0x67d   : > { %v8531_v55 = vadd.f32 %v4002_v30, %v3890_v13  ;;  %v8540_v30 = vpop.f32.mrf.mxu0 }
 0x67e   : > { %4411 = vmatmul.f32.gmra.mxu3 %v3532_v58  ;;  %10489 = vst [vmem:[#allocation26_spill] sm:$0xff] %v8540_v30  ;;  %v3787_v58 = vld [vmem:[#allocation3 + $0xd40] sm:$0xff] }
 0x67f   : > { %10488 = vst [vmem:[#allocation39_spill] sm:$0xff] %v8531_v55  ;;  %4295 = vmatmul.f32.gmra.mxu2 %v8534_v24 }
 0x680   : > { %4711 = vmatpush.msra.mxu2 %v3787_v58 }
 0x681   : > { %v8537_v29 = vpop.f32.mrf.mxu1  ;;  %4518 = vmatmul.f32.gmra.mxu0 %v3562_v37  ;;  %v3563_v37 = vld [vmem:[#allocation2 + $0x98] sm:$0xff] }
 0x682   : > { %v3892_v16 = vpop.f32.mrf.mxu2  ;;  %v4008_v5 = vpop.f32.mrf.mxu3  ;;  %4712 = vmatpush.msra.mxu2 %v3786_v53  ;;  %v3763_v53 = vld [vmem:[#allocation3 + $0xc80] sm:$0xff] }
 0x683   : > { %v3893_v25 = vadd.f32 %v8247_v33, %v3892_v16 }
 0x684   : > { %4230 = vmatmul.f32.gmra.mxu1 %v8374_v59  ;;  %v3771_v59 = vld [vmem:[#allocation3 + $0xcc0] sm:$0xff] }
 0x685   : > { %v8542_v13 = vadd.f32 %v4005_v35, %v3893_v25  ;;  %4598 = vmatpush.msra.mxu1 %v3771_v59  ;;  %v8561_v58 = vpop.f32.mrf.mxu0 }
 0x686   : > { %4414 = vmatmul.f32.gmra.mxu3 %v8547_v2  ;;  %10494 = vst [vmem:[#allocation57_spill] sm:$0xff] %v8561_v58  ;;  %v3768_v2 = vld [vmem:[#allocation3 + $0xca8] sm:$0xff]  ;;  %v3767_v58 = vld [vmem:[#allocation3 + $0xca0] sm:$0xff] }
 0x687   : > { %10490 = vst [vmem:[#allocation76_spill] sm:$0xff] %v8542_v13  ;;  %4298 = vmatmul.f32.gmra.mxu2 %v8545_v10  ;;  %v3770_v13 = vld [vmem:[#allocation3 + $0xcb8] sm:$0xff] }
 0x688   : > { %4599 = vmatpush.msra.mxu1 %v3770_v13  ;;  %v8575_v13 = vld [vmem:[#allocation2 + $0xb2] sm:$0xff] }
 0x689   : > { %v8551_v16 = vpop.f32.mrf.mxu1  ;;  %4521 = vmatmul.f32.gmra.mxu0 %v3563_v37  ;;  %10496 = vst [vmem:[#allocation33_spill] sm:$0xff] %v8575_v13 }
 0x68a   : > { %v3895_v55 = vpop.f32.mrf.mxu2  ;;  %v4011_v35 = vpop.f32.mrf.mxu3 }
 0x68b   : > { %v3896_v30 = vadd.f32 %v8247_v33, %v3895_v55  ;;  %v3769_v33 = vld [vmem:[#allocation3 + $0xcb0] sm:$0xff] }
 0x68c   : > { %4233 = vmatmul.f32.gmra.mxu1 %v8389_v49  ;;  %v8567_v49 = vld [vmem:[#allocation5 + $0x2] ss:$0 sm:$0xff] }
 0x68d   : > { %v8554_v25 = vadd.f32 %v4008_v5, %v3896_v30  ;;  %v3564_v30 = vld [vmem:[#allocation2 + $0xa8] sm:$0xff]  ;;  %4600 = vmatpush.msra.mxu1 %v3769_v33 }
 0x68e   : > { %4417 = vmatmul.f32.gmra.mxu3 %v8559_v36  ;;  %v8573_v36 = vld [vmem:[#allocation2 + $0xa9] sm:$0xff] }
 0x68f   : > { %10492 = vst [vmem:[#allocation64_spill] sm:$0xff] %v8554_v25  ;;  %4301 = vmatmul.f32.gmra.mxu2 %v8557_v0  ;;  %4601 = vmatpush.msra.mxu1 %v3768_v2  ;;  %v3766_v33 = vld [vmem:[#allocation3 + $0xc98] sm:$0xff] }
 0x691   : > { %v8565_v5 = vpop.f32.mrf.mxu1  ;;  %4524 = vmatmul.f32.gmra.mxu0 %v3564_v30  ;;  %4602 = vmatpush.msra.mxu1 %v3767_v58  ;;  %v3764_v58 = vld [vmem:[#allocation3 + $0xc88] sm:$0xff] }
 0x692   : > { %v3898_v55 = vpop.f32.mrf.mxu2  ;;  %v4014_v25 = vpop.f32.mrf.mxu3 }
 0x693   : > { %v3899_v37 = vadd.f32 %v8567_v49, %v3898_v55  ;;  %v5185_v55 = vld [vmem:[#allocation3 + $0xdf8] sm:$0xff]  ;;  %4603 = vmatpush.msra.mxu1 %v3766_v33 }
 0x694   : > { %4236 = vmatmul.f32.gmra.mxu1 %v8404_v12  ;;  %5319 = vmatpush.msra.mxu3 %v5185_v55  ;;  %v3765_v12 = vld [vmem:[#allocation3 + $0xc90] sm:$0xff] }
 0x695   : > { %v8570_v59 = vadd.f32 %v4011_v35, %v3899_v37  ;;  %v8579_v35 = vpop.f32.mrf.mxu0  ;;  %4604 = vmatpush.msra.mxu1 %v3765_v12  ;;  %v8589_v55 = vld [vmem:[#allocation2 + $0xc2] sm:$0xff] }
 0x696   : > { %4420 = vmatmul.f32.gmra.mxu3 %v8575_v13  ;;  %10497 = vst [vmem:[#allocation63_spill] sm:$0xff] %v8579_v35  ;;  %v3566_v12 = vld [vmem:[#allocation2 + $0xc0] sm:$0xff] }
 0x697   : > { %10495 = vst [vmem:[#allocation79_spill] sm:$0xff] %v8570_v59  ;;  %4304 = vmatmul.f32.gmra.mxu2 %v8573_v36  ;;  %v3565_v59 = vld [vmem:[#allocation2 + $0xb0] sm:$0xff]  ;;  %4605 = vmatpush.msra.mxu1 %v3764_v58  ;;  %v8601_v58 = vld [vmem:[#allocation2 + $0xc1] sm:$0xff] }
 0x698   : > { %10499 = vst [vmem:[#allocation42_spill] sm:$0xff] %v8589_v55 }
 0x699   : > { %v8581_v37 = vpop.f32.mrf.mxu1  ;;  %4527 = vmatmul.f32.gmra.mxu0 %v3565_v59  ;;  %4606 = vmatpush.msra.mxu1 %v3763_v53  ;;  %v3785_v53 = vld [vmem:[#allocation3 + $0xd30] sm:$0xff] }
 0x69a   : > { %v3901_v30 = vpop.f32.mrf.mxu2  ;;  %v4017_v3 = vpop.f32.mrf.mxu3  ;;  %4713 = vmatpush.msra.mxu2 %v3785_v53  ;;  %v8619_v53 = vld [vmem:[#allocation2 + $0xda] sm:$0xff] }
 0x69b   : > { %v3902_v2 = vadd.f32 %v8567_v49, %v3901_v30  ;;  %10509 = vst [vmem:[#allocation13_spill] sm:$0xff] %v8619_v53 }
 0x69c   : > { %4239 = vmatmul.f32.gmra.mxu1 %v8419_v52 }
 0x69d   : > { %v8584_v13 = vadd.f32 %v4014_v25, %v3902_v2  ;;  %v8595_v25 = vpop.f32.mrf.mxu0 }
 0x69e   : > { %4423 = vmatmul.f32.gmra.mxu3 %v8589_v55  ;;  %10501 = vst [vmem:[#allocation19_spill] sm:$0xff] %v8595_v25  ;;  %v5184_v55 = vld [vmem:[#allocation3 + $0xdf0] sm:$0xff] }
 0x69f   : > { %10498 = vst [vmem:[#allocation77_spill] sm:$0xff] %v8584_v13  ;;  %4307 = vmatmul.f32.gmra.mxu2 %v8587_v14  ;;  %v8603_v13 = vld [vmem:[#allocation2 + $0xca] sm:$0xff]  ;;  %5320 = vmatpush.msra.mxu3 %v5184_v55  ;;  %v3818_v55 = vadd.f32 %v8567_v49, %v8209_v4 }
 0x6a0   : > { %10503 = vst [vmem:[#allocation27_spill] sm:$0xff] %v8603_v13 }
 0x6a1   : > { %v8593_v59 = vpop.f32.mrf.mxu1  ;;  %4530 = vmatmul.f32.gmra.mxu0 %v3566_v12  ;;  %v3567_v12 = vld [vmem:[#allocation2 + $0xc8] sm:$0xff] }
 0x6a2   : > { %v3904_v33 = vpop.f32.mrf.mxu2  ;;  %10500 = vst [vmem:[#allocation52_spill] sm:$0xff] %v8593_v59  ;;  %v4020_v30 = vpop.f32.mrf.mxu3 }
 0x6a3   : > { %v3905_v52 = vadd.f32 %v8567_v49, %v3904_v33 }
 0x6a4   : > { %4242 = vmatmul.f32.gmra.mxu1 %v8434_v23 }
 0x6a5   : > { %v8598_v2 = vadd.f32 %v4017_v3, %v3905_v52  ;;  %v8610_v52 = vld [vmem:[#allocation2 + $0x180] sm:$0xff] }
 0x6a6   : > { %4426 = vmatmul.f32.gmra.mxu3 %v8603_v13  ;;  %10505 = vst [vmem:[#allocation41_spill] sm:$0xff] %v8610_v52  ;;  %v8617_v13 = vld [vmem:[#allocation2 + $0xc9] sm:$0xff] }
 0x6a7   : > { %10502 = vst [vmem:[#allocation80_spill] sm:$0xff] %v8598_v2  ;;  %4310 = vmatmul.f32.gmra.mxu2 %v8601_v58  ;;  %v8612_v2 = vpop.f32.mrf.mxu0 }
 0x6a8   : > { %10506 = vst [vmem:[#allocation81_spill] sm:$0xff] %v8612_v2  ;;  %v10512_v2 = vld [vmem:[#allocation46_spill] sm:$0xff] }
 0x6a9   : > { %v8607_v33 = vpop.f32.mrf.mxu1  ;;  %4533 = vmatmul.f32.gmra.mxu0 %v3567_v12  ;;  %10508 = vst [vmem:[#allocation83_spill] sm:$0xff] %v8617_v13  ;;  %v3931_v63 = vadd.f32 %v10512_v2, %v3818_v55  ;;  %v10517_v2 = vld [vmem:[#allocation45_spill] sm:$0xff] }
 0x6aa   : > { %v3907_v25 = vpop.f32.mrf.mxu2  ;;  %10504 = vst [vmem:[#allocation51_spill] sm:$0xff] %v8607_v33  ;;  %v4023_v23 = vpop.f32.mrf.mxu3  ;;  %v3568_v33 = vld [vmem:[#allocation2 + $0xd8] sm:$0xff] }
 0x6ab   : > { %v3908_v3 = vadd.f32 %v8567_v49, %v3907_v25  ;;  %v4044_v4 = vadd.f32 %v8229_v7, %v3931_v63 }
 0x6ac   : > { %4245 = vmatmul.f32.gmra.mxu1 %v8610_v52 }
 0x6ad   : > { %v8614_v35 = vadd.f32 %v4020_v30, %v3908_v3  ;;  %v4157_v55 = vadd.f32 %v8445_v18, %v4044_v4 }
 0x6ae   : > { %4429 = vmatmul.f32.gmra.mxu3 %v8619_v53  ;;  %v8634_v53 = vld [vmem:[#allocation2 + $0xd9] sm:$0xff] }
 0x6af   : > { %10507 = vst [vmem:[#allocation60_spill] sm:$0xff] %v8614_v35  ;;  %4313 = vmatmul.f32.gmra.mxu2 %v8617_v13  ;;  %v8628_v35 = vld [vmem:[#allocation2 + $0x188] sm:$0xff] }
 0x6b0   : > { %10511 = vst [vmem:[#allocation82_spill] sm:$0xff] %v8628_v35  ;;  %v8636_v13 = vld [vmem:[#allocation2 + $0xe2] sm:$0xff] }
 0x6b1   : > { %v8625_v12 = vpop.f32.mrf.mxu1  ;;  %4536 = vmatmul.f32.gmra.mxu0 %v3568_v33  ;;  %10514 = vst [vmem:[#allocation85_spill] sm:$0xff] %v8634_v53  ;;  %v3784_v33 = vld [vmem:[#allocation3 + $0xd28] sm:$0xff] }
 0x6b2   : > { %v3910_v25 = vpop.f32.mrf.mxu2  ;;  %10510 = vst [vmem:[#allocation65_spill] sm:$0xff] %v8625_v12  ;;  %v4382_v3 = vpop.f32.mrf.mxu3  ;;  %4714 = vmatpush.msra.mxu2 %v3784_v33  ;;  %v8652_v33 = vld [vmem:[#allocation2 + $0xe1] sm:$0xff] }
 0x6b3   : > { %v3911_v30 = vadd.f32 %v8567_v49, %v3910_v25  ;;  %10515 = vst [vmem:[#allocation34_spill] sm:$0xff] %v8636_v13  ;;  %v8639_v12 = vpop.f32.mrf.mxu0  ;;  %v5183_v25 = vld [vmem:[#allocation3 + $0xde8] sm:$0xff] }
 0x6b4   : > { %4248 = vmatmul.f32.gmra.mxu1 %v8628_v35  ;;  %10516 = vst [vmem:[#allocation20_spill] sm:$0xff] %v8639_v12  ;;  %5321 = vmatpush.msra.mxu3 %v5183_v25  ;;  %v3569_v35 = vld [vmem:[#allocation2 + $0xe0] sm:$0xff]  ;;  %v3540_v25 = vld [vmem:[#allocation2 + $0xf2] sm:$0xff] }
 0x6b5   : > { %v8631_v52 = vadd.f32 %v4023_v23, %v3911_v30  ;;  %v3821_v23 = vadd.f32 %v8567_v49, %v10517_v2  ;;  %v10518_v12 = vld [vmem:[#allocation15_spill] sm:$0xff] }
 0x6b6   : > { %4432 = vmatmul.f32.gmra.mxu3 %v8636_v13  ;;  %v10519_v13 = vld [vmem:[#allocation59_spill] sm:$0xff] }
 0x6b7   : > { %10513 = vst [vmem:[#allocation28_spill] sm:$0xff] %v8631_v52  ;;  %4316 = vmatmul.f32.gmra.mxu2 %v8634_v53  ;;  %v3934_v53 = vadd.f32 %v10518_v12, %v3821_v23  ;;  %v3570_v12 = vld [vmem:[#allocation2 + $0xf0] sm:$0xff] }
 0x6b8   : > { %v8664_v23 = vld [vmem:[#allocation2 + $0xf1] sm:$0xff] }
 0x6b9   : > { %v8646_v30 = vpop.f32.mrf.mxu1  ;;  %4539 = vmatmul.f32.gmra.mxu0 %v3569_v35  ;;  %v4047_v49 = vadd.f32 %v10519_v13, %v3934_v53  ;;  %v3541_v13 = vld [vmem:[#allocation2 + $0xfa] sm:$0xff]  ;;  %v4050_v53 = vadd.f32 %v8260_v8, %v8251_v26  ;;  %v3542_v8 = vld [vmem:[#allocation2 + $0x10a] sm:$0xff] }
 0x6ba   : > { %v4269_v52 = vpop.f32.mrf.mxu2  ;;  %v4385_v63 = vpop.f32.mrf.mxu3  ;;  %v8677_v26 = vld [vmem:[#allocation2 + $0xf9] sm:$0xff] }
 0x6bb   : > { %v4270_v7 = vadd.f32 %v4269_v52, %v4157_v55  ;;  %v4160_v18 = vadd.f32 %v8453_v9, %v4047_v49  ;;  %v8657_v4 = vpop.f32.mrf.mxu0  ;;  %v3783_v9 = vld [vmem:[#allocation3 + $0xd20] sm:$0xff]  ;;  %v3571_v49 = vld [vmem:[#allocation2 + $0xf8] sm:$0xff] }
 0x6bc   : > { %4607 = vmatmul.f32.vlgmr.msra.gmra.mxu1 %v8459_v62  ;;  %v5182_v55 = vld [vmem:[#allocation3 + $0xde0] sm:$0xff]  ;;  %4715 = vmatpush.msra.mxu2 %v3783_v9  ;;  %v3572_v9 = vld [vmem:[#allocation2 + $0x108] sm:$0xff] }
 0x6bd   : > { %v8649_v59 = vadd.f32 %v4382_v3, %v4270_v7  ;;  %5322 = vmatpush.msra.mxu3 %v5182_v55  ;;  %v4163_v7 = vadd.f32 %v8464_v46, %v4050_v53 }
 0x6be   : > { %4435 = vmatmul.f32.gmra.mxu3 %v3540_v25 }
 0x6bf   : > { %4319 = vmatmul.f32.gmra.mxu2 %v8652_v33 }
 0x6c1   : > { %v8659_v35 = vpop.f32.mrf.mxu1  ;;  %4542 = vmatmul.f32.gmra.mxu0 %v3570_v12 }
 0x6c2   : > { %v4272_v52 = vpop.f32.mrf.mxu2  ;;  %v4388_v2 = vpop.f32.mrf.mxu3 }
 0x6c3   : > { %v4273_v3 = vadd.f32 %v4272_v52, %v4160_v18 }
 0x6c4   : > { %4610 = vmatmul.f32.gmra.mxu1 %v8470_v61  ;;  %v8672_v61 = vpop.f32.mrf.mxu0 }
 0x6c5   : > { %v8661_v62 = vadd.f32 %v4385_v63, %v4273_v3  ;;  %v4053_v3 = vadd.f32 %v8275_v21, %v8266_v43  ;;  %v3543_v43 = vld [vmem:[#allocation2 + $0x112] sm:$0xff] }
 0x6c6   : > { %4438 = vmatmul.f32.gmra.mxu3 %v3541_v13  ;;  %v10520_v21 = vld [vmem:[#allocation21_spill] sm:$0xff] }
 0x6c7   : > { %4322 = vmatmul.f32.gmra.mxu2 %v8664_v23  ;;  %v4166_v46 = vadd.f32 %v8473_v6, %v4053_v3  ;;  %v3782_v6 = vld [vmem:[#allocation3 + $0xd18] sm:$0xff] }
 0x6c8   : > { %4716 = vmatpush.msra.mxu2 %v3782_v6 }
 0x6c9   : > { %v8670_v25 = vpop.f32.mrf.mxu1  ;;  %4545 = vmatmul.f32.gmra.mxu0 %v3571_v49  ;;  %v4056_v49 = vadd.f32 %v10520_v21, %v8281_v41  ;;  %v8701_v41 = vld [vmem:[#allocation2 + $0x111] sm:$0xff] }
 0x6ca   : > { %v4275_v63 = vpop.f32.mrf.mxu2  ;;  %v4391_v52 = vpop.f32.mrf.mxu3 }
 0x6cb   : > { %v4276_v18 = vadd.f32 %v4275_v63, %v4163_v7  ;;  %v8690_v63 = vld [vmem:[#allocation2 + $0x109] sm:$0xff] }
 0x6cc   : > { %4613 = vmatmul.f32.gmra.mxu1 %v8481_v34 }
 0x6cd   : > { %v8674_v12 = vadd.f32 %v4388_v2, %v4276_v18  ;;  %v8685_v2 = vpop.f32.mrf.mxu0  ;;  %v5181_v18 = vld [vmem:[#allocation3 + $0xdd8] sm:$0xff] }
 0x6ce   : > { %4441 = vmatmul.f32.gmra.mxu3 %v3542_v8  ;;  %v4169_v8 = vadd.f32 %v8484_v38, %v4056_v49 }
 0x6cf   : > { %4325 = vmatmul.f32.gmra.mxu2 %v8677_v26  ;;  %5323 = vmatpush.msra.mxu3 %v5181_v18  ;;  %v3574_v18 = vld [vmem:[#allocation2 + $0x120] sm:$0xff] }
 0x6d1   : > { %v8683_v13 = vpop.f32.mrf.mxu1  ;;  %4548 = vmatmul.f32.gmra.mxu0 %v3572_v9  ;;  %v3544_v9 = vld [vmem:[#allocation2 + $0x122] sm:$0xff] }
 0x6d2   : > { %v4278_v53 = vpop.f32.mrf.mxu2  ;;  %v4394_v7 = vpop.f32.mrf.mxu3 }
 0x6d3   : > { %v4279_v55 = vadd.f32 %v4278_v53, %v4166_v46 }
 0x6d4   : > { %4616 = vmatmul.f32.gmra.mxu1 %v8492_v39  ;;  %v3573_v39 = vld [vmem:[#allocation2 + $0x110] sm:$0xff] }
 0x6d5   : > { %v8687_v34 = vadd.f32 %v4391_v52, %v4279_v55  ;;  %v10521_v55 = vld [vmem:[#allocation9_spill] sm:$0xff]  ;;  %v8705_v21 = vpop.f32.mrf.mxu0 }
 0x6d6   : > { %4444 = vmatmul.f32.gmra.mxu3 %v3543_v43  ;;  %v4059_v43 = vadd.f32 %v8305_v40, %v10521_v55  ;;  %v3545_v40 = vld [vmem:[#allocation2 + $0x12a] sm:$0xff] }
 0x6d7   : > { %4328 = vmatmul.f32.gmra.mxu2 %v8690_v63 }
 0x6d8   : > { %v4172_v49 = vadd.f32 %v8495_v57, %v4059_v43  ;;  %v3781_v57 = vld [vmem:[#allocation3 + $0xd10] sm:$0xff] }
 0x6d9   : > { %v8696_v52 = vpop.f32.mrf.mxu1  ;;  %4551 = vmatmul.f32.gmra.mxu0 %v3573_v39  ;;  %v10522_v39 = vld [vmem:[#allocation47_spill] sm:$0xff]  ;;  %4717 = vmatpush.msra.mxu2 %v3781_v57 }
 0x6da   : > { %v4281_v3 = vpop.f32.mrf.mxu2  ;;  %v4397_v38 = vpop.f32.mrf.mxu3 }
 0x6db   : > { %v4282_v46 = vadd.f32 %v4281_v3, %v4169_v8  ;;  %v8714_v3 = vld [vmem:[#allocation2 + $0x121] sm:$0xff] }
 0x6dc   : > { %4619 = vmatmul.f32.gmra.mxu1 %v8501_v51 }
 0x6dd   : > { %v8698_v53 = vadd.f32 %v4394_v7, %v4282_v46  ;;  %v4062_v46 = vadd.f32 %v10522_v39, %v8311_v28  ;;  %v8720_v43 = vpop.f32.mrf.mxu0  ;;  %v8727_v28 = vld [vmem:[#allocation2 + $0x129] sm:$0xff]  ;;  %v4065_v39 = vadd.f32 %v8335_v42, %v8326_v17  ;;  %v4068_v42 = vadd.f32 %v8350_v50, %v8341_v22  ;;  %v8756_v22 = vld [vmem:[#allocation2 + $0x141] sm:$0xff]  ;;  %v8758_v50 = vld [vmem:[#allocation2 + $0x152] sm:$0xff] }
 0x6de   : > { %4447 = vmatmul.f32.gmra.mxu3 %v3544_v9  ;;  %v5180_v9 = vld [vmem:[#allocation3 + $0xdd0] sm:$0xff]  ;;  %10525 = vst [vmem:[#allocation87_spill] sm:$0xff] %v8758_v50 }
 0x6df   : > { %4331 = vmatmul.f32.gmra.mxu2 %v8701_v41  ;;  %5324 = vmatpush.msra.mxu3 %v5180_v9  ;;  %v4175_v55 = vadd.f32 %v8506_v31, %v4062_v46  ;;  %v4178_v31 = vadd.f32 %v8517_v15, %v4065_v39  ;;  %v3576_v9 = vld [vmem:[#allocation2 + $0x138] sm:$0xff]  ;;  %v8742_v17 = vld [vmem:[#allocation2 + $0x142] sm:$0xff] }
 0x6e0   : > { %10523 = vst [vmem:[#allocation84_spill] sm:$0xff] %v8742_v17  ;;  %v3780_v15 = vld [vmem:[#allocation3 + $0xd08] sm:$0xff] }
 0x6e1   : > { %v8709_v6 = vpop.f32.mrf.mxu1  ;;  %4554 = vmatmul.f32.gmra.mxu0 %v3574_v18  ;;  %4718 = vmatpush.msra.mxu2 %v3780_v15  ;;  %v3578_v15 = vld [vmem:[#allocation2 + $0x150] sm:$0xff] }
 0x6e2   : > { %v4284_v7 = vpop.f32.mrf.mxu2 }
 0x6e3   : > { %v4285_v8 = vadd.f32 %v4284_v7, %v4172_v49  ;;  %v3575_v7 = vld [vmem:[#allocation2 + $0x128] sm:$0xff] }
 0x6e4   : > { %4622 = vmatmul.f32.gmra.mxu1 %v8512_v60 }
 0x6e5   : > { %v8711_v51 = vadd.f32 %v4397_v38, %v4285_v8  ;;  %v4400_v38 = vpop.f32.mrf.mxu3 }
 0x6e6   : > { %4450 = vmatmul.f32.gmra.mxu3 %v3545_v40  ;;  %v3546_v40 = vld [vmem:[#allocation2 + $0x13a] sm:$0xff] }
 0x6e7   : > { %4334 = vmatmul.f32.gmra.mxu2 %v8714_v3 }
 0x6e9   : > { %v8722_v49 = vpop.f32.mrf.mxu1  ;;  %4557 = vmatmul.f32.gmra.mxu0 %v3575_v7  ;;  %v8740_v7 = vld [vmem:[#allocation2 + $0x139] sm:$0xff] }
 0x6ea   : > { %v4287_v60 = vpop.f32.mrf.mxu2 }
 0x6eb   : > { %v4288_v18 = vadd.f32 %v4287_v60, %v4175_v55  ;;  %v8735_v55 = vpop.f32.mrf.mxu0 }
 0x6ec   : > { %4625 = vmatmul.f32.gmra.mxu1 %v8523_v48 }
 0x6ed   : > { %v8724_v8 = vadd.f32 %v4400_v38, %v4288_v18  ;;  %v4403_v48 = vpop.f32.mrf.mxu3  ;;  %v5179_v18 = vld [vmem:[#allocation3 + $0xdc8] sm:$0xff] }
 0x6ee   : > { %4453 = vmatmul.f32.gmra.mxu3 %v3546_v40  ;;  %v4181_v40 = vadd.f32 %v8526_v47, %v4068_v42 }
 0x6ef   : > { %4337 = vmatmul.f32.gmra.mxu2 %v8727_v28  ;;  %5325 = vmatpush.msra.mxu3 %v5179_v18 }
 0x6f1   : > { %v8733_v46 = vpop.f32.mrf.mxu1  ;;  %4560 = vmatmul.f32.gmra.mxu0 %v3576_v9 }
 0x6f2   : > { %v4290_v57 = vpop.f32.mrf.mxu2 }
 0x6f3   : > { %v4291_v38 = vadd.f32 %v4290_v57, %v4178_v31  ;;  %v3577_v31 = vld [vmem:[#allocation2 + $0x140] sm:$0xff]  ;;  %v8753_v9 = vpop.f32.mrf.mxu0 }
 0x6f4   : > { %4628 = vmatmul.f32.gmra.mxu1 %v8534_v24 }
 0x6f5   : > { %v8737_v60 = vadd.f32 %v4403_v48, %v4291_v38  ;;  %v4071_v38 = vadd.f32 %v8365_v44, %v8356_v45  ;;  %v4074_v45 = vadd.f32 %v8380_v27, %v8371_v54  ;;  %v8786_v54 = vld [vmem:[#allocation2 + $0x159] sm:$0xff]  ;;  %v8788_v27 = vld [vmem:[#allocation2 + $0x16a] sm:$0xff] }
 0x6f6   : > { %4456 = vmatmul.f32.gmra.mxu3 %v8742_v17  ;;  %10529 = vst [vmem:[#allocation10_spill] sm:$0xff] %v8788_v27  ;;  %v10554_v17 = vld [vmem:[#allocation40_spill] sm:$0xff] }
 0x6f7   : > { %4340 = vmatmul.f32.gmra.mxu2 %v8740_v7  ;;  %v4184_v47 = vadd.f32 %v8537_v29, %v4071_v38  ;;  %v3779_v29 = vld [vmem:[#allocation3 + $0xd00] sm:$0xff] }
 0x6f8   : > { %4719 = vmatpush.msra.mxu2 %v3779_v29 }
 0x6f9   : > { %v8749_v39 = vpop.f32.mrf.mxu1  ;;  %4563 = vmatmul.f32.gmra.mxu0 %v3577_v31  ;;  %v4187_v31 = vadd.f32 %v8551_v16, %v4074_v45 }
 0x6fa   : > { %v4293_v24 = vpop.f32.mrf.mxu2 }
 0x6fb   : > { %v8751_v57 = vadd.f32 %v4293_v24, %v4181_v40  ;;  %v8772_v40 = vld [vmem:[#allocation2 + $0x15a] sm:$0xff]  ;;  %v8776_v44 = vpop.f32.mrf.mxu0  ;;  %v5178_v24 = vld [vmem:[#allocation3 + $0xdc0] sm:$0xff] }
 0x6fc   : > { %4631 = vmatmul.f32.gmra.mxu1 %v8545_v10  ;;  %v8770_v10 = vld [vmem:[#allocation2 + $0x151] sm:$0xff]  ;;  %10527 = vst [vmem:[#allocation44_spill] sm:$0xff] %v8772_v40  ;;  %5326 = vmatpush.msra.mxu3 %v5178_v24 }
 0x6fd   : > { %10524 = vst [vmem:[#allocation30_spill] sm:$0xff] %v8751_v57 }
 0x6fe   : > { %4459 = vmatmul.f32.gmra.mxu3 %v8758_v50 }
 0x6ff   : > { %4343 = vmatmul.f32.gmra.mxu2 %v8756_v22 }
 0x701   : > { %v8765_v48 = vpop.f32.mrf.mxu1  ;;  %4566 = vmatmul.f32.gmra.mxu0 %v3578_v15  ;;  %v4077_v15 = vadd.f32 %v8395_v1, %v8386_v19  ;;  %v8804_v19 = vld [vmem:[#allocation2 + $0x172] sm:$0xff]  ;;  %v4080_v1 = vadd.f32 %v8412_v11, %v8401_v56  ;;  %v8820_v11 = vld [vmem:[#allocation2 + $0x182] sm:$0xff] }
 0x702   : > { %v4296_v42 = vpop.f32.mrf.mxu2  ;;  %10531 = vst [vmem:[#allocation68_spill] sm:$0xff] %v8804_v19  ;;  %v8818_v56 = vld [vmem:[#allocation2 + $0x171] sm:$0xff] }
 0x703   : > { %v8767_v18 = vadd.f32 %v4296_v42, %v4184_v47  ;;  %v3579_v47 = vld [vmem:[#allocation2 + $0x158] sm:$0xff]  ;;  %v4190_v16 = vadd.f32 %v8565_v5, %v4077_v15  ;;  %v8795_v45 = vpop.f32.mrf.mxu0  ;;  %v5177_v5 = vld [vmem:[#allocation3 + $0xdb8] sm:$0xff]  ;;  %10533 = vst [vmem:[#allocation70_spill] sm:$0xff] %v8820_v11 }
 0x704   : > { %4634 = vmatmul.f32.gmra.mxu1 %v8557_v0  ;;  %5327 = vmatpush.msra.mxu3 %v5177_v5  ;;  %v4083_v5 = vadd.f32 %v8427_v20, %v8416_v32  ;;  %v8837_v32 = vld [vmem:[#allocation2 + $0x18a] sm:$0xff] }
 0x705   : > { %10526 = vst [vmem:[#allocation54_spill] sm:$0xff] %v8767_v18  ;;  %v10539_v20 = vld [vmem:[#allocation32_spill] sm:$0xff] }
 0x706   : > { %4462 = vmatmul.f32.gmra.mxu3 %v8772_v40  ;;  %10538 = vst [vmem:[#allocation67_spill] sm:$0xff] %v8837_v32  ;;  %v8850_v40 = vld [vmem:[#allocation2 + $0x189] sm:$0xff] }
 0x707   : > { %4346 = vmatmul.f32.gmra.mxu2 %v8770_v10 }
 0x709   : > { %v8781_v0 = vpop.f32.mrf.mxu1  ;;  %4569 = vmatmul.f32.gmra.mxu0 %v3579_v47  ;;  %v4193_v47 = vadd.f32 %v8581_v37, %v4080_v1  ;;  %v10534_v37 = vld [vmem:[#allocation52_spill] sm:$0xff] }
 0x70a   : > { %v4299_v38 = vpop.f32.mrf.mxu2  ;;  %v4196_v1 = vadd.f32 %v10534_v37, %v4083_v5  ;;  %v5176_v5 = vld [vmem:[#allocation3 + $0xdb0] sm:$0xff] }
 0x70b   : > { %v8783_v42 = vadd.f32 %v4299_v38, %v4187_v31  ;;  %v3580_v31 = vld [vmem:[#allocation2 + $0x168] sm:$0xff]  ;;  %5328 = vmatpush.msra.mxu3 %v5176_v5  ;;  %v10547_v5 = vld [vmem:[#allocation65_spill] sm:$0xff] }
 0x70c   : > { %4637 = vmatmul.f32.gmra.mxu1 %v8573_v36  ;;  %v8802_v38 = vld [vmem:[#allocation2 + $0x169] sm:$0xff] }
 0x70d   : > { %10528 = vst [vmem:[#allocation86_spill] sm:$0xff] %v8783_v42  ;;  %v10541_v37 = vld [vmem:[#allocation51_spill] sm:$0xff]  ;;  %v10544_v42 = vld [vmem:[#allocation85_spill] sm:$0xff] }
 0x70e   : > { %4465 = vmatmul.f32.gmra.mxu3 %v8788_v27  ;;  %v10540_v27 = vld [vmem:[#allocation16_spill] sm:$0xff] }
 0x70f   : > { %4349 = vmatmul.f32.gmra.mxu2 %v8786_v54 }
 0x711   : > { %v8797_v29 = vpop.f32.mrf.mxu1  ;;  %4572 = vmatmul.f32.gmra.mxu0 %v3580_v31 }
 0x712   : > { %v4302_v24 = vpop.f32.mrf.mxu2 }
 0x713   : > { %v8799_v36 = vadd.f32 %v4302_v24, %v4190_v16  ;;  %v3581_v24 = vld [vmem:[#allocation2 + $0x170] sm:$0xff] }
 0x714   : > { %4640 = vmatmul.f32.gmra.mxu1 %v8587_v14  ;;  %v8813_v14 = vpop.f32.mrf.mxu0 }
 0x715   : > { %10530 = vst [vmem:[#allocation35_spill] sm:$0xff] %v8799_v36  ;;  %v8835_v36 = vld [vmem:[#allocation2 + $0x181] sm:$0xff] }
 0x716   : > { %4468 = vmatmul.f32.gmra.mxu3 %v8804_v19 }
 0x717   : > { %4352 = vmatmul.f32.gmra.mxu2 %v8802_v38 }
 0x719   : > { %v8811_v15 = vpop.f32.mrf.mxu1  ;;  %4575 = vmatmul.f32.gmra.mxu0 %v3581_v24  ;;  %v10536_v24 = vld [vmem:[#allocation41_spill] sm:$0xff] }
 0x71a   : > { %v4305_v16 = vpop.f32.mrf.mxu2 }
 0x71b   : > { %v8815_v31 = vadd.f32 %v4305_v16, %v4193_v47 }
 0x71c   : > { %4643 = vmatmul.f32.gmra.mxu1 %v8601_v58  ;;  %v8832_v58 = vpop.f32.mrf.mxu0 }
 0x71d   : > { %10532 = vst [vmem:[#allocation88_spill] sm:$0xff] %v8815_v31  ;;  %v10537_v31 = vld [vmem:[#allocation83_spill] sm:$0xff] }
 0x71e   : > { %4471 = vmatmul.f32.gmra.mxu3 %v8820_v11  ;;  %v4086_v11 = vadd.f32 %v10540_v27, %v10539_v20  ;;  %v10545_v27 = vld [vmem:[#allocation43_spill] sm:$0xff]  ;;  %v10546_v20 = vld [vmem:[#allocation29_spill] sm:$0xff] }
 0x71f   : > { %4355 = vmatmul.f32.gmra.mxu2 %v8818_v56  ;;  %v4089_v18 = vadd.f32 %v10546_v20, %v10545_v27  ;;  %v10550_v27 = vld [vmem:[#allocation11_spill] sm:$0xff] }
 0x721   : > { %v8827_v19 = vpop.f32.mrf.mxu1  ;;  %4578 = vmatmul.f32.gmra.mxu0 %v10536_v24 }
 0x722   : > { %v4308_v47 = vpop.f32.mrf.mxu2 }
 0x723   : > { %v8829_v16 = vadd.f32 %v4308_v47, %v4196_v1  ;;  %v4199_v1 = vadd.f32 %v10541_v37, %v4086_v11  ;;  %v4202_v11 = vadd.f32 %v10547_v5, %v4089_v18 }
 0x724   : > { %4646 = vmatmul.f32.gmra.mxu1 %v10537_v31  ;;  %v10543_v31 = vld [vmem:[#allocation82_spill] sm:$0xff]  ;;  %v8854_v50 = vpop.f32.mrf.mxu0 }
 0x725   : > { %10535 = vst [vmem:[#allocation36_spill] sm:$0xff] %v8829_v16 }
 0x726   : > { %4474 = vmatmul.f32.gmra.mxu3 %v8837_v32 }
 0x727   : > { %4358 = vmatmul.f32.gmra.mxu2 %v8835_v36 }
 0x729   : > { %v8844_v47 = vpop.f32.mrf.mxu1  ;;  %4581 = vmatmul.f32.gmra.mxu0 %v10543_v31  ;;  %v10549_v31 = vld [vmem:[#allocation50_spill] sm:$0xff] }
 0x72a   : > { %v4311_v24 = vpop.f32.mrf.mxu2  ;;  %v4092_v20 = vadd.f32 %v10550_v27, %v10549_v31 }
 0x72b   : > { %v8846_v16 = vadd.f32 %v4311_v24, %v4199_v1  ;;  %v8862_v24 = vld [vmem:[#allocation2] sm:$0xff] }
 0x72c   : > { %4649 = vmatmul.f32.gmra.mxu1 %v10544_v42  ;;  %v3618_v42 = vld [vmem:[#allocation2 + $0x32] sm:$0xff]  ;;  %v4205_v18 = vadd.f32 %v8646_v30, %v4092_v20  ;;  %v8869_v5 = vpop.f32.mrf.mxu0 }
 0x72d   : > { %10542 = vst [vmem:[#allocation71_spill] sm:$0xff] %v8846_v16  ;;  %v5175_v16 = vld [vmem:[#allocation3 + $0xda8] sm:$0xff] }
 0x72e   : > { %5329 = vmatpush.msra.mxu3 %v5175_v16  ;;  %10551 = vst [vmem:[#allocation66_spill] sm:$0xff] %v8869_v5  ;;  %v8889_v5 = vpop.f32.mrf.mxu3 }
 0x72f   : > { %4361 = vmatmul.f32.gmra.mxu2 %v8850_v40 }
 0x731   : > { %v8858_v37 = vpop.f32.mrf.mxu1  ;;  %4584 = vmatmul.f32.gmra.mxu0 %v8862_v24 }
 0x732   : > { %v4314_v32 = vpop.f32.mrf.mxu2 }
 0x733   : > { %v8860_v1 = vadd.f32 %v4314_v32, %v4202_v11 }
 0x734   : > { %4652 = vmatmul.f32.gmra.mxu1 %v8652_v33  ;;  %v3619_v33 = vld [vmem:[#allocation2 + $0x3a] sm:$0xff]  ;;  %v8882_v27 = vpop.f32.mrf.mxu0 }
 0x735   : > { %10548 = vst [vmem:[#allocation58_spill] sm:$0xff] %v8860_v1  ;;  %v10553_v1 = vld [vmem:[#allocation23_spill] sm:$0xff] }
 0x736   : > { %v4095_v31 = vadd.f32 %v10554_v17, %v10553_v1  ;;  %v5174_v17 = vld [vmem:[#allocation3 + $0xda0] sm:$0xff] }
 0x737   : > { %4720 = vmatmul.f32.vlgmr.msra.gmra.mxu2 %v3618_v42  ;;  %5330 = vmatpush.msra.mxu3 %v5174_v17 }
 0x738   : > { %v4208_v16 = vadd.f32 %v8659_v35, %v4095_v31 }
 0x739   : > { %v8871_v32 = vpop.f32.mrf.mxu1  ;;  %4587 = vmatmul.f32.gmra.mxu0 %v8862_v24 }
 0x73a   : > { %v4317_v57 = vpop.f32.mrf.mxu2 }
 0x73b   : > { %v8873_v11 = vadd.f32 %v4317_v57, %v4205_v18  ;;  %v3620_v57 = vld [vmem:[#allocation2 + $0x4a] sm:$0xff]  ;;  %v10556_v18 = vld [vmem:[#allocation61_spill] sm:$0xff] }
 0x73c   : > { %4655 = vmatmul.f32.gmra.mxu1 %v8664_v23 }
 0x73d   : > { %10552 = vst [vmem:[#allocation72_spill] sm:$0xff] %v8873_v11  ;;  %v10557_v11 = vld [vmem:[#allocation31_spill] sm:$0xff] }
 0x73e   : > { %v4098_v23 = vadd.f32 %v10557_v11, %v10556_v18  ;;  %v8902_v18 = vpop.f32.mrf.mxu3 }
 0x73f   : > { %4723 = vmatmul.f32.gmra.mxu2 %v3619_v33 }
 0x740   : > { %v4211_v35 = vadd.f32 %v8670_v25, %v4098_v23 }
 0x741   : > { %v8880_v30 = vpop.f32.mrf.mxu1 }
 0x742   : > { %v4320_v42 = vpop.f32.mrf.mxu2 }
 0x743   : > { %v8884_v20 = vadd.f32 %v4320_v42, %v4208_v16  ;;  %v8896_v16 = vpop.f32.mrf.mxu0  ;;  %v10560_v42 = vld [vmem:[#allocation24_spill] sm:$0xff] }
 0x744   : > { %4658 = vmatmul.f32.gmra.mxu1 %v8677_v26  ;;  %10559 = vst [vmem:[#allocation73_spill] sm:$0xff] %v8896_v16  ;;  %v3621_v26 = vld [vmem:[#allocation2 + $0x52] sm:$0xff] }
 0x745   : > { %10555 = vst [vmem:[#allocation37_spill] sm:$0xff] %v8884_v20  ;;  %v10561_v20 = vld [vmem:[#allocation25_spill] sm:$0xff] }
 0x746   : > { %v4101_v11 = vadd.f32 %v10561_v20, %v10560_v42  ;;  %v5173_v20 = vld [vmem:[#allocation3 + $0xd98] sm:$0xff] }
 0x747   : > { %4726 = vmatmul.f32.gmra.mxu2 %v3620_v57  ;;  %5331 = vmatpush.msra.mxu3 %v5173_v20 }
 0x748   : > { %v4214_v57 = vadd.f32 %v8683_v13, %v4101_v11  ;;  %v8916_v11 = vpop.f32.mrf.mxu3 }
 0x749   : > { %v8892_v33 = vpop.f32.mrf.mxu1 }
 0x74a   : > { %v4323_v1 = vpop.f32.mrf.mxu2 }
 0x74b   : > { %v8894_v31 = vadd.f32 %v4323_v1, %v4211_v35  ;;  %v3622_v35 = vld [vmem:[#allocation2 + $0x62] sm:$0xff]  ;;  %v8911_v16 = vpop.f32.mrf.mxu0 }
 0x74c   : > { %4661 = vmatmul.f32.gmra.mxu1 %v8690_v63  ;;  %v10563_v1 = vld [vmem:[#allocation38_spill] sm:$0xff]  ;;  %10565 = vst [vmem:[#allocation53_spill] sm:$0xff] %v8911_v16 }
 0x74d   : > { %10558 = vst [vmem:[#allocation22_spill] sm:$0xff] %v8894_v31  ;;  %v10564_v31 = vld [vmem:[#allocation18_spill] sm:$0xff] }
 0x74e   : > { %v4104_v63 = vadd.f32 %v10564_v31, %v10563_v1 }
 0x74f   : > { %4729 = vmatmul.f32.gmra.mxu2 %v3621_v26 }
 0x750   : > { %v4217_v13 = vadd.f32 %v8696_v52, %v4104_v63  ;;  %v8930_v16 = vpop.f32.mrf.mxu3 }
 0x751   : > { %v8904_v25 = vpop.f32.mrf.mxu1  ;;  %10571 = vst [vmem:[#allocation78_spill] sm:$0xff] %v8930_v16 }
 0x752   : > { %v4326_v17 = vpop.f32.mrf.mxu2 }
 0x753   : > { %v8906_v23 = vadd.f32 %v4326_v17, %v4214_v57  ;;  %v10567_v17 = vld [vmem:[#allocation69_spill] sm:$0xff]  ;;  %v8924_v1 = vpop.f32.mrf.mxu0 }
 0x754   : > { %4664 = vmatmul.f32.gmra.mxu1 %v8701_v41  ;;  %v3623_v41 = vld [vmem:[#allocation2 + $0x6a] sm:$0xff]  ;;  %10569 = vst [vmem:[#allocation62_spill] sm:$0xff] %v8924_v1 }
 0x755   : > { %10562 = vst [vmem:[#allocation17_spill] sm:$0xff] %v8906_v23  ;;  %v10568_v23 = vld [vmem:[#allocation48_spill] sm:$0xff] }
 0x756   : > { %v4107_v31 = vadd.f32 %v10568_v23, %v10567_v17  ;;  %v5172_v23 = vld [vmem:[#allocation3 + $0xd90] sm:$0xff] }
 0x757   : > { %4732 = vmatmul.f32.gmra.mxu2 %v3622_v35  ;;  %5332 = vmatpush.msra.mxu3 %v5172_v23  ;;  %v3626_v23 = vld [vmem:[#allocation2 + $0x92] sm:$0xff] }
 0x758   : > { %v4220_v35 = vadd.f32 %v8709_v6, %v4107_v31  ;;  %v8945_v16 = vpop.f32.mrf.mxu3 }
 0x759   : > { %v8914_v42 = vpop.f32.mrf.mxu1 }
 0x75a   : > { %v4329_v26 = vpop.f32.mrf.mxu2 }
 0x75b   : > { %v8918_v57 = vadd.f32 %v4329_v26, %v4217_v13  ;;  %v3624_v13 = vld [vmem:[#allocation2 + $0x7a] sm:$0xff]  ;;  %v8938_v31 = vpop.f32.mrf.mxu0 }
 0x75c   : > { %4667 = vmatmul.f32.gmra.mxu1 %v8714_v3  ;;  %v10572_v3 = vld [vmem:[#allocation49_spill] sm:$0xff]  ;;  %v10573_v26 = vld [vmem:[#allocation26_spill] sm:$0xff]  ;;  %10574 = vst [vmem:[#allocation14_spill] sm:$0xff] %v8938_v31 }
 0x75d   : > { %10566 = vst [vmem:[#allocation75_spill] sm:$0xff] %v8918_v57  ;;  %v4110_v57 = vadd.f32 %v10573_v26, %v10572_v3  ;;  %v5170_v31 = vld [vmem:[#allocation3 + $0xd80] sm:$0xff] }
 0x75f   : > { %4735 = vmatmul.f32.gmra.mxu2 %v3623_v41  ;;  %v4223_v6 = vadd.f32 %v8722_v49, %v4110_v57 }
 0x761   : > { %v8926_v52 = vpop.f32.mrf.mxu1 }
 0x762   : > { %v4332_v20 = vpop.f32.mrf.mxu2 }
 0x763   : > { %v8928_v63 = vadd.f32 %v4332_v20, %v4220_v35  ;;  %v3625_v20 = vld [vmem:[#allocation2 + $0x82] sm:$0xff]  ;;  %v8952_v26 = vpop.f32.mrf.mxu0 }
 0x764   : > { %4670 = vmatmul.f32.gmra.mxu1 %v8727_v28  ;;  %v10576_v28 = vld [vmem:[#allocation56_spill] sm:$0xff]  ;;  %10579 = vst [vmem:[#allocation15_spill] sm:$0xff] %v8952_v26 }
 0x765   : > { %10570 = vst [vmem:[#allocation55_spill] sm:$0xff] %v8928_v63  ;;  %v10577_v63 = vld [vmem:[#allocation57_spill] sm:$0xff]  ;;  %v5197_v26 = vld [vmem:[#allocation3 + $0xe58] sm:$0xff] }
 0x766   : > { %v4113_v1 = vadd.f32 %v10577_v63, %v10576_v28  ;;  %v5171_v63 = vld [vmem:[#allocation3 + $0xd88] sm:$0xff]  ;;  %v8958_v28 = vpop.f32.mrf.mxu3 }
 0x767   : > { %4738 = vmatmul.f32.gmra.mxu2 %v3624_v13  ;;  %5333 = vmatpush.msra.mxu3 %v5171_v63 }
 0x768   : > { %v4226_v13 = vadd.f32 %v8733_v46, %v4113_v1  ;;  %v5201_v46 = vld [vmem:[#allocation3 + $0xe78] sm:$0xff] }
 0x769   : > { %v8936_v17 = vpop.f32.mrf.mxu1  ;;  %5432 = vmatpush.msrb.mxu0 %v5201_v46  ;;  %v5217_v46 = vld [vmem:[#allocation3 + $0xef8] sm:$0xff]  ;;  %5334 = vmatpush.msra.mxu3 %v5170_v31  ;;  %v5191_v31 = vld [vmem:[#allocation3 + $0xe28] sm:$0xff] }
 0x76a   : > { %v4335_v41 = vpop.f32.mrf.mxu2  ;;  %5545 = vmatpush.msrb.mxu1 %v5217_v46  ;;  %v5214_v46 = vld [vmem:[#allocation3 + $0xee0] sm:$0xff]  ;;  %5335 = vmatmul.f32.vlgmr.msra.gmra.mxu3 %v8862_v24 }
 0x76b   : > { %v8940_v35 = vadd.f32 %v4335_v41, %v4223_v6  ;;  %v10581_v6 = vld [vmem:[#allocation63_spill] sm:$0xff]  ;;  %v8967_v63 = vpop.f32.mrf.mxu0 }
 0x76c   : > { %4673 = vmatmul.f32.gmra.mxu1 %v8740_v7  ;;  %v10580_v7 = vld [vmem:[#allocation39_spill] sm:$0xff]  ;;  %10585 = vst [vmem:[#allocation21_spill] sm:$0xff] %v8967_v63  ;;  %v10590_v63 = vld [vmem:[#allocation74_spill] sm:$0xff] }
 0x76d   : > { %10575 = vst [vmem:[#allocation46_spill] sm:$0xff] %v8940_v35  ;;  %v4116_v41 = vadd.f32 %v10581_v6, %v10580_v7  ;;  %v10583_v7 = vld [vmem:[#allocation76_spill] sm:$0xff] }
 0x76f   : > { %4741 = vmatmul.f32.gmra.mxu2 %v3625_v20  ;;  %v4229_v20 = vadd.f32 %v8749_v39, %v4116_v41  ;;  %v10586_v39 = vld [vmem:[#allocation12_spill] sm:$0xff] }
 0x770   : > { %v5198_v41 = vld [vmem:[#allocation3 + $0xe60] sm:$0xff] }
 0x771   : > { %v8948_v49 = vpop.f32.mrf.mxu1 }
 0x772   : > { %v4338_v3 = vpop.f32.mrf.mxu2  ;;  %5338 = vmatmul.f32.gmra.mxu3 %v8862_v24  ;;  %v5206_v24 = vld [vmem:[#allocation3 + $0xea0] sm:$0xff] }
 0x773   : > { %v8950_v57 = vadd.f32 %v4338_v3, %v4226_v13  ;;  %v5199_v3 = vld [vmem:[#allocation3 + $0xe68] sm:$0xff] }
 0x774   : > { %4676 = vmatmul.f32.gmra.mxu1 %v8756_v22  ;;  %v5200_v22 = vld [vmem:[#allocation3 + $0xe70] sm:$0xff] }
 0x775   : > { %10578 = vst [vmem:[#allocation45_spill] sm:$0xff] %v8950_v57  ;;  %5433 = vmatpush.msrb.mxu0 %v5200_v22 }
 0x777   : > { %4744 = vmatmul.f32.gmra.mxu2 %v3626_v23  ;;  %v10584_v23 = vld [vmem:[#allocation19_spill] sm:$0xff]  ;;  %5434 = vmatpush.msrb.mxu0 %v5199_v3  ;;  %v10588_v3 = vld [vmem:[#allocation64_spill] sm:$0xff] }
 0x778   : > { %v4119_v6 = vadd.f32 %v10584_v23, %v10583_v7  ;;  %v5196_v7 = vld [vmem:[#allocation3 + $0xe50] sm:$0xff] }
 0x779   : > { %v8960_v35 = vpop.f32.mrf.mxu1  ;;  %5435 = vmatpush.msrb.mxu0 %v5198_v41  ;;  %v5216_v23 = vld [vmem:[#allocation3 + $0xef0] sm:$0xff]  ;;  %v5194_v41 = vld [vmem:[#allocation3 + $0xe40] sm:$0xff] }
 0x77a   : > { %v4341_v1 = vpop.f32.mrf.mxu2  ;;  %v4232_v57 = vadd.f32 %v8765_v48, %v4119_v6  ;;  %5546 = vmatpush.msrb.mxu1 %v5216_v23  ;;  %v5215_v48 = vld [vmem:[#allocation3 + $0xee8] sm:$0xff] }
 0x77b   : > { %v8962_v13 = vadd.f32 %v4341_v1, %v4229_v20  ;;  %5436 = vmatpush.msrb.mxu0 %v5197_v26  ;;  %v10589_v6 = vld [vmem:[#allocation81_spill] sm:$0xff]  ;;  %v8982_v26 = vpop.f32.mrf.mxu0 }
 0x77c   : > { %4679 = vmatmul.f32.gmra.mxu1 %v8770_v10  ;;  %v8973_v10 = vpop.f32.mrf.mxu3 }
 0x77d   : > { %10582 = vst [vmem:[#allocation59_spill] sm:$0xff] %v8962_v13  ;;  %5437 = vmatpush.msrb.mxu0 %v5196_v7  ;;  %v4122_v13 = vadd.f32 %v10589_v6, %v10588_v3  ;;  %5547 = vmatpush.msrb.mxu1 %v5215_v48  ;;  %v10592_v48 = vld [vmem:[#allocation79_spill] sm:$0xff]  ;;  %v10593_v6 = vld [vmem:[#allocation20_spill] sm:$0xff] }
 0x77f   : > { %4747 = vmatmul.f32.gmra.mxu2 %v10586_v39  ;;  %v5195_v39 = vld [vmem:[#allocation3 + $0xe48] sm:$0xff]  ;;  %5548 = vmatpush.msrb.mxu1 %v5214_v46 }
 0x780   : > { %5438 = vmatpush.msrb.mxu0 %v5195_v39  ;;  %v5211_v39 = vld [vmem:[#allocation3 + $0xec8] sm:$0xff] }
 0x781   : > { %v8971_v1 = vpop.f32.mrf.mxu1  ;;  %v10594_v46 = vld [vmem:[#allocation33_spill] sm:$0xff] }
 0x782   : > { %v4344_v20 = vpop.f32.mrf.mxu2  ;;  %5439 = vmatpush.msrb.mxu0 %v5194_v41  ;;  %v4125_v41 = vadd.f32 %v10593_v6, %v10592_v48  ;;  %v5207_v48 = vld [vmem:[#allocation3 + $0xea8] sm:$0xff]  ;;  %v5233_v6 = vld [vmem:[#allocation3 + $0xf78] sm:$0xff] }
 0x783   : > { %v8975_v22 = vadd.f32 %v4344_v20, %v4232_v57  ;;  %v4235_v57 = vadd.f32 %v8781_v0, %v4122_v13  ;;  %v5213_v20 = vld [vmem:[#allocation3 + $0xed8] sm:$0xff]  ;;  %v5192_v0 = vld [vmem:[#allocation3 + $0xe30] sm:$0xff]  ;;  %5658 = vmatpush.msrb.mxu2 %v5233_v6 }
 0x784   : > { %4682 = vmatmul.f32.gmra.mxu1 %v8786_v54  ;;  %v5193_v54 = vld [vmem:[#allocation3 + $0xe38] sm:$0xff]  ;;  %v5212_v13 = vld [vmem:[#allocation3 + $0xed0] sm:$0xff] }
 0x785   : > { %10587 = vst [vmem:[#allocation9_spill] sm:$0xff] %v8975_v22  ;;  %5440 = vmatpush.msrb.mxu0 %v5193_v54  ;;  %5549 = vmatpush.msrb.mxu1 %v5213_v20  ;;  %v4238_v54 = vadd.f32 %v8797_v29, %v4125_v41  ;;  %v5189_v20 = vld [vmem:[#allocation3 + $0xe18] sm:$0xff]  ;;  %v5187_v29 = vld [vmem:[#allocation3 + $0xe08] sm:$0xff]  ;;  %v5204_v6 = vld [vmem:[#allocation3 + $0xe90] sm:$0xff] }
 0x786   : > { %v10596_v41 = vld [vmem:[#allocation77_spill] sm:$0xff] }
 0x787   : > { %4750 = vmatmul.f32.gmra.mxu2 %v10590_v63  ;;  %v8989_v63 = vpop.f32.mrf.mxu3  ;;  %5441 = vmatpush.msrb.mxu0 %v5192_v0  ;;  %v8998_v0 = vpop.f32.mrf.mxu0 }
 0x788   : > { %5550 = vmatpush.msrb.mxu1 %v5212_v13 }
 0x789   : > { %v8984_v23 = vpop.f32.mrf.mxu1  ;;  %5442 = vmatpush.msrb.mxu0 %v5191_v31  ;;  %v5188_v31 = vld [vmem:[#allocation3 + $0xe10] sm:$0xff] }
 0x78a   : > { %v4347_v7 = vpop.f32.mrf.mxu2  ;;  %5551 = vmatpush.msrb.mxu1 %v5211_v39  ;;  %v5208_v39 = vld [vmem:[#allocation3 + $0xeb0] sm:$0xff] }
 0x78b   : > { %v8986_v3 = vadd.f32 %v4347_v7, %v4235_v57  ;;  %v5190_v57 = vld [vmem:[#allocation3 + $0xe20] sm:$0xff] }
 0x78c   : > { %4685 = vmatmul.f32.gmra.mxu1 %v8802_v38  ;;  %v5210_v7 = vld [vmem:[#allocation3 + $0xec0] sm:$0xff]  ;;  %5443 = vmatpush.msrb.mxu0 %v5190_v57 }
 0x78d   : > { %10591 = vst [vmem:[#allocation47_spill] sm:$0xff] %v8986_v3  ;;  %v5209_v3 = vld [vmem:[#allocation3 + $0xeb8] sm:$0xff]  ;;  %5552 = vmatpush.msrb.mxu1 %v5210_v7  ;;  %v10597_v7 = vld [vmem:[#allocation42_spill] sm:$0xff] }
 0x78e   : > { %5444 = vmatpush.msrb.mxu0 %v5189_v20 }
 0x78f   : > { %4753 = vmatmul.f32.gmra.mxu2 %v10594_v46  ;;  %5553 = vmatpush.msrb.mxu1 %v5209_v3  ;;  %v4128_v46 = vadd.f32 %v8657_v4, %v10596_v41  ;;  %v9006_v57 = vpop.f32.mrf.mxu3  ;;  %v4913_v3 = vld [vmem:[#allocation2 + $0x1] sm:$0xff]  ;;  %v9014_v41 = vpop.f32.mrf.mxu0 }
 0x790   : > { %5445 = vmatpush.msrb.mxu0 %v5188_v31 }
 0x791   : > { %v8996_v22 = vpop.f32.mrf.mxu1  ;;  %5554 = vmatpush.msrb.mxu1 %v5208_v39  ;;  %v4241_v20 = vadd.f32 %v8811_v15, %v4128_v46  ;;  %v10600_v15 = vld [vmem:[#allocation27_spill] sm:$0xff]  ;;  %v5203_v46 = vld [vmem:[#allocation3 + $0xe88] sm:$0xff] }
 0x792   : > { %v4350_v38 = vpop.f32.mrf.mxu2  ;;  %5446 = vmatpush.msrb.mxu0 %v5187_v29  ;;  %v10599_v29 = vld [vmem:[#allocation80_spill] sm:$0xff] }
 0x793   : > { %v9000_v13 = vadd.f32 %v4350_v38, %v4238_v54  ;;  %v5186_v54 = vld [vmem:[#allocation3 + $0xe00] sm:$0xff]  ;;  %5555 = vmatpush.msrb.mxu1 %v5207_v48  ;;  %v5205_v38 = vld [vmem:[#allocation3 + $0xe98] sm:$0xff]  ;;  %v4131_v48 = vadd.f32 %v8672_v61, %v10599_v29 }
 0x794   : > { %4688 = vmatmul.f32.gmra.mxu1 %v8818_v56  ;;  %v5249_v56 = vld [vmem:[#allocation3 + $0xff8] sm:$0xff]  ;;  %5447 = vmatpush.msrb.mxu0 %v5186_v54  ;;  %v10603_v29 = vld [vmem:[#allocation13_spill] sm:$0xff] }
 0x795   : > { %10595 = vst [vmem:[#allocation52_spill] sm:$0xff] %v9000_v13  ;;  %5771 = vmatpush.msrb.mxu3 %v5249_v56  ;;  %5556 = vmatpush.msrb.mxu1 %v5206_v24  ;;  %v4244_v54 = vadd.f32 %v8827_v19, %v4131_v48  ;;  %v5202_v56 = vld [vmem:[#allocation3 + $0xe80] sm:$0xff]  ;;  %v5232_v19 = vld [vmem:[#allocation3 + $0xf70] sm:$0xff]  ;;  %v4517_v13 = vadd.f32 %v8854_v50, %v8737_v60 }
 0x796   : > { %5448 = vmatmul.f32.vlgmr.msrb.gmra.mxu0 %v4913_v3  ;;  %v10602_v61 = vld [vmem:[#allocation60_spill] sm:$0xff]  ;;  %v5248_v48 = vld [vmem:[#allocation3 + $0xff0] sm:$0xff]  ;;  %5659 = vmatpush.msrb.mxu2 %v5232_v19 }
 0x797   : > { %4756 = vmatmul.f32.gmra.mxu2 %v10597_v7  ;;  %5557 = vmatpush.msrb.mxu1 %v5205_v38  ;;  %v4914_v7 = vld [vmem:[#allocation2 + $0x9] sm:$0xff]  ;;  %v9021_v24 = vpop.f32.mrf.mxu3  ;;  %v10613_v50 = vld [vmem:[#allocation66_spill] sm:$0xff] }
 0x798   : > { %5772 = vmatpush.msrb.mxu3 %v5248_v48 }
 0x799   : > { %v9010_v39 = vpop.f32.mrf.mxu1  ;;  %5558 = vmatpush.msrb.mxu1 %v5204_v6 }
 0x79a   : > { %v4353_v31 = vpop.f32.mrf.mxu2 }
 0x79b   : > { %v9012_v4 = vadd.f32 %v4353_v31, %v4241_v20  ;;  %5559 = vmatpush.msrb.mxu1 %v5203_v46  ;;  %v9030_v31 = vpop.f32.mrf.mxu0 }
 0x79c   : > { %4691 = vmatmul.f32.gmra.mxu1 %v8835_v36  ;;  %v4134_v36 = vadd.f32 %v8685_v2, %v10602_v61  ;;  %v10605_v2 = vld [vmem:[#allocation28_spill] sm:$0xff] }
 0x79d   : > { %10598 = vst [vmem:[#allocation41_spill] sm:$0xff] %v9012_v4  ;;  %5560 = vmatpush.msrb.mxu1 %v5202_v56  ;;  %v4137_v56 = vadd.f32 %v8705_v21, %v10605_v2  ;;  %v5231_v21 = vld [vmem:[#allocation3 + $0xf68] sm:$0xff] }
 0x79e   : > { %5451 = vmatmul.f32.gmra.mxu0 %v4914_v7  ;;  %v3616_v7 = vld [vmem:[#allocation2 + $0x199] sm:$0xff]  ;;  %5660 = vmatpush.msrb.mxu2 %v5231_v21  ;;  %v4946_v21 = vld [vmem:[#allocation2 + $0xa] sm:$0xff] }
 0x79f   : > { %4759 = vmatmul.f32.gmra.mxu2 %v10600_v15  ;;  %v4247_v15 = vadd.f32 %v8844_v47, %v4134_v36  ;;  %v4250_v61 = vadd.f32 %v8858_v37, %v4137_v56  ;;  %v3617_v36 = vld [vmem:[#allocation2 + $0x1a1] sm:$0xff] }
 0x7a1   : > { %v9023_v20 = vpop.f32.mrf.mxu1 }
 0x7a2   : > { %v4356_v3 = vpop.f32.mrf.mxu2 }
 0x7a3   : > { %v9025_v38 = vadd.f32 %v4356_v3, %v4244_v54  ;;  %v9036_v54 = vpop.f32.mrf.mxu3  ;;  %v10606_v3 = vld [vmem:[#allocation34_spill] sm:$0xff] }
 0x7a4   : > { %4694 = vmatmul.f32.gmra.mxu1 %v8850_v40 }
 0x7a5   : > { %10601 = vst [vmem:[#allocation83_spill] sm:$0xff] %v9025_v38 }
 0x7a7   : > { %4762 = vmatmul.f32.gmra.mxu2 %v10603_v29  ;;  %v9044_v29 = vpop.f32.mrf.mxu0 }
 0x7a9   : > { %v9034_v46 = vpop.f32.mrf.mxu1 }
 0x7aa   : > { %v4359_v6 = vpop.f32.mrf.mxu2 }
 0x7ab   : > { %v9038_v40 = vadd.f32 %v4359_v6, %v4247_v15  ;;  %v9050_v38 = vpop.f32.mrf.mxu3  ;;  %v3634_v15 = vld [vmem:[#allocation2 + $0xf2] sm:$0xff]  ;;  %v4496_v6 = vadd.f32 %v8720_v43, %v8649_v59  ;;  %v4499_v59 = vadd.f32 %v8735_v55, %v8661_v62  ;;  %v4502_v62 = vadd.f32 %v8753_v9, %v8674_v12 }
 0x7ac   : > { %4697 = vmatmul.f32.gmra.mxu1 %v3616_v7  ;;  %v5247_v7 = vld [vmem:[#allocation3 + $0xfe8] sm:$0xff]  ;;  %v5230_v55 = vld [vmem:[#allocation3 + $0xf60] sm:$0xff] }
 0x7ad   : > { %10604 = vst [vmem:[#allocation32_spill] sm:$0xff] %v9038_v40  ;;  %v4609_v37 = vadd.f32 %v8871_v32, %v4496_v6  ;;  %5773 = vmatpush.msrb.mxu3 %v5247_v7  ;;  %v4612_v32 = vadd.f32 %v8880_v30, %v4499_v59  ;;  %5661 = vmatpush.msrb.mxu2 %v5230_v55  ;;  %v5246_v30 = vld [vmem:[#allocation3 + $0xfe0] sm:$0xff] }
 0x7af   : > { %4765 = vmatmul.f32.gmra.mxu2 %v10606_v3  ;;  %v4945_v3 = vld [vmem:[#allocation2 + $0x2] sm:$0xff]  ;;  %5774 = vmatpush.msrb.mxu3 %v5246_v30 }
 0x7b1   : > { %v9046_v47 = vpop.f32.mrf.mxu1 }
 0x7b2   : > { %v4362_v19 = vpop.f32.mrf.mxu2 }
 0x7b3   : > { %v9048_v48 = vadd.f32 %v4362_v19, %v4250_v61  ;;  %v9057_v61 = vpop.f32.mrf.mxu0  ;;  %v9061_v43 = vpop.f32.mrf.mxu3 }
 0x7b4   : > { %4700 = vmatmul.f32.gmra.mxu1 %v3617_v36  ;;  %v3635_v36 = vld [vmem:[#allocation2 + $0xfa] sm:$0xff] }
 0x7b5   : > { %10607 = vst [vmem:[#allocation16_spill] sm:$0xff] %v9048_v48 }
 0x7b7   : > { %4768 = vmatmul.f32.gmra.mxu2 %v3634_v15 }
 0x7b9   : > { %v9055_v2 = vpop.f32.mrf.mxu1 }
 0x7ba   : > { %v4721_v56 = vpop.f32.mrf.mxu2 }
 0x7bb   : > { %v4722_v19 = vadd.f32 %v4721_v56, %v4609_v37  ;;  %v9066_v40 = vpop.f32.mrf.mxu0  ;;  %v3636_v56 = vld [vmem:[#allocation2 + $0x10a] sm:$0xff] }
 0x7bc   : > { %5561 = vmatmul.f32.vlgmr.msrb.gmra.mxu1 %v4945_v3 }
 0x7bd   : > { %v4817_v48 = vmax.f32 %v4722_v19, 0.0  ;;  %v9074_v19 = vpop.f32.mrf.mxu3 }
 0x7bf   : > { %4849 = vst [vmem:[#allocation2 + $0x19] sm:$0xff] %v4817_v48  ;;  %4771 = vmatmul.f32.gmra.mxu2 %v3635_v36  ;;  %5454 = vmatmul.f32.gmra.mxu0 %v4817_v48  ;;  %v4615_v48 = vadd.f32 %v8892_v33, %v4502_v62 }
 0x7c1   : > { %v9064_v15 = vpop.f32.mrf.mxu1 }
 0x7c2   : > { %v4724_v6 = vpop.f32.mrf.mxu2 }
 0x7c3   : > { %v4725_v7 = vadd.f32 %v4724_v6, %v4612_v32 }
 0x7c4   : > { %5564 = vmatmul.f32.gmra.mxu1 %v4946_v21  ;;  %v3637_v21 = vld [vmem:[#allocation2 + $0x112] sm:$0xff] }
 0x7c5   : > { %v4818_v37 = vmax.f32 %v4725_v7, 0.0  ;;  %v4505_v7 = vadd.f32 %v8776_v44, %v8687_v34  ;;  %v9088_v55 = vpop.f32.mrf.mxu3  ;;  %v4508_v34 = vadd.f32 %v8795_v45, %v8698_v53 }
 0x7c6   : > { %v9068_v3 = vld [vmem:[#allocation2 + $0x18] sm:$0xff] }
 0x7c7   : > { %4850 = vst [vmem:[#allocation2 + $0x21] sm:$0xff] %v4818_v37  ;;  %4774 = vmatmul.f32.gmra.mxu2 %v3636_v56  ;;  %5341 = vmatmul.f32.gmra.mxu3 %v9068_v3  ;;  %v4618_v33 = vadd.f32 %v8904_v25, %v4505_v7  ;;  %v5245_v25 = vld [vmem:[#allocation3 + $0xfd8] sm:$0xff] }
 0x7c8   : > { %5457 = vmatmul.f32.gmra.mxu0 %v4818_v37  ;;  %v9082_v37 = vpop.f32.mrf.mxu0  ;;  %5775 = vmatpush.msrb.mxu3 %v5245_v25 }
 0x7c9   : > { %v9076_v36 = vpop.f32.mrf.mxu1 }
 0x7ca   : > { %v4727_v59 = vpop.f32.mrf.mxu2 }
 0x7cb   : > { %v4728_v32 = vadd.f32 %v4727_v59, %v4615_v48  ;;  %v3638_v59 = vld [vmem:[#allocation2 + $0x122] sm:$0xff] }
 0x7cd   : > { %v4819_v6 = vmax.f32 %v4728_v32, 0.0  ;;  %v9100_v53 = vpop.f32.mrf.mxu3 }
 0x7ce   : > { %v9078_v12 = vld [vmem:[#allocation2 + $0x20] sm:$0xff] }
 0x7cf   : > { %v4947_v9 = vld [vmem:[#allocation2 + $0x1a] sm:$0xff]  ;;  %4851 = vst [vmem:[#allocation2 + $0x31] sm:$0xff] %v4819_v6  ;;  %4777 = vmatmul.f32.gmra.mxu2 %v3637_v21  ;;  %5344 = vmatmul.f32.gmra.mxu3 %v9078_v12  ;;  %v4948_v44 = vld [vmem:[#allocation2 + $0x22] sm:$0xff]  ;;  %v4621_v21 = vadd.f32 %v8914_v42, %v4508_v34 }
 0x7d0   : > { %5567 = vmatmul.f32.gmra.mxu1 %v4947_v9  ;;  %5460 = vmatmul.f32.gmra.mxu0 %v4819_v6  ;;  %v5229_v6 = vld [vmem:[#allocation3 + $0xf58] sm:$0xff]  ;;  %v9096_v9 = vpop.f32.mrf.mxu0 }
 0x7d1   : > { %v9086_v56 = vpop.f32.mrf.mxu1  ;;  %5662 = vmatpush.msrb.mxu2 %v5229_v6 }
 0x7d2   : > { %v4730_v62 = vpop.f32.mrf.mxu2 }
 0x7d3   : > { %v4731_v30 = vadd.f32 %v4730_v62, %v4618_v33 }
 0x7d5   : > { %v4820_v48 = vmax.f32 %v4731_v30, 0.0  ;;  %v3639_v30 = vld [vmem:[#allocation2 + $0x12a] sm:$0xff] }
 0x7d6   : > { %v9090_v32 = vld [vmem:[#allocation2 + $0x30] sm:$0xff] }
 0x7d7   : > { %4852 = vst [vmem:[#allocation2 + $0x39] sm:$0xff] %v4820_v48  ;;  %4780 = vmatmul.f32.gmra.mxu2 %v3638_v59  ;;  %5347 = vmatmul.f32.gmra.mxu3 %v9090_v32 }
 0x7d8   : > { %5570 = vmatmul.f32.gmra.mxu1 %v4948_v44  ;;  %5463 = vmatmul.f32.gmra.mxu0 %v4820_v48  ;;  %v4511_v48 = vadd.f32 %v8813_v14, %v8711_v51  ;;  %v9110_v6 = vpop.f32.mrf.mxu0  ;;  %v4514_v51 = vadd.f32 %v8832_v58, %v8724_v8  ;;  %v9116_v14 = vpop.f32.mrf.mxu3 }
 0x7d9   : > { %v9098_v7 = vpop.f32.mrf.mxu1  ;;  %10608 = vst [vmem:[#allocation51_spill] sm:$0xff] %v9110_v6 }
 0x7da   : > { %v4733_v33 = vpop.f32.mrf.mxu2  ;;  %v4624_v42 = vadd.f32 %v8926_v52, %v4511_v48 }
 0x7db   : > { %v4734_v62 = vadd.f32 %v4733_v33, %v4621_v21  ;;  %v3640_v33 = vld [vmem:[#allocation2 + $0x13a] sm:$0xff] }
 0x7dd   : > { %v4821_v45 = vmax.f32 %v4734_v62, 0.0 }
 0x7de   : > { %v9102_v59 = vld [vmem:[#allocation2 + $0x38] sm:$0xff] }
 0x7df   : > { %v4949_v4 = vld [vmem:[#allocation2 + $0x32] sm:$0xff]  ;;  %4853 = vst [vmem:[#allocation2 + $0x49] sm:$0xff] %v4821_v45  ;;  %4783 = vmatmul.f32.gmra.mxu2 %v3639_v30  ;;  %5350 = vmatmul.f32.gmra.mxu3 %v9102_v59  ;;  %v4950_v52 = vld [vmem:[#allocation2 + $0x3a] sm:$0xff]  ;;  %v4627_v30 = vadd.f32 %v8936_v17, %v4514_v51  ;;  %v4630_v17 = vadd.f32 %v8948_v49, %v4517_v13 }
 0x7e0   : > { %5573 = vmatmul.f32.gmra.mxu1 %v4949_v4  ;;  %5466 = vmatmul.f32.gmra.mxu0 %v4821_v45  ;;  %v5228_v4 = vld [vmem:[#allocation3 + $0xf50] sm:$0xff]  ;;  %v9122_v8 = vpop.f32.mrf.mxu0  ;;  %v9131_v51 = vpop.f32.mrf.mxu3  ;;  %v5227_v13 = vld [vmem:[#allocation3 + $0xf48] sm:$0xff] }
 0x7e1   : > { %v9108_v34 = vpop.f32.mrf.mxu1  ;;  %v5244_v45 = vld [vmem:[#allocation3 + $0xfd0] sm:$0xff]  ;;  %5663 = vmatpush.msrb.mxu2 %v5228_v4  ;;  %10609 = vst [vmem:[#allocation82_spill] sm:$0xff] %v9122_v8 }
 0x7e2   : > { %v4736_v44 = vpop.f32.mrf.mxu2  ;;  %5776 = vmatpush.msrb.mxu3 %v5244_v45  ;;  %10611 = vst [vmem:[#allocation85_spill] sm:$0xff] %v9131_v51 }
 0x7e3   : > { %v4737_v25 = vadd.f32 %v4736_v44, %v4624_v42  ;;  %5664 = vmatpush.msrb.mxu2 %v5227_v13 }
 0x7e5   : > { %v4822_v21 = vmax.f32 %v4737_v25, 0.0 }
 0x7e6   : > { %v9112_v62 = vld [vmem:[#allocation2 + $0x48] sm:$0xff] }
 0x7e7   : > { %4854 = vst [vmem:[#allocation2 + $0x51] sm:$0xff] %v4822_v21  ;;  %4786 = vmatmul.f32.gmra.mxu2 %v3640_v33  ;;  %5353 = vmatmul.f32.gmra.mxu3 %v9112_v62 }
 0x7e8   : > { %5576 = vmatmul.f32.gmra.mxu1 %v4950_v52  ;;  %5469 = vmatmul.f32.gmra.mxu0 %v4822_v21  ;;  %v10610_v21 = vld [vmem:[#allocation84_spill] sm:$0xff]  ;;  %v9140_v8 = vpop.f32.mrf.mxu0 }
 0x7e9   : > { %v9120_v48 = vpop.f32.mrf.mxu1  ;;  %10614 = vst [vmem:[#allocation43_spill] sm:$0xff] %v9140_v8 }
 0x7ea   : > { %v4739_v42 = vpop.f32.mrf.mxu2 }
 0x7eb   : > { %v4740_v44 = vadd.f32 %v4739_v42, %v4627_v30  ;;  %v10612_v30 = vld [vmem:[#allocation30_spill] sm:$0xff] }
 0x7ec   : > { %v4407_v42 = vadd.f32 %v8889_v5, %v10612_v30 }
 0x7ed   : > { %v4823_v58 = vmax.f32 %v4740_v44, 0.0 }
 0x7ee   : > { %v9124_v25 = vld [vmem:[#allocation2 + $0x50] sm:$0xff] }
 0x7ef   : > { %v4951_v33 = vld [vmem:[#allocation2 + $0x4a] sm:$0xff]  ;;  %4855 = vst [vmem:[#allocation2 + $0x61] sm:$0xff] %v4823_v58  ;;  %4789 = vmatmul.f32.gmra.mxu2 %v10610_v21  ;;  %5356 = vmatmul.f32.gmra.mxu3 %v9124_v25  ;;  %v4520_v21 = vadd.f32 %v10613_v50, %v4407_v42  ;;  %v4952_v49 = vld [vmem:[#allocation2 + $0x52] sm:$0xff]  ;;  %v10617_v42 = vld [vmem:[#allocation54_spill] sm:$0xff] }
 0x7f0   : > { %5579 = vmatmul.f32.gmra.mxu1 %v4951_v33  ;;  %5472 = vmatmul.f32.gmra.mxu0 %v4823_v58  ;;  %v10615_v58 = vld [vmem:[#allocation87_spill] sm:$0xff]  ;;  %v5243_v33 = vld [vmem:[#allocation3 + $0xfc8] sm:$0xff]  ;;  %v4410_v50 = vadd.f32 %v8902_v18, %v10617_v42 }
 0x7f1   : > { %v9133_v52 = vpop.f32.mrf.mxu1  ;;  %5777 = vmatpush.msrb.mxu3 %v5243_v33 }
 0x7f2   : > { %v4742_v4 = vpop.f32.mrf.mxu2 }
 0x7f3   : > { %v4743_v45 = vadd.f32 %v4742_v4, %v4630_v17  ;;  %v4633_v17 = vadd.f32 %v8960_v35, %v4520_v21  ;;  %v9157_v21 = vpop.f32.mrf.mxu0 }
 0x7f4   : > { %10619 = vst [vmem:[#allocation65_spill] sm:$0xff] %v9157_v21 }
 0x7f5   : > { %v4824_v44 = vmax.f32 %v4743_v45, 0.0  ;;  %v9147_v45 = vpop.f32.mrf.mxu3 }
 0x7f6   : > { %v9137_v60 = vld [vmem:[#allocation2 + $0x60] sm:$0xff]  ;;  %10616 = vst [vmem:[#allocation29_spill] sm:$0xff] %v9147_v45 }
 0x7f7   : > { %4856 = vst [vmem:[#allocation2 + $0x69] sm:$0xff] %v4824_v44  ;;  %4792 = vmatmul.f32.gmra.mxu2 %v10615_v58  ;;  %5359 = vmatmul.f32.gmra.mxu3 %v9137_v60 }
 0x7f8   : > { %5582 = vmatmul.f32.gmra.mxu1 %v4952_v49  ;;  %5475 = vmatmul.f32.gmra.mxu0 %v4824_v44  ;;  %v4523_v44 = vadd.f32 %v8882_v27, %v4410_v50  ;;  %v10618_v49 = vld [vmem:[#allocation44_spill] sm:$0xff]  ;;  %v10623_v50 = vld [vmem:[#allocation73_spill] sm:$0xff] }
 0x7f9   : > { %v9145_v5 = vpop.f32.mrf.mxu1 }
 0x7fa   : > { %v4745_v4 = vpop.f32.mrf.mxu2  ;;  %v4636_v35 = vadd.f32 %v8971_v1, %v4523_v44  ;;  %v5242_v44 = vld [vmem:[#allocation3 + $0xfc0] sm:$0xff] }
 0x7fb   : > { %v4746_v30 = vadd.f32 %v4745_v4, %v4633_v17  ;;  %v10621_v17 = vld [vmem:[#allocation86_spill] sm:$0xff]  ;;  %5778 = vmatpush.msrb.mxu3 %v5242_v44 }
 0x7fc   : > { %v4413_v4 = vadd.f32 %v8916_v11, %v10621_v17  ;;  %v9173_v17 = vpop.f32.mrf.mxu0 }
 0x7fd   : > { %v4825_v58 = vmax.f32 %v4746_v30, 0.0  ;;  %v9163_v30 = vpop.f32.mrf.mxu3  ;;  %10625 = vst [vmem:[#allocation23_spill] sm:$0xff] %v9173_v17 }
 0x7fe   : > { %v9151_v8 = vld [vmem:[#allocation2 + $0x68] sm:$0xff]  ;;  %10622 = vst [vmem:[#allocation11_spill] sm:$0xff] %v9163_v30 }
 0x7ff   : > { %v4953_v6 = vld [vmem:[#allocation2 + $0x62] sm:$0xff]  ;;  %4857 = vst [vmem:[#allocation2 + $0x79] sm:$0xff] %v4825_v58  ;;  %4795 = vmatmul.f32.gmra.mxu2 %v10618_v49  ;;  %5362 = vmatmul.f32.gmra.mxu3 %v9151_v8  ;;  %v4526_v49 = vadd.f32 %v10623_v50, %v4413_v4  ;;  %v4954_v1 = vld [vmem:[#allocation2 + $0x6a] sm:$0xff] }
 0x800   : > { %5585 = vmatmul.f32.gmra.mxu1 %v4953_v6  ;;  %5478 = vmatmul.f32.gmra.mxu0 %v4825_v58  ;;  %v10624_v6 = vld [vmem:[#allocation10_spill] sm:$0xff]  ;;  %v5226_v58 = vld [vmem:[#allocation3 + $0xf40] sm:$0xff]  ;;  %v10626_v50 = vld [vmem:[#allocation35_spill] sm:$0xff] }
 0x801   : > { %v9159_v13 = vpop.f32.mrf.mxu1  ;;  %v4639_v11 = vadd.f32 %v8984_v23, %v4526_v49  ;;  %5665 = vmatpush.msrb.mxu2 %v5226_v58  ;;  %v10629_v23 = vld [vmem:[#allocation68_spill] sm:$0xff]  ;;  %v5224_v49 = vld [vmem:[#allocation3 + $0xf30] sm:$0xff]  ;;  %v5223_v58 = vld [vmem:[#allocation3 + $0xf28] sm:$0xff] }
 0x802   : > { %10620 = vst [vmem:[#allocation50_spill] sm:$0xff] %v9159_v13  ;;  %v4748_v18 = vpop.f32.mrf.mxu2 }
 0x803   : > { %v4749_v33 = vadd.f32 %v4748_v18, %v4636_v35  ;;  %v5225_v35 = vld [vmem:[#allocation3 + $0xf38] sm:$0xff] }
 0x804   : > { %5666 = vmatpush.msrb.mxu2 %v5225_v35 }
 0x805   : > { %v4826_v27 = vmax.f32 %v4749_v33, 0.0  ;;  %v9180_v51 = vpop.f32.mrf.mxu3 }
 0x806   : > { %v9165_v42 = vld [vmem:[#allocation2 + $0x78] sm:$0xff]  ;;  %5667 = vmatpush.msrb.mxu2 %v5224_v49  ;;  %v5220_v49 = vld [vmem:[#allocation3 + $0xf10] sm:$0xff] }
 0x807   : > { %4858 = vst [vmem:[#allocation2 + $0x81] sm:$0xff] %v4826_v27  ;;  %4798 = vmatmul.f32.gmra.mxu2 %v10624_v6  ;;  %5365 = vmatmul.f32.gmra.mxu3 %v9165_v42  ;;  %v10627_v6 = vld [vmem:[#allocation78_spill] sm:$0xff] }
 0x808   : > { %5588 = vmatmul.f32.gmra.mxu1 %v4954_v1  ;;  %5481 = vmatmul.f32.gmra.mxu0 %v4826_v27  ;;  %v4416_v21 = vadd.f32 %v10627_v6, %v10626_v50  ;;  %v10628_v1 = vld [vmem:[#allocation53_spill] sm:$0xff]  ;;  %v9189_v6 = vpop.f32.mrf.mxu0 }
 0x809   : > { %v9171_v18 = vpop.f32.mrf.mxu1  ;;  %5668 = vmatpush.msrb.mxu2 %v5223_v58  ;;  %10631 = vst [vmem:[#allocation40_spill] sm:$0xff] %v9189_v6  ;;  %v5241_v58 = vld [vmem:[#allocation3 + $0xfb8] sm:$0xff]  ;;  %v5218_v6 = vld [vmem:[#allocation3 + $0xf00] sm:$0xff] }
 0x80a   : > { %v4751_v33 = vpop.f32.mrf.mxu2  ;;  %v4529_v13 = vadd.f32 %v10628_v1, %v4416_v21  ;;  %v10630_v21 = vld [vmem:[#allocation88_spill] sm:$0xff]  ;;  %5779 = vmatpush.msrb.mxu3 %v5241_v58 }
 0x80b   : > { %v4752_v4 = vadd.f32 %v4751_v33, %v4639_v11  ;;  %v5222_v33 = vld [vmem:[#allocation3 + $0xf20] sm:$0xff]  ;;  %v4419_v50 = vadd.f32 %v8945_v16, %v10630_v21 }
 0x80c   : > { %v4642_v44 = vadd.f32 %v8996_v22, %v4529_v13  ;;  %5669 = vmatpush.msrb.mxu2 %v5222_v33  ;;  %v10633_v22 = vld [vmem:[#allocation70_spill] sm:$0xff] }
 0x80d   : > { %v4827_v30 = vmax.f32 %v4752_v4, 0.0 }
 0x80e   : > { %v9177_v45 = vld [vmem:[#allocation2 + $0x80] sm:$0xff] }
 0x80f   : > { %v4955_v27 = vld [vmem:[#allocation2 + $0x7a] sm:$0xff]  ;;  %4859 = vst [vmem:[#allocation2 + $0x91] sm:$0xff] %v4827_v30  ;;  %4801 = vmatmul.f32.gmra.mxu2 %v10629_v23  ;;  %5368 = vmatmul.f32.gmra.mxu3 %v9177_v45  ;;  %v4956_v13 = vld [vmem:[#allocation2 + $0x82] sm:$0xff] }
 0x810   : > { %5591 = vmatmul.f32.gmra.mxu1 %v4955_v27  ;;  %5484 = vmatmul.f32.gmra.mxu0 %v4827_v30  ;;  %v5221_v30 = vld [vmem:[#allocation3 + $0xf18] sm:$0xff]  ;;  %v10632_v27 = vld [vmem:[#allocation62_spill] sm:$0xff] }
 0x811   : > { %v9185_v35 = vpop.f32.mrf.mxu1  ;;  %v4532_v17 = vadd.f32 %v10632_v27, %v4419_v50  ;;  %5670 = vmatpush.msrb.mxu2 %v5221_v30  ;;  %v10635_v50 = vld [vmem:[#allocation36_spill] sm:$0xff]  ;;  %v10638_v30 = vld [vmem:[#allocation67_spill] sm:$0xff] }
 0x812   : > { %v4754_v11 = vpop.f32.mrf.mxu2  ;;  %v4422_v27 = vadd.f32 %v8958_v28, %v10635_v50 }
 0x813   : > { %v4755_v4 = vadd.f32 %v4754_v11, %v4642_v44  ;;  %v4645_v16 = vadd.f32 %v9010_v39, %v4532_v17  ;;  %v9197_v44 = vpop.f32.mrf.mxu3  ;;  %5671 = vmatpush.msrb.mxu2 %v5220_v49  ;;  %v10636_v39 = vld [vmem:[#allocation14_spill] sm:$0xff] }
 0x814   : > { %10634 = vst [vmem:[#allocation61_spill] sm:$0xff] %v9197_v44  ;;  %v4535_v17 = vadd.f32 %v10636_v39, %v4422_v27  ;;  %v9206_v44 = vpop.f32.mrf.mxu0 }
 0x815   : > { %v4828_v1 = vmax.f32 %v4755_v4, 0.0  ;;  %v5219_v4 = vld [vmem:[#allocation3 + $0xf08] sm:$0xff]  ;;  %10637 = vst [vmem:[#allocation31_spill] sm:$0xff] %v9206_v44 }
 0x816   : > { %v9191_v23 = vld [vmem:[#allocation2 + $0x90] sm:$0xff]  ;;  %5672 = vmatpush.msrb.mxu2 %v5219_v4  ;;  %v4648_v49 = vadd.f32 %v9023_v20, %v4535_v17  ;;  %v3648_v4 = vld [vmem:[#allocation2 + $0x19a] sm:$0xff] }
 0x817   : > { %4860 = vst [vmem:[#allocation2 + $0x99] sm:$0xff] %v4828_v1  ;;  %4804 = vmatmul.f32.gmra.mxu2 %v10633_v22  ;;  %5371 = vmatmul.f32.gmra.mxu3 %v9191_v23 }
 0x818   : > { %5594 = vmatmul.f32.gmra.mxu1 %v4956_v13  ;;  %5487 = vmatmul.f32.gmra.mxu0 %v4828_v1 }
 0x819   : > { %v9199_v11 = vpop.f32.mrf.mxu1  ;;  %5673 = vmatpush.msrb.mxu2 %v5218_v6 }
 0x81a   : > { %v4757_v33 = vpop.f32.mrf.mxu2 }
 0x81b   : > { %v4758_v21 = vadd.f32 %v4757_v33, %v4645_v16  ;;  %v9213_v33 = vpop.f32.mrf.mxu3 }
 0x81c   : > { %v9221_v6 = vpop.f32.mrf.mxu0 }
 0x81d   : > { %v4829_v22 = vmax.f32 %v4758_v21, 0.0  ;;  %v10639_v21 = vld [vmem:[#allocation71_spill] sm:$0xff]  ;;  %10641 = vst [vmem:[#allocation24_spill] sm:$0xff] %v9221_v6 }
 0x81e   : > { %v9203_v1 = vld [vmem:[#allocation2 + $0x98] sm:$0xff]  ;;  %v4425_v50 = vadd.f32 %v8973_v10, %v10639_v21 }
 0x81f   : > { %v4957_v13 = vld [vmem:[#allocation2 + $0x92] sm:$0xff]  ;;  %4861 = vst [vmem:[#allocation2 + $0xa9] sm:$0xff] %v4829_v22  ;;  %4807 = vmatmul.f32.gmra.mxu2 %v10638_v30  ;;  %5374 = vmatmul.f32.gmra.mxu3 %v9203_v1  ;;  %v10640_v30 = vld [vmem:[#allocation15_spill] sm:$0xff]  ;;  %v4958_v20 = vld [vmem:[#allocation2 + $0x9a] sm:$0xff] }
 0x820   : > { %5597 = vmatmul.f32.gmra.mxu1 %v4957_v13  ;;  %5490 = vmatmul.f32.gmra.mxu0 %v4829_v22  ;;  %v4538_v44 = vadd.f32 %v10640_v30, %v4425_v50  ;;  %v5240_v22 = vld [vmem:[#allocation3 + $0xfb0] sm:$0xff] }
 0x821   : > { %v9211_v28 = vpop.f32.mrf.mxu1  ;;  %5780 = vmatpush.msrb.mxu3 %v5240_v22 }
 0x822   : > { %v4760_v58 = vpop.f32.mrf.mxu2  ;;  %v4651_v13 = vadd.f32 %v9034_v46, %v4538_v44 }
 0x823   : > { %v4761_v16 = vadd.f32 %v4760_v58, %v4648_v49  ;;  %v3649_v58 = vld [vmem:[#allocation2 + $0x1a2] sm:$0xff]  ;;  %v9228_v50 = vpop.f32.mrf.mxu3 }
 0x824   : > { %10643 = vst [vmem:[#allocation25_spill] sm:$0xff] %v9228_v50  ;;  %v9235_v44 = vpop.f32.mrf.mxu0 }
 0x825   : > { %v4830_v27 = vmax.f32 %v4761_v16, 0.0  ;;  %v10642_v16 = vld [vmem:[#allocation58_spill] sm:$0xff] }
 0x826   : > { %v9217_v39 = vld [vmem:[#allocation2 + $0xa8] sm:$0xff]  ;;  %v4428_v21 = vadd.f32 %v8989_v63, %v10642_v16 }
 0x827   : > { %4862 = vst [vmem:[#allocation2 + $0xb1] sm:$0xff] %v4830_v27  ;;  %4810 = vmatmul.f32.gmra.mxu2 %v3648_v4  ;;  %5377 = vmatmul.f32.gmra.mxu3 %v9217_v39 }
 0x828   : > { %5600 = vmatmul.f32.gmra.mxu1 %v4958_v20  ;;  %5493 = vmatmul.f32.gmra.mxu0 %v4830_v27  ;;  %v10644_v20 = vld [vmem:[#allocation21_spill] sm:$0xff] }
 0x829   : > { %v9224_v17 = vpop.f32.mrf.mxu1  ;;  %v4541_v27 = vadd.f32 %v10644_v20, %v4428_v21 }
 0x82a   : > { %v4763_v10 = vpop.f32.mrf.mxu2 }
 0x82b   : > { %v4764_v49 = vadd.f32 %v4763_v10, %v4651_v13  ;;  %v4654_v46 = vadd.f32 %v9046_v47, %v4541_v27  ;;  %v10645_v10 = vld [vmem:[#allocation72_spill] sm:$0xff]  ;;  %v9243_v21 = vpop.f32.mrf.mxu3 }
 0x82d   : > { %v4831_v4 = vmax.f32 %v4764_v49, 0.0  ;;  %v4431_v49 = vadd.f32 %v9006_v57, %v10645_v10 }
 0x82e   : > { %v9230_v30 = vld [vmem:[#allocation2 + $0xb0] sm:$0xff] }
 0x82f   : > { %v4959_v6 = vld [vmem:[#allocation2 + $0xaa] sm:$0xff]  ;;  %4863 = vst [vmem:[#allocation2 + $0xc1] sm:$0xff] %v4831_v4  ;;  %4813 = vmatmul.f32.gmra.mxu2 %v3649_v58  ;;  %5380 = vmatmul.f32.gmra.mxu3 %v9230_v30  ;;  %v4544_v58 = vadd.f32 %v8982_v26, %v4431_v49  ;;  %v4960_v47 = vld [vmem:[#allocation2 + $0xb2] sm:$0xff] }
 0x830   : > { %5603 = vmatmul.f32.gmra.mxu1 %v4959_v6  ;;  %5496 = vmatmul.f32.gmra.mxu0 %v4831_v4  ;;  %v5239_v6 = vld [vmem:[#allocation3 + $0xfa8] sm:$0xff] }
 0x831   : > { %v9237_v22 = vpop.f32.mrf.mxu1  ;;  %v4657_v4 = vadd.f32 %v9055_v2, %v4544_v58  ;;  %5781 = vmatpush.msrb.mxu3 %v5239_v6  ;;  %v10648_v6 = vld [vmem:[#allocation22_spill] sm:$0xff] }
 0x832   : > { %v4766_v63 = vpop.f32.mrf.mxu2 }
 0x833   : > { %v4767_v13 = vadd.f32 %v4766_v63, %v4654_v46  ;;  %v10646_v63 = vld [vmem:[#allocation37_spill] sm:$0xff]  ;;  %v9258_v2 = vpop.f32.mrf.mxu3 }
 0x834   : > { %v4434_v26 = vadd.f32 %v9021_v24, %v10646_v63 }
 0x835   : > { %v4832_v16 = vmax.f32 %v4767_v13, 0.0 }
 0x836   : > { %v9241_v50 = vld [vmem:[#allocation2 + $0xc0] sm:$0xff] }
 0x837   : > { %4864 = vst [vmem:[#allocation2 + $0xc9] sm:$0xff] %v4832_v16  ;;  %5383 = vmatmul.f32.gmra.mxu3 %v9241_v50  ;;  %5674 = vmatmul.f32.vlgmr.msrb.gmra.mxu2 %v9068_v3  ;;  %v4547_v3 = vadd.f32 %v8998_v0, %v4434_v26 }
 0x838   : > { %5606 = vmatmul.f32.gmra.mxu1 %v4960_v47  ;;  %5499 = vmatmul.f32.gmra.mxu0 %v4832_v16 }
 0x839   : > { %v9249_v20 = vpop.f32.mrf.mxu1  ;;  %v4660_v16 = vadd.f32 %v9064_v15, %v4547_v3  ;;  %v5238_v15 = vld [vmem:[#allocation3 + $0xfa0] sm:$0xff] }
 0x83a   : > { %v4769_v57 = vpop.f32.mrf.mxu2  ;;  %5782 = vmatpush.msrb.mxu3 %v5238_v15 }
 0x83b   : > { %v4770_v27 = vadd.f32 %v4769_v57, %v4657_v4  ;;  %v4437_v4 = vadd.f32 %v9036_v54, %v10648_v6 }
 0x83c   : > { %v5455_v46 = vpop.f32.mrf.mxu0 }
 0x83d   : > { %v4833_v13 = vmax.f32 %v4770_v27, 0.0  ;;  %v4550_v63 = vadd.f32 %v9014_v41, %v4437_v4  ;;  %v10649_v41 = vld [vmem:[#allocation17_spill] sm:$0xff] }
 0x83e   : > { %v9253_v10 = vld [vmem:[#allocation2 + $0xc8] sm:$0xff] }
 0x83f   : > { %v4961_v49 = vld [vmem:[#allocation2 + $0xc2] sm:$0xff]  ;;  %4865 = vst [vmem:[#allocation2 + $0xd9] sm:$0xff] %v4833_v13  ;;  %5386 = vmatmul.f32.gmra.mxu3 %v9253_v10  ;;  %5677 = vmatmul.f32.gmra.mxu2 %v9078_v12  ;;  %v4962_v12 = vld [vmem:[#allocation2 + $0xca] sm:$0xff]  ;;  %v4663_v26 = vadd.f32 %v9076_v36, %v4550_v63 }
 0x840   : > { %5609 = vmatmul.f32.gmra.mxu1 %v4961_v49  ;;  %5502 = vmatmul.f32.gmra.mxu0 %v4833_v13  ;;  %v9271_v13 = vld [vmem:[#allocation5 + $0x3] ss:$0 sm:$0xff] }
 0x841   : > { %v9261_v24 = vpop.f32.mrf.mxu1 }
 0x842   : > { %v4772_v58 = vpop.f32.mrf.mxu2  ;;  %10647 = vst [vmem:[#allocation38_spill] sm:$0xff] %v9261_v24  ;;  %v10664_v24 = vld [vmem:[#allocation43_spill] sm:$0xff] }
 0x843   : > { %v4773_v47 = vadd.f32 %v4772_v58, %v4660_v16  ;;  %v4440_v58 = vadd.f32 %v9050_v38, %v10649_v41 }
 0x845   : > { %v4834_v57 = vmax.f32 %v4773_v47, 0.0  ;;  %v5458_v0 = vpop.f32.mrf.mxu0  ;;  %v4553_v63 = vadd.f32 %v9030_v31, %v4440_v58 }
 0x846   : > { %v9265_v27 = vld [vmem:[#allocation2 + $0xd8] sm:$0xff] }
 0x847   : > { %4866 = vst [vmem:[#allocation2 + $0xe1] sm:$0xff] %v4834_v57  ;;  %5389 = vmatmul.f32.gmra.mxu3 %v9265_v27  ;;  %5680 = vmatmul.f32.gmra.mxu2 %v9090_v32  ;;  %v4666_v38 = vadd.f32 %v9086_v56, %v4553_v63 }
 0x848   : > { %5612 = vmatmul.f32.gmra.mxu1 %v4962_v12  ;;  %5505 = vmatmul.f32.gmra.mxu0 %v4834_v57 }
 0x84a   : > { %v4775_v54 = vpop.f32.mrf.mxu2  ;;  %v5342_v49 = vpop.f32.mrf.mxu3 }
 0x84b   : > { %v4776_v3 = vadd.f32 %v4775_v54, %v4663_v26  ;;  %v5343_v16 = vadd.f32 %v9271_v13, %v5342_v49  ;;  %v10650_v54 = vld [vmem:[#allocation75_spill] sm:$0xff] }
 0x84c   : > { %v4443_v49 = vadd.f32 %v9061_v43, %v10650_v54 }
 0x84d   : > { %v4835_v47 = vmax.f32 %v4776_v3, 0.0  ;;  %v9276_v6 = vadd.f32 %v5455_v46, %v5343_v16  ;;  %v9278_v32 = vpop.f32.mrf.mxu1  ;;  %v5461_v4 = vpop.f32.mrf.mxu0 }
 0x84e   : > { %v9280_v57 = vld [vmem:[#allocation2 + $0xe0] sm:$0xff] }
 0x84f   : > { %v4963_v36 = vld [vmem:[#allocation2 + $0xda] sm:$0xff]  ;;  %4867 = vst [vmem:[#allocation2 + $0xf1] sm:$0xff] %v4835_v47  ;;  %5392 = vmatmul.f32.gmra.mxu3 %v9280_v57  ;;  %5683 = vmatmul.f32.gmra.mxu2 %v9102_v59  ;;  %v4556_v59 = vadd.f32 %v9044_v29, %v4443_v49  ;;  %v4964_v56 = vld [vmem:[#allocation2 + $0xe2] sm:$0xff] }
 0x850   : > { %5615 = vmatmul.f32.gmra.mxu1 %v4963_v36  ;;  %5508 = vmatmul.f32.gmra.mxu0 %v4835_v47  ;;  %v5237_v47 = vld [vmem:[#allocation3 + $0xf98] sm:$0xff] }
 0x851   : > { %v4669_v43 = vadd.f32 %v9098_v7, %v4556_v59  ;;  %5783 = vmatpush.msrb.mxu3 %v5237_v47  ;;  %v10652_v47 = vld [vmem:[#allocation46_spill] sm:$0xff] }
 0x852   : > { %v4778_v12 = vpop.f32.mrf.mxu2  ;;  %v5345_v46 = vpop.f32.mrf.mxu3 }
 0x853   : > { %v4779_v15 = vadd.f32 %v4778_v12, %v4666_v38  ;;  %v5346_v26 = vadd.f32 %v9271_v13, %v5345_v46  ;;  %v10651_v12 = vld [vmem:[#allocation55_spill] sm:$0xff] }
 0x854   : > { %v4446_v29 = vadd.f32 %v9074_v19, %v10651_v12  ;;  %v5236_v12 = vld [vmem:[#allocation3 + $0xf90] sm:$0xff] }
 0x855   : > { %v4836_v3 = vmax.f32 %v4779_v15, 0.0  ;;  %v9289_v16 = vadd.f32 %v5458_v0, %v5346_v26  ;;  %v9291_v31 = vpop.f32.mrf.mxu1  ;;  %v5464_v41 = vpop.f32.mrf.mxu0  ;;  %5784 = vmatpush.msrb.mxu3 %v5236_v12 }
 0x856   : > { %v9293_v58 = vld [vmem:[#allocation2 + $0xf0] sm:$0xff]  ;;  %v4559_v7 = vadd.f32 %v9057_v61, %v4446_v29 }
 0x857   : > { %4868 = vst [vmem:[#allocation2 + $0xf9] sm:$0xff] %v4836_v3  ;;  %5395 = vmatmul.f32.gmra.mxu3 %v9293_v58  ;;  %5686 = vmatmul.f32.gmra.mxu2 %v9112_v62 }
 0x858   : > { %5618 = vmatmul.f32.gmra.mxu1 %v4964_v56  ;;  %5511 = vmatmul.f32.gmra.mxu0 %v4836_v3  ;;  %v4672_v19 = vadd.f32 %v9108_v34, %v4559_v7  ;;  %v10653_v7 = vld [vmem:[#allocation45_spill] sm:$0xff] }
 0x85a   : > { %v4781_v0 = vpop.f32.mrf.mxu2  ;;  %v5348_v36 = vpop.f32.mrf.mxu3 }
 0x85b   : > { %v4782_v63 = vadd.f32 %v4781_v0, %v4669_v43  ;;  %v5349_v38 = vadd.f32 %v9271_v13, %v5348_v36  ;;  %v4449_v43 = vadd.f32 %v9088_v55, %v10652_v47 }
 0x85d   : > { %v4837_v46 = vmax.f32 %v4782_v63, 0.0  ;;  %v9302_v15 = vadd.f32 %v5461_v4, %v5349_v38  ;;  %v9304_v26 = vpop.f32.mrf.mxu1  ;;  %v5467_v62 = vpop.f32.mrf.mxu0 }
 0x85e   : > { %v9306_v54 = vld [vmem:[#allocation2 + $0xf8] sm:$0xff] }
 0x85f   : > { %v4965_v49 = vld [vmem:[#allocation2 + $0xf2] sm:$0xff]  ;;  %4869 = vst [vmem:[#allocation2 + $0x109] sm:$0xff] %v4837_v46  ;;  %5398 = vmatmul.f32.gmra.mxu3 %v9306_v54  ;;  %5689 = vmatmul.f32.gmra.mxu2 %v9124_v25  ;;  %v4562_v25 = vadd.f32 %v9066_v40, %v4449_v43  ;;  %v4966_v34 = vld [vmem:[#allocation2 + $0xfa] sm:$0xff]  ;;  %v4452_v40 = vadd.f32 %v9100_v53, %v10653_v7 }
 0x860   : > { %5621 = vmatmul.f32.gmra.mxu1 %v4965_v49  ;;  %5514 = vmatmul.f32.gmra.mxu0 %v4837_v46 }
 0x861   : > { %v4675_v55 = vadd.f32 %v9120_v48, %v4562_v25  ;;  %v4565_v48 = vadd.f32 %v9082_v37, %v4452_v40  ;;  %v10654_v25 = vld [vmem:[#allocation59_spill] sm:$0xff] }
 0x862   : > { %v4784_v3 = vpop.f32.mrf.mxu2  ;;  %v5351_v4 = vpop.f32.mrf.mxu3 }
 0x863   : > { %v4785_v59 = vadd.f32 %v4784_v3, %v4672_v19  ;;  %v5352_v56 = vadd.f32 %v9271_v13, %v5351_v4  ;;  %v4678_v53 = vadd.f32 %v9133_v52, %v4565_v48 }
 0x865   : > { %v4838_v0 = vmax.f32 %v4785_v59, 0.0  ;;  %v9315_v36 = vadd.f32 %v5464_v41, %v5352_v56  ;;  %v9317_v61 = vpop.f32.mrf.mxu1  ;;  %v5470_v63 = vpop.f32.mrf.mxu0 }
 0x866   : > { %v9319_v38 = vld [vmem:[#allocation2 + $0x108] sm:$0xff] }
 0x867   : > { %4870 = vst [vmem:[#allocation2 + $0x111] sm:$0xff] %v4838_v0  ;;  %5401 = vmatmul.f32.gmra.mxu3 %v9319_v38  ;;  %5692 = vmatmul.f32.gmra.mxu2 %v9137_v60 }
 0x868   : > { %5624 = vmatmul.f32.gmra.mxu1 %v4966_v34  ;;  %5517 = vmatmul.f32.gmra.mxu0 %v4838_v0  ;;  %v4455_v34 = vadd.f32 %v9116_v14, %v10654_v25  ;;  %v5265_v14 = vld [vmem:[#allocation3 + $0x1078] sm:$0xff] }
 0x869   : > { %5884 = vmatpush.msra.mxu0 %v5265_v14 }
 0x86a   : > { %v4787_v41 = vpop.f32.mrf.mxu2  ;;  %v5354_v29 = vpop.f32.mrf.mxu3 }
 0x86b   : > { %v4788_v46 = vadd.f32 %v4787_v41, %v4675_v55  ;;  %v5355_v49 = vadd.f32 %v9271_v13, %v5354_v29 }
 0x86d   : > { %v4839_v19 = vmax.f32 %v4788_v46, 0.0  ;;  %v9328_v3 = vadd.f32 %v5467_v62, %v5355_v49  ;;  %v9330_v4 = vpop.f32.mrf.mxu1  ;;  %v5473_v60 = vpop.f32.mrf.mxu0  ;;  %v5235_v46 = vld [vmem:[#allocation3 + $0xf88] sm:$0xff] }
 0x86e   : > { %v9332_v59 = vld [vmem:[#allocation2 + $0x110] sm:$0xff]  ;;  %5785 = vmatpush.msrb.mxu3 %v5235_v46 }
 0x86f   : > { %v4967_v56 = vld [vmem:[#allocation2 + $0x10a] sm:$0xff]  ;;  %4871 = vst [vmem:[#allocation2 + $0x121] sm:$0xff] %v4839_v19  ;;  %5404 = vmatmul.f32.gmra.mxu3 %v9332_v59  ;;  %5695 = vmatmul.f32.gmra.mxu2 %v9151_v8  ;;  %v4568_v8 = vadd.f32 %v9096_v9, %v4455_v34  ;;  %v4968_v52 = vld [vmem:[#allocation2 + $0x112] sm:$0xff] }
 0x870   : > { %5627 = vmatmul.f32.gmra.mxu1 %v4967_v56  ;;  %5520 = vmatmul.f32.gmra.mxu0 %v4839_v19  ;;  %v10655_v19 = vld [vmem:[#allocation9_spill] sm:$0xff] }
 0x871   : > { %v10656_v56 = vld [vmem:[#allocation85_spill] sm:$0xff] }
 0x872   : > { %v4790_v47 = vpop.f32.mrf.mxu2  ;;  %v5357_v62 = vpop.f32.mrf.mxu3  ;;  %v4458_v48 = vadd.f32 %v10656_v56, %v10655_v19  ;;  %v5263_v34 = vld [vmem:[#allocation3 + $0x1068] sm:$0xff] }
 0x873   : > { %v4791_v43 = vadd.f32 %v4790_v47, %v4678_v53  ;;  %v5358_v0 = vadd.f32 %v9271_v13, %v5357_v62 }
 0x875   : > { %v4840_v12 = vmax.f32 %v4791_v43, 0.0  ;;  %v9341_v55 = vadd.f32 %v5470_v63, %v5358_v0  ;;  %v5476_v37 = vpop.f32.mrf.mxu0  ;;  %v9346_v29 = vpop.f32.mrf.mxu1  ;;  %v4681_v63 = vadd.f32 %v9145_v5, %v4568_v8  ;;  %v10657_v0 = vld [vmem:[#allocation51_spill] sm:$0xff]  ;;  %v10658_v8 = vld [vmem:[#allocation50_spill] sm:$0xff] }
 0x876   : > { %v9343_v41 = vld [vmem:[#allocation2 + $0x120] sm:$0xff]  ;;  %v4571_v25 = vadd.f32 %v10657_v0, %v4458_v48 }
 0x877   : > { %4872 = vst [vmem:[#allocation2 + $0x129] sm:$0xff] %v4840_v12  ;;  %5407 = vmatmul.f32.gmra.mxu3 %v9343_v41  ;;  %5698 = vmatmul.f32.gmra.mxu2 %v9165_v42  ;;  %v5264_v5 = vld [vmem:[#allocation3 + $0x1070] sm:$0xff] }
 0x878   : > { %5630 = vmatmul.f32.gmra.mxu1 %v4968_v52  ;;  %5523 = vmatmul.f32.gmra.mxu0 %v4840_v12  ;;  %v5281_v12 = vld [vmem:[#allocation3 + $0x10f8] sm:$0xff]  ;;  %v4684_v52 = vadd.f32 %v10658_v8, %v4571_v25  ;;  %v10661_v0 = vld [vmem:[#allocation82_spill] sm:$0xff] }
 0x879   : > { %5885 = vmatpush.msra.mxu0 %v5264_v5  ;;  %5997 = vmatpush.msra.mxu1 %v5281_v12  ;;  %v5260_v12 = vld [vmem:[#allocation3 + $0x1050] sm:$0xff]  ;;  %v5279_v8 = vld [vmem:[#allocation3 + $0x10e8] sm:$0xff] }
 0x87a   : > { %v4793_v49 = vpop.f32.mrf.mxu2  ;;  %v5360_v7 = vpop.f32.mrf.mxu3 }
 0x87b   : > { %v4794_v40 = vadd.f32 %v4793_v49, %v4681_v63  ;;  %v5361_v9 = vadd.f32 %v9271_v13, %v5360_v7  ;;  %v5262_v63 = vld [vmem:[#allocation3 + $0x1060] sm:$0xff]  ;;  %5886 = vmatpush.msra.mxu0 %v5263_v34  ;;  %v5280_v34 = vld [vmem:[#allocation3 + $0x10f0] sm:$0xff] }
 0x87c   : > { %5998 = vmatpush.msra.mxu1 %v5280_v34 }
 0x87d   : > { %v4841_v53 = vmax.f32 %v4794_v40, 0.0  ;;  %v9354_v47 = vadd.f32 %v5473_v60, %v5361_v9  ;;  %v5479_v42 = vpop.f32.mrf.mxu0  ;;  %v9362_v60 = vpop.f32.mrf.mxu1  ;;  %v10659_v40 = vld [vmem:[#allocation47_spill] sm:$0xff]  ;;  %5887 = vmatpush.msra.mxu0 %v5262_v63  ;;  %v5259_v63 = vld [vmem:[#allocation3 + $0x1048] sm:$0xff] }
 0x87e   : > { %v9356_v62 = vld [vmem:[#allocation2 + $0x128] sm:$0xff]  ;;  %5999 = vmatpush.msra.mxu1 %v5279_v8 }
 0x87f   : > { %v4969_v43 = vld [vmem:[#allocation2 + $0x122] sm:$0xff]  ;;  %4873 = vst [vmem:[#allocation2 + $0x139] sm:$0xff] %v4841_v53  ;;  %5410 = vmatmul.f32.gmra.mxu3 %v9356_v62  ;;  %5701 = vmatmul.f32.gmra.mxu2 %v9177_v45  ;;  %v10660_v45 = vld [vmem:[#allocation29_spill] sm:$0xff]  ;;  %v4970_v5 = vld [vmem:[#allocation2 + $0x12a] sm:$0xff] }
 0x880   : > { %5633 = vmatmul.f32.gmra.mxu1 %v4969_v43  ;;  %5526 = vmatmul.f32.gmra.mxu0 %v4841_v53  ;;  %v4461_v9 = vadd.f32 %v10660_v45, %v10659_v40  ;;  %v5261_v43 = vld [vmem:[#allocation3 + $0x1058] sm:$0xff] }
 0x881   : > { %5888 = vmatpush.msra.mxu0 %v5261_v43  ;;  %v10662_v45 = vld [vmem:[#allocation52_spill] sm:$0xff] }
 0x882   : > { %v4796_v46 = vpop.f32.mrf.mxu2  ;;  %v5363_v14 = vpop.f32.mrf.mxu3  ;;  %v4574_v25 = vadd.f32 %v10661_v0, %v4461_v9  ;;  %v10663_v9 = vld [vmem:[#allocation11_spill] sm:$0xff] }
 0x883   : > { %v4797_v49 = vadd.f32 %v4796_v46, %v4684_v52  ;;  %v5364_v7 = vadd.f32 %v9271_v13, %v5363_v14  ;;  %v5234_v52 = vld [vmem:[#allocation3 + $0xf80] sm:$0xff]  ;;  %5889 = vmatpush.msra.mxu0 %v5260_v12  ;;  %v5257_v12 = vld [vmem:[#allocation3 + $0x1038] sm:$0xff] }
 0x884   : > { %5786 = vmatpush.msrb.mxu3 %v5234_v52  ;;  %v5277_v52 = vld [vmem:[#allocation3 + $0x10d8] sm:$0xff] }
 0x885   : > { %v4842_v19 = vmax.f32 %v4797_v49, 0.0  ;;  %v9367_v56 = vadd.f32 %v5476_v37, %v5364_v7  ;;  %v5482_v48 = vpop.f32.mrf.mxu0  ;;  %v4687_v37 = vadd.f32 %v9171_v18, %v4574_v25  ;;  %v5278_v49 = vld [vmem:[#allocation3 + $0x10e0] sm:$0xff]  ;;  %v9375_v7 = vpop.f32.mrf.mxu1  ;;  %5890 = vmatpush.msra.mxu0 %v5259_v63  ;;  %v5256_v63 = vld [vmem:[#allocation3 + $0x1030] sm:$0xff] }
 0x886   : > { %v9369_v53 = vld [vmem:[#allocation2 + $0x138] sm:$0xff]  ;;  %v5258_v25 = vld [vmem:[#allocation3 + $0x1040] sm:$0xff]  ;;  %6000 = vmatpush.msra.mxu1 %v5278_v49 }
 0x887   : > { %4874 = vst [vmem:[#allocation2 + $0x141] sm:$0xff] %v4842_v19  ;;  %5413 = vmatmul.f32.gmra.mxu3 %v9369_v53  ;;  %5704 = vmatmul.f32.gmra.mxu2 %v9191_v23  ;;  %v5275_v49 = vld [vmem:[#allocation3 + $0x10c8] sm:$0xff] }
 0x888   : > { %5636 = vmatmul.f32.gmra.mxu1 %v4970_v5  ;;  %5529 = vmatmul.f32.gmra.mxu0 %v4842_v19  ;;  %v4464_v19 = vadd.f32 %v10663_v9, %v10662_v45 }
 0x889   : > { %5891 = vmatpush.msra.mxu0 %v5258_v25  ;;  %6001 = vmatpush.msra.mxu1 %v5277_v52  ;;  %v5255_v25 = vld [vmem:[#allocation3 + $0x1028] sm:$0xff] }
 0x88a   : > { %v4799_v46 = vpop.f32.mrf.mxu2  ;;  %v5366_v14 = vpop.f32.mrf.mxu3  ;;  %v10666_v52 = vld [vmem:[#allocation65_spill] sm:$0xff] }
 0x88b   : > { %v4800_v40 = vadd.f32 %v4799_v46, %v4687_v37  ;;  %v5367_v23 = vadd.f32 %v9271_v13, %v5366_v14  ;;  %v4577_v37 = vadd.f32 %v10664_v24, %v4464_v19  ;;  %5892 = vmatpush.msra.mxu0 %v5257_v12 }
 0x88d   : > { %v4843_v0 = vmax.f32 %v4800_v40, 0.0  ;;  %v9380_v18 = vadd.f32 %v5479_v42, %v5367_v23  ;;  %v5485_v43 = vpop.f32.mrf.mxu0  ;;  %v5276_v42 = vld [vmem:[#allocation3 + $0x10d0] sm:$0xff]  ;;  %v4690_v8 = vadd.f32 %v9185_v35, %v4577_v37  ;;  %v10665_v23 = vld [vmem:[#allocation41_spill] sm:$0xff]  ;;  %v9391_v45 = vpop.f32.mrf.mxu1  ;;  %5893 = vmatpush.msra.mxu0 %v5256_v63 }
 0x88e   : > { %v9382_v5 = vld [vmem:[#allocation2 + $0x140] sm:$0xff]  ;;  %6002 = vmatpush.msra.mxu1 %v5276_v42  ;;  %v5297_v42 = vld [vmem:[#allocation3 + $0x1178] sm:$0xff] }
 0x88f   : > { %v4971_v34 = vld [vmem:[#allocation2 + $0x13a] sm:$0xff]  ;;  %4875 = vst [vmem:[#allocation2 + $0x151] sm:$0xff] %v4843_v0  ;;  %5416 = vmatmul.f32.gmra.mxu3 %v9382_v5  ;;  %5707 = vmatmul.f32.gmra.mxu2 %v9203_v1  ;;  %v4467_v1 = vadd.f32 %v9180_v51, %v10665_v23  ;;  %v4972_v12 = vld [vmem:[#allocation2 + $0x142] sm:$0xff]  ;;  %v5254_v51 = vld [vmem:[#allocation3 + $0x1020] sm:$0xff] }
 0x890   : > { %5639 = vmatmul.f32.gmra.mxu1 %v4971_v34  ;;  %5532 = vmatmul.f32.gmra.mxu0 %v4843_v0  ;;  %v5274_v34 = vld [vmem:[#allocation3 + $0x10c0] sm:$0xff] }
 0x891   : > { %6003 = vmatpush.msra.mxu1 %v5275_v49  ;;  %v4580_v37 = vadd.f32 %v10666_v52, %v4467_v1  ;;  %5894 = vmatpush.msra.mxu0 %v5255_v25  ;;  %v5253_v49 = vld [vmem:[#allocation3 + $0x1018] sm:$0xff]  ;;  %v10668_v1 = vld [vmem:[#allocation61_spill] sm:$0xff]  ;;  %v5252_v25 = vld [vmem:[#allocation3 + $0x1010] sm:$0xff] }
 0x892   : > { %v4802_v46 = vpop.f32.mrf.mxu2  ;;  %v5369_v14 = vpop.f32.mrf.mxu3  ;;  %6110 = vmatpush.msra.mxu2 %v5297_v42  ;;  %v5271_v42 = vld [vmem:[#allocation3 + $0x10a8] sm:$0xff] }
 0x893   : > { %v4803_v40 = vadd.f32 %v4802_v46, %v4690_v8  ;;  %v5370_v24 = vadd.f32 %v9271_v13, %v5369_v14  ;;  %v4693_v8 = vadd.f32 %v9199_v11, %v4580_v37  ;;  %6004 = vmatpush.msra.mxu1 %v5274_v34  ;;  %v5313_v46 = vld [vmem:[#allocation3 + $0x11f8] sm:$0xff]  ;;  %5895 = vmatpush.msra.mxu0 %v5254_v51  ;;  %v5270_v51 = vld [vmem:[#allocation3 + $0x10a0] sm:$0xff] }
 0x894   : > { %6223 = vmatpush.msra.mxu3 %v5313_v46  ;;  %v10669_v46 = vld [vmem:[#allocation23_spill] sm:$0xff] }
 0x895   : > { %v4844_v9 = vmax.f32 %v4803_v40, 0.0  ;;  %v9393_v19 = vadd.f32 %v5482_v48, %v5370_v24  ;;  %v5488_v35 = vpop.f32.mrf.mxu0  ;;  %v5273_v48 = vld [vmem:[#allocation3 + $0x10b8] sm:$0xff]  ;;  %v5272_v40 = vld [vmem:[#allocation3 + $0x10b0] sm:$0xff]  ;;  %5896 = vmatpush.msra.mxu0 %v5253_v49 }
 0x896   : > { %v9395_v0 = vld [vmem:[#allocation2 + $0x150] sm:$0xff]  ;;  %6005 = vmatpush.msra.mxu1 %v5273_v48 }
 0x897   : > { %4876 = vst [vmem:[#allocation2 + $0x159] sm:$0xff] %v4844_v9  ;;  %5419 = vmatmul.f32.gmra.mxu3 %v9395_v0  ;;  %5710 = vmatmul.f32.gmra.mxu2 %v9217_v39  ;;  %v10667_v39 = vld [vmem:[#allocation83_spill] sm:$0xff] }
 0x898   : > { %5642 = vmatmul.f32.gmra.mxu1 %v4972_v12  ;;  %5535 = vmatmul.f32.gmra.mxu0 %v4844_v9  ;;  %v4470_v9 = vadd.f32 %v10668_v1, %v10667_v39  ;;  %v10670_v1 = vld [vmem:[#allocation32_spill] sm:$0xff] }
 0x899   : > { %6006 = vmatpush.msra.mxu1 %v5272_v40  ;;  %5897 = vmatpush.msra.mxu0 %v5252_v25  ;;  %v5250_v40 = vld [vmem:[#allocation3 + $0x1000] sm:$0xff]  ;;  %v5268_v25 = vld [vmem:[#allocation3 + $0x1090] sm:$0xff] }
 0x89a   : > { %v4805_v14 = vpop.f32.mrf.mxu2  ;;  %v5372_v63 = vpop.f32.mrf.mxu3 }
 0x89b   : > { %v4806_v24 = vadd.f32 %v4805_v14, %v4693_v8  ;;  %v5373_v23 = vadd.f32 %v9271_v13, %v5372_v63  ;;  %v4583_v8 = vadd.f32 %v10669_v46, %v4470_v9  ;;  %v9409_v14 = vpop.f32.mrf.mxu1  ;;  %6007 = vmatpush.msra.mxu1 %v5271_v42  ;;  %v10671_v42 = vld [vmem:[#allocation40_spill] sm:$0xff] }
 0x89d   : > { %v4845_v52 = vmax.f32 %v4806_v24, 0.0  ;;  %v9404_v12 = vadd.f32 %v5485_v43, %v5373_v23  ;;  %v5491_v11 = vpop.f32.mrf.mxu0  ;;  %v5251_v43 = vld [vmem:[#allocation3 + $0x1008] sm:$0xff]  ;;  %v4696_v48 = vadd.f32 %v9211_v28, %v4583_v8  ;;  %v5269_v24 = vld [vmem:[#allocation3 + $0x1098] sm:$0xff]  ;;  %6008 = vmatpush.msra.mxu1 %v5270_v51 }
 0x89e   : > { %v9406_v34 = vld [vmem:[#allocation2 + $0x158] sm:$0xff]  ;;  %5898 = vmatpush.msra.mxu0 %v5251_v43  ;;  %v5296_v43 = vld [vmem:[#allocation3 + $0x1170] sm:$0xff] }
 0x89f   : > { %v4973_v37 = vld [vmem:[#allocation2 + $0x152] sm:$0xff]  ;;  %4877 = vst [vmem:[#allocation2 + $0x169] sm:$0xff] %v4845_v52  ;;  %5422 = vmatmul.f32.gmra.mxu3 %v9406_v34  ;;  %5713 = vmatmul.f32.gmra.mxu2 %v9230_v30  ;;  %v4473_v30 = vadd.f32 %v9213_v33, %v10670_v1  ;;  %v4974_v8 = vld [vmem:[#allocation2 + $0x15a] sm:$0xff] }
 0x8a0   : > { %5645 = vmatmul.f32.gmra.mxu1 %v4973_v37  ;;  %5538 = vmatmul.f32.gmra.mxu0 %v4845_v52  ;;  %v5267_v33 = vld [vmem:[#allocation3 + $0x1088] sm:$0xff] }
 0x8a1   : > { %5899 = vmatpush.msra.mxu0 %v5250_v40  ;;  %6009 = vmatpush.msra.mxu1 %v5269_v24  ;;  %v4586_v46 = vadd.f32 %v10671_v42, %v4473_v30  ;;  %v5266_v40 = vld [vmem:[#allocation3 + $0x1080] sm:$0xff] }
 0x8a2   : > { %v4808_v63 = vpop.f32.mrf.mxu2  ;;  %v5375_v49 = vpop.f32.mrf.mxu3  ;;  %6111 = vmatpush.msra.mxu2 %v5296_v43  ;;  %v5041_v43 = vld [vmem:[#allocation2 + $0x1a] sm:$0xff] }
 0x8a3   : > { %v4809_v23 = vadd.f32 %v4808_v63, %v4696_v48  ;;  %v5376_v39 = vadd.f32 %v9271_v13, %v5375_v49  ;;  %v4699_v51 = vadd.f32 %v9224_v17, %v4586_v46  ;;  %v9425_v48 = vpop.f32.mrf.mxu1  ;;  %6010 = vmatpush.msra.mxu1 %v5268_v25  ;;  %v10674_v46 = vld [vmem:[#allocation31_spill] sm:$0xff] }
 0x8a5   : > { %v4846_v9 = vmax.f32 %v4809_v23, 0.0  ;;  %v9417_v52 = vadd.f32 %v5488_v35, %v5376_v39  ;;  %v5494_v37 = vpop.f32.mrf.mxu0  ;;  %v5312_v35 = vld [vmem:[#allocation3 + $0x11f0] sm:$0xff]  ;;  %6011 = vmatpush.msra.mxu1 %v5267_v33  ;;  %v10673_v39 = vld [vmem:[#allocation25_spill] sm:$0xff] }
 0x8a6   : > { %v9419_v28 = vld [vmem:[#allocation2 + $0x168] sm:$0xff]  ;;  %6224 = vmatpush.msra.mxu3 %v5312_v35 }
 0x8a7   : > { %4878 = vst [vmem:[#allocation2 + $0x171] sm:$0xff] %v4846_v9  ;;  %5425 = vmatmul.f32.gmra.mxu3 %v9419_v28  ;;  %5716 = vmatmul.f32.gmra.mxu2 %v9241_v50  ;;  %v10672_v50 = vld [vmem:[#allocation16_spill] sm:$0xff] }
 0x8a8   : > { %5648 = vmatmul.f32.gmra.mxu1 %v4974_v8  ;;  %5541 = vmatmul.f32.gmra.mxu0 %v4846_v9  ;;  %v4476_v1 = vadd.f32 %v10673_v39, %v10672_v50  ;;  %v5009_v50 = vld [vmem:[#allocation2 + $0x19] sm:$0xff] }
 0x8a9   : > { %6012 = vmatpush.msra.mxu1 %v5266_v40 }
 0x8aa   : > { %v4811_v63 = vpop.f32.mrf.mxu2  ;;  %v5378_v49 = vpop.f32.mrf.mxu3  ;;  %v4589_v8 = vadd.f32 %v10674_v46, %v4476_v1  ;;  %v5295_v1 = vld [vmem:[#allocation3 + $0x1168] sm:$0xff] }
 0x8ab   : > { %v4812_v24 = vadd.f32 %v4811_v63, %v4699_v51  ;;  %v5379_v23 = vadd.f32 %v9271_v13, %v5378_v49  ;;  %v9438_v51 = vpop.f32.mrf.mxu1  ;;  %6112 = vmatpush.msra.mxu2 %v5295_v1  ;;  %v5294_v1 = vld [vmem:[#allocation3 + $0x1160] sm:$0xff] }
 0x8ac   : > { %v4702_v33 = vadd.f32 %v9237_v22, %v4589_v8  ;;  %v5311_v22 = vld [vmem:[#allocation3 + $0x11e8] sm:$0xff] }
 0x8ad   : > { %v4847_v30 = vmax.f32 %v4812_v24, 0.0  ;;  %v9430_v9 = vadd.f32 %v5491_v11, %v5379_v23  ;;  %v5497_v42 = vpop.f32.mrf.mxu0  ;;  %6225 = vmatpush.msra.mxu3 %v5311_v22  ;;  %v5310_v22 = vld [vmem:[#allocation3 + $0x11e0] sm:$0xff]  ;;  %6113 = vmatpush.msra.mxu2 %v5294_v1 }
 0x8ae   : > { %v9432_v17 = vld [vmem:[#allocation2 + $0x170] sm:$0xff] }
 0x8af   : > { %v4975_v25 = vld [vmem:[#allocation2 + $0x16a] sm:$0xff]  ;;  %4879 = vst [vmem:[#allocation2 + $0x181] sm:$0xff] %v4847_v30  ;;  %5428 = vmatmul.f32.gmra.mxu3 %v9432_v17  ;;  %5719 = vmatmul.f32.gmra.mxu2 %v9253_v10  ;;  %v4976_v39 = vld [vmem:[#allocation2 + $0x172] sm:$0xff]  ;;  %v5042_v10 = vld [vmem:[#allocation2 + $0x22] sm:$0xff] }
 0x8b0   : > { %5651 = vmatmul.f32.gmra.mxu1 %v4975_v25  ;;  %5900 = vmatmul.f32.vlgmr.msra.gmra.mxu0 %v5041_v43 }
 0x8b1   : > { %6226 = vmatpush.msra.mxu3 %v5310_v22 }
 0x8b2   : > { %v4814_v35 = vpop.f32.mrf.mxu2  ;;  %v5381_v11 = vpop.f32.mrf.mxu3 }
 0x8b3   : > { %v4815_v63 = vadd.f32 %v4814_v35, %v4702_v33  ;;  %v5382_v49 = vadd.f32 %v9271_v13, %v5381_v11  ;;  %v9447_v46 = vpop.f32.mrf.mxu1  ;;  %v5010_v33 = vld [vmem:[#allocation2 + $0x21] sm:$0xff]  ;;  %v5043_v35 = vld [vmem:[#allocation2 + $0x32] sm:$0xff] }
 0x8b5   : > { %v4848_v40 = vmax.f32 %v4815_v63, 0.0  ;;  %v9441_v24 = vadd.f32 %v5494_v37, %v5382_v49  ;;  %v5500_v23 = vpop.f32.mrf.mxu0 }
 0x8b7   : > { %4880 = vst [vmem:[#allocation2 + $0x189] sm:$0xff] %v4848_v40  ;;  %5722 = vmatmul.f32.gmra.mxu2 %v9265_v27  ;;  %5787 = vmatmul.f32.vlgmr.msrb.gmra.mxu3 %v5009_v50  ;;  %v5073_v27 = vld [vmem:[#allocation2 + $0x30] sm:$0xff] }
 0x8b8   : > { %5654 = vmatmul.f32.gmra.mxu1 %v4976_v39  ;;  %5903 = vmatmul.f32.gmra.mxu0 %v5042_v10  ;;  %v9457_v39 = vld [vmem:[#allocation2 + $0x31] sm:$0xff]  ;;  %v5044_v10 = vld [vmem:[#allocation2 + $0x3a] sm:$0xff] }
 0x8ba   : > { %v5384_v30 = vpop.f32.mrf.mxu3  ;;  %v9444_v25 = vpop.f32.mrf.mxu2 }
 0x8bb   : > { %v5385_v37 = vadd.f32 %v9271_v13, %v5384_v30  ;;  %v5569_v30 = vadd.f32 %v9278_v32, %v9276_v6  ;;  %v5572_v6 = vadd.f32 %v9291_v31, %v9289_v16  ;;  %v5293_v16 = vld [vmem:[#allocation3 + $0x1158] sm:$0xff] }
 0x8bc   : > { %v5309_v31 = vld [vmem:[#allocation3 + $0x11d8] sm:$0xff]  ;;  %6114 = vmatpush.msra.mxu2 %v5293_v16 }
 0x8bd   : > { %v9449_v8 = vadd.f32 %v5497_v42, %v5385_v37  ;;  %v5503_v43 = vpop.f32.mrf.mxu0  ;;  %v9459_v42 = vpop.f32.mrf.mxu1  ;;  %6227 = vmatpush.msra.mxu3 %v5309_v31 }
 0x8bf   : > { %5725 = vmatmul.f32.gmra.mxu2 %v9280_v57  ;;  %5790 = vmatmul.f32.gmra.mxu3 %v5010_v33  ;;  %v5074_v57 = vld [vmem:[#allocation2 + $0x38] sm:$0xff] }
 0x8c0   : > { %6013 = vmatmul.f32.vlgmr.msra.gmra.mxu1 %v5073_v27  ;;  %5906 = vmatmul.f32.gmra.mxu0 %v5043_v35 }
 0x8c2   : > { %v5387_v11 = vpop.f32.mrf.mxu3  ;;  %v9452_v63 = vpop.f32.mrf.mxu2 }
 0x8c3   : > { %v5388_v49 = vadd.f32 %v9271_v13, %v5387_v11  ;;  %v9470_v11 = vld [vmem:[#allocation2 + $0x39] sm:$0xff] }
 0x8c5   : > { %v9455_v40 = vadd.f32 %v5500_v23, %v5388_v49  ;;  %v5506_v50 = vpop.f32.mrf.mxu0  ;;  %v5075_v49 = vld [vmem:[#allocation2 + $0x48] sm:$0xff]  ;;  %v9476_v32 = vpop.f32.mrf.mxu1 }
 0x8c7   : > { %5728 = vmatmul.f32.gmra.mxu2 %v9293_v58  ;;  %5793 = vmatmul.f32.gmra.mxu3 %v9457_v39 }
 0x8c8   : > { %6016 = vmatmul.f32.gmra.mxu1 %v5074_v57  ;;  %5909 = vmatmul.f32.gmra.mxu0 %v5044_v10  ;;  %v5045_v57 = vld [vmem:[#allocation2 + $0x4a] sm:$0xff] }
 0x8ca   : > { %v5390_v23 = vpop.f32.mrf.mxu3  ;;  %v5681_v37 = vpop.f32.mrf.mxu2 }
 0x8cb   : > { %v5391_v33 = vadd.f32 %v9271_v13, %v5390_v23  ;;  %v9466_v27 = vadd.f32 %v5681_v37, %v5569_v30  ;;  %v9483_v23 = vld [vmem:[#allocation2 + $0x49] sm:$0xff] }
 0x8cc   : > { %v5076_v37 = vld [vmem:[#allocation2 + $0x50] sm:$0xff] }
 0x8cd   : > { %v9468_v58 = vadd.f32 %v5503_v43, %v5391_v33  ;;  %v5509_v35 = vpop.f32.mrf.mxu0  ;;  %v5046_v33 = vld [vmem:[#allocation2 + $0x52] sm:$0xff] }
 0x8cf   : > { %5731 = vmatmul.f32.gmra.mxu2 %v9306_v54  ;;  %5796 = vmatmul.f32.gmra.mxu3 %v9470_v11 }
 0x8d0   : > { %6019 = vmatmul.f32.gmra.mxu1 %v5075_v49  ;;  %5912 = vmatmul.f32.gmra.mxu0 %v5045_v57  ;;  %v5575_v49 = vadd.f32 %v9304_v26, %v9302_v15  ;;  %v5077_v15 = vld [vmem:[#allocation2 + $0x60] sm:$0xff] }
 0x8d1   : > { %v5047_v26 = vld [vmem:[#allocation2 + $0x62] sm:$0xff] }
 0x8d2   : > { %v5393_v10 = vpop.f32.mrf.mxu3  ;;  %v5684_v1 = vpop.f32.mrf.mxu2 }
 0x8d3   : > { %v5394_v43 = vadd.f32 %v9271_v13, %v5393_v10  ;;  %v9479_v22 = vadd.f32 %v5684_v1, %v5572_v6  ;;  %v9489_v6 = vpop.f32.mrf.mxu1 }
 0x8d5   : > { %10675 = vst [vmem:[#allocation18_spill] sm:$0xff] %v9479_v22  ;;  %v9481_v30 = vadd.f32 %v5506_v50, %v5394_v43  ;;  %v5512_v54 = vpop.f32.mrf.mxu0  ;;  %v9496_v22 = vld [vmem:[#allocation2 + $0x51] sm:$0xff] }
 0x8d7   : > { %5734 = vmatmul.f32.gmra.mxu2 %v9319_v38  ;;  %5799 = vmatmul.f32.gmra.mxu3 %v9483_v23 }
 0x8d8   : > { %6022 = vmatmul.f32.gmra.mxu1 %v5076_v37  ;;  %5915 = vmatmul.f32.gmra.mxu0 %v5046_v33  ;;  %v5578_v37 = vadd.f32 %v9317_v61, %v9315_v36  ;;  %v5292_v36 = vld [vmem:[#allocation3 + $0x1150] sm:$0xff] }
 0x8d9   : > { %v5308_v61 = vld [vmem:[#allocation3 + $0x11d0] sm:$0xff]  ;;  %6115 = vmatpush.msra.mxu2 %v5292_v36  ;;  %v5584_v36 = vadd.f32 %v9346_v29, %v9341_v55  ;;  %v5307_v55 = vld [vmem:[#allocation3 + $0x11c8] sm:$0xff]  ;;  %v5587_v29 = vadd.f32 %v9362_v60, %v9354_v47  ;;  %v5081_v47 = vld [vmem:[#allocation2 + $0x90] sm:$0xff] }
 0x8da   : > { %v5396_v50 = vpop.f32.mrf.mxu3  ;;  %v5687_v57 = vpop.f32.mrf.mxu2  ;;  %6228 = vmatpush.msra.mxu3 %v5308_v61  ;;  %v9559_v60 = vld [vmem:[#allocation2 + $0x92] sm:$0xff] }
 0x8db   : > { %v5397_v10 = vadd.f32 %v9271_v13, %v5396_v50  ;;  %v9492_v38 = vadd.f32 %v5687_v57, %v5575_v49  ;;  %v9505_v49 = vpop.f32.mrf.mxu1  ;;  %v9509_v57 = vld [vmem:[#allocation2 + $0x61] sm:$0xff]  ;;  %10682 = vst [vmem:[#allocation39_spill] sm:$0xff] %v9559_v60 }
 0x8dc   : > { %6229 = vmatpush.msra.mxu3 %v5307_v55 }
 0x8dd   : > { %v9494_v1 = vadd.f32 %v5509_v35, %v5397_v10  ;;  %v5515_v43 = vpop.f32.mrf.mxu0  ;;  %v5078_v10 = vld [vmem:[#allocation2 + $0x68] sm:$0xff] }
 0x8df   : > { %5737 = vmatmul.f32.gmra.mxu2 %v9332_v59  ;;  %5802 = vmatmul.f32.gmra.mxu3 %v9496_v22 }
 0x8e0   : > { %6025 = vmatmul.f32.gmra.mxu1 %v5077_v15  ;;  %5918 = vmatmul.f32.gmra.mxu0 %v5047_v26  ;;  %v9513_v15 = vld [vmem:[#allocation2 + $0x6a] sm:$0xff]  ;;  %v5581_v26 = vadd.f32 %v9330_v4, %v9328_v3  ;;  %v5079_v3 = vld [vmem:[#allocation2 + $0x78] sm:$0xff] }
 0x8e1   : > { %10677 = vst [vmem:[#allocation48_spill] sm:$0xff] %v9513_v15  ;;  %v9529_v4 = vld [vmem:[#allocation2 + $0x7a] sm:$0xff] }
 0x8e2   : > { %v5399_v33 = vpop.f32.mrf.mxu3  ;;  %v5690_v16 = vpop.f32.mrf.mxu2  ;;  %10678 = vst [vmem:[#allocation49_spill] sm:$0xff] %v9529_v4 }
 0x8e3   : > { %v5400_v31 = vadd.f32 %v9271_v13, %v5399_v33  ;;  %v9503_v35 = vadd.f32 %v5690_v16, %v5578_v37 }
 0x8e5   : > { %10676 = vst [vmem:[#allocation69_spill] sm:$0xff] %v9503_v35  ;;  %v9507_v50 = vadd.f32 %v5512_v54, %v5400_v31  ;;  %v5518_v59 = vpop.f32.mrf.mxu0  ;;  %v9523_v35 = vld [vmem:[#allocation2 + $0x69] sm:$0xff] }
 0x8e7   : > { %5740 = vmatmul.f32.gmra.mxu2 %v9343_v41  ;;  %5805 = vmatmul.f32.gmra.mxu3 %v9509_v57 }
 0x8e8   : > { %6028 = vmatmul.f32.gmra.mxu1 %v5078_v10  ;;  %5921 = vmatmul.f32.gmra.mxu0 %v9513_v15  ;;  %v9525_v10 = vpop.f32.mrf.mxu1  ;;  %v5291_v15 = vld [vmem:[#allocation3 + $0x1148] sm:$0xff] }
 0x8e9   : > { %6116 = vmatpush.msra.mxu2 %v5291_v15  ;;  %v5590_v15 = vadd.f32 %v9375_v7, %v9367_v56  ;;  %v5290_v56 = vld [vmem:[#allocation3 + $0x1140] sm:$0xff] }
 0x8ea   : > { %v5402_v54 = vpop.f32.mrf.mxu3  ;;  %v5693_v37 = vpop.f32.mrf.mxu2  ;;  %v5306_v7 = vld [vmem:[#allocation3 + $0x11c0] sm:$0xff] }
 0x8eb   : > { %v5403_v33 = vadd.f32 %v9271_v13, %v5402_v54  ;;  %v9519_v41 = vadd.f32 %v5693_v37, %v5581_v26  ;;  %6117 = vmatpush.msra.mxu2 %v5290_v56  ;;  %6230 = vmatpush.msra.mxu3 %v5306_v7  ;;  %v5286_v56 = vld [vmem:[#allocation3 + $0x1120] sm:$0xff] }
 0x8ed   : > { %v9521_v16 = vadd.f32 %v5515_v43, %v5403_v33  ;;  %v5521_v31 = vpop.f32.mrf.mxu0  ;;  %v9539_v33 = vld [vmem:[#allocation2 + $0x79] sm:$0xff] }
 0x8ef   : > { %5743 = vmatmul.f32.gmra.mxu2 %v9356_v62  ;;  %5808 = vmatmul.f32.gmra.mxu3 %v9523_v35 }
 0x8f0   : > { %6031 = vmatmul.f32.gmra.mxu1 %v5079_v3  ;;  %5924 = vmatmul.f32.gmra.mxu0 %v9529_v4  ;;  %v5080_v3 = vld [vmem:[#allocation2 + $0x80] sm:$0xff] }
 0x8f1   : > { %v9543_v4 = vld [vmem:[#allocation2 + $0x82] sm:$0xff] }
 0x8f2   : > { %v5405_v43 = vpop.f32.mrf.mxu3  ;;  %v5696_v61 = vpop.f32.mrf.mxu2  ;;  %10680 = vst [vmem:[#allocation56_spill] sm:$0xff] %v9543_v4 }
 0x8f3   : > { %v5406_v26 = vadd.f32 %v9271_v13, %v5405_v43  ;;  %v9535_v54 = vadd.f32 %v5696_v61, %v5584_v36 }
 0x8f5   : > { %10679 = vst [vmem:[#allocation26_spill] sm:$0xff] %v9535_v54  ;;  %v9537_v37 = vadd.f32 %v5518_v59, %v5406_v26  ;;  %v5524_v62 = vpop.f32.mrf.mxu0  ;;  %v9548_v59 = vpop.f32.mrf.mxu1 }
 0x8f7   : > { %5746 = vmatmul.f32.gmra.mxu2 %v9369_v53  ;;  %5811 = vmatmul.f32.gmra.mxu3 %v9539_v33 }
 0x8f8   : > { %6034 = vmatmul.f32.gmra.mxu1 %v5080_v3  ;;  %5927 = vmatmul.f32.gmra.mxu0 %v9543_v4  ;;  %v9555_v3 = vld [vmem:[#allocation2 + $0x81] sm:$0xff]  ;;  %v9571_v4 = vld [vmem:[#allocation2 + $0x91] sm:$0xff] }
 0x8fa   : > { %v5408_v36 = vpop.f32.mrf.mxu3  ;;  %v5699_v43 = vpop.f32.mrf.mxu2 }
 0x8fb   : > { %v5409_v53 = vadd.f32 %v9271_v13, %v5408_v36  ;;  %v9551_v61 = vadd.f32 %v5699_v43, %v5587_v29 }
 0x8fd   : > { %10681 = vst [vmem:[#allocation57_spill] sm:$0xff] %v9551_v61  ;;  %v9553_v26 = vadd.f32 %v5521_v31, %v5409_v53  ;;  %v5527_v54 = vpop.f32.mrf.mxu0  ;;  %v9564_v31 = vpop.f32.mrf.mxu1  ;;  %v9587_v61 = vld [vmem:[#allocation2 + $0x99] sm:$0xff] }
 0x8ff   : > { %5749 = vmatmul.f32.gmra.mxu2 %v9382_v5  ;;  %5814 = vmatmul.f32.gmra.mxu3 %v9555_v3 }
 0x900   : > { %6037 = vmatmul.f32.gmra.mxu1 %v5081_v47  ;;  %5930 = vmatmul.f32.gmra.mxu0 %v9559_v60  ;;  %v5082_v47 = vld [vmem:[#allocation2 + $0x98] sm:$0xff] }
 0x901   : > { %v9575_v60 = vld [vmem:[#allocation2 + $0x9a] sm:$0xff] }
 0x902   : > { %v5411_v55 = vpop.f32.mrf.mxu3  ;;  %v5702_v29 = vpop.f32.mrf.mxu2  ;;  %10685 = vst [vmem:[#allocation19_spill] sm:$0xff] %v9575_v60 }
 0x903   : > { %v5412_v36 = vadd.f32 %v9271_v13, %v5411_v55  ;;  %v9567_v43 = vadd.f32 %v5702_v29, %v5590_v15  ;;  %v5289_v55 = vld [vmem:[#allocation3 + $0x1138] sm:$0xff] }
 0x904   : > { %6118 = vmatpush.msra.mxu2 %v5289_v55  ;;  %v5285_v55 = vld [vmem:[#allocation3 + $0x1118] sm:$0xff] }
 0x905   : > { %10683 = vst [vmem:[#allocation63_spill] sm:$0xff] %v9567_v43  ;;  %v9569_v5 = vadd.f32 %v5524_v62, %v5412_v36  ;;  %v5530_v53 = vpop.f32.mrf.mxu0  ;;  %v5593_v62 = vadd.f32 %v9391_v45, %v9380_v18  ;;  %v5288_v43 = vld [vmem:[#allocation3 + $0x1130] sm:$0xff]  ;;  %v5083_v18 = vld [vmem:[#allocation2 + $0xa8] sm:$0xff] }
 0x906   : > { %6119 = vmatpush.msra.mxu2 %v5288_v43  ;;  %v9591_v45 = vld [vmem:[#allocation2 + $0xaa] sm:$0xff] }
 0x907   : > { %10684 = vst [vmem:[#allocation76_spill] sm:$0xff] %v9569_v5  ;;  %5752 = vmatmul.f32.gmra.mxu2 %v9395_v0  ;;  %5817 = vmatmul.f32.gmra.mxu3 %v9571_v4  ;;  %v9583_v5 = vpop.f32.mrf.mxu1 }
 0x908   : > { %6040 = vmatmul.f32.gmra.mxu1 %v5082_v47  ;;  %5933 = vmatmul.f32.gmra.mxu0 %v9575_v60  ;;  %10687 = vst [vmem:[#allocation64_spill] sm:$0xff] %v9591_v45 }
 0x90a   : > { %v5414_v15 = vpop.f32.mrf.mxu3  ;;  %v5705_v29 = vpop.f32.mrf.mxu2 }
 0x90b   : > { %v5415_v0 = vadd.f32 %v9271_v13, %v5414_v15  ;;  %v9581_v36 = vadd.f32 %v5705_v29, %v5593_v62  ;;  %v5287_v13 = vld [vmem:[#allocation3 + $0x1128] sm:$0xff]  ;;  %v9596_v62 = vld [vmem:[#allocation5 + $0x3] ss:$0 sm:$0xff] }
 0x90c   : > { %6120 = vmatpush.msra.mxu2 %v5287_v13  ;;  %v5283_v13 = vld [vmem:[#allocation3 + $0x1108] sm:$0xff] }
 0x90d   : > { %10686 = vst [vmem:[#allocation12_spill] sm:$0xff] %v9581_v36  ;;  %v9585_v47 = vadd.f32 %v5527_v54, %v5415_v0  ;;  %v5533_v60 = vpop.f32.mrf.mxu0  ;;  %v5596_v54 = vadd.f32 %v9409_v14, %v9393_v19  ;;  %v5084_v19 = vld [vmem:[#allocation2 + $0xb0] sm:$0xff] }
 0x90e   : > { %6121 = vmatpush.msra.mxu2 %v5286_v56  ;;  %v9609_v14 = vld [vmem:[#allocation2 + $0xb2] sm:$0xff]  ;;  %v5599_v56 = vadd.f32 %v9425_v48, %v9404_v12  ;;  %v5085_v12 = vld [vmem:[#allocation2 + $0xc0] sm:$0xff] }
 0x90f   : > { %5755 = vmatmul.f32.gmra.mxu2 %v9406_v34  ;;  %5820 = vmatmul.f32.gmra.mxu3 %v9587_v61  ;;  %v9605_v36 = vpop.f32.mrf.mxu1  ;;  %10688 = vst [vmem:[#allocation81_spill] sm:$0xff] %v9609_v14  ;;  %v9623_v48 = vld [vmem:[#allocation2 + $0xc2] sm:$0xff] }
 0x910   : > { %6043 = vmatmul.f32.gmra.mxu1 %v5083_v18  ;;  %5936 = vmatmul.f32.gmra.mxu0 %v9591_v45  ;;  %v9603_v18 = vld [vmem:[#allocation2 + $0xa9] sm:$0xff]  ;;  %v5284_v45 = vld [vmem:[#allocation3 + $0x1110] sm:$0xff]  ;;  %10689 = vst [vmem:[#allocation74_spill] sm:$0xff] %v9623_v48 }
 0x911   : > { %6122 = vmatpush.msra.mxu2 %v5285_v55 }
 0x912   : > { %v5417_v7 = vpop.f32.mrf.mxu3  ;;  %v5708_v43 = vpop.f32.mrf.mxu2 }
 0x913   : > { %v5418_v34 = vadd.f32 %v9596_v62, %v5417_v7  ;;  %v9599_v15 = vadd.f32 %v5708_v43, %v5596_v54  ;;  %6123 = vmatpush.msra.mxu2 %v5284_v45  ;;  %v5282_v43 = vld [vmem:[#allocation3 + $0x1100] sm:$0xff]  ;;  %v5602_v45 = vadd.f32 %v9438_v51, %v9417_v52  ;;  %v5086_v52 = vld [vmem:[#allocation2 + $0xc8] sm:$0xff] }
 0x914   : > { %v9641_v51 = vld [vmem:[#allocation2 + $0xca] sm:$0xff] }
 0x915   : > { %v9601_v29 = vadd.f32 %v5530_v53, %v5418_v34  ;;  %v5536_v0 = vpop.f32.mrf.mxu0  ;;  %v5305_v53 = vld [vmem:[#allocation3 + $0x11b8] sm:$0xff]  ;;  %6124 = vmatpush.msra.mxu2 %v5283_v13  ;;  %10693 = vst [vmem:[#allocation77_spill] sm:$0xff] %v9641_v51 }
 0x916   : > { %6231 = vmatpush.msra.mxu3 %v5305_v53 }
 0x917   : > { %5758 = vmatmul.f32.gmra.mxu2 %v9419_v28  ;;  %5823 = vmatmul.f32.gmra.mxu3 %v9603_v18  ;;  %v9628_v13 = vpop.f32.mrf.mxu1 }
 0x918   : > { %6046 = vmatmul.f32.gmra.mxu1 %v5084_v19  ;;  %5939 = vmatmul.f32.gmra.mxu0 %v9609_v14  ;;  %v9619_v14 = vld [vmem:[#allocation2 + $0xb1] sm:$0xff] }
 0x919   : > { %6125 = vmatpush.msra.mxu2 %v5282_v43  ;;  %v9635_v43 = vld [vmem:[#allocation2 + $0x180] sm:$0xff] }
 0x91a   : > { %v5420_v54 = vpop.f32.mrf.mxu3  ;;  %v5711_v7 = vpop.f32.mrf.mxu2  ;;  %10692 = vst [vmem:[#allocation33_spill] sm:$0xff] %v9635_v43 }
 0x91b   : > { %v5421_v28 = vadd.f32 %v9596_v62, %v5420_v54  ;;  %v9615_v55 = vadd.f32 %v5711_v7, %v5599_v56 }
 0x91d   : > { %v9617_v34 = vadd.f32 %v5533_v60, %v5421_v28  ;;  %v5539_v19 = vpop.f32.mrf.mxu0  ;;  %v9637_v28 = vld [vmem:[#allocation2 + $0xc1] sm:$0xff] }
 0x91f   : > { %5761 = vmatmul.f32.gmra.mxu2 %v9432_v17  ;;  %5826 = vmatmul.f32.gmra.mxu3 %v9619_v14 }
 0x920   : > { %6049 = vmatmul.f32.gmra.mxu1 %v5085_v12  ;;  %5942 = vmatmul.f32.gmra.mxu0 %v9623_v48  ;;  %v5304_v12 = vld [vmem:[#allocation3 + $0x11b0] sm:$0xff] }
 0x921   : > { %6232 = vmatpush.msra.mxu3 %v5304_v12 }
 0x922   : > { %v5423_v60 = vpop.f32.mrf.mxu3  ;;  %v5714_v53 = vpop.f32.mrf.mxu2 }
 0x923   : > { %v5424_v56 = vadd.f32 %v9596_v62, %v5423_v60  ;;  %v9631_v54 = vadd.f32 %v5714_v53, %v5602_v45  ;;  %v9646_v53 = vpop.f32.mrf.mxu1 }
 0x925   : > { %10690 = vst [vmem:[#allocation79_spill] sm:$0xff] %v9631_v54  ;;  %v9633_v17 = vadd.f32 %v5536_v0, %v5424_v56  ;;  %v5542_v7 = vpop.f32.mrf.mxu0  ;;  %v5605_v0 = vadd.f32 %v9447_v46, %v9430_v9  ;;  %v5087_v9 = vld [vmem:[#allocation2 + $0xd8] sm:$0xff] }
 0x926   : > { %v9661_v46 = vld [vmem:[#allocation2 + $0xda] sm:$0xff] }
 0x927   : > { %10691 = vst [vmem:[#allocation20_spill] sm:$0xff] %v9633_v17  ;;  %5764 = vmatmul.f32.gmra.mxu2 %v9635_v43  ;;  %5829 = vmatmul.f32.gmra.mxu3 %v9637_v28  ;;  %v9653_v43 = vld [vmem:[#allocation2 + $0x188] sm:$0xff] }
 0x928   : > { %6052 = vmatmul.f32.gmra.mxu1 %v5086_v52  ;;  %5945 = vmatmul.f32.gmra.mxu0 %v9641_v51  ;;  %10696 = vst [vmem:[#allocation27_spill] sm:$0xff] %v9653_v43  ;;  %v9655_v52 = vld [vmem:[#allocation2 + $0xc9] sm:$0xff]  ;;  %v5337_v51 = vadd.f32 %v9596_v62, %v9243_v21 }
 0x929   : > { %10697 = vst [vmem:[#allocation60_spill] sm:$0xff] %v9661_v46 }
 0x92a   : > { %v5426_v45 = vpop.f32.mrf.mxu3  ;;  %v5717_v60 = vpop.f32.mrf.mxu2 }
 0x92b   : > { %v5427_v56 = vadd.f32 %v9596_v62, %v5426_v45  ;;  %v9649_v48 = vadd.f32 %v5717_v60, %v5605_v0  ;;  %v10698_v45 = vld [vmem:[#allocation24_spill] sm:$0xff] }
 0x92c   : > { %v5450_v60 = vadd.f32 %v10698_v45, %v5337_v51  ;;  %v9681_v51 = vld [vmem:[#allocation2 + $0xe2] sm:$0xff] }
 0x92d   : > { %10694 = vst [vmem:[#allocation42_spill] sm:$0xff] %v9649_v48  ;;  %v9651_v54 = vadd.f32 %v5539_v19, %v5427_v56  ;;  %v5901_v17 = vpop.f32.mrf.mxu0  ;;  %v5608_v19 = vadd.f32 %v9459_v42, %v9441_v24  ;;  %v9670_v48 = vpop.f32.mrf.mxu1  ;;  %v5088_v24 = vld [vmem:[#allocation2 + $0xe0] sm:$0xff] }
 0x92e   : > { %10699 = vst [vmem:[#allocation13_spill] sm:$0xff] %v9681_v51 }
 0x92f   : > { %10695 = vst [vmem:[#allocation80_spill] sm:$0xff] %v9651_v54  ;;  %5767 = vmatmul.f32.gmra.mxu2 %v9653_v43  ;;  %5832 = vmatmul.f32.gmra.mxu3 %v9655_v52  ;;  %v9674_v43 = vld [vmem:[#allocation2 + $0xd9] sm:$0xff] }
 0x930   : > { %6055 = vmatmul.f32.gmra.mxu1 %v5087_v9  ;;  %5948 = vmatmul.f32.gmra.mxu0 %v9661_v46  ;;  %v5563_v9 = vadd.f32 %v9249_v20, %v5450_v60  ;;  %v5340_v46 = vadd.f32 %v9596_v62, %v9258_v2  ;;  %v5611_v20 = vadd.f32 %v9476_v32, %v9449_v8  ;;  %v9692_v60 = vld [vmem:[#allocation2 + $0xe1] sm:$0xff]  ;;  %v9699_v8 = vld [vmem:[#allocation2 + $0xf2] sm:$0xff] }
 0x931   : > { %v5614_v32 = vadd.f32 %v9489_v6, %v9455_v40  ;;  %v5617_v40 = vadd.f32 %v9505_v49, %v9468_v58  ;;  %v9729_v58 = vld [vmem:[#allocation2 + $0x10a] sm:$0xff]  ;;  %v5620_v49 = vadd.f32 %v9525_v10, %v9481_v30  ;;  %v5623_v10 = vadd.f32 %v9548_v59, %v9494_v1  ;;  %v9761_v1 = vld [vmem:[#allocation2 + $0x122] sm:$0xff] }
 0x932   : > { %v5429_v12 = vpop.f32.mrf.mxu3  ;;  %v5720_v0 = vpop.f32.mrf.mxu2  ;;  %v5301_v30 = vld [vmem:[#allocation3 + $0x1198] sm:$0xff] }
 0x933   : > { %v5430_v56 = vadd.f32 %v9596_v62, %v5429_v12  ;;  %v9668_v21 = vadd.f32 %v5720_v0, %v5608_v19  ;;  %v5676_v19 = vadd.f32 %v9444_v25, %v5563_v9  ;;  %v5453_v62 = vadd.f32 %v9235_v44, %v5340_v46  ;;  %v5089_v25 = vld [vmem:[#allocation2 + $0xf0] sm:$0xff] }
 0x935   : > { %v9672_v54 = vadd.f32 %v5542_v7, %v5430_v56  ;;  %v5904_v42 = vpop.f32.mrf.mxu0  ;;  %v5303_v7 = vld [vmem:[#allocation3 + $0x11a8] sm:$0xff] }
 0x936   : > { %6233 = vmatpush.msra.mxu3 %v5303_v7  ;;  %v10700_v56 = vld [vmem:[#allocation38_spill] sm:$0xff] }
 0x937   : > { %5835 = vmatmul.f32.gmra.mxu3 %v9674_v43  ;;  %6126 = vmatmul.f32.vlgmr.msra.gmra.mxu2 %v9457_v39 }
 0x938   : > { %6058 = vmatmul.f32.gmra.mxu1 %v5088_v24  ;;  %5951 = vmatmul.f32.gmra.mxu0 %v9681_v51  ;;  %v5566_v24 = vadd.f32 %v10700_v56, %v5453_v62  ;;  %v9695_v51 = vpop.f32.mrf.mxu1 }
 0x93a   : > { %v5723_v12 = vpop.f32.mrf.mxu2  ;;  %v5788_v2 = vpop.f32.mrf.mxu3  ;;  %v5679_v44 = vadd.f32 %v9452_v63, %v5566_v24  ;;  %v5302_v63 = vld [vmem:[#allocation3 + $0x11a0] sm:$0xff] }
 0x93b   : > { %v9688_v0 = vadd.f32 %v5723_v12, %v5611_v20  ;;  %v5789_v39 = vadd.f32 %v5788_v2, %v5676_v19  ;;  %v9709_v12 = vld [vmem:[#allocation2 + $0xf1] sm:$0xff]  ;;  %v9713_v2 = vld [vmem:[#allocation2 + $0xfa] sm:$0xff]  ;;  %6234 = vmatpush.msra.mxu3 %v5302_v63 }
 0x93d   : > { %v9690_v45 = vadd.f32 %v5901_v17, %v5789_v39  ;;  %v5907_v17 = vpop.f32.mrf.mxu0  ;;  %6235 = vmatpush.msra.mxu3 %v5301_v30 }
 0x93f   : > { %5838 = vmatmul.f32.gmra.mxu3 %v9692_v60  ;;  %6129 = vmatmul.f32.gmra.mxu2 %v9470_v11  ;;  %v5090_v11 = vld [vmem:[#allocation2 + $0xf8] sm:$0xff] }
 0x940   : > { %6061 = vmatmul.f32.gmra.mxu1 %v5089_v25  ;;  %5954 = vmatmul.f32.gmra.mxu0 %v9699_v8  ;;  %v9718_v6 = vpop.f32.mrf.mxu1  ;;  %v9725_v25 = vld [vmem:[#allocation2 + $0xf9] sm:$0xff] }
 0x942   : > { %v5726_v46 = vpop.f32.mrf.mxu2  ;;  %v5791_v9 = vpop.f32.mrf.mxu3 }
 0x943   : > { %v9705_v7 = vadd.f32 %v5726_v46, %v5614_v32  ;;  %v5792_v19 = vadd.f32 %v5791_v9, %v5679_v44  ;;  %v5091_v44 = vld [vmem:[#allocation2 + $0x108] sm:$0xff]  ;;  %v10701_v9 = vld [vmem:[#allocation18_spill] sm:$0xff] }
 0x945   : > { %v9707_v20 = vadd.f32 %v5904_v42, %v5792_v19  ;;  %v5910_v24 = vpop.f32.mrf.mxu0 }
 0x947   : > { %5841 = vmatmul.f32.gmra.mxu3 %v9709_v12  ;;  %6132 = vmatmul.f32.gmra.mxu2 %v9483_v23 }
 0x948   : > { %6064 = vmatmul.f32.gmra.mxu1 %v5090_v11  ;;  %5957 = vmatmul.f32.gmra.mxu0 %v9713_v2  ;;  %v9734_v46 = vpop.f32.mrf.mxu1 }
 0x94a   : > { %v5729_v42 = vpop.f32.mrf.mxu2  ;;  %v5794_v62 = vpop.f32.mrf.mxu3 }
 0x94b   : > { %v9720_v39 = vadd.f32 %v5729_v42, %v5617_v40  ;;  %v5795_v56 = vadd.f32 %v5794_v62, %v9466_v27  ;;  %v5092_v40 = vld [vmem:[#allocation2 + $0x110] sm:$0xff] }
 0x94c   : > { %v9745_v42 = vld [vmem:[#allocation2 + $0x112] sm:$0xff] }
 0x94d   : > { %v9723_v23 = vadd.f32 %v5907_v17, %v5795_v56  ;;  %v5913_v11 = vpop.f32.mrf.mxu0 }
 0x94f   : > { %5844 = vmatmul.f32.gmra.mxu3 %v9725_v25  ;;  %6135 = vmatmul.f32.gmra.mxu2 %v9496_v22  ;;  %v9741_v22 = vld [vmem:[#allocation2 + $0x109] sm:$0xff] }
 0x950   : > { %6067 = vmatmul.f32.gmra.mxu1 %v5091_v44  ;;  %5960 = vmatmul.f32.gmra.mxu0 %v9729_v58 }
 0x952   : > { %v5732_v32 = vpop.f32.mrf.mxu2  ;;  %v5797_v27 = vpop.f32.mrf.mxu3 }
 0x953   : > { %v9736_v17 = vadd.f32 %v5732_v32, %v5620_v49  ;;  %v5798_v19 = vadd.f32 %v5797_v27, %v10701_v9  ;;  %v9753_v49 = vpop.f32.mrf.mxu1  ;;  %v5093_v9 = vld [vmem:[#allocation2 + $0x120] sm:$0xff] }
 0x955   : > { %v9739_v63 = vadd.f32 %v5910_v24, %v5798_v19  ;;  %v5916_v27 = vpop.f32.mrf.mxu0 }
 0x957   : > { %5847 = vmatmul.f32.gmra.mxu3 %v9741_v22  ;;  %6138 = vmatmul.f32.gmra.mxu2 %v9509_v57  ;;  %v9757_v57 = vld [vmem:[#allocation2 + $0x111] sm:$0xff] }
 0x958   : > { %6070 = vmatmul.f32.gmra.mxu1 %v5092_v40  ;;  %5963 = vmatmul.f32.gmra.mxu0 %v9745_v42  ;;  %v10702_v40 = vld [vmem:[#allocation69_spill] sm:$0xff] }
 0x95a   : > { %v5735_v62 = vpop.f32.mrf.mxu2  ;;  %v5800_v56 = vpop.f32.mrf.mxu3 }
 0x95b   : > { %v9750_v24 = vadd.f32 %v5735_v62, %v5623_v10  ;;  %v5801_v44 = vadd.f32 %v5800_v56, %v9492_v38  ;;  %v5626_v38 = vadd.f32 %v9564_v31, %v9507_v50  ;;  %v9771_v62 = vld [vmem:[#allocation2 + $0x121] sm:$0xff]  ;;  %v9773_v56 = vpop.f32.mrf.mxu1  ;;  %v5629_v31 = vadd.f32 %v9583_v5, %v9521_v16 }
 0x95c   : > { %v5300_v50 = vld [vmem:[#allocation3 + $0x1190] sm:$0xff]  ;;  %v5632_v16 = vadd.f32 %v9605_v36, %v9537_v37  ;;  %v5299_v37 = vld [vmem:[#allocation3 + $0x1188] sm:$0xff]  ;;  %v5635_v36 = vadd.f32 %v9628_v13, %v9553_v26  ;;  %v10710_v26 = vld [vmem:[#allocation76_spill] sm:$0xff] }
 0x95d   : > { %v9755_v32 = vadd.f32 %v5913_v11, %v5801_v44  ;;  %v9777_v44 = vld [vmem:[#allocation2 + $0x12a] sm:$0xff]  ;;  %6236 = vmatpush.msra.mxu3 %v5300_v50  ;;  %v5638_v13 = vadd.f32 %v9646_v53, %v10710_v26  ;;  %v5641_v26 = vadd.f32 %v9670_v48, %v9585_v47  ;;  %v5644_v47 = vadd.f32 %v9695_v51, %v9601_v29 }
 0x95e   : > { %10703 = vst [vmem:[#allocation28_spill] sm:$0xff] %v9777_v44  ;;  %v5298_v53 = vld [vmem:[#allocation3 + $0x1180] sm:$0xff]  ;;  %v5647_v29 = vadd.f32 %v9718_v6, %v9617_v34 }
 0x95f   : > { %5850 = vmatmul.f32.gmra.mxu3 %v9757_v57  ;;  %6141 = vmatmul.f32.gmra.mxu2 %v9523_v35  ;;  %v5094_v35 = vld [vmem:[#allocation2 + $0x128] sm:$0xff] }
 0x960   : > { %6073 = vmatmul.f32.gmra.mxu1 %v5093_v9  ;;  %5966 = vmatmul.f32.gmra.mxu0 %v9761_v1  ;;  %v10721_v34 = vld [vmem:[#allocation20_spill] sm:$0xff] }
 0x961   : > { %6237 = vmatpush.msra.mxu3 %v5299_v37  ;;  %v5650_v6 = vadd.f32 %v9734_v46, %v10721_v34  ;;  %v10726_v46 = vld [vmem:[#allocation80_spill] sm:$0xff] }
 0x962   : > { %v5738_v59 = vpop.f32.mrf.mxu2  ;;  %v5803_v19 = vpop.f32.mrf.mxu3  ;;  %v5653_v34 = vadd.f32 %v9753_v49, %v10726_v46 }
 0x963   : > { %v9766_v11 = vadd.f32 %v5738_v59, %v5626_v38  ;;  %v5804_v30 = vadd.f32 %v5803_v19, %v10702_v40  ;;  %v9796_v5 = vpop.f32.mrf.mxu1  ;;  %6238 = vmatpush.msra.mxu3 %v5298_v53 }
 0x965   : > { %v9769_v10 = vadd.f32 %v5916_v27, %v5804_v30  ;;  %v5919_v27 = vpop.f32.mrf.mxu0  ;;  %v5095_v30 = vld [vmem:[#allocation2 + $0x138] sm:$0xff] }
 0x967   : > { %5853 = vmatmul.f32.gmra.mxu3 %v9771_v62  ;;  %6144 = vmatmul.f32.gmra.mxu2 %v9539_v33  ;;  %v9787_v33 = vld [vmem:[#allocation2 + $0x129] sm:$0xff] }
 0x968   : > { %6076 = vmatmul.f32.gmra.mxu1 %v5094_v35  ;;  %5969 = vmatmul.f32.gmra.mxu0 %v9777_v44  ;;  %v9791_v35 = vld [vmem:[#allocation2 + $0x13a] sm:$0xff]  ;;  %v9835_v44 = vld [vmem:[#allocation2 + $0x151] sm:$0xff] }
 0x969   : > { %10704 = vst [vmem:[#allocation34_spill] sm:$0xff] %v9791_v35 }
 0x96a   : > { %v5741_v9 = vpop.f32.mrf.mxu2  ;;  %v5806_v38 = vpop.f32.mrf.mxu3 }
 0x96b   : > { %v9782_v59 = vadd.f32 %v5741_v9, %v5629_v31  ;;  %v5807_v19 = vadd.f32 %v5806_v38, %v9519_v41 }
 0x96d   : > { %v9785_v40 = vadd.f32 %v5919_v27, %v5807_v19  ;;  %v10705_v27 = vld [vmem:[#allocation26_spill] sm:$0xff]  ;;  %v5922_v38 = vpop.f32.mrf.mxu0 }
 0x96f   : > { %5856 = vmatmul.f32.gmra.mxu3 %v9787_v33  ;;  %6147 = vmatmul.f32.gmra.mxu2 %v9555_v3  ;;  %v9803_v3 = vld [vmem:[#allocation2 + $0x139] sm:$0xff] }
 0x970   : > { %6079 = vmatmul.f32.gmra.mxu1 %v5095_v30  ;;  %5972 = vmatmul.f32.gmra.mxu0 %v9791_v35  ;;  %v5096_v30 = vld [vmem:[#allocation2 + $0x140] sm:$0xff] }
 0x971   : > { %v9807_v35 = vld [vmem:[#allocation2 + $0x142] sm:$0xff] }
 0x972   : > { %v5744_v41 = vpop.f32.mrf.mxu2  ;;  %v5809_v50 = vpop.f32.mrf.mxu3  ;;  %10706 = vst [vmem:[#allocation84_spill] sm:$0xff] %v9807_v35 }
 0x973   : > { %v9798_v31 = vadd.f32 %v5744_v41, %v5632_v16  ;;  %v5810_v9 = vadd.f32 %v5809_v50, %v10705_v27  ;;  %v9812_v50 = vpop.f32.mrf.mxu1 }
 0x975   : > { %v9801_v19 = vadd.f32 %v5922_v38, %v5810_v9  ;;  %v10707_v9 = vld [vmem:[#allocation57_spill] sm:$0xff] }
 0x977   : > { %5859 = vmatmul.f32.gmra.mxu3 %v9803_v3  ;;  %6150 = vmatmul.f32.gmra.mxu2 %v9571_v4  ;;  %v9819_v4 = vld [vmem:[#allocation2 + $0x141] sm:$0xff] }
 0x978   : > { %6082 = vmatmul.f32.gmra.mxu1 %v5096_v30  ;;  %5975 = vmatmul.f32.gmra.mxu0 %v9807_v35  ;;  %v5097_v30 = vld [vmem:[#allocation2 + $0x150] sm:$0xff] }
 0x979   : > { %v9823_v35 = vld [vmem:[#allocation2 + $0x152] sm:$0xff] }
 0x97a   : > { %v5747_v16 = vpop.f32.mrf.mxu2  ;;  %v5812_v41 = vpop.f32.mrf.mxu3  ;;  %10709 = vst [vmem:[#allocation66_spill] sm:$0xff] %v9823_v35 }
 0x97b   : > { %v9814_v27 = vadd.f32 %v5747_v16, %v5635_v36  ;;  %v9817_v38 = vadd.f32 %v5812_v41, %v10707_v9  ;;  %v10711_v41 = vld [vmem:[#allocation63_spill] sm:$0xff] }
 0x97d   : > { %10708 = vst [vmem:[#allocation30_spill] sm:$0xff] %v9817_v38  ;;  %v9833_v38 = vpop.f32.mrf.mxu1 }
 0x97f   : > { %5862 = vmatmul.f32.gmra.mxu3 %v9819_v4  ;;  %6153 = vmatmul.f32.gmra.mxu2 %v9587_v61  ;;  %v5098_v61 = vld [vmem:[#allocation2 + $0x158] sm:$0xff] }
 0x980   : > { %6085 = vmatmul.f32.gmra.mxu1 %v5097_v30  ;;  %5978 = vmatmul.f32.gmra.mxu0 %v9823_v35  ;;  %v9839_v30 = vld [vmem:[#allocation2 + $0x15a] sm:$0xff] }
 0x981   : > { %10713 = vst [vmem:[#allocation54_spill] sm:$0xff] %v9839_v30  ;;  %v9849_v35 = vld [vmem:[#allocation2 + $0x159] sm:$0xff] }
 0x982   : > { %v5750_v37 = vpop.f32.mrf.mxu2  ;;  %v5815_v36 = vpop.f32.mrf.mxu3 }
 0x983   : > { %v9828_v16 = vadd.f32 %v5750_v37, %v5638_v13  ;;  %v9831_v9 = vadd.f32 %v5815_v36, %v10711_v41  ;;  %v10714_v41 = vld [vmem:[#allocation12_spill] sm:$0xff] }
 0x985   : > { %10712 = vst [vmem:[#allocation87_spill] sm:$0xff] %v9831_v9 }
 0x987   : > { %5865 = vmatmul.f32.gmra.mxu3 %v9835_v44  ;;  %6156 = vmatmul.f32.gmra.mxu2 %v9603_v18  ;;  %v9851_v18 = vpop.f32.mrf.mxu1 }
 0x988   : > { %6088 = vmatmul.f32.gmra.mxu1 %v5098_v61  ;;  %5981 = vmatmul.f32.gmra.mxu0 %v9839_v30  ;;  %v5099_v61 = vld [vmem:[#allocation2 + $0x168] sm:$0xff] }
 0x989   : > { %v9855_v30 = vld [vmem:[#allocation2 + $0x16a] sm:$0xff] }
 0x98a   : > { %v5753_v13 = vpop.f32.mrf.mxu2  ;;  %v5818_v37 = vpop.f32.mrf.mxu3  ;;  %10715 = vst [vmem:[#allocation44_spill] sm:$0xff] %v9855_v30 }
 0x98b   : > { %v9844_v36 = vadd.f32 %v5753_v13, %v5641_v26  ;;  %v9847_v9 = vadd.f32 %v5818_v37, %v10714_v41  ;;  %v9865_v37 = vld [vmem:[#allocation2 + $0x169] sm:$0xff]  ;;  %v9869_v41 = vld [vmem:[#allocation2 + $0x172] sm:$0xff] }
 0x98c   : > { %10717 = vst [vmem:[#allocation73_spill] sm:$0xff] %v9869_v41 }
 0x98f   : > { %5868 = vmatmul.f32.gmra.mxu3 %v9849_v35  ;;  %6159 = vmatmul.f32.gmra.mxu2 %v9619_v14  ;;  %v5100_v14 = vld [vmem:[#allocation2 + $0x170] sm:$0xff]  ;;  %v9874_v51 = vpop.f32.mrf.mxu1 }
 0x990   : > { %6091 = vmatmul.f32.gmra.mxu1 %v5099_v61  ;;  %5984 = vmatmul.f32.gmra.mxu0 %v9855_v30  ;;  %v9913_v30 = vld [vmem:[#allocation2 + $0x189] sm:$0xff] }
 0x992   : > { %v5756_v48 = vpop.f32.mrf.mxu2  ;;  %v5821_v53 = vpop.f32.mrf.mxu3 }
 0x993   : > { %v9860_v26 = vadd.f32 %v5756_v48, %v5644_v47  ;;  %v9863_v13 = vadd.f32 %v5821_v53, %v9599_v15  ;;  %v9881_v53 = vld [vmem:[#allocation2 + $0x171] sm:$0xff] }
 0x995   : > { %10716 = vst [vmem:[#allocation86_spill] sm:$0xff] %v9863_v13  ;;  %v9898_v13 = vld [vmem:[#allocation2 + $0x181] sm:$0xff] }
 0x997   : > { %5871 = vmatmul.f32.gmra.mxu3 %v9865_v37  ;;  %6162 = vmatmul.f32.gmra.mxu2 %v9637_v28  ;;  %v9885_v28 = vld [vmem:[#allocation2 + $0x182] sm:$0xff] }
 0x998   : > { %6094 = vmatmul.f32.gmra.mxu1 %v5100_v14  ;;  %5987 = vmatmul.f32.gmra.mxu0 %v9869_v41  ;;  %10719 = vst [vmem:[#allocation35_spill] sm:$0xff] %v9885_v28  ;;  %v10720_v14 = vld [vmem:[#allocation33_spill] sm:$0xff] }
 0x99a   : > { %v5759_v61 = vpop.f32.mrf.mxu2  ;;  %v5824_v15 = vpop.f32.mrf.mxu3 }
 0x99b   : > { %v9876_v47 = vadd.f32 %v5759_v61, %v5647_v29  ;;  %v9879_v48 = vadd.f32 %v5824_v15, %v9615_v55  ;;  %v10722_v55 = vld [vmem:[#allocation79_spill] sm:$0xff] }
 0x99d   : > { %10718 = vst [vmem:[#allocation10_spill] sm:$0xff] %v9879_v48  ;;  %v9896_v48 = vpop.f32.mrf.mxu1 }
 0x99f   : > { %5874 = vmatmul.f32.gmra.mxu3 %v9881_v53  ;;  %6165 = vmatmul.f32.gmra.mxu2 %v9655_v52  ;;  %v9902_v52 = vld [vmem:[#allocation2 + $0x18a] sm:$0xff] }
 0x9a0   : > { %6097 = vmatmul.f32.gmra.mxu1 %v10720_v14  ;;  %5990 = vmatmul.f32.gmra.mxu0 %v9885_v28  ;;  %10724 = vst [vmem:[#allocation53_spill] sm:$0xff] %v9902_v52  ;;  %v10725_v14 = vld [vmem:[#allocation27_spill] sm:$0xff] }
 0x9a2   : > { %v5762_v29 = vpop.f32.mrf.mxu2  ;;  %v5827_v61 = vpop.f32.mrf.mxu3 }
 0x9a3   : > { %v9891_v41 = vadd.f32 %v5762_v29, %v5650_v6  ;;  %v9894_v15 = vadd.f32 %v5827_v61, %v10722_v55  ;;  %v10727_v55 = vld [vmem:[#allocation42_spill] sm:$0xff] }
 0x9a5   : > { %10723 = vst [vmem:[#allocation78_spill] sm:$0xff] %v9894_v15  ;;  %v6032_v28 = vpop.f32.mrf.mxu1 }
 0x9a7   : > { %5877 = vmatmul.f32.gmra.mxu3 %v9898_v13  ;;  %6168 = vmatmul.f32.gmra.mxu2 %v9674_v43  ;;  %v6539_v43 = vld [vmem:[#allocation2] sm:$0xff] }
 0x9a8   : > { %6100 = vmatmul.f32.gmra.mxu1 %v10725_v14  ;;  %5993 = vmatmul.f32.gmra.mxu0 %v9902_v52  ;;  %v5656_v14 = vadd.f32 %v9773_v56, %v9672_v54 }
 0x9aa   : > { %v5765_v6 = vpop.f32.mrf.mxu2  ;;  %v5830_v29 = vpop.f32.mrf.mxu3 }
 0x9ab   : > { %v9908_v61 = vadd.f32 %v5765_v6, %v5653_v34  ;;  %v9911_v15 = vadd.f32 %v5830_v29, %v10727_v55  ;;  %v5137_v6 = vld [vmem:[#allocation2 + $0x32] sm:$0xff] }
 0x9ad   : > { %10728 = vst [vmem:[#allocation68_spill] sm:$0xff] %v9911_v15  ;;  %v6035_v29 = vpop.f32.mrf.mxu1 }
 0x9af   : > { %5880 = vmatmul.f32.gmra.mxu3 %v9913_v30  ;;  %6171 = vmatmul.f32.gmra.mxu2 %v9692_v60  ;;  %v6015_v60 = vadd.f32 %v9796_v5, %v9690_v45  ;;  %v5139_v5 = vld [vmem:[#allocation2 + $0x4a] sm:$0xff] }
 0x9b0   : > { %6103 = vmatmul.f32.gmra.mxu1 %v6539_v43 }
 0x9b2   : > { %v5768_v49 = vpop.f32.mrf.mxu2  ;;  %v5833_v46 = vpop.f32.mrf.mxu3 }
 0x9b3   : > { %v9919_v52 = vadd.f32 %v5768_v49, %v5656_v14  ;;  %v9922_v34 = vadd.f32 %v5833_v46, %v9668_v21  ;;  %v5138_v14 = vld [vmem:[#allocation2 + $0x3a] sm:$0xff]  ;;  %v6018_v21 = vadd.f32 %v9812_v50, %v9707_v20  ;;  %v5140_v50 = vld [vmem:[#allocation2 + $0x52] sm:$0xff] }
 0x9b7   : > { %6174 = vmatmul.f32.gmra.mxu2 %v9709_v12  ;;  %6239 = vmatmul.f32.vlgmr.msra.gmra.mxu3 %v5137_v6 }
 0x9b8   : > { %6106 = vmatmul.f32.gmra.mxu1 %v6539_v43 }
 0x9ba   : > { %v5836_v55 = vpop.f32.mrf.mxu3  ;;  %v6127_v15 = vpop.f32.mrf.mxu2 }
 0x9bb   : > { %v9928_v54 = vadd.f32 %v5836_v55, %v9688_v0  ;;  %v9930_v56 = vadd.f32 %v6127_v15, %v6015_v60  ;;  %v6021_v0 = vadd.f32 %v9833_v38, %v9723_v23  ;;  %v5141_v38 = vld [vmem:[#allocation2 + $0x62] sm:$0xff] }
 0x9bf   : > { %6177 = vmatmul.f32.gmra.mxu2 %v9725_v25  ;;  %6242 = vmatmul.f32.gmra.mxu3 %v5138_v14 }
 0x9c2   : > { %v5839_v12 = vpop.f32.mrf.mxu3  ;;  %v6130_v49 = vpop.f32.mrf.mxu2 }
 0x9c3   : > { %v9936_v43 = vadd.f32 %v5839_v12, %v9705_v7  ;;  %v9938_v45 = vadd.f32 %v6130_v49, %v6018_v21  ;;  %v6024_v7 = vadd.f32 %v9851_v18, %v9739_v63  ;;  %v6030_v18 = vadd.f32 %v9896_v48, %v9769_v10  ;;  %v10731_v10 = vld [vmem:[#allocation56_spill] sm:$0xff] }
 0x9c7   : > { %6180 = vmatmul.f32.gmra.mxu2 %v9741_v22  ;;  %6245 = vmatmul.f32.gmra.mxu3 %v5139_v5 }
 0x9ca   : > { %v5842_v15 = vpop.f32.mrf.mxu3  ;;  %v6133_v25 = vpop.f32.mrf.mxu2 }
 0x9cb   : > { %v9944_v46 = vadd.f32 %v5842_v15, %v9720_v39  ;;  %v9946_v20 = vadd.f32 %v6133_v25, %v6021_v0  ;;  %v6027_v39 = vadd.f32 %v9874_v51, %v9755_v32  ;;  %v6033_v51 = vadd.f32 %v6032_v28, %v9785_v40  ;;  %v10732_v40 = vld [vmem:[#allocation39_spill] sm:$0xff] }
 0x9cf   : > { %6183 = vmatmul.f32.gmra.mxu2 %v9757_v57  ;;  %6248 = vmatmul.f32.gmra.mxu3 %v5140_v50 }
 0x9d2   : > { %v5845_v6 = vpop.f32.mrf.mxu3  ;;  %v6136_v22 = vpop.f32.mrf.mxu2 }
 0x9d3   : > { %v9952_v60 = vadd.f32 %v5845_v6, %v9736_v17  ;;  %v9954_v23 = vadd.f32 %v6136_v22, %v6024_v7  ;;  %v10729_v17 = vld [vmem:[#allocation48_spill] sm:$0xff] }
 0x9d7   : > { %6186 = vmatmul.f32.gmra.mxu2 %v9771_v62  ;;  %6251 = vmatmul.f32.gmra.mxu3 %v5141_v38  ;;  %v5135_v38 = vld [vmem:[#allocation2 + $0x199] sm:$0xff] }
 0x9da   : > { %v5848_v55 = vpop.f32.mrf.mxu3  ;;  %v6139_v57 = vpop.f32.mrf.mxu2 }
 0x9db   : > { %v9960_v14 = vadd.f32 %v5848_v55, %v9750_v24  ;;  %v9962_v63 = vadd.f32 %v6139_v57, %v6027_v39  ;;  %v10730_v24 = vld [vmem:[#allocation49_spill] sm:$0xff]  ;;  %v5136_v55 = vld [vmem:[#allocation2 + $0x1a1] sm:$0xff] }
 0x9df   : > { %6189 = vmatmul.f32.gmra.mxu2 %v9787_v33  ;;  %6254 = vmatmul.f32.gmra.mxu3 %v10729_v17 }
 0x9e2   : > { %v5851_v21 = vpop.f32.mrf.mxu3  ;;  %v6142_v62 = vpop.f32.mrf.mxu2 }
 0x9e3   : > { %v9969_v12 = vadd.f32 %v5851_v21, %v9766_v11  ;;  %v9971_v32 = vadd.f32 %v6142_v62, %v6030_v18  ;;  %v6036_v11 = vadd.f32 %v6035_v29, %v9801_v19 }
 0x9e7   : > { %6192 = vmatmul.f32.gmra.mxu2 %v9803_v3  ;;  %6257 = vmatmul.f32.gmra.mxu3 %v10730_v24 }
 0x9ea   : > { %v5854_v49 = vpop.f32.mrf.mxu3  ;;  %v6145_v33 = vpop.f32.mrf.mxu2 }
 0x9eb   : > { %v9977_v5 = vadd.f32 %v5854_v49, %v9782_v59  ;;  %v9979_v0 = vadd.f32 %v6145_v33, %v6033_v51 }
 0x9ef   : > { %6195 = vmatmul.f32.gmra.mxu2 %v9819_v4  ;;  %6260 = vmatmul.f32.gmra.mxu3 %v10731_v10  ;;  %v10733_v4 = vld [vmem:[#allocation19_spill] sm:$0xff] }
 0x9f2   : > { %v5857_v48 = vpop.f32.mrf.mxu3  ;;  %v6148_v15 = vpop.f32.mrf.mxu2 }
 0x9f3   : > { %v9985_v3 = vadd.f32 %v5857_v48, %v9798_v31  ;;  %v9987_v25 = vadd.f32 %v6148_v15, %v6036_v11  ;;  %v10734_v31 = vld [vmem:[#allocation64_spill] sm:$0xff] }
 0x9f7   : > { %6198 = vmatmul.f32.gmra.mxu2 %v9835_v44  ;;  %6263 = vmatmul.f32.gmra.mxu3 %v10732_v40 }
 0x9fa   : > { %v5860_v59 = vpop.f32.mrf.mxu3  ;;  %v6151_v62 = vpop.f32.mrf.mxu2 }
 0x9fb   : > { %v9992_v28 = vadd.f32 %v5860_v59, %v9814_v27  ;;  %v10735_v27 = vld [vmem:[#allocation81_spill] sm:$0xff] }
 0x9ff   : > { %6201 = vmatmul.f32.gmra.mxu2 %v9849_v35  ;;  %6266 = vmatmul.f32.gmra.mxu3 %v10733_v4 }
 0xa02   : > { %v5863_v19 = vpop.f32.mrf.mxu3  ;;  %v6154_v10 = vpop.f32.mrf.mxu2 }
 0xa03   : > { %v9997_v29 = vadd.f32 %v5863_v19, %v9828_v16  ;;  %v10736_v16 = vld [vmem:[#allocation74_spill] sm:$0xff] }
 0xa07   : > { %6204 = vmatmul.f32.gmra.mxu2 %v9865_v37  ;;  %6269 = vmatmul.f32.gmra.mxu3 %v10734_v31 }
 0xa0a   : > { %v5866_v50 = vpop.f32.mrf.mxu3  ;;  %v6157_v59 = vpop.f32.mrf.mxu2 }
 0xa0b   : > { %v10002_v44 = vadd.f32 %v5866_v50, %v9844_v36  ;;  %v10737_v36 = vld [vmem:[#allocation77_spill] sm:$0xff] }
 0xa0f   : > { %6207 = vmatmul.f32.gmra.mxu2 %v9881_v53  ;;  %6272 = vmatmul.f32.gmra.mxu3 %v10735_v27 }
 0xa12   : > { %v5869_v7 = vpop.f32.mrf.mxu3 }
 0xa13   : > { %v10007_v35 = vadd.f32 %v5869_v7, %v9860_v26  ;;  %v10738_v26 = vld [vmem:[#allocation60_spill] sm:$0xff]  ;;  %v6160_v7 = vpop.f32.mrf.mxu2 }
 0xa17   : > { %6210 = vmatmul.f32.gmra.mxu2 %v9898_v13  ;;  %6275 = vmatmul.f32.gmra.mxu3 %v10736_v16 }
 0xa1a   : > { %v5872_v6 = vpop.f32.mrf.mxu3 }
 0xa1b   : > { %v10012_v37 = vadd.f32 %v5872_v6, %v9876_v47  ;;  %v10739_v47 = vld [vmem:[#allocation13_spill] sm:$0xff] }
 0xa1f   : > { %6213 = vmatmul.f32.gmra.mxu2 %v9913_v30  ;;  %6278 = vmatmul.f32.gmra.mxu3 %v10737_v36 }
 0xa22   : > { %v5875_v53 = vpop.f32.mrf.mxu3 }
 0xa23   : > { %v10017_v22 = vadd.f32 %v5875_v53, %v9891_v41 }
 0xa27   : > { %6216 = vmatmul.f32.gmra.mxu2 %v5135_v38  ;;  %6281 = vmatmul.f32.gmra.mxu3 %v10738_v26  ;;  %v10742_v38 = vld [vmem:[#allocation84_spill] sm:$0xff]  ;;  %v6163_v26 = vpop.f32.mrf.mxu2 }
 0xa2a   : > { %v5878_v13 = vpop.f32.mrf.mxu3 }
 0xa2b   : > { %v10021_v39 = vadd.f32 %v5878_v13, %v9908_v61 }
 0xa2f   : > { %6219 = vmatmul.f32.gmra.mxu2 %v5136_v55  ;;  %6284 = vmatmul.f32.gmra.mxu3 %v10739_v47  ;;  %v10743_v55 = vld [vmem:[#allocation30_spill] sm:$0xff] }
 0xa32   : > { %v5881_v30 = vpop.f32.mrf.mxu3 }
 0xa33   : > { %v10025_v57 = vadd.f32 %v5881_v30, %v9919_v52 }
 0xa37   : > { %6287 = vmatmul.f32.gmra.mxu3 %v9699_v8  ;;  %v5925_v8 = vpop.f32.mrf.mxu0 }
 0xa3a   : > { %v6240_v41 = vpop.f32.mrf.mxu3 }
 0xa3b   : > { %v6241_v17 = vadd.f32 %v6240_v41, %v9930_v56  ;;  %v6038_v56 = vpop.f32.mrf.mxu1 }
 0xa3d   : > { %v6336_v61 = vmax.f32 %v6241_v17, 0.0 }
 0xa3f   : > { %6368 = vst [vmem:[%s10034_s8] sm:$0xff] %v6336_v61  ;;  %6290 = vmatmul.f32.gmra.mxu3 %v9713_v2  ;;  %v5928_v33 = vpop.f32.mrf.mxu0  ;;  %v10744_v61 = vld [vmem:[#allocation66_spill] sm:$0xff] }
 0xa42   : > { %v6243_v52 = vpop.f32.mrf.mxu3 }
 0xa43   : > { %v6244_v18 = vadd.f32 %v6243_v52, %v9938_v45  ;;  %v6041_v2 = vpop.f32.mrf.mxu1 }
 0xa45   : > { %v6337_v21 = vmax.f32 %v6244_v18, 0.0  ;;  %v6166_v18 = vpop.f32.mrf.mxu2 }
 0xa47   : > { %6369 = vst [vmem:[%s10034_s8 + $0x8] sm:$0xff] %v6337_v21  ;;  %6293 = vmatmul.f32.gmra.mxu3 %v9729_v58  ;;  %v5931_v58 = vpop.f32.mrf.mxu0 }
 0xa4a   : > { %v6246_v24 = vpop.f32.mrf.mxu3 }
 0xa4b   : > { %v6247_v51 = vadd.f32 %v6246_v24, %v9946_v20  ;;  %v6044_v40 = vpop.f32.mrf.mxu1  ;;  %v10745_v24 = vld [vmem:[#allocation87_spill] sm:$0xff] }
 0xa4d   : > { %v6338_v49 = vmax.f32 %v6247_v51, 0.0  ;;  %v5929_v51 = vadd.f32 %v5928_v33, %v10745_v24 }
 0xa4f   : > { %6370 = vst [vmem:[%s10034_s8 + $0x10] sm:$0xff] %v6338_v49  ;;  %6296 = vmatmul.f32.gmra.mxu3 %v9745_v42  ;;  %v10740_v42 = vld [vmem:[#allocation28_spill] sm:$0xff]  ;;  %v5934_v19 = vpop.f32.mrf.mxu0 }
 0xa52   : > { %v6249_v45 = vpop.f32.mrf.mxu3 }
 0xa53   : > { %v6250_v11 = vadd.f32 %v6249_v45, %v9954_v23  ;;  %v6047_v50 = vpop.f32.mrf.mxu1 }
 0xa55   : > { %v6339_v48 = vmax.f32 %v6250_v11, 0.0  ;;  %v6042_v11 = vadd.f32 %v6041_v2, %v5929_v51 }
 0xa57   : > { %6371 = vst [vmem:[%s10034_s8 + $0x18] sm:$0xff] %v6339_v48  ;;  %6299 = vmatmul.f32.gmra.mxu3 %v9761_v1  ;;  %v10741_v1 = vld [vmem:[#allocation34_spill] sm:$0xff]  ;;  %v5937_v6 = vpop.f32.mrf.mxu0  ;;  %v6155_v48 = vadd.f32 %v6154_v10, %v6042_v11 }
 0xa5a   : > { %v6252_v15 = vpop.f32.mrf.mxu3 }
 0xa5b   : > { %v6253_v20 = vadd.f32 %v6252_v15, %v9962_v63  ;;  %v6050_v53 = vpop.f32.mrf.mxu1 }
 0xa5d   : > { %v6340_v4 = vmax.f32 %v6253_v20, 0.0 }
 0xa5f   : > { %6372 = vst [vmem:[%s10034_s8 + $0x20] sm:$0xff] %v6340_v4  ;;  %6302 = vmatmul.f32.gmra.mxu3 %v10740_v42  ;;  %v5940_v41 = vpop.f32.mrf.mxu0 }
 0xa62   : > { %v6255_v31 = vpop.f32.mrf.mxu3 }
 0xa63   : > { %v6256_v23 = vadd.f32 %v6255_v31, %v9971_v32  ;;  %v5926_v32 = vadd.f32 %v5925_v8, %v10743_v55  ;;  %v10746_v8 = vld [vmem:[#allocation54_spill] sm:$0xff] }
 0xa65   : > { %v6341_v27 = vmax.f32 %v6256_v23, 0.0  ;;  %v6039_v17 = vadd.f32 %v6038_v56, %v5926_v32  ;;  %v5932_v56 = vadd.f32 %v5931_v58, %v9847_v9  ;;  %v10747_v23 = vld [vmem:[#allocation44_spill] sm:$0xff]  ;;  %v10749_v58 = vld [vmem:[#allocation73_spill] sm:$0xff] }
 0xa67   : > { %6373 = vst [vmem:[%s10034_s8 + $0x28] sm:$0xff] %v6341_v27  ;;  %6305 = vmatmul.f32.gmra.mxu3 %v10741_v1  ;;  %v6152_v52 = vadd.f32 %v6151_v62, %v6039_v17  ;;  %v6169_v62 = vpop.f32.mrf.mxu2  ;;  %v6045_v31 = vadd.f32 %v6044_v40, %v5932_v56  ;;  %v10748_v1 = vld [vmem:[#allocation86_spill] sm:$0xff]  ;;  %v10754_v56 = vld [vmem:[#allocation68_spill] sm:$0xff] }
 0xa68   : > { %v10750_v40 = vld [vmem:[#allocation10_spill] sm:$0xff] }
 0xa69   : > { %v6158_v33 = vadd.f32 %v6157_v59, %v6045_v31  ;;  %v5938_v32 = vadd.f32 %v5937_v6, %v10750_v40  ;;  %v10753_v6 = vld [vmem:[#allocation53_spill] sm:$0xff] }
 0xa6a   : > { %v6258_v16 = vpop.f32.mrf.mxu3 }
 0xa6b   : > { %v6259_v63 = vadd.f32 %v6258_v16, %v9979_v0  ;;  %v6053_v0 = vpop.f32.mrf.mxu1  ;;  %v5935_v16 = vadd.f32 %v5934_v19, %v10748_v1  ;;  %v6051_v17 = vadd.f32 %v6050_v53, %v5938_v32  ;;  %v10751_v19 = vld [vmem:[#allocation35_spill] sm:$0xff] }
 0xa6d   : > { %v6342_v36 = vmax.f32 %v6259_v63, 0.0  ;;  %v6048_v9 = vadd.f32 %v6047_v50, %v5935_v16  ;;  %v10752_v50 = vld [vmem:[#allocation78_spill] sm:$0xff] }
 0xa6e   : > { %v5941_v51 = vadd.f32 %v5940_v41, %v10752_v50 }
 0xa6f   : > { %6374 = vst [vmem:[%s10034_s8 + $0x30] sm:$0xff] %v6342_v36  ;;  %6308 = vmatmul.f32.gmra.mxu3 %v10742_v38  ;;  %v6172_v38 = vpop.f32.mrf.mxu2 }
 0xa70   : > { %v6054_v11 = vadd.f32 %v6053_v0, %v5941_v51 }
 0xa72   : > { %v6261_v13 = vpop.f32.mrf.mxu3 }
 0xa73   : > { %v6262_v47 = vadd.f32 %v6261_v13, %v9987_v25  ;;  %v5943_v25 = vpop.f32.mrf.mxu0  ;;  %v6056_v20 = vpop.f32.mrf.mxu1  ;;  %v6161_v13 = vadd.f32 %v6160_v7, %v6048_v9 }
 0xa75   : > { %v6343_v30 = vmax.f32 %v6262_v47, 0.0 }
 0xa77   : > { %6375 = vst [vmem:[%s10034_s8 + $0x38] sm:$0xff] %v6343_v30  ;;  %6311 = vmatmul.f32.gmra.mxu3 %v10744_v61 }
 0xa7a   : > { %v6264_v21 = vpop.f32.mrf.mxu3 }
 0xa7b   : > { %v6265_v49 = vadd.f32 %v6264_v21, %v6152_v52  ;;  %v5946_v27 = vpop.f32.mrf.mxu0  ;;  %v6059_v10 = vpop.f32.mrf.mxu1  ;;  %v6164_v21 = vadd.f32 %v6163_v26, %v6051_v17  ;;  %v5167_v26 = vld [vmem:[#allocation2 + $0x19a] sm:$0xff] }
 0xa7c   : > { %v6175_v52 = vpop.f32.mrf.mxu2  ;;  %v5947_v0 = vadd.f32 %v5946_v27, %v9922_v34 }
 0xa7d   : > { %v6344_v45 = vmax.f32 %v6265_v49, 0.0 }
 0xa7e   : > { %v6060_v9 = vadd.f32 %v6059_v10, %v5947_v0 }
 0xa7f   : > { %6376 = vst [vmem:[%s10034_s8 + $0x40] sm:$0xff] %v6344_v45  ;;  %6314 = vmatmul.f32.gmra.mxu3 %v10746_v8 }
 0xa82   : > { %v6267_v15 = vpop.f32.mrf.mxu3 }
 0xa83   : > { %v6268_v4 = vadd.f32 %v6267_v15, %v6155_v48  ;;  %v5949_v59 = vpop.f32.mrf.mxu0  ;;  %v6062_v61 = vpop.f32.mrf.mxu1  ;;  %v6167_v48 = vadd.f32 %v6166_v18, %v6054_v11 }
 0xa84   : > { %v6178_v53 = vpop.f32.mrf.mxu2 }
 0xa85   : > { %v6345_v42 = vmax.f32 %v6268_v4, 0.0  ;;  %v5944_v4 = vadd.f32 %v5943_v25, %v10754_v56  ;;  %v6173_v25 = vadd.f32 %v6172_v38, %v6060_v9 }
 0xa87   : > { %6377 = vst [vmem:[%s10034_s8 + $0x48] sm:$0xff] %v6345_v42  ;;  %6317 = vmatmul.f32.gmra.mxu3 %v10747_v23  ;;  %v6057_v23 = vadd.f32 %v6056_v20, %v5944_v4  ;;  %v5950_v20 = vadd.f32 %v5949_v59, %v9928_v54 }
 0xa89   : > { %v6063_v34 = vadd.f32 %v6062_v61, %v5950_v20 }
 0xa8a   : > { %v6270_v2 = vpop.f32.mrf.mxu3 }
 0xa8b   : > { %v6271_v63 = vadd.f32 %v6270_v2, %v6158_v33  ;;  %v5952_v45 = vpop.f32.mrf.mxu0  ;;  %v6065_v8 = vpop.f32.mrf.mxu1  ;;  %v6170_v33 = vadd.f32 %v6169_v62, %v6057_v23  ;;  %v6176_v27 = vadd.f32 %v6175_v52, %v6063_v34 }
 0xa8c   : > { %v6181_v18 = vpop.f32.mrf.mxu2 }
 0xa8d   : > { %v6346_v36 = vmax.f32 %v6271_v63, 0.0  ;;  %v5168_v63 = vld [vmem:[#allocation2 + $0x1a2] sm:$0xff] }
 0xa8f   : > { %6378 = vst [vmem:[%s10034_s8 + $0x50] sm:$0xff] %v6346_v36  ;;  %6320 = vmatmul.f32.gmra.mxu3 %v10749_v58 }
 0xa92   : > { %v6273_v55 = vpop.f32.mrf.mxu3 }
 0xa93   : > { %v6274_v47 = vadd.f32 %v6273_v55, %v6161_v13  ;;  %v5955_v41 = vpop.f32.mrf.mxu0  ;;  %v6068_v1 = vpop.f32.mrf.mxu1 }
 0xa94   : > { %v6184_v32 = vpop.f32.mrf.mxu2  ;;  %v5956_v59 = vadd.f32 %v5955_v41, %v9944_v46 }
 0xa95   : > { %v6347_v30 = vmax.f32 %v6274_v47, 0.0 }
 0xa96   : > { %v6069_v52 = vadd.f32 %v6068_v1, %v5956_v59 }
 0xa97   : > { %6379 = vst [vmem:[%s10034_s8 + $0x58] sm:$0xff] %v6347_v30  ;;  %6323 = vmatmul.f32.gmra.mxu3 %v10751_v19  ;;  %v5953_v30 = vadd.f32 %v5952_v45, %v9936_v43 }
 0xa98   : > { %v6182_v11 = vadd.f32 %v6181_v18, %v6069_v52 }
 0xa99   : > { %v6066_v38 = vadd.f32 %v6065_v8, %v5953_v30 }
 0xa9a   : > { %v6276_v24 = vpop.f32.mrf.mxu3 }
 0xa9b   : > { %v6277_v49 = vadd.f32 %v6276_v24, %v6164_v21  ;;  %v5958_v58 = vpop.f32.mrf.mxu0  ;;  %v6071_v62 = vpop.f32.mrf.mxu1  ;;  %v6179_v50 = vadd.f32 %v6178_v53, %v6066_v38 }
 0xa9c   : > { %v6187_v24 = vpop.f32.mrf.mxu2 }
 0xa9d   : > { %v6348_v7 = vmax.f32 %v6277_v49, 0.0 }
 0xa9f   : > { %6380 = vst [vmem:[%s10034_s8 + $0x60] sm:$0xff] %v6348_v7  ;;  %6326 = vmatmul.f32.gmra.mxu3 %v10753_v6  ;;  %v5959_v6 = vadd.f32 %v5958_v58, %v9952_v60 }
 0xaa2   : > { %v6279_v15 = vpop.f32.mrf.mxu3 }
 0xaa3   : > { %v6280_v42 = vadd.f32 %v6279_v15, %v6167_v48  ;;  %v5961_v17 = vpop.f32.mrf.mxu0  ;;  %v6074_v21 = vpop.f32.mrf.mxu1  ;;  %v6072_v15 = vadd.f32 %v6071_v62, %v5959_v6 }
 0xaa4   : > { %v6190_v43 = vpop.f32.mrf.mxu2  ;;  %v5962_v46 = vadd.f32 %v5961_v17, %v9960_v14 }
 0xaa5   : > { %v6349_v31 = vmax.f32 %v6280_v42, 0.0  ;;  %v6185_v56 = vadd.f32 %v6184_v32, %v6072_v15 }
 0xaa6   : > { %v6075_v41 = vadd.f32 %v6074_v21, %v5962_v46 }
 0xaa7   : > { %6381 = vst [vmem:[%s10034_s8 + $0x68] sm:$0xff] %v6349_v31  ;;  %6329 = vmatmul.f32.gmra.mxu3 %v5167_v26 }
 0xaaa   : > { %v6282_v2 = vpop.f32.mrf.mxu3 }
 0xaab   : > { %v6283_v16 = vadd.f32 %v6282_v2, %v6170_v33  ;;  %v5964_v49 = vpop.f32.mrf.mxu0  ;;  %v6077_v7 = vpop.f32.mrf.mxu1  ;;  %v6188_v33 = vadd.f32 %v6187_v24, %v6075_v41 }
 0xaac   : > { %v6193_v31 = vpop.f32.mrf.mxu2  ;;  %v5965_v60 = vadd.f32 %v5964_v49, %v9969_v12 }
 0xaad   : > { %v6350_v36 = vmax.f32 %v6283_v16, 0.0 }
 0xaaf   : > { %6382 = vst [vmem:[%s10034_s8 + $0x70] sm:$0xff] %v6350_v36  ;;  %6332 = vmatmul.f32.gmra.mxu3 %v5168_v63  ;;  %v6078_v36 = vadd.f32 %v6077_v7, %v5965_v60 }
 0xab1   : > { %v6191_v14 = vadd.f32 %v6190_v43, %v6078_v36 }
 0xab2   : > { %v6285_v13 = vpop.f32.mrf.mxu3 }
 0xab3   : > { %v6286_v55 = vadd.f32 %v6285_v13, %v6173_v25  ;;  %v5967_v53 = vpop.f32.mrf.mxu0  ;;  %v6080_v42 = vpop.f32.mrf.mxu1 }
 0xab4   : > { %v6196_v63 = vpop.f32.mrf.mxu2  ;;  %v5968_v25 = vadd.f32 %v5967_v53, %v9977_v5 }
 0xab5   : > { %v6351_v40 = vmax.f32 %v6286_v55, 0.0 }
 0xab6   : > { %v6081_v55 = vadd.f32 %v6080_v42, %v5968_v25 }
 0xab7   : > { %6383 = vst [vmem:[%s10034_s8 + $0x78] sm:$0xff] %v6351_v40 }
 0xab8   : > { %v6194_v32 = vadd.f32 %v6193_v31, %v6081_v55 }
 0xaba   : > { %v6288_v47 = vpop.f32.mrf.mxu3 }
 0xabb   : > { %v6289_v10 = vadd.f32 %v6288_v47, %v6176_v27  ;;  %v5970_v2 = vpop.f32.mrf.mxu0  ;;  %v6083_v16 = vpop.f32.mrf.mxu1 }
 0xabc   : > { %v6199_v40 = vpop.f32.mrf.mxu2  ;;  %v5971_v34 = vadd.f32 %v5970_v2, %v9985_v3 }
 0xabd   : > { %v6352_v19 = vmax.f32 %v6289_v10, 0.0 }
 0xabe   : > { %v6084_v10 = vadd.f32 %v6083_v16, %v5971_v34 }
 0xabf   : > { %6384 = vst [vmem:[%s10034_s8 + $0x80] sm:$0xff] %v6352_v19 }
 0xac0   : > { %v6197_v19 = vadd.f32 %v6196_v63, %v6084_v10 }
 0xac2   : > { %v6291_v54 = vpop.f32.mrf.mxu3 }
 0xac3   : > { %v6292_v51 = vadd.f32 %v6291_v54, %v6179_v50  ;;  %v5973_v13 = vpop.f32.mrf.mxu0  ;;  %v6086_v62 = vpop.f32.mrf.mxu1 }
 0xac4   : > { %v6202_v5 = vpop.f32.mrf.mxu2  ;;  %v5974_v21 = vadd.f32 %v5973_v13, %v9992_v28 }
 0xac5   : > { %v6353_v61 = vmax.f32 %v6292_v51, 0.0 }
 0xac6   : > { %v6087_v54 = vadd.f32 %v6086_v62, %v5974_v21 }
 0xac7   : > { %6385 = vst [vmem:[%s10034_s8 + $0x88] sm:$0xff] %v6353_v61 }
 0xac8   : > { %v6200_v51 = vadd.f32 %v6199_v40, %v6087_v54 }
 0xaca   : > { %v6294_v45 = vpop.f32.mrf.mxu3 }
 0xacb   : > { %v6295_v8 = vadd.f32 %v6294_v45, %v6182_v11  ;;  %v5976_v30 = vpop.f32.mrf.mxu0  ;;  %v6089_v17 = vpop.f32.mrf.mxu1 }
 0xacc   : > { %v5977_v3 = vadd.f32 %v5976_v30, %v9997_v29  ;;  %v6205_v7 = vpop.f32.mrf.mxu2 }
 0xacd   : > { %v6354_v48 = vmax.f32 %v6295_v8, 0.0 }
 0xace   : > { %v6090_v43 = vadd.f32 %v6089_v17, %v5977_v3 }
 0xacf   : > { %6386 = vst [vmem:[%s10034_s8 + $0x90] sm:$0xff] %v6354_v48 }
 0xad0   : > { %v6203_v45 = vadd.f32 %v6202_v5, %v6090_v43 }
 0xad2   : > { %v6297_v4 = vpop.f32.mrf.mxu3 }
 0xad3   : > { %v6298_v26 = vadd.f32 %v6297_v4, %v6185_v56  ;;  %v5979_v59 = vpop.f32.mrf.mxu0  ;;  %v6092_v49 = vpop.f32.mrf.mxu1 }
 0xad4   : > { %v5980_v28 = vadd.f32 %v5979_v59, %v10002_v44  ;;  %v6208_v56 = vpop.f32.mrf.mxu2 }
 0xad5   : > { %v6355_v23 = vmax.f32 %v6298_v26, 0.0 }
 0xad6   : > { %v6093_v4 = vadd.f32 %v6092_v49, %v5980_v28 }
 0xad7   : > { %6387 = vst [vmem:[%s10034_s8 + $0x98] sm:$0xff] %v6355_v23 }
 0xad8   : > { %v6206_v29 = vadd.f32 %v6205_v7, %v6093_v4 }
 0xada   : > { %v6300_v0 = vpop.f32.mrf.mxu3 }
 0xadb   : > { %v6301_v1 = vadd.f32 %v6300_v0, %v6188_v33  ;;  %v5982_v6 = vpop.f32.mrf.mxu0  ;;  %v6095_v15 = vpop.f32.mrf.mxu1 }
 0xadc   : > { %v5983_v42 = vadd.f32 %v5982_v6, %v10007_v35  ;;  %v6211_v2 = vpop.f32.mrf.mxu2 }
 0xadd   : > { %v6356_v18 = vmax.f32 %v6301_v1, 0.0 }
 0xade   : > { %v6096_v41 = vadd.f32 %v6095_v15, %v5983_v42 }
 0xadf   : > { %6388 = vst [vmem:[%s10034_s8 + $0xa0] sm:$0xff] %v6356_v18 }
 0xae0   : > { %v6209_v0 = vadd.f32 %v6208_v56, %v6096_v41 }
 0xae2   : > { %v6303_v9 = vpop.f32.mrf.mxu3 }
 0xae3   : > { %v6304_v58 = vadd.f32 %v6303_v9, %v6191_v14  ;;  %v5985_v31 = vpop.f32.mrf.mxu0  ;;  %v6098_v33 = vpop.f32.mrf.mxu1 }
 0xae4   : > { %v5986_v60 = vadd.f32 %v5985_v31, %v10012_v37  ;;  %v6214_v35 = vpop.f32.mrf.mxu2 }
 0xae5   : > { %v6357_v20 = vmax.f32 %v6304_v58, 0.0 }
 0xae6   : > { %v6099_v63 = vadd.f32 %v6098_v33, %v5986_v60 }
 0xae7   : > { %6389 = vst [vmem:[%s10034_s8 + $0xa8] sm:$0xff] %v6357_v20 }
 0xae8   : > { %v6212_v14 = vadd.f32 %v6211_v2, %v6099_v63 }
 0xaea   : > { %v6306_v12 = vpop.f32.mrf.mxu3 }
 0xaeb   : > { %v6307_v27 = vadd.f32 %v6306_v12, %v6194_v32  ;;  %v5988_v18 = vpop.f32.mrf.mxu0  ;;  %v6101_v36 = vpop.f32.mrf.mxu1 }
 0xaec   : > { %v5989_v25 = vadd.f32 %v5988_v18, %v10017_v22  ;;  %v6217_v34 = vpop.f32.mrf.mxu2 }
 0xaed   : > { %v6358_v47 = vmax.f32 %v6307_v27, 0.0 }
 0xaee   : > { %v6102_v20 = vadd.f32 %v6101_v36, %v5989_v25 }
 0xaef   : > { %6390 = vst [vmem:[%s10034_s8 + $0xb0] sm:$0xff] %v6358_v47 }
 0xaf0   : > { %v6215_v62 = vadd.f32 %v6214_v35, %v6102_v20 }
 0xaf2   : > { %v6309_v38 = vpop.f32.mrf.mxu3 }
 0xaf3   : > { %v6310_v24 = vadd.f32 %v6309_v38, %v6197_v19  ;;  %v5991_v55 = vpop.f32.mrf.mxu0  ;;  %v6104_v40 = vpop.f32.mrf.mxu1 }
 0xaf4   : > { %v5992_v32 = vadd.f32 %v5991_v55, %v10021_v39  ;;  %v6220_v21 = vpop.f32.mrf.mxu2 }
 0xaf5   : > { %v6359_v50 = vmax.f32 %v6310_v24, 0.0 }
 0xaf6   : > { %v6105_v47 = vadd.f32 %v6104_v40, %v5992_v32 }
 0xaf7   : > { %6391 = vst [vmem:[%s10034_s8 + $0xb8] sm:$0xff] %v6359_v50 }
 0xaf8   : > { %v6218_v30 = vadd.f32 %v6217_v34, %v6105_v47 }
 0xafa   : > { %v6312_v61 = vpop.f32.mrf.mxu3 }
 0xafb   : > { %v6313_v52 = vadd.f32 %v6312_v61, %v6200_v51  ;;  %v5994_v10 = vpop.f32.mrf.mxu0  ;;  %v6107_v5 = vpop.f32.mrf.mxu1 }
 0xafc   : > { %v5995_v17 = vadd.f32 %v5994_v10, %v10025_v57 }
 0xafd   : > { %v6360_v11 = vmax.f32 %v6313_v52, 0.0 }
 0xafe   : > { %v6108_v24 = vadd.f32 %v6107_v5, %v5995_v17 }
 0xaff   : > { %6392 = vst [vmem:[%s10034_s8 + $0xc0] sm:$0xff] %v6360_v11 }
 0xb00   : > { %v6221_v50 = vadd.f32 %v6220_v21, %v6108_v24 }
 0xb02   : > { %v6315_v8 = vpop.f32.mrf.mxu3 }
 0xb03   : > { %v6316_v48 = vadd.f32 %v6315_v8, %v6203_v45 }
 0xb05   : > { %v6361_v53 = vmax.f32 %v6316_v48, 0.0 }
 0xb07   : > { %6393 = vst [vmem:[%s10034_s8 + $0xc8] sm:$0xff] %v6361_v53 }
 0xb0a   : > { %v6318_v46 = vpop.f32.mrf.mxu3 }
 0xb0b   : > { %v6319_v26 = vadd.f32 %v6318_v46, %v6206_v29 }
 0xb0d   : > { %v6362_v23 = vmax.f32 %v6319_v26, 0.0 }
 0xb0f   : > { %6394 = vst [vmem:[%s10034_s8 + $0xd0] sm:$0xff] %v6362_v23 }
 0xb12   : > { %v6321_v44 = vpop.f32.mrf.mxu3 }
 0xb13   : > { %v6322_v1 = vadd.f32 %v6321_v44, %v6209_v0 }
 0xb15   : > { %v6363_v16 = vmax.f32 %v6322_v1, 0.0 }
 0xb17   : > { %6395 = vst [vmem:[%s10034_s8 + $0xd8] sm:$0xff] %v6363_v16 }
 0xb1a   : > { %v6324_v9 = vpop.f32.mrf.mxu3 }
 0xb1b   : > { %v6325_v58 = vadd.f32 %v6324_v9, %v6212_v14 }
 0xb1d   : > { %v6364_v13 = vmax.f32 %v6325_v58, 0.0 }
 0xb1f   : > { %6396 = vst [vmem:[%s10034_s8 + $0xe0] sm:$0xff] %v6364_v13 }
 0xb22   : > { %v6327_v37 = vpop.f32.mrf.mxu3 }
 0xb23   : > { %v6328_v12 = vadd.f32 %v6327_v37, %v6215_v62 }
 0xb25   : > { %v6365_v27 = vmax.f32 %v6328_v12, 0.0 }
 0xb27   : > { %6397 = vst [vmem:[%s10034_s8 + $0xe8] sm:$0xff] %v6365_v27 }
 0xb2a   : > { %v6330_v22 = vpop.f32.mrf.mxu3 }
 0xb2b   : > { %v6331_v19 = vadd.f32 %v6330_v22, %v6218_v30 }
 0xb2d   : > { %v6366_v38 = vmax.f32 %v6331_v19, 0.0 }
 0xb2f   : > { %6398 = vst [vmem:[%s10034_s8 + $0xf0] sm:$0xff] %v6366_v38 }
 0xb32   : > { %v6333_v54 = vpop.f32.mrf.mxu3 }
 0xb33   : > { %v6334_v39 = vadd.f32 %v6333_v54, %v6221_v50 }
 0xb35   : > { %v6367_v59 = vmax.f32 %v6334_v39, 0.0 }
 0xb37   : > { %6399 = vst [vmem:[%s10034_s8 + $0xf8] sm:$0xff] %v6367_v59 }
 0xb38 PF: > { %s15_s12 = sadd.s32 1, %s6614_s12  }
 0xb39   : > { %p12_p7 = scmp.ge.s32.totalorder %s15_s12, 4  }
 0xb3b   :  { %14 = sbr.rel (!%p12_p7) target bundleno = 2 (0x2), region = 79 }
 0xb40   :  { %6421 = vsyncpa [#allocation4], 1 }
 0xb41   :  { %6423 = vsyncpa [#allocation4 + $0x1], 1 }
 0xb42   :  { %6424 = vsyncpa [#allocation6], 1 }

</bundles_post_ra>
